<compile_context>
chip_gen: v6e
topology: v6e:2x2x1
jax: 0.10.0
libtpu: 0.0.40
codegen_flags: <defaults>
</compile_context>

<pallas_src>
import jax
import jax.numpy as jnp
from jax.experimental import pallas as pl
from jax.experimental.pallas import tpu as pltpu

KSIZE = 5
PAD = 2              # 'same' padding for kernel size 5, stride 1
NEG_SLOPE = 0.01     # F.leaky_relu default
CPAD = 32            # channel counts padded to a sublane-friendly 32
COUT_LAST = 8        # final layer: only channel 0 is real; 8 keeps alignment
NUM_LAYERS = 8


def _detect_v7x():
    try:
        kind = jax.devices()[0].device_kind.lower()
    except Exception:
        return False
    return ("v7" in kind) or ("7x" in kind)


_IS_V7X = _detect_v7x()
# v7x: 64 MiB VMEM, 2 TensorCores  -> smaller tiles, guarantee >=2 grid steps.
# v5e/v6e: 128 MiB VMEM, 1 TensorCore -> fatter tiles, fewer grid steps.
_TARGET_COLS = 8192 if _IS_V7X else 16384
_VMEM_LIMIT = (48 if _IS_V7X else 64) * 1024 * 1024


def _shifted(h, d, n):
    """tap[:, c] = h[:, (c + d) % n] (circular; edges fixed by the caller's mask).

    Uses the XLU lane rotate (pltpu.roll) on 128-aligned lane axes (free slot,
    no VMEM copies); falls back to slice+concat otherwise.
    """
    s = (-d) % n
    if s == 0:
        return h
    if n % 128 == 0:
        return pltpu.roll(h, shift=s, axis=1)
    i = d % n
    return jnp.concatenate([h[:, i:], h[:, :i]], axis=-1)


def disc_kernel(x_ref, w_ref, b_ref, o_ref):
    """Fused 8x Conv1d(k=5,'same') (+leaky_relu) + mean over L + sigmoid.

    x_ref: (1, Bt*L) f32        lane-dense input row (pre-flattened in wrapper)
    w_ref: (8, 5, 32, 32) bf16  packed weights, W[i,k,co,ci] = w_i[k,ci,co]
    b_ref: (8, 32, 1) f32       packed biases
    o_ref: (Bt, 1) f32          sigmoid(mean_L(final conv))
    """
    N = x_ref.shape[1]
    Bt = o_ref.shape[0]
    L = N // Bt

    # Position-within-row of every flattened column (period L); zeroes the
    # circular-roll wraparound so padding='same' holds and taps never leak
    # across batch rows of the flattened (C, Bt*L) layout.  (Built via 2-D
    # iota + reshape: vector integer '%' is not a native VPU op, and this is
    # a once-per-tile constant.)
    pos = jax.lax.broadcasted_iota(jnp.int32, (Bt, L), 1).reshape(1, N)
    tap_mask = {}
    for d in range(-PAD, PAD + 1):
        if d != 0:
            tap_mask[d] = ((pos >= -d) & (pos < L - d)).astype(jnp.float32)

    # Initial activation: channel 0 = x, channels 1..31 = 0 (padded c_in).
    h = jnp.concatenate(
        [x_ref[...], jnp.zeros((CPAD - 1, N), jnp.float32)], axis=0)  # (32, N)

    final = None
    for i in range(NUM_LAYERS):
        last = i == NUM_LAYERS - 1
        cout = COUT_LAST if last else CPAD

        # 5 accumulated per-tap matmuls (bf16 operands, f32 accumulation).
        acc = None
        for k in range(KSIZE):
            d = k - PAD
            tap = _shifted(h, d, N)
            if d != 0:
                tap = tap * tap_mask[d]
            tap = tap.astype(jnp.bfloat16)                     # MXU operand
            w_k = w_ref[i, k]                                  # (32, 32) bf16
            if last:
                w_k = w_k[:cout, :]                            # (8, 32)
            part = jnp.dot(w_k, tap, preferred_element_type=jnp.float32)
            acc = part if acc is None else acc + part          # (cout, N) f32

        b_i = b_ref[i]                                         # (32, 1) f32
        acc = acc + b_i[:cout]
        if not last:
            h = jnp.where(acc >= 0.0, acc, NEG_SLOPE * acc)    # leaky_relu
        else:
            final = acc[0:1, :]                                # real channel 0

    # Epilogue: (1, N) -> (Bt, L) -> mean over L (lane reduce) -> sigmoid.
    mean = jnp.sum(final.reshape(Bt, L), axis=1, keepdims=True) * (1.0 / L)
    o_ref[...] = jax.nn.sigmoid(mean)


def _divisor_tile(B, max_bt):
    """Largest multiple of 8 that divides B and is <= max_bt (assumes B%8==0)."""
    bt = min(B, max(8, (max_bt // 8) * 8))
    while B % bt:
        bt -= 8
    return bt


def _pick_batch_tile(B, L):
    """Biggest batch tile that keeps the fused working set (~200 * Bt*L bytes)
    well under scoped VMEM (generation-aware), and guarantees >=2 grid steps on
    v7x (2 TensorCores) when the batch allows it."""
    if B % 8 != 0:
        return B                      # single tile (blocks == full array dims)
    bt = _divisor_tile(B, max(8, _TARGET_COLS // max(L, 1)))
    if _IS_V7X and B // bt < 2 and B >= 16:
        bt = _divisor_tile(B, B // 2)
    return bt


def pack_params(params):
    """Pack the 8 per-layer (w:(K,cin,cout) f32, b:(cout,) f32) into padded
    tensors: Wk[i,k,co,ci] = w_i[k,ci,co]  (8,5,32,32) bf16 (MXU operands);
             Bk[i,co,0]    = b_i[co]       (8,32,1)    f32.
    Zero padding of unused channels is mathematically inert.  Call ONCE and
    reuse: it is deliberately kept out of the jitted forward path."""
    Wk = jnp.zeros((NUM_LAYERS, KSIZE, CPAD, CPAD), jnp.float32)
    Bk = jnp.zeros((NUM_LAYERS, CPAD, 1), jnp.float32)
    for i, (w, b) in enumerate(params):
        _, cin, cout = w.shape
        wt = jnp.transpose(w, (0, 2, 1))                      # (K, cout, cin)
        wt = jnp.pad(wt, ((0, 0), (0, CPAD - cout), (0, CPAD - cin)))
        Wk = Wk.at[i].set(wt)
        Bk = Bk.at[i, :cout, 0].set(b.reshape(-1))
    return Wk.astype(jnp.bfloat16), Bk


@jax.jit
def disc_forward(packed, x):
    """packed = pack_params(params); x: (B, L) f32 -> (B,) f32 (Disc.forward)."""
    Wk, Bk = packed
    B, L = x.shape
    Bt = _pick_batch_tile(B, L)
    T = B // Bt
    N = Bt * L
    x2 = x.astype(jnp.float32).reshape(T, N)      # lane-dense input blocks
    # TODO(synk): for very long L (Bt*L*~200B exceeding scoped VMEM even at
    # Bt=8) an L-tiled grid with per-layer halos and a cross-tile mean reduce
    # would be needed.
    out = pl.pallas_call(
        disc_kernel,
        out_shape=jax.ShapeDtypeStruct((B, 1), jnp.float32),
        grid_spec=pltpu.PrefetchScalarGridSpec(
            num_scalar_prefetch=0,
            grid=(T,),
            in_specs=[
                pl.BlockSpec((1, N), lambda i: (i, 0)),
                pl.BlockSpec((NUM_LAYERS, KSIZE, CPAD, CPAD),
                             lambda i: (0, 0, 0, 0)),
                pl.BlockSpec((NUM_LAYERS, CPAD, 1), lambda i: (0, 0, 0)),
            ],
            out_specs=pl.BlockSpec((Bt, 1), lambda i: (i, 0)),
        ),
        compiler_params=pltpu.CompilerParams(
            dimension_semantics=("parallel",),            # megacore on v7x
            vmem_limit_bytes=_VMEM_LIMIT,
        ),
    )(x2, Wk, Bk)
    return out[:, 0]


def init_conv_params(key, cin, cout):
    """PyTorch Conv1d-style init: U(-1/sqrt(cin*K), 1/sqrt(cin*K))."""
    kw, kb = jax.random.split(key)
    bound = 1.0 / float(cin * KSIZE) ** 0.5
    w = jax.random.uniform(kw, (KSIZE, cin, cout), jnp.float32, -bound, bound)
    b = jax.random.uniform(kb, (cout,), jnp.float32, -bound, bound)
    return w, b


def init_disc_params(key):
    # channel plan: 1->30->30->30->30->30->20->10->1
    plan = [(1, 30), (30, 30), (30, 30), (30, 30), (30, 30),
            (30, 20), (20, 10), (10, 1)]
    keys = jax.random.split(key, len(plan))
    return [init_conv_params(k, cin, cout) for k, (cin, cout) in zip(keys, plan)]


def disc_reference(params, x):
    """Pure-JAX (lax.conv, f32 HIGHEST) reference with identical semantics."""
    h = x[:, None, :].astype(jnp.float32)                     # (B, 1, L) NCL
    for i, (w, b) in enumerate(params):
        rhs = jnp.transpose(w, (2, 1, 0))                     # (cout, cin, K)
        h = jax.lax.conv_general_dilated(
            h, rhs, window_strides=(1,), padding=((PAD, PAD),),
            dimension_numbers=("NCH", "OIH", "NCH"),
            precision=jax.lax.Precision.HIGHEST)
        h = h + b.reshape(1, -1, 1)
        if i < len(params) - 1:
            h = jnp.where(h >= 0.0, h, NEG_SLOPE * h)
    return jax.nn.sigmoid(jnp.mean(h[:, 0, :], axis=1))


if __name__ == "__main__":
    key = jax.random.PRNGKey(0)
    k_par, k_x = jax.random.split(key)
    params = init_disc_params(k_par)
    packed = pack_params(params)          # pack once, outside the jitted path

    B, L = 4, 128
    x = jax.random.normal(k_x, (B, L), dtype=jnp.float32)

    out = jax.block_until_ready(disc_forward(packed, x))
    assert out.shape == (B,), out.shape
    assert bool(jnp.all(jnp.isfinite(out)))

    ref = jax.block_until_ready(disc_reference(params, x))
    assert bool(jnp.allclose(out, ref, atol=2e-3, rtol=2e-3)), (out, ref)

    print("KERNEL_OK")
</pallas_src>

<mosaic_0001>
module attributes {stable_mosaic.version = 11 : i64} {
  func.func @disc_kernel(%arg0: i32, %arg1: memref<1x512xf32, #tpu.memory_space<vmem>>, %arg2: memref<8x5x32x32xbf16, #tpu.memory_space<vmem>>, %arg3: memref<8x32x1xf32, #tpu.memory_space<vmem>>, %arg4: memref<4x1xf32, #tpu.memory_space<vmem>>) attributes {dimension_semantics = [#tpu.dimension_semantics<parallel>], iteration_bounds = array<i64: 1>, scalar_prefetch = 0 : i64, scratch_operands = 0 : i64, tpu.core_type = #tpu.core_type<tc>, window_params = [{transform_indices = @transform_0, window_bounds = array<i64: 1, 512>}, {pipeline_mode = #tpu.pipeline_mode<synchronous>, transform_indices = @transform_1, window_bounds = array<i64: 8, 5, 32, 32>}, {pipeline_mode = #tpu.pipeline_mode<synchronous>, transform_indices = @transform_2, window_bounds = array<i64: 8, 32, 1>}, {transform_indices = @transform_3, window_bounds = array<i64: 4, 1>}]} {
    %0 = tpu.iota {dimensions = array<i32: 1>} : vector<4x128xi32>
    %1 = vector.shape_cast %0 : vector<4x128xi32> to vector<1x512xi32>
    %c2_i32 = arith.constant 2 : i32
    %2 = vector.broadcast %c2_i32 : i32 to vector<1x512xi32>
    %3 = arith.cmpi sge, %1, %2 : vector<1x512xi32>
    %c130_i32 = arith.constant 130 : i32
    %4 = vector.broadcast %c130_i32 : i32 to vector<1x512xi32>
    %5 = arith.cmpi slt, %1, %4 : vector<1x512xi32>
    %6 = arith.andi %3, %5 : vector<1x512xi1>
    %7 = arith.extui %6 : vector<1x512xi1> to vector<1x512xi32>
    %8 = arith.sitofp %7 : vector<1x512xi32> to vector<1x512xf32>
    %c1_i32 = arith.constant 1 : i32
    %9 = vector.broadcast %c1_i32 : i32 to vector<1x512xi32>
    %10 = arith.cmpi sge, %1, %9 : vector<1x512xi32>
    %c129_i32 = arith.constant 129 : i32
    %11 = vector.broadcast %c129_i32 : i32 to vector<1x512xi32>
    %12 = arith.cmpi slt, %1, %11 : vector<1x512xi32>
    %13 = arith.andi %10, %12 : vector<1x512xi1>
    %14 = arith.extui %13 : vector<1x512xi1> to vector<1x512xi32>
    %15 = arith.sitofp %14 : vector<1x512xi32> to vector<1x512xf32>
    %c-1_i32 = arith.constant -1 : i32
    %16 = vector.broadcast %c-1_i32 : i32 to vector<1x512xi32>
    %17 = arith.cmpi sge, %1, %16 : vector<1x512xi32>
    %c127_i32 = arith.constant 127 : i32
    %18 = vector.broadcast %c127_i32 : i32 to vector<1x512xi32>
    %19 = arith.cmpi slt, %1, %18 : vector<1x512xi32>
    %20 = arith.andi %17, %19 : vector<1x512xi1>
    %21 = arith.extui %20 : vector<1x512xi1> to vector<1x512xi32>
    %22 = arith.sitofp %21 : vector<1x512xi32> to vector<1x512xf32>
    %c-2_i32 = arith.constant -2 : i32
    %23 = vector.broadcast %c-2_i32 : i32 to vector<1x512xi32>
    %24 = arith.cmpi sge, %1, %23 : vector<1x512xi32>
    %c126_i32 = arith.constant 126 : i32
    %25 = vector.broadcast %c126_i32 : i32 to vector<1x512xi32>
    %26 = arith.cmpi slt, %1, %25 : vector<1x512xi32>
    %27 = arith.andi %24, %26 : vector<1x512xi1>
    %28 = arith.extui %27 : vector<1x512xi1> to vector<1x512xi32>
    %29 = arith.sitofp %28 : vector<1x512xi32> to vector<1x512xf32>
    %c0 = arith.constant 0 : index
    %c0_0 = arith.constant 0 : index
    %30 = vector.load %arg1[%c0, %c0_0] : memref<1x512xf32, #tpu.memory_space<vmem>>, vector<1x512xf32>
    %cst = arith.constant 0.000000e+00 : f32
    %31 = vector.broadcast %cst : f32 to vector<31x512xf32>
    %32 = tpu.concatenate %30, %31 in 0 : vector<1x512xf32>, vector<31x512xf32> -> vector<32x512xf32>
    %c2_i32_1 = arith.constant 2 : i32
    %33 = tpu.dynamic_rotate %32 by %c2_i32_1 dim 1 : vector<32x512xf32>, i32 -> vector<32x512xf32>
    %34 = vector.broadcast %8 : vector<1x512xf32> to vector<32x512xf32>
    %35 = arith.mulf %33, %34 : vector<32x512xf32>
    %36 = arith.truncf %35 : vector<32x512xf32> to vector<32x512xbf16>
    %c0_2 = arith.constant 0 : index
    %c0_3 = arith.constant 0 : index
    %c0_4 = arith.constant 0 : index
    %c0_5 = arith.constant 0 : index
    %37 = vector.load %arg2[%c0_2, %c0_3, %c0_4, %c0_5] : memref<8x5x32x32xbf16, #tpu.memory_space<vmem>>, vector<1x1x32x32xbf16>
    %38 = vector.shape_cast %37 : vector<1x1x32x32xbf16> to vector<32x32xbf16>
    %cst_6 = arith.constant dense<0.000000e+00> : vector<32x512xf32>
    %39 = tpu.matmul %38, %36, %cst_6 {dimension_numbers = #tpu.dot_dimension_numbers<[1], [0], [0], [1], [0, 0, 1, 1], [], []>} : vector<32x32xbf16>, vector<32x512xbf16>, vector<32x512xf32> -> vector<32x512xf32>
    %c1_i32_7 = arith.constant 1 : i32
    %40 = tpu.dynamic_rotate %32 by %c1_i32_7 dim 1 : vector<32x512xf32>, i32 -> vector<32x512xf32>
    %41 = vector.broadcast %15 : vector<1x512xf32> to vector<32x512xf32>
    %42 = arith.mulf %40, %41 : vector<32x512xf32>
    %43 = arith.truncf %42 : vector<32x512xf32> to vector<32x512xbf16>
    %c0_8 = arith.constant 0 : index
    %c1 = arith.constant 1 : index
    %c0_9 = arith.constant 0 : index
    %c0_10 = arith.constant 0 : index
    %44 = vector.load %arg2[%c0_8, %c1, %c0_9, %c0_10] : memref<8x5x32x32xbf16, #tpu.memory_space<vmem>>, vector<1x1x32x32xbf16>
    %45 = vector.shape_cast %44 : vector<1x1x32x32xbf16> to vector<32x32xbf16>
    %cst_11 = arith.constant dense<0.000000e+00> : vector<32x512xf32>
    %46 = tpu.matmul %45, %43, %cst_11 {dimension_numbers = #tpu.dot_dimension_numbers<[1], [0], [0], [1], [0, 0, 1, 1], [], []>} : vector<32x32xbf16>, vector<32x512xbf16>, vector<32x512xf32> -> vector<32x512xf32>
    %47 = arith.addf %39, %46 : vector<32x512xf32>
    %48 = arith.truncf %32 : vector<32x512xf32> to vector<32x512xbf16>
    %c0_12 = arith.constant 0 : index
    %c2 = arith.constant 2 : index
    %c0_13 = arith.constant 0 : index
    %c0_14 = arith.constant 0 : index
    %49 = vector.load %arg2[%c0_12, %c2, %c0_13, %c0_14] : memref<8x5x32x32xbf16, #tpu.memory_space<vmem>>, vector<1x1x32x32xbf16>
    %50 = vector.shape_cast %49 : vector<1x1x32x32xbf16> to vector<32x32xbf16>
    %cst_15 = arith.constant dense<0.000000e+00> : vector<32x512xf32>
    %51 = tpu.matmul %50, %48, %cst_15 {dimension_numbers = #tpu.dot_dimension_numbers<[1], [0], [0], [1], [0, 0, 1, 1], [], []>} : vector<32x32xbf16>, vector<32x512xbf16>, vector<32x512xf32> -> vector<32x512xf32>
    %52 = arith.addf %47, %51 : vector<32x512xf32>
    %c511_i32 = arith.constant 511 : i32
    %53 = tpu.dynamic_rotate %32 by %c511_i32 dim 1 : vector<32x512xf32>, i32 -> vector<32x512xf32>
    %54 = vector.broadcast %22 : vector<1x512xf32> to vector<32x512xf32>
    %55 = arith.mulf %53, %54 : vector<32x512xf32>
    %56 = arith.truncf %55 : vector<32x512xf32> to vector<32x512xbf16>
    %c0_16 = arith.constant 0 : index
    %c3 = arith.constant 3 : index
    %c0_17 = arith.constant 0 : index
    %c0_18 = arith.constant 0 : index
    %57 = vector.load %arg2[%c0_16, %c3, %c0_17, %c0_18] : memref<8x5x32x32xbf16, #tpu.memory_space<vmem>>, vector<1x1x32x32xbf16>
    %58 = vector.shape_cast %57 : vector<1x1x32x32xbf16> to vector<32x32xbf16>
    %cst_19 = arith.constant dense<0.000000e+00> : vector<32x512xf32>
    %59 = tpu.matmul %58, %56, %cst_19 {dimension_numbers = #tpu.dot_dimension_numbers<[1], [0], [0], [1], [0, 0, 1, 1], [], []>} : vector<32x32xbf16>, vector<32x512xbf16>, vector<32x512xf32> -> vector<32x512xf32>
    %60 = arith.addf %52, %59 : vector<32x512xf32>
    %c510_i32 = arith.constant 510 : i32
    %61 = tpu.dynamic_rotate %32 by %c510_i32 dim 1 : vector<32x512xf32>, i32 -> vector<32x512xf32>
    %62 = vector.broadcast %29 : vector<1x512xf32> to vector<32x512xf32>
    %63 = arith.mulf %61, %62 : vector<32x512xf32>
    %64 = arith.truncf %63 : vector<32x512xf32> to vector<32x512xbf16>
    %c0_20 = arith.constant 0 : index
    %c4 = arith.constant 4 : index
    %c0_21 = arith.constant 0 : index
    %c0_22 = arith.constant 0 : index
    %65 = vector.load %arg2[%c0_20, %c4, %c0_21, %c0_22] : memref<8x5x32x32xbf16, #tpu.memory_space<vmem>>, vector<1x1x32x32xbf16>
    %66 = vector.shape_cast %65 : vector<1x1x32x32xbf16> to vector<32x32xbf16>
    %cst_23 = arith.constant dense<0.000000e+00> : vector<32x512xf32>
    %67 = tpu.matmul %66, %64, %cst_23 {dimension_numbers = #tpu.dot_dimension_numbers<[1], [0], [0], [1], [0, 0, 1, 1], [], []>} : vector<32x32xbf16>, vector<32x512xbf16>, vector<32x512xf32> -> vector<32x512xf32>
    %68 = arith.addf %60, %67 : vector<32x512xf32>
    %c0_24 = arith.constant 0 : index
    %c0_25 = arith.constant 0 : index
    %c0_26 = arith.constant 0 : index
    %69 = vector.load %arg3[%c0_24, %c0_25, %c0_26] : memref<8x32x1xf32, #tpu.memory_space<vmem>>, vector<1x32x1xf32>
    %70 = vector.shape_cast %69 : vector<1x32x1xf32> to vector<32x1xf32>
    %71 = vector.broadcast %70 : vector<32x1xf32> to vector<32x512xf32>
    %72 = arith.addf %68, %71 : vector<32x512xf32>
    %cst_27 = arith.constant 0.000000e+00 : f32
    %73 = vector.broadcast %cst_27 : f32 to vector<32x512xf32>
    %74 = arith.cmpf oge, %72, %73 : vector<32x512xf32>
    %cst_28 = arith.constant 0.00999999977 : f32
    %75 = vector.broadcast %cst_28 : f32 to vector<32x512xf32>
    %76 = arith.mulf %75, %72 : vector<32x512xf32>
    %77 = arith.select %74, %72, %76 : vector<32x512xi1>, vector<32x512xf32>
    %c2_i32_29 = arith.constant 2 : i32
    %78 = tpu.dynamic_rotate %77 by %c2_i32_29 dim 1 : vector<32x512xf32>, i32 -> vector<32x512xf32>
    %79 = vector.broadcast %8 : vector<1x512xf32> to vector<32x512xf32>
    %80 = arith.mulf %78, %79 : vector<32x512xf32>
    %81 = arith.truncf %80 : vector<32x512xf32> to vector<32x512xbf16>
    %c1_30 = arith.constant 1 : index
    %c0_31 = arith.constant 0 : index
    %c0_32 = arith.constant 0 : index
    %c0_33 = arith.constant 0 : index
    %82 = vector.load %arg2[%c1_30, %c0_31, %c0_32, %c0_33] : memref<8x5x32x32xbf16, #tpu.memory_space<vmem>>, vector<1x1x32x32xbf16>
    %83 = vector.shape_cast %82 : vector<1x1x32x32xbf16> to vector<32x32xbf16>
    %cst_34 = arith.constant dense<0.000000e+00> : vector<32x512xf32>
    %84 = tpu.matmul %83, %81, %cst_34 {dimension_numbers = #tpu.dot_dimension_numbers<[1], [0], [0], [1], [0, 0, 1, 1], [], []>} : vector<32x32xbf16>, vector<32x512xbf16>, vector<32x512xf32> -> vector<32x512xf32>
    %c1_i32_35 = arith.constant 1 : i32
    %85 = tpu.dynamic_rotate %77 by %c1_i32_35 dim 1 : vector<32x512xf32>, i32 -> vector<32x512xf32>
    %86 = vector.broadcast %15 : vector<1x512xf32> to vector<32x512xf32>
    %87 = arith.mulf %85, %86 : vector<32x512xf32>
    %88 = arith.truncf %87 : vector<32x512xf32> to vector<32x512xbf16>
    %c1_36 = arith.constant 1 : index
    %c1_37 = arith.constant 1 : index
    %c0_38 = arith.constant 0 : index
    %c0_39 = arith.constant 0 : index
    %89 = vector.load %arg2[%c1_36, %c1_37, %c0_38, %c0_39] : memref<8x5x32x32xbf16, #tpu.memory_space<vmem>>, vector<1x1x32x32xbf16>
    %90 = vector.shape_cast %89 : vector<1x1x32x32xbf16> to vector<32x32xbf16>
    %cst_40 = arith.constant dense<0.000000e+00> : vector<32x512xf32>
    %91 = tpu.matmul %90, %88, %cst_40 {dimension_numbers = #tpu.dot_dimension_numbers<[1], [0], [0], [1], [0, 0, 1, 1], [], []>} : vector<32x32xbf16>, vector<32x512xbf16>, vector<32x512xf32> -> vector<32x512xf32>
    %92 = arith.addf %84, %91 : vector<32x512xf32>
    %93 = arith.truncf %77 : vector<32x512xf32> to vector<32x512xbf16>
    %c1_41 = arith.constant 1 : index
    %c2_42 = arith.constant 2 : index
    %c0_43 = arith.constant 0 : index
    %c0_44 = arith.constant 0 : index
    %94 = vector.load %arg2[%c1_41, %c2_42, %c0_43, %c0_44] : memref<8x5x32x32xbf16, #tpu.memory_space<vmem>>, vector<1x1x32x32xbf16>
    %95 = vector.shape_cast %94 : vector<1x1x32x32xbf16> to vector<32x32xbf16>
    %cst_45 = arith.constant dense<0.000000e+00> : vector<32x512xf32>
    %96 = tpu.matmul %95, %93, %cst_45 {dimension_numbers = #tpu.dot_dimension_numbers<[1], [0], [0], [1], [0, 0, 1, 1], [], []>} : vector<32x32xbf16>, vector<32x512xbf16>, vector<32x512xf32> -> vector<32x512xf32>
    %97 = arith.addf %92, %96 : vector<32x512xf32>
    %c511_i32_46 = arith.constant 511 : i32
    %98 = tpu.dynamic_rotate %77 by %c511_i32_46 dim 1 : vector<32x512xf32>, i32 -> vector<32x512xf32>
    %99 = vector.broadcast %22 : vector<1x512xf32> to vector<32x512xf32>
    %100 = arith.mulf %98, %99 : vector<32x512xf32>
    %101 = arith.truncf %100 : vector<32x512xf32> to vector<32x512xbf16>
    %c1_47 = arith.constant 1 : index
    %c3_48 = arith.constant 3 : index
    %c0_49 = arith.constant 0 : index
    %c0_50 = arith.constant 0 : index
    %102 = vector.load %arg2[%c1_47, %c3_48, %c0_49, %c0_50] : memref<8x5x32x32xbf16, #tpu.memory_space<vmem>>, vector<1x1x32x32xbf16>
    %103 = vector.shape_cast %102 : vector<1x1x32x32xbf16> to vector<32x32xbf16>
    %cst_51 = arith.constant dense<0.000000e+00> : vector<32x512xf32>
    %104 = tpu.matmul %103, %101, %cst_51 {dimension_numbers = #tpu.dot_dimension_numbers<[1], [0], [0], [1], [0, 0, 1, 1], [], []>} : vector<32x32xbf16>, vector<32x512xbf16>, vector<32x512xf32> -> vector<32x512xf32>
    %105 = arith.addf %97, %104 : vector<32x512xf32>
    %c510_i32_52 = arith.constant 510 : i32
    %106 = tpu.dynamic_rotate %77 by %c510_i32_52 dim 1 : vector<32x512xf32>, i32 -> vector<32x512xf32>
    %107 = vector.broadcast %29 : vector<1x512xf32> to vector<32x512xf32>
    %108 = arith.mulf %106, %107 : vector<32x512xf32>
    %109 = arith.truncf %108 : vector<32x512xf32> to vector<32x512xbf16>
    %c1_53 = arith.constant 1 : index
    %c4_54 = arith.constant 4 : index
    %c0_55 = arith.constant 0 : index
    %c0_56 = arith.constant 0 : index
    %110 = vector.load %arg2[%c1_53, %c4_54, %c0_55, %c0_56] : memref<8x5x32x32xbf16, #tpu.memory_space<vmem>>, vector<1x1x32x32xbf16>
    %111 = vector.shape_cast %110 : vector<1x1x32x32xbf16> to vector<32x32xbf16>
    %cst_57 = arith.constant dense<0.000000e+00> : vector<32x512xf32>
    %112 = tpu.matmul %111, %109, %cst_57 {dimension_numbers = #tpu.dot_dimension_numbers<[1], [0], [0], [1], [0, 0, 1, 1], [], []>} : vector<32x32xbf16>, vector<32x512xbf16>, vector<32x512xf32> -> vector<32x512xf32>
    %113 = arith.addf %105, %112 : vector<32x512xf32>
    %c1_58 = arith.constant 1 : index
    %c0_59 = arith.constant 0 : index
    %c0_60 = arith.constant 0 : index
    %114 = vector.load %arg3[%c1_58, %c0_59, %c0_60] : memref<8x32x1xf32, #tpu.memory_space<vmem>>, vector<1x32x1xf32>
    %115 = vector.shape_cast %114 : vector<1x32x1xf32> to vector<32x1xf32>
    %116 = vector.broadcast %115 : vector<32x1xf32> to vector<32x512xf32>
    %117 = arith.addf %113, %116 : vector<32x512xf32>
    %cst_61 = arith.constant 0.000000e+00 : f32
    %118 = vector.broadcast %cst_61 : f32 to vector<32x512xf32>
    %119 = arith.cmpf oge, %117, %118 : vector<32x512xf32>
    %cst_62 = arith.constant 0.00999999977 : f32
    %120 = vector.broadcast %cst_62 : f32 to vector<32x512xf32>
    %121 = arith.mulf %120, %117 : vector<32x512xf32>
    %122 = arith.select %119, %117, %121 : vector<32x512xi1>, vector<32x512xf32>
    %c2_i32_63 = arith.constant 2 : i32
    %123 = tpu.dynamic_rotate %122 by %c2_i32_63 dim 1 : vector<32x512xf32>, i32 -> vector<32x512xf32>
    %124 = vector.broadcast %8 : vector<1x512xf32> to vector<32x512xf32>
    %125 = arith.mulf %123, %124 : vector<32x512xf32>
    %126 = arith.truncf %125 : vector<32x512xf32> to vector<32x512xbf16>
    %c2_64 = arith.constant 2 : index
    %c0_65 = arith.constant 0 : index
    %c0_66 = arith.constant 0 : index
    %c0_67 = arith.constant 0 : index
    %127 = vector.load %arg2[%c2_64, %c0_65, %c0_66, %c0_67] : memref<8x5x32x32xbf16, #tpu.memory_space<vmem>>, vector<1x1x32x32xbf16>
    %128 = vector.shape_cast %127 : vector<1x1x32x32xbf16> to vector<32x32xbf16>
    %cst_68 = arith.constant dense<0.000000e+00> : vector<32x512xf32>
    %129 = tpu.matmul %128, %126, %cst_68 {dimension_numbers = #tpu.dot_dimension_numbers<[1], [0], [0], [1], [0, 0, 1, 1], [], []>} : vector<32x32xbf16>, vector<32x512xbf16>, vector<32x512xf32> -> vector<32x512xf32>
    %c1_i32_69 = arith.constant 1 : i32
    %130 = tpu.dynamic_rotate %122 by %c1_i32_69 dim 1 : vector<32x512xf32>, i32 -> vector<32x512xf32>
    %131 = vector.broadcast %15 : vector<1x512xf32> to vector<32x512xf32>
    %132 = arith.mulf %130, %131 : vector<32x512xf32>
    %133 = arith.truncf %132 : vector<32x512xf32> to vector<32x512xbf16>
    %c2_70 = arith.constant 2 : index
    %c1_71 = arith.constant 1 : index
    %c0_72 = arith.constant 0 : index
    %c0_73 = arith.constant 0 : index
    %134 = vector.load %arg2[%c2_70, %c1_71, %c0_72, %c0_73] : memref<8x5x32x32xbf16, #tpu.memory_space<vmem>>, vector<1x1x32x32xbf16>
    %135 = vector.shape_cast %134 : vector<1x1x32x32xbf16> to vector<32x32xbf16>
    %cst_74 = arith.constant dense<0.000000e+00> : vector<32x512xf32>
    %136 = tpu.matmul %135, %133, %cst_74 {dimension_numbers = #tpu.dot_dimension_numbers<[1], [0], [0], [1], [0, 0, 1, 1], [], []>} : vector<32x32xbf16>, vector<32x512xbf16>, vector<32x512xf32> -> vector<32x512xf32>
    %137 = arith.addf %129, %136 : vector<32x512xf32>
    %138 = arith.truncf %122 : vector<32x512xf32> to vector<32x512xbf16>
    %c2_75 = arith.constant 2 : index
    %c2_76 = arith.constant 2 : index
    %c0_77 = arith.constant 0 : index
    %c0_78 = arith.constant 0 : index
    %139 = vector.load %arg2[%c2_75, %c2_76, %c0_77, %c0_78] : memref<8x5x32x32xbf16, #tpu.memory_space<vmem>>, vector<1x1x32x32xbf16>
    %140 = vector.shape_cast %139 : vector<1x1x32x32xbf16> to vector<32x32xbf16>
    %cst_79 = arith.constant dense<0.000000e+00> : vector<32x512xf32>
    %141 = tpu.matmul %140, %138, %cst_79 {dimension_numbers = #tpu.dot_dimension_numbers<[1], [0], [0], [1], [0, 0, 1, 1], [], []>} : vector<32x32xbf16>, vector<32x512xbf16>, vector<32x512xf32> -> vector<32x512xf32>
    %142 = arith.addf %137, %141 : vector<32x512xf32>
    %c511_i32_80 = arith.constant 511 : i32
    %143 = tpu.dynamic_rotate %122 by %c511_i32_80 dim 1 : vector<32x512xf32>, i32 -> vector<32x512xf32>
    %144 = vector.broadcast %22 : vector<1x512xf32> to vector<32x512xf32>
    %145 = arith.mulf %143, %144 : vector<32x512xf32>
    %146 = arith.truncf %145 : vector<32x512xf32> to vector<32x512xbf16>
    %c2_81 = arith.constant 2 : index
    %c3_82 = arith.constant 3 : index
    %c0_83 = arith.constant 0 : index
    %c0_84 = arith.constant 0 : index
    %147 = vector.load %arg2[%c2_81, %c3_82, %c0_83, %c0_84] : memref<8x5x32x32xbf16, #tpu.memory_space<vmem>>, vector<1x1x32x32xbf16>
    %148 = vector.shape_cast %147 : vector<1x1x32x32xbf16> to vector<32x32xbf16>
    %cst_85 = arith.constant dense<0.000000e+00> : vector<32x512xf32>
    %149 = tpu.matmul %148, %146, %cst_85 {dimension_numbers = #tpu.dot_dimension_numbers<[1], [0], [0], [1], [0, 0, 1, 1], [], []>} : vector<32x32xbf16>, vector<32x512xbf16>, vector<32x512xf32> -> vector<32x512xf32>
    %150 = arith.addf %142, %149 : vector<32x512xf32>
    %c510_i32_86 = arith.constant 510 : i32
    %151 = tpu.dynamic_rotate %122 by %c510_i32_86 dim 1 : vector<32x512xf32>, i32 -> vector<32x512xf32>
    %152 = vector.broadcast %29 : vector<1x512xf32> to vector<32x512xf32>
    %153 = arith.mulf %151, %152 : vector<32x512xf32>
    %154 = arith.truncf %153 : vector<32x512xf32> to vector<32x512xbf16>
    %c2_87 = arith.constant 2 : index
    %c4_88 = arith.constant 4 : index
    %c0_89 = arith.constant 0 : index
    %c0_90 = arith.constant 0 : index
    %155 = vector.load %arg2[%c2_87, %c4_88, %c0_89, %c0_90] : memref<8x5x32x32xbf16, #tpu.memory_space<vmem>>, vector<1x1x32x32xbf16>
    %156 = vector.shape_cast %155 : vector<1x1x32x32xbf16> to vector<32x32xbf16>
    %cst_91 = arith.constant dense<0.000000e+00> : vector<32x512xf32>
    %157 = tpu.matmul %156, %154, %cst_91 {dimension_numbers = #tpu.dot_dimension_numbers<[1], [0], [0], [1], [0, 0, 1, 1], [], []>} : vector<32x32xbf16>, vector<32x512xbf16>, vector<32x512xf32> -> vector<32x512xf32>
    %158 = arith.addf %150, %157 : vector<32x512xf32>
    %c2_92 = arith.constant 2 : index
    %c0_93 = arith.constant 0 : index
    %c0_94 = arith.constant 0 : index
    %159 = vector.load %arg3[%c2_92, %c0_93, %c0_94] : memref<8x32x1xf32, #tpu.memory_space<vmem>>, vector<1x32x1xf32>
    %160 = vector.shape_cast %159 : vector<1x32x1xf32> to vector<32x1xf32>
    %161 = vector.broadcast %160 : vector<32x1xf32> to vector<32x512xf32>
    %162 = arith.addf %158, %161 : vector<32x512xf32>
    %cst_95 = arith.constant 0.000000e+00 : f32
    %163 = vector.broadcast %cst_95 : f32 to vector<32x512xf32>
    %164 = arith.cmpf oge, %162, %163 : vector<32x512xf32>
    %cst_96 = arith.constant 0.00999999977 : f32
    %165 = vector.broadcast %cst_96 : f32 to vector<32x512xf32>
    %166 = arith.mulf %165, %162 : vector<32x512xf32>
    %167 = arith.select %164, %162, %166 : vector<32x512xi1>, vector<32x512xf32>
    %c2_i32_97 = arith.constant 2 : i32
    %168 = tpu.dynamic_rotate %167 by %c2_i32_97 dim 1 : vector<32x512xf32>, i32 -> vector<32x512xf32>
    %169 = vector.broadcast %8 : vector<1x512xf32> to vector<32x512xf32>
    %170 = arith.mulf %168, %169 : vector<32x512xf32>
    %171 = arith.truncf %170 : vector<32x512xf32> to vector<32x512xbf16>
    %c3_98 = arith.constant 3 : index
    %c0_99 = arith.constant 0 : index
    %c0_100 = arith.constant 0 : index
    %c0_101 = arith.constant 0 : index
    %172 = vector.load %arg2[%c3_98, %c0_99, %c0_100, %c0_101] : memref<8x5x32x32xbf16, #tpu.memory_space<vmem>>, vector<1x1x32x32xbf16>
    %173 = vector.shape_cast %172 : vector<1x1x32x32xbf16> to vector<32x32xbf16>
    %cst_102 = arith.constant dense<0.000000e+00> : vector<32x512xf32>
    %174 = tpu.matmul %173, %171, %cst_102 {dimension_numbers = #tpu.dot_dimension_numbers<[1], [0], [0], [1], [0, 0, 1, 1], [], []>} : vector<32x32xbf16>, vector<32x512xbf16>, vector<32x512xf32> -> vector<32x512xf32>
    %c1_i32_103 = arith.constant 1 : i32
    %175 = tpu.dynamic_rotate %167 by %c1_i32_103 dim 1 : vector<32x512xf32>, i32 -> vector<32x512xf32>
    %176 = vector.broadcast %15 : vector<1x512xf32> to vector<32x512xf32>
    %177 = arith.mulf %175, %176 : vector<32x512xf32>
    %178 = arith.truncf %177 : vector<32x512xf32> to vector<32x512xbf16>
    %c3_104 = arith.constant 3 : index
    %c1_105 = arith.constant 1 : index
    %c0_106 = arith.constant 0 : index
    %c0_107 = arith.constant 0 : index
    %179 = vector.load %arg2[%c3_104, %c1_105, %c0_106, %c0_107] : memref<8x5x32x32xbf16, #tpu.memory_space<vmem>>, vector<1x1x32x32xbf16>
    %180 = vector.shape_cast %179 : vector<1x1x32x32xbf16> to vector<32x32xbf16>
    %cst_108 = arith.constant dense<0.000000e+00> : vector<32x512xf32>
    %181 = tpu.matmul %180, %178, %cst_108 {dimension_numbers = #tpu.dot_dimension_numbers<[1], [0], [0], [1], [0, 0, 1, 1], [], []>} : vector<32x32xbf16>, vector<32x512xbf16>, vector<32x512xf32> -> vector<32x512xf32>
    %182 = arith.addf %174, %181 : vector<32x512xf32>
    %183 = arith.truncf %167 : vector<32x512xf32> to vector<32x512xbf16>
    %c3_109 = arith.constant 3 : index
    %c2_110 = arith.constant 2 : index
    %c0_111 = arith.constant 0 : index
    %c0_112 = arith.constant 0 : index
    %184 = vector.load %arg2[%c3_109, %c2_110, %c0_111, %c0_112] : memref<8x5x32x32xbf16, #tpu.memory_space<vmem>>, vector<1x1x32x32xbf16>
    %185 = vector.shape_cast %184 : vector<1x1x32x32xbf16> to vector<32x32xbf16>
    %cst_113 = arith.constant dense<0.000000e+00> : vector<32x512xf32>
    %186 = tpu.matmul %185, %183, %cst_113 {dimension_numbers = #tpu.dot_dimension_numbers<[1], [0], [0], [1], [0, 0, 1, 1], [], []>} : vector<32x32xbf16>, vector<32x512xbf16>, vector<32x512xf32> -> vector<32x512xf32>
    %187 = arith.addf %182, %186 : vector<32x512xf32>
    %c511_i32_114 = arith.constant 511 : i32
    %188 = tpu.dynamic_rotate %167 by %c511_i32_114 dim 1 : vector<32x512xf32>, i32 -> vector<32x512xf32>
    %189 = vector.broadcast %22 : vector<1x512xf32> to vector<32x512xf32>
    %190 = arith.mulf %188, %189 : vector<32x512xf32>
    %191 = arith.truncf %190 : vector<32x512xf32> to vector<32x512xbf16>
    %c3_115 = arith.constant 3 : index
    %c3_116 = arith.constant 3 : index
    %c0_117 = arith.constant 0 : index
    %c0_118 = arith.constant 0 : index
    %192 = vector.load %arg2[%c3_115, %c3_116, %c0_117, %c0_118] : memref<8x5x32x32xbf16, #tpu.memory_space<vmem>>, vector<1x1x32x32xbf16>
    %193 = vector.shape_cast %192 : vector<1x1x32x32xbf16> to vector<32x32xbf16>
    %cst_119 = arith.constant dense<0.000000e+00> : vector<32x512xf32>
    %194 = tpu.matmul %193, %191, %cst_119 {dimension_numbers = #tpu.dot_dimension_numbers<[1], [0], [0], [1], [0, 0, 1, 1], [], []>} : vector<32x32xbf16>, vector<32x512xbf16>, vector<32x512xf32> -> vector<32x512xf32>
    %195 = arith.addf %187, %194 : vector<32x512xf32>
    %c510_i32_120 = arith.constant 510 : i32
    %196 = tpu.dynamic_rotate %167 by %c510_i32_120 dim 1 : vector<32x512xf32>, i32 -> vector<32x512xf32>
    %197 = vector.broadcast %29 : vector<1x512xf32> to vector<32x512xf32>
    %198 = arith.mulf %196, %197 : vector<32x512xf32>
    %199 = arith.truncf %198 : vector<32x512xf32> to vector<32x512xbf16>
    %c3_121 = arith.constant 3 : index
    %c4_122 = arith.constant 4 : index
    %c0_123 = arith.constant 0 : index
    %c0_124 = arith.constant 0 : index
    %200 = vector.load %arg2[%c3_121, %c4_122, %c0_123, %c0_124] : memref<8x5x32x32xbf16, #tpu.memory_space<vmem>>, vector<1x1x32x32xbf16>
    %201 = vector.shape_cast %200 : vector<1x1x32x32xbf16> to vector<32x32xbf16>
    %cst_125 = arith.constant dense<0.000000e+00> : vector<32x512xf32>
    %202 = tpu.matmul %201, %199, %cst_125 {dimension_numbers = #tpu.dot_dimension_numbers<[1], [0], [0], [1], [0, 0, 1, 1], [], []>} : vector<32x32xbf16>, vector<32x512xbf16>, vector<32x512xf32> -> vector<32x512xf32>
    %203 = arith.addf %195, %202 : vector<32x512xf32>
    %c3_126 = arith.constant 3 : index
    %c0_127 = arith.constant 0 : index
    %c0_128 = arith.constant 0 : index
    %204 = vector.load %arg3[%c3_126, %c0_127, %c0_128] : memref<8x32x1xf32, #tpu.memory_space<vmem>>, vector<1x32x1xf32>
    %205 = vector.shape_cast %204 : vector<1x32x1xf32> to vector<32x1xf32>
    %206 = vector.broadcast %205 : vector<32x1xf32> to vector<32x512xf32>
    %207 = arith.addf %203, %206 : vector<32x512xf32>
    %cst_129 = arith.constant 0.000000e+00 : f32
    %208 = vector.broadcast %cst_129 : f32 to vector<32x512xf32>
    %209 = arith.cmpf oge, %207, %208 : vector<32x512xf32>
    %cst_130 = arith.constant 0.00999999977 : f32
    %210 = vector.broadcast %cst_130 : f32 to vector<32x512xf32>
    %211 = arith.mulf %210, %207 : vector<32x512xf32>
    %212 = arith.select %209, %207, %211 : vector<32x512xi1>, vector<32x512xf32>
    %c2_i32_131 = arith.constant 2 : i32
    %213 = tpu.dynamic_rotate %212 by %c2_i32_131 dim 1 : vector<32x512xf32>, i32 -> vector<32x512xf32>
    %214 = vector.broadcast %8 : vector<1x512xf32> to vector<32x512xf32>
    %215 = arith.mulf %213, %214 : vector<32x512xf32>
    %216 = arith.truncf %215 : vector<32x512xf32> to vector<32x512xbf16>
    %c4_132 = arith.constant 4 : index
    %c0_133 = arith.constant 0 : index
    %c0_134 = arith.constant 0 : index
    %c0_135 = arith.constant 0 : index
    %217 = vector.load %arg2[%c4_132, %c0_133, %c0_134, %c0_135] : memref<8x5x32x32xbf16, #tpu.memory_space<vmem>>, vector<1x1x32x32xbf16>
    %218 = vector.shape_cast %217 : vector<1x1x32x32xbf16> to vector<32x32xbf16>
    %cst_136 = arith.constant dense<0.000000e+00> : vector<32x512xf32>
    %219 = tpu.matmul %218, %216, %cst_136 {dimension_numbers = #tpu.dot_dimension_numbers<[1], [0], [0], [1], [0, 0, 1, 1], [], []>} : vector<32x32xbf16>, vector<32x512xbf16>, vector<32x512xf32> -> vector<32x512xf32>
    %c1_i32_137 = arith.constant 1 : i32
    %220 = tpu.dynamic_rotate %212 by %c1_i32_137 dim 1 : vector<32x512xf32>, i32 -> vector<32x512xf32>
    %221 = vector.broadcast %15 : vector<1x512xf32> to vector<32x512xf32>
    %222 = arith.mulf %220, %221 : vector<32x512xf32>
    %223 = arith.truncf %222 : vector<32x512xf32> to vector<32x512xbf16>
    %c4_138 = arith.constant 4 : index
    %c1_139 = arith.constant 1 : index
    %c0_140 = arith.constant 0 : index
    %c0_141 = arith.constant 0 : index
    %224 = vector.load %arg2[%c4_138, %c1_139, %c0_140, %c0_141] : memref<8x5x32x32xbf16, #tpu.memory_space<vmem>>, vector<1x1x32x32xbf16>
    %225 = vector.shape_cast %224 : vector<1x1x32x32xbf16> to vector<32x32xbf16>
    %cst_142 = arith.constant dense<0.000000e+00> : vector<32x512xf32>
    %226 = tpu.matmul %225, %223, %cst_142 {dimension_numbers = #tpu.dot_dimension_numbers<[1], [0], [0], [1], [0, 0, 1, 1], [], []>} : vector<32x32xbf16>, vector<32x512xbf16>, vector<32x512xf32> -> vector<32x512xf32>
    %227 = arith.addf %219, %226 : vector<32x512xf32>
    %228 = arith.truncf %212 : vector<32x512xf32> to vector<32x512xbf16>
    %c4_143 = arith.constant 4 : index
    %c2_144 = arith.constant 2 : index
    %c0_145 = arith.constant 0 : index
    %c0_146 = arith.constant 0 : index
    %229 = vector.load %arg2[%c4_143, %c2_144, %c0_145, %c0_146] : memref<8x5x32x32xbf16, #tpu.memory_space<vmem>>, vector<1x1x32x32xbf16>
    %230 = vector.shape_cast %229 : vector<1x1x32x32xbf16> to vector<32x32xbf16>
    %cst_147 = arith.constant dense<0.000000e+00> : vector<32x512xf32>
    %231 = tpu.matmul %230, %228, %cst_147 {dimension_numbers = #tpu.dot_dimension_numbers<[1], [0], [0], [1], [0, 0, 1, 1], [], []>} : vector<32x32xbf16>, vector<32x512xbf16>, vector<32x512xf32> -> vector<32x512xf32>
    %232 = arith.addf %227, %231 : vector<32x512xf32>
    %c511_i32_148 = arith.constant 511 : i32
    %233 = tpu.dynamic_rotate %212 by %c511_i32_148 dim 1 : vector<32x512xf32>, i32 -> vector<32x512xf32>
    %234 = vector.broadcast %22 : vector<1x512xf32> to vector<32x512xf32>
    %235 = arith.mulf %233, %234 : vector<32x512xf32>
    %236 = arith.truncf %235 : vector<32x512xf32> to vector<32x512xbf16>
    %c4_149 = arith.constant 4 : index
    %c3_150 = arith.constant 3 : index
    %c0_151 = arith.constant 0 : index
    %c0_152 = arith.constant 0 : index
    %237 = vector.load %arg2[%c4_149, %c3_150, %c0_151, %c0_152] : memref<8x5x32x32xbf16, #tpu.memory_space<vmem>>, vector<1x1x32x32xbf16>
    %238 = vector.shape_cast %237 : vector<1x1x32x32xbf16> to vector<32x32xbf16>
    %cst_153 = arith.constant dense<0.000000e+00> : vector<32x512xf32>
    %239 = tpu.matmul %238, %236, %cst_153 {dimension_numbers = #tpu.dot_dimension_numbers<[1], [0], [0], [1], [0, 0, 1, 1], [], []>} : vector<32x32xbf16>, vector<32x512xbf16>, vector<32x512xf32> -> vector<32x512xf32>
    %240 = arith.addf %232, %239 : vector<32x512xf32>
    %c510_i32_154 = arith.constant 510 : i32
    %241 = tpu.dynamic_rotate %212 by %c510_i32_154 dim 1 : vector<32x512xf32>, i32 -> vector<32x512xf32>
    %242 = vector.broadcast %29 : vector<1x512xf32> to vector<32x512xf32>
    %243 = arith.mulf %241, %242 : vector<32x512xf32>
    %244 = arith.truncf %243 : vector<32x512xf32> to vector<32x512xbf16>
    %c4_155 = arith.constant 4 : index
    %c4_156 = arith.constant 4 : index
    %c0_157 = arith.constant 0 : index
    %c0_158 = arith.constant 0 : index
    %245 = vector.load %arg2[%c4_155, %c4_156, %c0_157, %c0_158] : memref<8x5x32x32xbf16, #tpu.memory_space<vmem>>, vector<1x1x32x32xbf16>
    %246 = vector.shape_cast %245 : vector<1x1x32x32xbf16> to vector<32x32xbf16>
    %cst_159 = arith.constant dense<0.000000e+00> : vector<32x512xf32>
    %247 = tpu.matmul %246, %244, %cst_159 {dimension_numbers = #tpu.dot_dimension_numbers<[1], [0], [0], [1], [0, 0, 1, 1], [], []>} : vector<32x32xbf16>, vector<32x512xbf16>, vector<32x512xf32> -> vector<32x512xf32>
    %248 = arith.addf %240, %247 : vector<32x512xf32>
    %c4_160 = arith.constant 4 : index
    %c0_161 = arith.constant 0 : index
    %c0_162 = arith.constant 0 : index
    %249 = vector.load %arg3[%c4_160, %c0_161, %c0_162] : memref<8x32x1xf32, #tpu.memory_space<vmem>>, vector<1x32x1xf32>
    %250 = vector.shape_cast %249 : vector<1x32x1xf32> to vector<32x1xf32>
    %251 = vector.broadcast %250 : vector<32x1xf32> to vector<32x512xf32>
    %252 = arith.addf %248, %251 : vector<32x512xf32>
    %cst_163 = arith.constant 0.000000e+00 : f32
    %253 = vector.broadcast %cst_163 : f32 to vector<32x512xf32>
    %254 = arith.cmpf oge, %252, %253 : vector<32x512xf32>
    %cst_164 = arith.constant 0.00999999977 : f32
    %255 = vector.broadcast %cst_164 : f32 to vector<32x512xf32>
    %256 = arith.mulf %255, %252 : vector<32x512xf32>
    %257 = arith.select %254, %252, %256 : vector<32x512xi1>, vector<32x512xf32>
    %c2_i32_165 = arith.constant 2 : i32
    %258 = tpu.dynamic_rotate %257 by %c2_i32_165 dim 1 : vector<32x512xf32>, i32 -> vector<32x512xf32>
    %259 = vector.broadcast %8 : vector<1x512xf32> to vector<32x512xf32>
    %260 = arith.mulf %258, %259 : vector<32x512xf32>
    %261 = arith.truncf %260 : vector<32x512xf32> to vector<32x512xbf16>
    %c5 = arith.constant 5 : index
    %c0_166 = arith.constant 0 : index
    %c0_167 = arith.constant 0 : index
    %c0_168 = arith.constant 0 : index
    %262 = vector.load %arg2[%c5, %c0_166, %c0_167, %c0_168] : memref<8x5x32x32xbf16, #tpu.memory_space<vmem>>, vector<1x1x32x32xbf16>
    %263 = vector.shape_cast %262 : vector<1x1x32x32xbf16> to vector<32x32xbf16>
    %cst_169 = arith.constant dense<0.000000e+00> : vector<32x512xf32>
    %264 = tpu.matmul %263, %261, %cst_169 {dimension_numbers = #tpu.dot_dimension_numbers<[1], [0], [0], [1], [0, 0, 1, 1], [], []>} : vector<32x32xbf16>, vector<32x512xbf16>, vector<32x512xf32> -> vector<32x512xf32>
    %c1_i32_170 = arith.constant 1 : i32
    %265 = tpu.dynamic_rotate %257 by %c1_i32_170 dim 1 : vector<32x512xf32>, i32 -> vector<32x512xf32>
    %266 = vector.broadcast %15 : vector<1x512xf32> to vector<32x512xf32>
    %267 = arith.mulf %265, %266 : vector<32x512xf32>
    %268 = arith.truncf %267 : vector<32x512xf32> to vector<32x512xbf16>
    %c5_171 = arith.constant 5 : index
    %c1_172 = arith.constant 1 : index
    %c0_173 = arith.constant 0 : index
    %c0_174 = arith.constant 0 : index
    %269 = vector.load %arg2[%c5_171, %c1_172, %c0_173, %c0_174] : memref<8x5x32x32xbf16, #tpu.memory_space<vmem>>, vector<1x1x32x32xbf16>
    %270 = vector.shape_cast %269 : vector<1x1x32x32xbf16> to vector<32x32xbf16>
    %cst_175 = arith.constant dense<0.000000e+00> : vector<32x512xf32>
    %271 = tpu.matmul %270, %268, %cst_175 {dimension_numbers = #tpu.dot_dimension_numbers<[1], [0], [0], [1], [0, 0, 1, 1], [], []>} : vector<32x32xbf16>, vector<32x512xbf16>, vector<32x512xf32> -> vector<32x512xf32>
    %272 = arith.addf %264, %271 : vector<32x512xf32>
    %273 = arith.truncf %257 : vector<32x512xf32> to vector<32x512xbf16>
    %c5_176 = arith.constant 5 : index
    %c2_177 = arith.constant 2 : index
    %c0_178 = arith.constant 0 : index
    %c0_179 = arith.constant 0 : index
    %274 = vector.load %arg2[%c5_176, %c2_177, %c0_178, %c0_179] : memref<8x5x32x32xbf16, #tpu.memory_space<vmem>>, vector<1x1x32x32xbf16>
    %275 = vector.shape_cast %274 : vector<1x1x32x32xbf16> to vector<32x32xbf16>
    %cst_180 = arith.constant dense<0.000000e+00> : vector<32x512xf32>
    %276 = tpu.matmul %275, %273, %cst_180 {dimension_numbers = #tpu.dot_dimension_numbers<[1], [0], [0], [1], [0, 0, 1, 1], [], []>} : vector<32x32xbf16>, vector<32x512xbf16>, vector<32x512xf32> -> vector<32x512xf32>
    %277 = arith.addf %272, %276 : vector<32x512xf32>
    %c511_i32_181 = arith.constant 511 : i32
    %278 = tpu.dynamic_rotate %257 by %c511_i32_181 dim 1 : vector<32x512xf32>, i32 -> vector<32x512xf32>
    %279 = vector.broadcast %22 : vector<1x512xf32> to vector<32x512xf32>
    %280 = arith.mulf %278, %279 : vector<32x512xf32>
    %281 = arith.truncf %280 : vector<32x512xf32> to vector<32x512xbf16>
    %c5_182 = arith.constant 5 : index
    %c3_183 = arith.constant 3 : index
    %c0_184 = arith.constant 0 : index
    %c0_185 = arith.constant 0 : index
    %282 = vector.load %arg2[%c5_182, %c3_183, %c0_184, %c0_185] : memref<8x5x32x32xbf16, #tpu.memory_space<vmem>>, vector<1x1x32x32xbf16>
    %283 = vector.shape_cast %282 : vector<1x1x32x32xbf16> to vector<32x32xbf16>
    %cst_186 = arith.constant dense<0.000000e+00> : vector<32x512xf32>
    %284 = tpu.matmul %283, %281, %cst_186 {dimension_numbers = #tpu.dot_dimension_numbers<[1], [0], [0], [1], [0, 0, 1, 1], [], []>} : vector<32x32xbf16>, vector<32x512xbf16>, vector<32x512xf32> -> vector<32x512xf32>
    %285 = arith.addf %277, %284 : vector<32x512xf32>
    %c510_i32_187 = arith.constant 510 : i32
    %286 = tpu.dynamic_rotate %257 by %c510_i32_187 dim 1 : vector<32x512xf32>, i32 -> vector<32x512xf32>
    %287 = vector.broadcast %29 : vector<1x512xf32> to vector<32x512xf32>
    %288 = arith.mulf %286, %287 : vector<32x512xf32>
    %289 = arith.truncf %288 : vector<32x512xf32> to vector<32x512xbf16>
    %c5_188 = arith.constant 5 : index
    %c4_189 = arith.constant 4 : index
    %c0_190 = arith.constant 0 : index
    %c0_191 = arith.constant 0 : index
    %290 = vector.load %arg2[%c5_188, %c4_189, %c0_190, %c0_191] : memref<8x5x32x32xbf16, #tpu.memory_space<vmem>>, vector<1x1x32x32xbf16>
    %291 = vector.shape_cast %290 : vector<1x1x32x32xbf16> to vector<32x32xbf16>
    %cst_192 = arith.constant dense<0.000000e+00> : vector<32x512xf32>
    %292 = tpu.matmul %291, %289, %cst_192 {dimension_numbers = #tpu.dot_dimension_numbers<[1], [0], [0], [1], [0, 0, 1, 1], [], []>} : vector<32x32xbf16>, vector<32x512xbf16>, vector<32x512xf32> -> vector<32x512xf32>
    %293 = arith.addf %285, %292 : vector<32x512xf32>
    %c5_193 = arith.constant 5 : index
    %c0_194 = arith.constant 0 : index
    %c0_195 = arith.constant 0 : index
    %294 = vector.load %arg3[%c5_193, %c0_194, %c0_195] : memref<8x32x1xf32, #tpu.memory_space<vmem>>, vector<1x32x1xf32>
    %295 = vector.shape_cast %294 : vector<1x32x1xf32> to vector<32x1xf32>
    %296 = vector.broadcast %295 : vector<32x1xf32> to vector<32x512xf32>
    %297 = arith.addf %293, %296 : vector<32x512xf32>
    %cst_196 = arith.constant 0.000000e+00 : f32
    %298 = vector.broadcast %cst_196 : f32 to vector<32x512xf32>
    %299 = arith.cmpf oge, %297, %298 : vector<32x512xf32>
    %cst_197 = arith.constant 0.00999999977 : f32
    %300 = vector.broadcast %cst_197 : f32 to vector<32x512xf32>
    %301 = arith.mulf %300, %297 : vector<32x512xf32>
    %302 = arith.select %299, %297, %301 : vector<32x512xi1>, vector<32x512xf32>
    %c2_i32_198 = arith.constant 2 : i32
    %303 = tpu.dynamic_rotate %302 by %c2_i32_198 dim 1 : vector<32x512xf32>, i32 -> vector<32x512xf32>
    %304 = vector.broadcast %8 : vector<1x512xf32> to vector<32x512xf32>
    %305 = arith.mulf %303, %304 : vector<32x512xf32>
    %306 = arith.truncf %305 : vector<32x512xf32> to vector<32x512xbf16>
    %c6 = arith.constant 6 : index
    %c0_199 = arith.constant 0 : index
    %c0_200 = arith.constant 0 : index
    %c0_201 = arith.constant 0 : index
    %307 = vector.load %arg2[%c6, %c0_199, %c0_200, %c0_201] : memref<8x5x32x32xbf16, #tpu.memory_space<vmem>>, vector<1x1x32x32xbf16>
    %308 = vector.shape_cast %307 : vector<1x1x32x32xbf16> to vector<32x32xbf16>
    %cst_202 = arith.constant dense<0.000000e+00> : vector<32x512xf32>
    %309 = tpu.matmul %308, %306, %cst_202 {dimension_numbers = #tpu.dot_dimension_numbers<[1], [0], [0], [1], [0, 0, 1, 1], [], []>} : vector<32x32xbf16>, vector<32x512xbf16>, vector<32x512xf32> -> vector<32x512xf32>
    %c1_i32_203 = arith.constant 1 : i32
    %310 = tpu.dynamic_rotate %302 by %c1_i32_203 dim 1 : vector<32x512xf32>, i32 -> vector<32x512xf32>
    %311 = vector.broadcast %15 : vector<1x512xf32> to vector<32x512xf32>
    %312 = arith.mulf %310, %311 : vector<32x512xf32>
    %313 = arith.truncf %312 : vector<32x512xf32> to vector<32x512xbf16>
    %c6_204 = arith.constant 6 : index
    %c1_205 = arith.constant 1 : index
    %c0_206 = arith.constant 0 : index
    %c0_207 = arith.constant 0 : index
    %314 = vector.load %arg2[%c6_204, %c1_205, %c0_206, %c0_207] : memref<8x5x32x32xbf16, #tpu.memory_space<vmem>>, vector<1x1x32x32xbf16>
    %315 = vector.shape_cast %314 : vector<1x1x32x32xbf16> to vector<32x32xbf16>
    %cst_208 = arith.constant dense<0.000000e+00> : vector<32x512xf32>
    %316 = tpu.matmul %315, %313, %cst_208 {dimension_numbers = #tpu.dot_dimension_numbers<[1], [0], [0], [1], [0, 0, 1, 1], [], []>} : vector<32x32xbf16>, vector<32x512xbf16>, vector<32x512xf32> -> vector<32x512xf32>
    %317 = arith.addf %309, %316 : vector<32x512xf32>
    %318 = arith.truncf %302 : vector<32x512xf32> to vector<32x512xbf16>
    %c6_209 = arith.constant 6 : index
    %c2_210 = arith.constant 2 : index
    %c0_211 = arith.constant 0 : index
    %c0_212 = arith.constant 0 : index
    %319 = vector.load %arg2[%c6_209, %c2_210, %c0_211, %c0_212] : memref<8x5x32x32xbf16, #tpu.memory_space<vmem>>, vector<1x1x32x32xbf16>
    %320 = vector.shape_cast %319 : vector<1x1x32x32xbf16> to vector<32x32xbf16>
    %cst_213 = arith.constant dense<0.000000e+00> : vector<32x512xf32>
    %321 = tpu.matmul %320, %318, %cst_213 {dimension_numbers = #tpu.dot_dimension_numbers<[1], [0], [0], [1], [0, 0, 1, 1], [], []>} : vector<32x32xbf16>, vector<32x512xbf16>, vector<32x512xf32> -> vector<32x512xf32>
    %322 = arith.addf %317, %321 : vector<32x512xf32>
    %c511_i32_214 = arith.constant 511 : i32
    %323 = tpu.dynamic_rotate %302 by %c511_i32_214 dim 1 : vector<32x512xf32>, i32 -> vector<32x512xf32>
    %324 = vector.broadcast %22 : vector<1x512xf32> to vector<32x512xf32>
    %325 = arith.mulf %323, %324 : vector<32x512xf32>
    %326 = arith.truncf %325 : vector<32x512xf32> to vector<32x512xbf16>
    %c6_215 = arith.constant 6 : index
    %c3_216 = arith.constant 3 : index
    %c0_217 = arith.constant 0 : index
    %c0_218 = arith.constant 0 : index
    %327 = vector.load %arg2[%c6_215, %c3_216, %c0_217, %c0_218] : memref<8x5x32x32xbf16, #tpu.memory_space<vmem>>, vector<1x1x32x32xbf16>
    %328 = vector.shape_cast %327 : vector<1x1x32x32xbf16> to vector<32x32xbf16>
    %cst_219 = arith.constant dense<0.000000e+00> : vector<32x512xf32>
    %329 = tpu.matmul %328, %326, %cst_219 {dimension_numbers = #tpu.dot_dimension_numbers<[1], [0], [0], [1], [0, 0, 1, 1], [], []>} : vector<32x32xbf16>, vector<32x512xbf16>, vector<32x512xf32> -> vector<32x512xf32>
    %330 = arith.addf %322, %329 : vector<32x512xf32>
    %c510_i32_220 = arith.constant 510 : i32
    %331 = tpu.dynamic_rotate %302 by %c510_i32_220 dim 1 : vector<32x512xf32>, i32 -> vector<32x512xf32>
    %332 = vector.broadcast %29 : vector<1x512xf32> to vector<32x512xf32>
    %333 = arith.mulf %331, %332 : vector<32x512xf32>
    %334 = arith.truncf %333 : vector<32x512xf32> to vector<32x512xbf16>
    %c6_221 = arith.constant 6 : index
    %c4_222 = arith.constant 4 : index
    %c0_223 = arith.constant 0 : index
    %c0_224 = arith.constant 0 : index
    %335 = vector.load %arg2[%c6_221, %c4_222, %c0_223, %c0_224] : memref<8x5x32x32xbf16, #tpu.memory_space<vmem>>, vector<1x1x32x32xbf16>
    %336 = vector.shape_cast %335 : vector<1x1x32x32xbf16> to vector<32x32xbf16>
    %cst_225 = arith.constant dense<0.000000e+00> : vector<32x512xf32>
    %337 = tpu.matmul %336, %334, %cst_225 {dimension_numbers = #tpu.dot_dimension_numbers<[1], [0], [0], [1], [0, 0, 1, 1], [], []>} : vector<32x32xbf16>, vector<32x512xbf16>, vector<32x512xf32> -> vector<32x512xf32>
    %338 = arith.addf %330, %337 : vector<32x512xf32>
    %c6_226 = arith.constant 6 : index
    %c0_227 = arith.constant 0 : index
    %c0_228 = arith.constant 0 : index
    %339 = vector.load %arg3[%c6_226, %c0_227, %c0_228] : memref<8x32x1xf32, #tpu.memory_space<vmem>>, vector<1x32x1xf32>
    %340 = vector.shape_cast %339 : vector<1x32x1xf32> to vector<32x1xf32>
    %341 = vector.broadcast %340 : vector<32x1xf32> to vector<32x512xf32>
    %342 = arith.addf %338, %341 : vector<32x512xf32>
    %cst_229 = arith.constant 0.000000e+00 : f32
    %343 = vector.broadcast %cst_229 : f32 to vector<32x512xf32>
    %344 = arith.cmpf oge, %342, %343 : vector<32x512xf32>
    %cst_230 = arith.constant 0.00999999977 : f32
    %345 = vector.broadcast %cst_230 : f32 to vector<32x512xf32>
    %346 = arith.mulf %345, %342 : vector<32x512xf32>
    %347 = arith.select %344, %342, %346 : vector<32x512xi1>, vector<32x512xf32>
    %c2_i32_231 = arith.constant 2 : i32
    %348 = tpu.dynamic_rotate %347 by %c2_i32_231 dim 1 : vector<32x512xf32>, i32 -> vector<32x512xf32>
    %349 = vector.broadcast %8 : vector<1x512xf32> to vector<32x512xf32>
    %350 = arith.mulf %348, %349 : vector<32x512xf32>
    %351 = arith.truncf %350 : vector<32x512xf32> to vector<32x512xbf16>
    %c7 = arith.constant 7 : index
    %c0_232 = arith.constant 0 : index
    %c0_233 = arith.constant 0 : index
    %c0_234 = arith.constant 0 : index
    %352 = vector.load %arg2[%c7, %c0_232, %c0_233, %c0_234] : memref<8x5x32x32xbf16, #tpu.memory_space<vmem>>, vector<1x1x32x32xbf16>
    %353 = vector.shape_cast %352 : vector<1x1x32x32xbf16> to vector<32x32xbf16>
    %354 = vector.extract_strided_slice %353 {offsets = [0, 0], sizes = [8, 32], strides = [1, 1]} : vector<32x32xbf16> to vector<8x32xbf16>
    %cst_235 = arith.constant dense<0.000000e+00> : vector<8x512xf32>
    %355 = tpu.matmul %354, %351, %cst_235 {dimension_numbers = #tpu.dot_dimension_numbers<[1], [0], [0], [1], [0, 0, 1, 1], [], []>} : vector<8x32xbf16>, vector<32x512xbf16>, vector<8x512xf32> -> vector<8x512xf32>
    %c1_i32_236 = arith.constant 1 : i32
    %356 = tpu.dynamic_rotate %347 by %c1_i32_236 dim 1 : vector<32x512xf32>, i32 -> vector<32x512xf32>
    %357 = vector.broadcast %15 : vector<1x512xf32> to vector<32x512xf32>
    %358 = arith.mulf %356, %357 : vector<32x512xf32>
    %359 = arith.truncf %358 : vector<32x512xf32> to vector<32x512xbf16>
    %c7_237 = arith.constant 7 : index
    %c1_238 = arith.constant 1 : index
    %c0_239 = arith.constant 0 : index
    %c0_240 = arith.constant 0 : index
    %360 = vector.load %arg2[%c7_237, %c1_238, %c0_239, %c0_240] : memref<8x5x32x32xbf16, #tpu.memory_space<vmem>>, vector<1x1x32x32xbf16>
    %361 = vector.shape_cast %360 : vector<1x1x32x32xbf16> to vector<32x32xbf16>
    %362 = vector.extract_strided_slice %361 {offsets = [0, 0], sizes = [8, 32], strides = [1, 1]} : vector<32x32xbf16> to vector<8x32xbf16>
    %cst_241 = arith.constant dense<0.000000e+00> : vector<8x512xf32>
    %363 = tpu.matmul %362, %359, %cst_241 {dimension_numbers = #tpu.dot_dimension_numbers<[1], [0], [0], [1], [0, 0, 1, 1], [], []>} : vector<8x32xbf16>, vector<32x512xbf16>, vector<8x512xf32> -> vector<8x512xf32>
    %364 = arith.addf %355, %363 : vector<8x512xf32>
    %365 = arith.truncf %347 : vector<32x512xf32> to vector<32x512xbf16>
    %c7_242 = arith.constant 7 : index
    %c2_243 = arith.constant 2 : index
    %c0_244 = arith.constant 0 : index
    %c0_245 = arith.constant 0 : index
    %366 = vector.load %arg2[%c7_242, %c2_243, %c0_244, %c0_245] : memref<8x5x32x32xbf16, #tpu.memory_space<vmem>>, vector<1x1x32x32xbf16>
    %367 = vector.shape_cast %366 : vector<1x1x32x32xbf16> to vector<32x32xbf16>
    %368 = vector.extract_strided_slice %367 {offsets = [0, 0], sizes = [8, 32], strides = [1, 1]} : vector<32x32xbf16> to vector<8x32xbf16>
    %cst_246 = arith.constant dense<0.000000e+00> : vector<8x512xf32>
    %369 = tpu.matmul %368, %365, %cst_246 {dimension_numbers = #tpu.dot_dimension_numbers<[1], [0], [0], [1], [0, 0, 1, 1], [], []>} : vector<8x32xbf16>, vector<32x512xbf16>, vector<8x512xf32> -> vector<8x512xf32>
    %370 = arith.addf %364, %369 : vector<8x512xf32>
    %c511_i32_247 = arith.constant 511 : i32
    %371 = tpu.dynamic_rotate %347 by %c511_i32_247 dim 1 : vector<32x512xf32>, i32 -> vector<32x512xf32>
    %372 = vector.broadcast %22 : vector<1x512xf32> to vector<32x512xf32>
    %373 = arith.mulf %371, %372 : vector<32x512xf32>
    %374 = arith.truncf %373 : vector<32x512xf32> to vector<32x512xbf16>
    %c7_248 = arith.constant 7 : index
    %c3_249 = arith.constant 3 : index
    %c0_250 = arith.constant 0 : index
    %c0_251 = arith.constant 0 : index
    %375 = vector.load %arg2[%c7_248, %c3_249, %c0_250, %c0_251] : memref<8x5x32x32xbf16, #tpu.memory_space<vmem>>, vector<1x1x32x32xbf16>
    %376 = vector.shape_cast %375 : vector<1x1x32x32xbf16> to vector<32x32xbf16>
    %377 = vector.extract_strided_slice %376 {offsets = [0, 0], sizes = [8, 32], strides = [1, 1]} : vector<32x32xbf16> to vector<8x32xbf16>
    %cst_252 = arith.constant dense<0.000000e+00> : vector<8x512xf32>
    %378 = tpu.matmul %377, %374, %cst_252 {dimension_numbers = #tpu.dot_dimension_numbers<[1], [0], [0], [1], [0, 0, 1, 1], [], []>} : vector<8x32xbf16>, vector<32x512xbf16>, vector<8x512xf32> -> vector<8x512xf32>
    %379 = arith.addf %370, %378 : vector<8x512xf32>
    %c510_i32_253 = arith.constant 510 : i32
    %380 = tpu.dynamic_rotate %347 by %c510_i32_253 dim 1 : vector<32x512xf32>, i32 -> vector<32x512xf32>
    %381 = vector.broadcast %29 : vector<1x512xf32> to vector<32x512xf32>
    %382 = arith.mulf %380, %381 : vector<32x512xf32>
    %383 = arith.truncf %382 : vector<32x512xf32> to vector<32x512xbf16>
    %c7_254 = arith.constant 7 : index
    %c4_255 = arith.constant 4 : index
    %c0_256 = arith.constant 0 : index
    %c0_257 = arith.constant 0 : index
    %384 = vector.load %arg2[%c7_254, %c4_255, %c0_256, %c0_257] : memref<8x5x32x32xbf16, #tpu.memory_space<vmem>>, vector<1x1x32x32xbf16>
    %385 = vector.shape_cast %384 : vector<1x1x32x32xbf16> to vector<32x32xbf16>
    %386 = vector.extract_strided_slice %385 {offsets = [0, 0], sizes = [8, 32], strides = [1, 1]} : vector<32x32xbf16> to vector<8x32xbf16>
    %cst_258 = arith.constant dense<0.000000e+00> : vector<8x512xf32>
    %387 = tpu.matmul %386, %383, %cst_258 {dimension_numbers = #tpu.dot_dimension_numbers<[1], [0], [0], [1], [0, 0, 1, 1], [], []>} : vector<8x32xbf16>, vector<32x512xbf16>, vector<8x512xf32> -> vector<8x512xf32>
    %388 = arith.addf %379, %387 : vector<8x512xf32>
    %c7_259 = arith.constant 7 : index
    %c0_260 = arith.constant 0 : index
    %c0_261 = arith.constant 0 : index
    %389 = vector.load %arg3[%c7_259, %c0_260, %c0_261] : memref<8x32x1xf32, #tpu.memory_space<vmem>>, vector<1x32x1xf32>
    %390 = vector.shape_cast %389 : vector<1x32x1xf32> to vector<32x1xf32>
    %391 = vector.extract_strided_slice %390 {offsets = [0, 0], sizes = [8, 1], strides = [1, 1]} : vector<32x1xf32> to vector<8x1xf32>
    %392 = vector.broadcast %391 : vector<8x1xf32> to vector<8x512xf32>
    %393 = arith.addf %388, %392 : vector<8x512xf32>
    %394 = vector.extract_strided_slice %393 {offsets = [0, 0], sizes = [1, 512], strides = [1, 1]} : vector<8x512xf32> to vector<1x512xf32>
    %395 = vector.shape_cast %394 : vector<1x512xf32> to vector<4x128xf32>
    %cst_262 = arith.constant dense<0.000000e+00> : vector<4xf32>
    %396 = vector.multi_reduction <add>, %395, %cst_262 [1] : vector<4x128xf32> to vector<4xf32>
    %397 = vector.shape_cast %396 : vector<4xf32> to vector<4x1xf32>
    %cst_263 = arith.constant 7.812500e-03 : f32
    %398 = vector.broadcast %cst_263 : f32 to vector<4x1xf32>
    %399 = arith.mulf %397, %398 : vector<4x1xf32>
    %400 = arith.negf %399 : vector<4x1xf32>
    %401 = math.exp %400 : vector<4x1xf32>
    %cst_264 = arith.constant 1.000000e+00 : f32
    %402 = vector.broadcast %cst_264 : f32 to vector<4x1xf32>
    %403 = arith.addf %402, %401 : vector<4x1xf32>
    %404 = arith.divf %402, %403 : vector<4x1xf32>
    %c0_265 = arith.constant 0 : index
    %c0_266 = arith.constant 0 : index
    %405 = vector.load %arg4[%c0_265, %c0_266] : memref<4x1xf32, #tpu.memory_space<vmem>>, vector<4x1xf32>
    tpu.vector_store %arg4[%c0_265, %c0_266], %404 {strides = array<i32>} : memref<4x1xf32, #tpu.memory_space<vmem>>, vector<4x1xf32>,
    return
  }
  func.func @transform_0(%arg0: i32) -> (i32, i32) {
    %c0_i32 = arith.constant 0 : i32
    %c0_i32_0 = arith.constant 0 : i32
    return %arg0, %c0_i32 : i32, i32
  }
  func.func @transform_1(%arg0: i32) -> (i32, i32, i32, i32) {
    %c0_i32 = arith.constant 0 : i32
    %c0_i32_0 = arith.constant 0 : i32
    %c0_i32_1 = arith.constant 0 : i32
    %c0_i32_2 = arith.constant 0 : i32
    %c0_i32_3 = arith.constant 0 : i32
    return %c0_i32, %c0_i32_0, %c0_i32_1, %c0_i32_2 : i32, i32, i32, i32
  }
  func.func @transform_2(%arg0: i32) -> (i32, i32, i32) {
    %c0_i32 = arith.constant 0 : i32
    %c0_i32_0 = arith.constant 0 : i32
    %c0_i32_1 = arith.constant 0 : i32
    %c0_i32_2 = arith.constant 0 : i32
    return %c0_i32, %c0_i32_0, %c0_i32_1 : i32, i32, i32
  }
  func.func @transform_3(%arg0: i32) -> (i32, i32) {
    %c0_i32 = arith.constant 0 : i32
    %c0_i32_0 = arith.constant 0 : i32
    return %arg0, %c0_i32 : i32, i32
  }
}

</mosaic_0001>

<bundles_post_ra>
// kernel: disc_forward.1
= control target key start
LH: loop header
LB: loop body
LE: loop exit
PB: predicated region body
PF: predicated region fallthrough
CT: control target
= control target key end

     0   :  { %8 = vsyncpa [#allocation3], 0  ;;  %s8714_s12 = smov [#allocation2]   ;;  %s13868_s0 = inlined_call_operand.vmem [shape: f32[1,512], index: 0, kind: input, shape index: {}]   ;;  %s13869_s1 = inlined_call_operand.hbm [shape: bf16[8,5,32,32], index: 1, kind: input, shape index: {}]   ;;  %s13870_s2 = inlined_call_operand.vmem [shape: f32[8,32,1], index: 2, kind: input, shape index: {}]   ;;  %s13871_s3 = inlined_call_operand.vmem [shape: f32[4,1], index: 3, kind: output, shape index: {}]  }
   0x1   :  { %s16_s13 = sshll.u32 %s8714_s12, 4  ;;  %s17_s13 = int_to_ptr.vmem [resolvable:$true] %s16_s13 }
   0x2   :  { %s8700_s14 = scalar_lea.vmem %s17_s13, 10240  ;;  %p8705_p1 = scmp.lt.s32.totalorder %s17_s13, %s17_s13 }
   0x3   :  { %p8701_p0 = scmp.ne.s32.totalorder %s17_s13, %s8700_s14  ;;  %p8706_p2 = scmp.lt.s32.totalorder %s8700_s14, %s8700_s14 }
   0x5   :  { %p8707_p3 = por %p8706_p2, %p8705_p1 }
   0x7   :  { %p8708_p4 = pnand %p8707_p3, %p8701_p0 }
   0x9   :  { %8711 = shalt.err (!%p8708_p4)
}
   0xa   :  { %s8715_s15 = smov 64   ;;  %s8716_s16 = smov 4  }
   0xb   :  { %22 = dma.hbm_to_vmem [thread:$0]  %s13869_s1, 10240, %s17_s13, [#allocation3], %s8715_s15, %s8715_s15, %s8716_s16  }
   0xc   :  { %8712 = dma.done.wait [#allocation3], 10240  }
   0xd   :  { %8713 = vsyncadd [#allocation3], 4294957056  ;;  %v29_v0 = vlaneseq  ;;  %v8717_v1 = vmov 0.0   ;;  %s8718_s19 = smov 1   ;;  %v8719_v2 = vmov 1935823168  }
   0xe   :  { %159 = vrot.lane.b32.xlu0 %v8717_v1, %s8718_s19  ;;  %v32_v3 = vunpack.c.l.s4 %v8719_v2  ;;  %vm80_vm0 = vcmask 1040384   ;;  %v58_v15 = vld [vmem:[%s13868_s0] sm:$0xf]  ;;  %s8720_s0 = smov 2   ;;  %v13872_v62 = vmov 0   ;;  %s8722_s21 = smov 127  }
   0xf   :  { %v8751_v4 = vshrl.u32 %v29_v0, 7  ;;  %v8753_v5 = vand.u32 127, %v29_v0  ;;  %279 = vmatprep.mubr.bf16.mxu0 %v13872_v62  ;;  %332 = vmatprep.mubr.bf16.mxu1 %v13872_v62  ;;  %s8723_s22 = smov 126   ;;  %v1048_v2 = vld [vmem:[%s13870_s2 + $0x18] sm:$0xff]  ;;  %vm240_vm15 = vcmask 261120  }
  0x10   :  { %v33_v6 = vunpack.c.0.s8 %v32_v3  ;;  %8616 = vset.pattern.permute.xlu0 %v13872_v62  ;;  %8617 = vset.pattern.permute.xlu1 %v13872_v62  ;;  %v1045_v3 = vld [vmem:[%s13870_s2] sm:$0xff] }
  0x11   :  { %14038 = vst [vmem:[#allocation5_spill] sm:$0xff] %v8751_v4  ;;  %14039 = vst [vmem:[#allocation6_spill] sm:$0xff] %v8753_v5  ;;  %v8756_v7 = vsub.s32 0, %v8751_v4  ;;  %v66_v8 = vsub.s32 1, %v8751_v4  ;;  %v8761_v10 = vsub.s32 2, %v8751_v4  ;;  %v8764_v11 = vsub.s32 4, %v8751_v4 }
  0x12   :  { %v36_v9 = vsub.s32 %v33_v6, %v8751_v4  ;;  %v8767_v12 = vsub.s32 6, %v8751_v4  ;;  %v74_v13 = vsub.s32 3, %v8751_v4  ;;  %v1046_v6 = vld [vmem:[%s13870_s2 + $0x8] sm:$0xff]  ;;  %vm167_vm13 = vcmp.lt.s32.totalorder %v8753_v5, 1 }
  0x13   :  { %v8774_v16 = vrot.slane %v58_v15, %v66_v8  ;;  %v63_v17 = vrot.slane %v58_v15, %v8756_v7  ;;  %v71_v18 = vrot.slane %v58_v15, %v8761_v10  ;;  %vm95_vm14 = vcmp.lt.s32.totalorder %v8753_v5, 2 }
  0x14   :  { %v37_v14 = vrot.slane %v8753_v5, %v36_v9  ;;  %v8778_v19 = vrot.slane %v58_v15, %v74_v13 }
  0x15   :  { %v8782_v20 = vsel %vm80_vm0, %v8774_v16, 0.0  ;;  %v8785_v21 = vsel %vm80_vm0, %v63_v17, 0.0  ;;  %v8788_v22 = vpack.c.bf16 %v8717_v1, %v63_v17  ;;  %v8797_v25 = vsel %vm80_vm0, %v71_v18, 0.0 }
  0x16   :  { %vm38_vm1 = vcmp.ge.s32.totalorder %v37_v14, 2  ;;  %vm39_vm2 = vcmp.lt.s32.totalorder %v37_v14, 130  ;;  %vm43_vm3 = vcmp.ge.s32.totalorder %v37_v14, 1  ;;  %vm44_vm4 = vcmp.lt.s32.totalorder %v37_v14, 129  ;;  %161 = vrot.lane.b32.xlu1 %v8782_v20, %s8718_s19  ;;  %157 = vrot.lane.b32.xlu0 %v8785_v21, %s8718_s19 }
  0x17   :  { %vm40_vm5 = vmand %vm38_vm1, %vm39_vm2  ;;  %vm48_vm6 = vcmp.ge.s32.totalorder %v37_v14, 4294967295  ;;  %vm49_vm8 = vcmp.lt.s32.totalorder %v37_v14, 127  ;;  %vm53_vm9 = vcmp.ge.s32.totalorder %v37_v14, 4294967294  ;;  %vm54_vm10 = vcmp.lt.s32.totalorder %v37_v14, 126 }
  0x18   :  { %v8342_v23 = vsel %vm40_vm5, 1.0, %v8717_v1  ;;  %vm45_vm7 = vmand %vm43_vm3, %vm44_vm4  ;;  %v8830_v42 = vpack.c.bf16 %v8717_v1, %v71_v18  ;;  %v84_v59 = vsel %vm80_vm0, %v8778_v19, 0.0  ;;  %v8898_v63 = vpack.c.bf16 %v8717_v1, %v8774_v16 }
  0x19   :  { %v8343_v24 = vsel %vm45_vm7, 1.0, %v8717_v1  ;;  %vm50_vm11 = vmand %vm48_vm6, %vm49_vm8  ;;  %v104_v26 = vrot.slane %v8342_v23, %v8756_v7  ;;  %v108_v27 = vrot.slane %v8342_v23, %v8761_v10  ;;  %v112_v29 = vrot.slane %v8342_v23, %v8764_v11 }
  0x1a   :  { %v8344_v28 = vsel %vm50_vm11, 1.0, %v8717_v1  ;;  %vm55_vm12 = vmand %vm53_vm9, %vm54_vm10  ;;  %v116_v30 = vrot.slane %v8342_v23, %v8767_v12  ;;  %v176_v31 = vrot.slane %v8343_v24, %v8756_v7  ;;  %v180_v35 = vrot.slane %v8343_v24, %v8761_v10  ;;  %163 = vrot.lane.b32.xlu1 %v8797_v25, %s8718_s19  ;;  %165 = vrot.lane.b32.xlu0 %v84_v59, %s8718_s19 }
  0x1b   :  { %v8345_v32 = vsel %vm55_vm12, 1.0, %v8717_v1  ;;  %v8807_v33 = vrot.slane %v104_v26, %v8756_v7  ;;  %v8810_v34 = vrot.slane %v108_v27, %v8756_v7  ;;  %v8814_v36 = vrot.slane %v112_v29, %v8756_v7 }
  0x1c   :  { %v8817_v37 = vrot.slane %v116_v30, %v8756_v7  ;;  %v184_v38 = vrot.slane %v8343_v24, %v8764_v11  ;;  %v188_v39 = vrot.slane %v8343_v24, %v8767_v12  ;;  %v8824_v40 = vrot.slane %v176_v31, %v8756_v7 }
  0x1d   :  { %14040 = vst [vmem:[#allocation7_spill] sm:$0xff] %v8807_v33  ;;  %14041 = vst [vmem:[#allocation8_spill] sm:$0xff] %v8810_v34  ;;  %v8827_v41 = vrot.slane %v180_v35, %v8756_v7  ;;  %v642_v43 = vrot.slane %v8344_v28, %v8756_v7  ;;  %v646_v46 = vrot.slane %v8344_v28, %v8761_v10  ;;  %vm8724_vm1 = vmmov 1  }
  0x1e   :  { %14042 = vst [vmem:[#allocation9_spill] sm:$0xff] %v8814_v36  ;;  %14043 = vst [vmem:[#allocation10_spill] sm:$0xff] %v8817_v37  ;;  %v8834_v44 = vrot.slane %v184_v38, %v8756_v7  ;;  %v8837_v45 = vrot.slane %v188_v39, %v8756_v7  ;;  %v650_v47 = vrot.slane %v8344_v28, %v8764_v11  ;;  %87 = vrot.lane.b32.xlu1 %v8717_v1, %s8720_s0 }
  0x1f   :  { %14044 = vst [vmem:[#allocation11_spill] sm:$0xff] %v8824_v40  ;;  %14045 = vst [vmem:[#allocation12_spill] sm:$0xff] %v8827_v41  ;;  %v654_v48 = vrot.slane %v8344_v28, %v8767_v12  ;;  %v8843_v49 = vrot.slane %v642_v43, %v8756_v7  ;;  %v853_v50 = vrot.slane %v8345_v32, %v8756_v7  ;;  %85 = vrot.lane.b32.xlu0 %v8785_v21, %s8720_s0 }
  0x20   :  { %14046 = vst [vmem:[#allocation13_spill] sm:$0xff] %v8834_v44  ;;  %14047 = vst [vmem:[#allocation14_spill] sm:$0xff] %v8837_v45  ;;  %v857_v51 = vrot.slane %v8345_v32, %v8761_v10  ;;  %v8848_v52 = vrot.slane %v646_v46, %v8756_v7  ;;  %v8851_v53 = vrot.slane %v650_v47, %v8756_v7  ;;  %vm844_vm3 = vcmp.lt.s32.totalorder %v8753_v5, 126 }
  0x21   :  { %14048 = vst [vmem:[#allocation15_spill] sm:$0xff] %v8843_v49  ;;  %v861_v54 = vrot.slane %v8345_v32, %v8764_v11  ;;  %v865_v55 = vrot.slane %v8345_v32, %v8767_v12  ;;  %v8858_v56 = vrot.slane %v654_v48, %v8756_v7  ;;  %v8861_v57 = vrot.slane %v853_v50, %v8756_v7  ;;  %vm8963_vm2 = vmpackc.low %vm8724_vm1, %vm80_vm0 }
  0x22   :  { %14049 = vst [vmem:[#allocation16_spill] sm:$0xff] %v8848_v52  ;;  %14050 = vst [vmem:[#allocation17_spill] sm:$0xff] %v8851_v53  ;;  %v8864_v58 = vrot.slane %v857_v51, %v8756_v7  ;;  %89 = vrot.lane.b32.xlu1 %v8782_v20, %s8720_s0  ;;  %v8903_v0 = vpack.c.bf16 %v8717_v1, %v8778_v19  ;;  %vm633_vm0 = vcmp.lt.s32.totalorder %v8753_v5, 127 }
  0x23   :  { %14051 = vst [vmem:[#allocation18_spill] sm:$0xff] %v8858_v56  ;;  %14052 = vst [vmem:[#allocation19_spill] sm:$0xff] %v8861_v57  ;;  %v8869_v60 = vrot.slane %v861_v54, %v8756_v7  ;;  %v8872_v61 = vrot.slane %v865_v55, %v8756_v7  ;;  %91 = vrot.lane.b32.xlu0 %v8797_v25, %s8720_s0  ;;  %v8618_v55 = vld [vmem:[#allocation2 + $0x10] sm:$0xff]  }
  0x24   :  { %14053 = vst [vmem:[#allocation20_spill] sm:$0xff] %v8864_v58 }
  0x25   :  { %14054 = vst [vmem:[#allocation21_spill] sm:$0xff] %v8869_v60  ;;  %14055 = vst [vmem:[#allocation22_spill] sm:$0xff] %v8872_v61 }
  0x26   :  { %93 = vrot.lane.b32.xlu1 %v84_v59, %s8720_s0 }
  0x27   :  { %625 = vrot.lane.b32.xlu0 %v8717_v1, %s8722_s21 }
  0x2a   :  { %623 = vrot.lane.b32.xlu1 %v8785_v21, %s8722_s21 }
  0x2b   :  { %627 = vrot.lane.b32.xlu0 %v8782_v20, %s8722_s21 }
  0x2e   :  { %629 = vrot.lane.b32.xlu1 %v8797_v25, %s8722_s21 }
  0x2f   :  { %631 = vrot.lane.b32.xlu0 %v84_v59, %s8722_s21 }
  0x32   :  { %836 = vrot.lane.b32.xlu1 %v8717_v1, %s8723_s22  ;;  %v1047_v1 = vld [vmem:[%s13870_s2 + $0x10] sm:$0xff] }
  0x33   :  { %834 = vrot.lane.b32.xlu0 %v8785_v21, %s8723_s22 }
  0x36   :  { %838 = vrot.lane.b32.xlu1 %v8782_v20, %s8723_s22 }
  0x37   :  { %840 = vrot.lane.b32.xlu0 %v8797_v25, %s8723_s22 }
  0x3a   :  { %842 = vrot.lane.b32.xlu1 %v84_v59, %s8723_s22 }
  0x3b   :  { %1061 = vperm.xlu0 %8616, %v1047_v1  }
  0x3e   :  { %1066 = vperm.xlu1 %8617, %v1048_v2  }
  0x3f   :  { %1056 = vperm.xlu0 %8616, %v1046_v6  }
  0x42   :  { %1051 = vperm.xlu1 %8617, %v1045_v3  }
  0x80   :  { %v160_v7 = vpop.permute.xlu0 %159 }
  0x81   :  { %v214_v8 = vmul.f32 %v8827_v41, %v160_v7  ;;  %v216_v9 = vmul.f32 %v8837_v45, %v160_v7  ;;  %v213_v10 = vmul.f32 %v8824_v40, %v160_v7  ;;  %v215_v11 = vmul.f32 %v8834_v44, %v160_v7 }
  0x83   :  { %v222_v12 = vpack.c.bf16 %v214_v8, %v214_v8  ;;  %v224_v13 = vpack.c.bf16 %v216_v9, %v216_v9  ;;  %v221_v14 = vpack.c.bf16 %v213_v10, %v213_v10  ;;  %v223_v15 = vpack.c.bf16 %v215_v11, %v215_v11 }
  0x85   :  { %259 = vmatprep.subr.bf16.mxu0 %v222_v12  ;;  %312 = vmatprep.subr.bf16.mxu1 %v224_v13 }
  0x86   :  { %260 = vmatpush1.bf16.msra.mxu0 %v221_v14  ;;  %313 = vmatpush1.bf16.msra.mxu1 %v223_v15 }
  0x88   :  { %v162_v16 = vpop.permute.xlu1 %161  ;;  %v158_v17 = vpop.permute.xlu0 %157 }
  0x89   :  { %v170_v18 = vsel %vm167_vm13, %v158_v17, %v162_v16 }
  0x8a   :  { %v210_v19 = vmul.f32 %v8827_v41, %v170_v18  ;;  %v8619_v18 = vld [vmem:[#allocation2 + $0x18] sm:$0xff]  }
  0x8c   :  { %v164_v20 = vpop.permute.xlu1 %163  ;;  %v218_v21 = vpack.c.bf16 %v214_v8, %v210_v19  ;;  %v166_v27 = vpop.permute.xlu0 %165 }
  0x8d   :  { %v169_v23 = vsel %vm167_vm13, %v162_v16, %v164_v20  ;;  %v168_v29 = vsel %vm167_vm13, %v164_v20, %v166_v27  ;;  %v171_v30 = vsel %vm167_vm13, %v166_v27, %v158_v17 }
  0x8e   :  { %261 = vmatprep.subr.bf16.mxu0 %v218_v21  ;;  %v211_v25 = vmul.f32 %v8834_v44, %v169_v23  ;;  %v209_v31 = vmul.f32 %v8824_v40, %v171_v30  ;;  %v212_v32 = vmul.f32 %v8837_v45, %v168_v29  ;;  %v8620_v21 = vld [vmem:[#allocation2] sm:$0xff]  }
  0x90   :  { %v88_v24 = vpop.permute.xlu1 %87  ;;  %v219_v39 = vpack.c.bf16 %v215_v11, %v211_v25  ;;  %v217_v48 = vpack.c.bf16 %v213_v10, %v209_v31  ;;  %v220_v50 = vpack.c.bf16 %v216_v9, %v212_v32 }
  0x91   :  { %v142_v26 = vmul.f32 %v8810_v34, %v88_v24  ;;  %v144_v28 = vmul.f32 %v8817_v37, %v88_v24  ;;  %v141_v38 = vmul.f32 %v8807_v33, %v88_v24  ;;  %v143_v43 = vmul.f32 %v8814_v36, %v88_v24  ;;  %v86_v47 = vpop.permute.xlu0 %85 }
  0x92   :  { %262 = vmatpush1.bf16.msra.mxu0 %v217_v48  ;;  %314 = vmatprep.subr.bf16.mxu1 %v220_v50 }
  0x93   :  { %v150_v46 = vpack.c.bf16 %v142_v26, %v142_v26  ;;  %v152_v51 = vpack.c.bf16 %v144_v28, %v144_v28  ;;  %v149_v1 = vpack.c.bf16 %v141_v38, %v141_v38  ;;  %315 = vmatpush1.bf16.msra.mxu1 %v219_v39  ;;  %v151_v6 = vpack.c.bf16 %v143_v43, %v143_v43 }
  0x94   :  { %v90_v35 = vpop.permute.xlu1 %89 }
  0x95   :  { %v98_v54 = vsel %vm95_vm14, %v86_v47, %v90_v35  ;;  %381 = vmatprep.subr.bf16.mxu0 %v150_v46  ;;  %v92_v7 = vpop.permute.xlu0 %91  ;;  %434 = vmatprep.subr.bf16.mxu1 %v152_v51 }
  0x96   :  { %v138_v59 = vmul.f32 %v8810_v34, %v98_v54  ;;  %v97_v10 = vsel %vm95_vm14, %v90_v35, %v92_v7  ;;  %8348 = vmatmul.mubr.msk.bf16.vlgmr.msra.gmra.mxu0 %vm240_vm15, %v8618_v55  ;;  %8350 = vmatmul.mubr.msk.bf16.vlgmr.msra.gmra.mxu1 %vm240_vm15, %v8618_v55 }
  0x97   :  { %v139_v12 = vmul.f32 %v8814_v36, %v97_v10  ;;  %382 = vmatpush1.bf16.msra.mxu0 %v149_v1  ;;  %435 = vmatpush1.bf16.msra.mxu1 %v151_v6 }
  0x98   :  { %v94_v2 = vpop.permute.xlu1 %93  ;;  %v146_v9 = vpack.c.bf16 %v142_v26, %v138_v59  ;;  %289 = vmatprep.mubr.bf16.mxu0 %v13872_v62  ;;  %342 = vmatprep.mubr.bf16.mxu1 %v13872_v62  ;;  %v8621_v26 = vld [vmem:[#allocation2 + $0x8] sm:$0xff]  }
  0x99   :  { %v99_v3 = vsel %vm95_vm14, %v94_v2, %v86_v47  ;;  %v96_v11 = vsel %vm95_vm14, %v92_v7, %v94_v2  ;;  %v147_v17 = vpack.c.bf16 %v143_v43, %v139_v12  ;;  %v626_v19 = vpop.permute.xlu0 %625  ;;  %v8622_v43 = vld [vmem:[#allocation2 + $0x20] sm:$0xff]  }
  0x9a   :  { %v137_v8 = vmul.f32 %v8807_v33, %v99_v3  ;;  %v140_v13 = vmul.f32 %v8817_v37, %v96_v11  ;;  %383 = vmatprep.subr.bf16.mxu0 %v146_v9  ;;  %v680_v20 = vmul.f32 %v8848_v52, %v626_v19  ;;  %v682_v23 = vmul.f32 %v8858_v56, %v626_v19  ;;  %v8623_v9 = vld [vmem:[#allocation2 + $0x28] sm:$0xff]  }
  0x9b   :  { %v681_v35 = vmul.f32 %v8851_v53, %v626_v19 }
  0x9c   :  { %v145_v14 = vpack.c.bf16 %v141_v38, %v137_v8  ;;  %v148_v15 = vpack.c.bf16 %v144_v28, %v140_v13  ;;  %v624_v24 = vpop.permute.xlu1 %623  ;;  %v688_v25 = vpack.c.bf16 %v680_v20, %v680_v20 }
  0x9d   :  { %v689_v50 = vpack.c.bf16 %v681_v35, %v681_v35 }
  0x9e   :  { %384 = vmatpush1.bf16.msra.mxu0 %v145_v14  ;;  %436 = vmatprep.subr.bf16.mxu1 %v148_v15 }
  0x9f   :  { %437 = vmatpush1.bf16.msra.mxu1 %v147_v17  ;;  %8362 = vmatprep.subr.msk.bf16.mxu0 %vm8963_vm2, %v8898_v63  ;;  %v628_v63 = vpop.permute.xlu0 %627 }
  0xa0   :  { %8370 = vmatprep.subr.msk.bf16.mxu1 %vm8963_vm2, %v8903_v0  ;;  %8349 = vmatmul.mubr.msk.bf16.gmra.mxu0 %vm240_vm15, %v8619_v18  ;;  %v690_v0 = vpack.c.bf16 %v682_v23, %v682_v23  ;;  %v630_v27 = vpop.permute.xlu1 %629  ;;  %v636_v31 = vsel %vm633_vm0, %v624_v24, %v628_v63 }
  0xa1   :  { %8351 = vmatmul.mubr.msk.bf16.gmra.mxu1 %vm240_vm15, %v8619_v18  ;;  %401 = vmatprep.mubr.bf16.mxu0 %v13872_v62  ;;  %v635_v29 = vsel %vm633_vm0, %v628_v63, %v630_v27  ;;  %v675_v46 = vmul.f32 %v8843_v49, %v636_v31 }
  0xa2   :  { %454 = vmatprep.mubr.bf16.mxu1 %v13872_v62  ;;  %v676_v32 = vmul.f32 %v8848_v52, %v635_v29  ;;  %v8626_v29 = vld [vmem:[#allocation2 + $0x40] sm:$0xff]  }
  0xa3   :  { %v632_v28 = vpop.permute.xlu0 %631 }
  0xa4   :  { %v637_v30 = vsel %vm633_vm0, %v632_v28, %v624_v24  ;;  %v634_v38 = vsel %vm633_vm0, %v630_v27, %v632_v28  ;;  %v684_v51 = vpack.c.bf16 %v680_v20, %v676_v32  ;;  %v8624_v20 = vld [vmem:[#allocation2 + $0x30] sm:$0xff]   ;;  %v8625_v28 = vld [vmem:[#allocation2 + $0x38] sm:$0xff]  }
  0xa5   :  { %v678_v39 = vmul.f32 %v8858_v56, %v637_v30  ;;  %v677_v48 = vmul.f32 %v8851_v53, %v634_v38  ;;  %v8627_v30 = vld [vmem:[#allocation2 + $0x48] sm:$0xff]  }
  0xa7   :  { %v835_v54 = vpop.permute.xlu0 %834  ;;  %v686_v59 = vpack.c.bf16 %v682_v23, %v678_v39  ;;  %v685_v6 = vpack.c.bf16 %v681_v35, %v677_v48 }
  0xa8   :  { %8354 = vmatmul.mubr.msk.bf16.vlgmr.msra.gmra.mxu0 %vm240_vm15, %v8620_v21 }
  0xa9   :  { %8356 = vmatmul.mubr.msk.bf16.vlgmr.msra.gmra.mxu1 %vm240_vm15, %v8620_v21  ;;  %411 = vmatprep.mubr.bf16.mxu0 %v13872_v62 }
  0xaa   :  { %464 = vmatprep.mubr.bf16.mxu1 %v13872_v62  ;;  %8365 = vmatpush1.bf16.msk.msra.mxu0 %vm8963_vm2, %v8788_v22  ;;  %v679_v22 = vmul.f32 %v8843_v49, %v626_v19 }
  0xab   :  { %8373 = vmatpush1.bf16.msk.msra.mxu1 %vm8963_vm2, %v8830_v42  ;;  %724 = vmatprep.subr.bf16.mxu0 %v688_v25  ;;  %v837_v42 = vpop.permute.xlu1 %836  ;;  %v841_v10 = vpop.permute.xlu0 %840 }
  0xac   :  { %777 = vmatprep.subr.bf16.mxu1 %v690_v0  ;;  %v687_v47 = vpack.c.bf16 %v679_v22, %v679_v22  ;;  %v891_v55 = vmul.f32 %v8864_v58, %v837_v42  ;;  %v893_v1 = vmul.f32 %v8872_v61, %v837_v42  ;;  %v683_v3 = vpack.c.bf16 %v679_v22, %v675_v46 }
  0xad   :  { %v890_v14 = vmul.f32 %v8861_v57, %v837_v42  ;;  %v892_v16 = vmul.f32 %v8869_v60, %v837_v42 }
  0xae   :  { %v899_v7 = vpack.c.bf16 %v891_v55, %v891_v55  ;;  %v901_v8 = vpack.c.bf16 %v893_v1, %v893_v1 }
  0xaf   :  { %v839_v2 = vpop.permute.xlu1 %838  ;;  %v898_v23 = vpack.c.bf16 %v890_v14, %v890_v14  ;;  %v900_v63 = vpack.c.bf16 %v892_v16, %v892_v16 }
  0xb0   :  { %8355 = vmatmul.mubr.msk.bf16.gmra.mxu0 %vm240_vm15, %v8621_v26  ;;  %v846_v12 = vsel %vm844_vm3, %v839_v2, %v841_v10  ;;  %v847_v15 = vsel %vm844_vm3, %v835_v54, %v839_v2 }
  0xb1   :  { %8357 = vmatmul.mubr.msk.bf16.gmra.mxu1 %vm240_vm15, %v8621_v26  ;;  %533 = vmatprep.mubr.bf16.mxu0 %v13872_v62  ;;  %v887_v17 = vmul.f32 %v8864_v58, %v846_v12  ;;  %v886_v21 = vmul.f32 %v8861_v57, %v847_v15 }
  0xb2   :  { %586 = vmatprep.mubr.bf16.mxu1 %v13872_v62 }
  0xb3   :  { %v843_v11 = vpop.permute.xlu1 %842  ;;  %v895_v25 = vpack.c.bf16 %v891_v55, %v887_v17  ;;  %v894_v26 = vpack.c.bf16 %v890_v14, %v886_v21 }
  0xb4   :  { %v848_v13 = vsel %vm844_vm3, %v843_v11, %v835_v54  ;;  %v845_v19 = vsel %vm844_vm3, %v841_v10, %v843_v11 }
  0xb5   :  { %v889_v18 = vmul.f32 %v8872_v61, %v848_v13  ;;  %v888_v24 = vmul.f32 %v8869_v60, %v845_v19 }
  0xb6   :  { %v9138_v41 = vpop.permute.xlu0 %1061 }
  0xb7   :  { %v897_v0 = vpack.c.bf16 %v893_v1, %v889_v18  ;;  %v896_v27 = vpack.c.bf16 %v892_v16, %v888_v24 }
  0xb8   :  { %8366 = vmatmul.mubr.msk.bf16.vlgmr.msra.gmra.mxu0 %vm240_vm15, %v8622_v43 }
  0xb9   :  { %8374 = vmatmul.mubr.msk.bf16.vlgmr.msra.gmra.mxu1 %vm240_vm15, %v8622_v43  ;;  %725 = vmatpush1.bf16.msra.mxu0 %v687_v47  ;;  %v9125_v56 = vpop.permute.xlu1 %1066 }
  0xba   :  { %778 = vmatpush1.bf16.msra.mxu1 %v689_v50  ;;  %726 = vmatprep.subr.bf16.mxu0 %v684_v51 }
  0xbb   :  { %779 = vmatprep.subr.bf16.mxu1 %v686_v59  ;;  %543 = vmatprep.mubr.bf16.mxu0 %v13872_v62 }
  0xbc   :  { %596 = vmatprep.mubr.bf16.mxu1 %v13872_v62 }
  0xbd   :  { %727 = vmatpush1.bf16.msra.mxu0 %v683_v3 }
  0xbe   :  { %780 = vmatpush1.bf16.msra.mxu1 %v685_v6  ;;  %935 = vmatprep.subr.bf16.mxu0 %v899_v7 }
  0xbf   :  { %988 = vmatprep.subr.bf16.mxu1 %v901_v8 }
  0xc0   :  { %8367 = vmatmul.mubr.msk.bf16.gmra.mxu0 %vm240_vm15, %v8623_v9 }
  0xc1   :  { %8375 = vmatmul.mubr.msk.bf16.gmra.mxu1 %vm240_vm15, %v8623_v9  ;;  %744 = vmatprep.mubr.bf16.mxu0 %v13872_v62 }
  0xc2   :  { %797 = vmatprep.mubr.bf16.mxu1 %v13872_v62 }
  0xc8   :  { %8378 = vmatmul.mubr.msk.bf16.vlgmr.msra.gmra.mxu0 %vm240_vm15, %v8624_v20 }
  0xc9   :  { %8380 = vmatmul.mubr.msk.bf16.vlgmr.msra.gmra.mxu1 %vm240_vm15, %v8624_v20  ;;  %936 = vmatpush1.bf16.msra.mxu0 %v898_v23 }
  0xca   :  { %989 = vmatpush1.bf16.msra.mxu1 %v900_v63  ;;  %937 = vmatprep.subr.bf16.mxu0 %v895_v25 }
  0xcb   :  { %990 = vmatprep.subr.bf16.mxu1 %v897_v0  ;;  %754 = vmatprep.mubr.bf16.mxu0 %v13872_v62 }
  0xcc   :  { %807 = vmatprep.mubr.bf16.mxu1 %v13872_v62 }
  0xcd   :  { %938 = vmatpush1.bf16.msra.mxu0 %v894_v26 }
  0xce   :  { %991 = vmatpush1.bf16.msra.mxu1 %v896_v27 }
  0xd0   :  { %8379 = vmatmul.mubr.msk.bf16.gmra.mxu0 %vm240_vm15, %v8625_v28 }
  0xd1   :  { %8381 = vmatmul.mubr.msk.bf16.gmra.mxu1 %vm240_vm15, %v8625_v28  ;;  %955 = vmatprep.mubr.bf16.mxu0 %v13872_v62 }
  0xd2   :  { %1008 = vmatprep.mubr.bf16.mxu1 %v13872_v62 }
  0xd8   :  { %8384 = vmatmul.mubr.msk.bf16.vlgmr.msra.gmra.mxu0 %vm240_vm15, %v8626_v29 }
  0xd9   :  { %8386 = vmatmul.mubr.msk.bf16.vlgmr.msra.gmra.mxu1 %vm240_vm15, %v8626_v29  ;;  %965 = vmatprep.mubr.bf16.mxu0 %v13872_v62 }
  0xda   :  { %1018 = vmatprep.mubr.bf16.mxu1 %v13872_v62 }
  0xe0   :  { %8385 = vmatmul.mubr.msk.bf16.gmra.mxu0 %vm240_vm15, %v8627_v30 }
  0xe1   :  { %8387 = vmatmul.mubr.msk.bf16.gmra.mxu1 %vm240_vm15, %v8627_v30  ;;  %1335 = vmatprep.mubr.bf16.mxu0 %v13872_v62 }
  0xe2   :  { %1388 = vmatprep.mubr.bf16.mxu1 %v13872_v62 }
 0x156   :  { %v9049_v22 = vpop.f32.mrf.mxu0  ;;  %v9051_v42 = vpop.f32.mrf.mxu1 }
 0x158   :  { %v9053_v31 = vpop.f32.mrf.mxu0  ;;  %v9055_v32 = vpop.f32.mrf.mxu1 }
 0x15a   :  { %v9057_v35 = vpop.f32.mrf.mxu0  ;;  %v9059_v38 = vpop.f32.mrf.mxu1 }
 0x15c   :  { %v9061_v39 = vpop.f32.mrf.mxu0  ;;  %v9063_v43 = vpop.f32.mrf.mxu1 }
 0x160   :  { %v291_v46 = vpop.f32.mrf.mxu0 }
 0x161   :  { %v344_v47 = vpop.f32.mrf.mxu1 }
 0x162   :  { %v293_v48 = vpop.f32.mrf.mxu0 }
 0x163   :  { %v346_v50 = vpop.f32.mrf.mxu1 }
 0x164   :  { %v295_v51 = vpop.f32.mrf.mxu0 }
 0x165   :  { %v348_v54 = vpop.f32.mrf.mxu1 }
 0x166   :  { %v9065_v55 = vpop.f32.mrf.mxu0 }
 0x167   :  { %v9067_v59 = vpop.f32.mrf.mxu1 }
 0x168   :  { %14058 = vst [vmem:[#allocation23_spill] sm:$0xff] %v9067_v59  ;;  %v403_v2 = vpop.f32.mrf.mxu0 }
 0x169   :  { %v456_v1 = vpop.f32.mrf.mxu1  ;;  %v404_v53 = vadd.f32 %v403_v2, %v9049_v22 }
 0x16a   :  { %v9069_v3 = vpop.f32.mrf.mxu0  ;;  %v457_v49 = vadd.f32 %v456_v1, %v9051_v42  ;;  %v1052_v42 = vpop.permute.xlu1 %1051 }
 0x16b   :  { %v9071_v6 = vpop.f32.mrf.mxu1 }
 0x16c   :  { %v407_v7 = vpop.f32.mrf.mxu0 }
 0x16d   :  { %v460_v8 = vpop.f32.mrf.mxu1  ;;  %v408_v44 = vadd.f32 %v407_v7, %v9057_v35 }
 0x16e   :  { %v9073_v9 = vpop.f32.mrf.mxu0  ;;  %v461_v22 = vadd.f32 %v460_v8, %v9059_v38 }
 0x16f   :  { %v9075_v10 = vpop.f32.mrf.mxu1 }
 0x170   :  { %v413_v11 = vpop.f32.mrf.mxu0 }
 0x171   :  { %v9077_v12 = vadd.f32 %v413_v11, %v291_v46  ;;  %v466_v13 = vpop.f32.mrf.mxu1 }
 0x172   :  { %v9079_v14 = vadd.f32 %v466_v13, %v344_v47  ;;  %v415_v15 = vpop.f32.mrf.mxu0 }
 0x173   :  { %v416_v16 = vadd.f32 %v415_v15, %v293_v48  ;;  %v468_v17 = vpop.f32.mrf.mxu1 }
 0x174   :  { %v469_v18 = vadd.f32 %v468_v17, %v346_v50  ;;  %v417_v19 = vpop.f32.mrf.mxu0 }
 0x175   :  { %v9081_v20 = vadd.f32 %v417_v19, %v295_v51  ;;  %v470_v21 = vpop.f32.mrf.mxu1 }
 0x176   :  { %v9083_v23 = vadd.f32 %v470_v21, %v348_v54  ;;  %v9085_v24 = vpop.f32.mrf.mxu0 }
 0x177   :  { %v9087_v63 = vpop.f32.mrf.mxu1 }
 0x178   :  { %14059 = vst [vmem:[#allocation24_spill] sm:$0xff] %v9087_v63  ;;  %v535_v25 = vpop.f32.mrf.mxu0 }
 0x179   :  { %v588_v0 = vpop.f32.mrf.mxu1  ;;  %v607_v37 = vadd.f32 %v535_v25, %v404_v53 }
 0x17a   :  { %v9089_v26 = vpop.f32.mrf.mxu0  ;;  %v609_v34 = vadd.f32 %v588_v0, %v457_v49 }
 0x17b   :  { %v9091_v27 = vpop.f32.mrf.mxu1 }
 0x17c   :  { %v539_v28 = vpop.f32.mrf.mxu0 }
 0x17d   :  { %v592_v29 = vpop.f32.mrf.mxu1  ;;  %v611_v1 = vadd.f32 %v539_v28, %v408_v44  ;;  %v410_v28 = vadd.f32 %v9073_v9, %v9061_v39  ;;  %v463_v39 = vadd.f32 %v9075_v10, %v9063_v43 }
 0x17e   :  { %v9093_v30 = vpop.f32.mrf.mxu0  ;;  %v613_v25 = vadd.f32 %v592_v29, %v461_v22 }
 0x17f   :  { %v9095_v46 = vpop.f32.mrf.mxu1 }
 0x180   :  { %v9097_v47 = vpop.f32.mrf.mxu0 }
 0x181   :  { %v9099_v48 = vpop.f32.mrf.mxu1 }
 0x182   :  { %v547_v50 = vpop.f32.mrf.mxu0 }
 0x183   :  { %v9101_v51 = vadd.f32 %v547_v50, %v416_v16  ;;  %v600_v54 = vpop.f32.mrf.mxu1 }
 0x184   :  { %v9103_v11 = vadd.f32 %v600_v54, %v469_v18  ;;  %v9105_v13 = vpop.f32.mrf.mxu0 }
 0x185   :  { %v9107_v15 = vpop.f32.mrf.mxu1 }
 0x186   :  { %14060 = vst [vmem:[#allocation25_spill] sm:$0xff] %v9103_v11  ;;  %v9109_v17 = vpop.f32.mrf.mxu0 }
 0x187   :  { %v9111_v19 = vpop.f32.mrf.mxu1 }
 0x188   :  { %14061 = vst [vmem:[#allocation26_spill] sm:$0xff] %v9111_v19  ;;  %v746_v21 = vpop.f32.mrf.mxu0 }
 0x189   :  { %v799_v62 = vpop.f32.mrf.mxu1  ;;  %v818_v45 = vadd.f32 %v746_v21, %v607_v37 }
 0x18a   :  { %v748_v4 = vpop.f32.mrf.mxu0  ;;  %v820_v2 = vadd.f32 %v799_v62, %v609_v34  ;;  %v406_v34 = vadd.f32 %v9069_v3, %v9053_v31  ;;  %v1057_v62 = vpop.permute.xlu0 %1056  ;;  %v459_v31 = vadd.f32 %v9071_v6, %v9055_v32  ;;  %v612_v3 = vadd.f32 %v9093_v30, %v410_v28 }
 0x18b   :  { %v9113_v61 = vpop.f32.mrf.mxu1  ;;  %v614_v6 = vadd.f32 %v9095_v46, %v463_v39 }
 0x18c   :  { %v750_v60 = vpop.f32.mrf.mxu0 }
 0x18d   :  { %v803_v58 = vpop.f32.mrf.mxu1  ;;  %v822_v0 = vadd.f32 %v750_v60, %v611_v1 }
 0x18e   :  { %v9115_v16 = vpop.f32.mrf.mxu0  ;;  %v824_v35 = vadd.f32 %v803_v58, %v613_v25 }
 0x18f   :  { %v9117_v50 = vpop.f32.mrf.mxu1 }
 0x190   :  { %v9119_v18 = vpop.f32.mrf.mxu0  ;;  %v825_v43 = vadd.f32 %v9117_v50, %v614_v6  ;;  %v615_v50 = vadd.f32 %v9097_v47, %v9077_v12  ;;  %v617_v47 = vadd.f32 %v9099_v48, %v9079_v14  ;;  %v14065_v6 = vld [vmem:[#allocation23_spill] sm:$0xff] }
 0x191   :  { %v9121_v54 = vpop.f32.mrf.mxu1 }
 0x192   :  { %v9123_v57 = vpop.f32.mrf.mxu0 }
 0x193   :  { %v9128_v52 = vpop.f32.mrf.mxu1 }
 0x194   :  { %14062 = vst [vmem:[#allocation27_spill] sm:$0xff] %v9128_v52  ;;  %v9131_v36 = vpop.f32.mrf.mxu0 }
 0x195   :  { %v9133_v33 = vpop.f32.mrf.mxu1 }
 0x196   :  { %v9135_v40 = vpop.f32.mrf.mxu0 }
 0x197   :  { %14063 = vst [vmem:[#allocation28_spill] sm:$0xff] %v9135_v40  ;;  %v9140_v5 = vpop.f32.mrf.mxu1 }
 0x198   :  { %14064 = vst [vmem:[#allocation29_spill] sm:$0xff] %v9140_v5  ;;  %v957_v19 = vpop.f32.mrf.mxu0 }
 0x199   :  { %v1029_v52 = vadd.f32 %v957_v19, %v818_v45  ;;  %v1010_v53 = vpop.f32.mrf.mxu1  ;;  %v608_v45 = vadd.f32 %v9089_v26, %v406_v34 }
 0x19a   :  { %v1031_v11 = vadd.f32 %v1010_v53, %v820_v2  ;;  %v959_v49 = vpop.f32.mrf.mxu0 }
 0x19b   :  { %v1069_v40 = vadd.f32 %v1052_v42, %v1029_v52  ;;  %v1012_v63 = vpop.f32.mrf.mxu1 }
 0x19c   :  { %v961_v37 = vpop.f32.mrf.mxu0  ;;  %v1071_v7 = vadd.f32 %v1052_v42, %v1031_v11 }
 0x19d   :  { %v1033_v21 = vadd.f32 %v961_v37, %v822_v0  ;;  %v1014_v59 = vpop.f32.mrf.mxu1  ;;  %v1101_v5 = vmul.f32 0.01, %v1069_v40  ;;  %vm1085_vm4 = vcmp.ge.f32.partialorder %v1069_v40, 0.0  ;;  %v619_v37 = vadd.f32 %v9105_v13, %v9081_v20 }
 0x19e   :  { %v1035_v38 = vadd.f32 %v1014_v59, %v824_v35  ;;  %v1103_v58 = vmul.f32 0.01, %v1071_v7  ;;  %vm1087_vm6 = vcmp.ge.f32.partialorder %v1071_v7, 0.0  ;;  %v819_v59 = vadd.f32 %v748_v4, %v608_v45  ;;  %v963_v11 = vpop.f32.mrf.mxu0 }
 0x19f   :  { %v1073_v44 = vadd.f32 %v1057_v62, %v1033_v21  ;;  %v9146_v52 = vsel %vm1085_vm4, %v1069_v40, %v1101_v5  ;;  %v610_v5 = vadd.f32 %v9091_v27, %v459_v31  ;;  %v823_v4 = vadd.f32 %v9115_v16, %v612_v3  ;;  %v1016_v2 = vpop.f32.mrf.mxu1 }
 0x1a0   :  { %v1075_v8 = vadd.f32 %v1057_v62, %v1035_v38  ;;  %1210 = vrot.lane.b32.xlu1 %v9146_v52, %s8718_s19  ;;  %v1030_v40 = vadd.f32 %v959_v49, %v819_v59  ;;  %v9158_v19 = vsel %vm1087_vm6, %v1071_v7, %v1103_v58  ;;  %v1036_v16 = vadd.f32 %v1016_v2, %v825_v43  ;;  %v967_v53 = vpop.f32.mrf.mxu0  ;;  %v14069_v2 = vld [vmem:[#allocation27_spill] sm:$0xff] }
 0x1a1   :  { %vm1089_vm5 = vcmp.ge.f32.partialorder %v1073_v44, 0.0  ;;  %v1105_v60 = vmul.f32 0.01, %v1073_v44  ;;  %v821_v32 = vadd.f32 %v9113_v61, %v610_v5  ;;  %v1034_v9 = vadd.f32 %v963_v11, %v823_v4  ;;  %v1020_v49 = vpop.f32.mrf.mxu1 }
 0x1a2   :  { %v1107_v26 = vmul.f32 0.01, %v1075_v8  ;;  %vm1091_vm7 = vcmp.ge.f32.partialorder %v1075_v8, 0.0  ;;  %v1070_v30 = vadd.f32 %v1052_v42, %v1030_v40  ;;  %v1076_v46 = vadd.f32 %v1057_v62, %v1036_v16  ;;  %v969_v0 = vpop.f32.mrf.mxu0 }
 0x1a3   :  { %v9155_v29 = vsel %vm1089_vm5, %v1073_v44, %v1105_v60  ;;  %v1032_v22 = vadd.f32 %v1012_v63, %v821_v32  ;;  %v1074_v10 = vadd.f32 %v1057_v62, %v1034_v9  ;;  %v1022_v34 = vpop.f32.mrf.mxu1  ;;  %v828_v20 = vadd.f32 %v9121_v54, %v617_v47  ;;  %v14066_v9 = vld [vmem:[#allocation24_spill] sm:$0xff] }
 0x1a4   :  { %1212 = vrot.lane.b32.xlu0 %v9155_v29, %s8718_s19  ;;  %1226 = vrot.lane.b32.xlu1 %v9158_v19, %s8718_s19  ;;  %v9169_v27 = vsel %vm1091_vm7, %v1075_v8, %v1107_v26  ;;  %v1102_v1 = vmul.f32 0.01, %v1070_v30  ;;  %vm1086_vm8 = vcmp.ge.f32.partialorder %v1070_v30, 0.0  ;;  %v1108_v7 = vmul.f32 0.01, %v1076_v46  ;;  %v971_v62 = vpop.f32.mrf.mxu0 }
 0x1a5   :  { %v1072_v61 = vadd.f32 %v1052_v42, %v1032_v22  ;;  %v1106_v63 = vmul.f32 0.01, %v1074_v10  ;;  %vm1090_vm9 = vcmp.ge.f32.partialorder %v1074_v10, 0.0  ;;  %v826_v42 = vadd.f32 %v9119_v18, %v615_v50  ;;  %v1024_v8 = vpop.f32.mrf.mxu1  ;;  %v14067_v22 = vld [vmem:[#allocation28_spill] sm:$0xff] }
 0x1a6   :  { %v9182_v35 = vsel %vm1086_vm8, %v1070_v30, %v1102_v1  ;;  %vm1092_vm11 = vcmp.ge.f32.partialorder %v1076_v46, 0.0  ;;  %v830_v18 = vadd.f32 %v9131_v36, %v619_v37  ;;  %v621_v13 = vadd.f32 %v9107_v15, %v9083_v23  ;;  %v973_v32 = vpop.f32.mrf.mxu0 }
 0x1a7   :  { %v1104_v25 = vmul.f32 0.01, %v1072_v61  ;;  %vm1088_vm10 = vcmp.ge.f32.partialorder %v1072_v61, 0.0  ;;  %v9191_v12 = vsel %vm1090_vm9, %v1074_v10, %v1106_v63  ;;  %v1037_v21 = vadd.f32 %v967_v53, %v826_v42  ;;  %v1026_v1 = vpop.f32.mrf.mxu1 }
 0x1a8   :  { %1228 = vrot.lane.b32.xlu0 %v9169_v27, %s8718_s19  ;;  %1133 = vrot.lane.b32.xlu1 %v9146_v52, %s8720_s0  ;;  %v1041_v14 = vadd.f32 %v971_v62, %v830_v18  ;;  %v9205_v48 = vsel %vm1092_vm11, %v1076_v46, %v1108_v7  ;;  %v1039_v45 = vadd.f32 %v1020_v49, %v828_v20 }
 0x1a9   :  { %v9195_v38 = vsel %vm1088_vm10, %v1072_v61, %v1104_v25  ;;  %v1077_v44 = vadd.f32 %v9138_v41, %v1037_v21  ;;  %v832_v36 = vadd.f32 %v9133_v33, %v621_v13  ;;  %v420_v5 = vadd.f32 %v9085_v24, %v9065_v55  ;;  %v14068_v24 = vld [vmem:[#allocation25_spill] sm:$0xff] }
 0x1aa   :  { %v1081_v54 = vadd.f32 %v9125_v56, %v1041_v14  ;;  %v1079_v23 = vadd.f32 %v9138_v41, %v1039_v45  ;;  %v827_v40 = vadd.f32 %v9123_v57, %v9101_v51  ;;  %v473_v30 = vadd.f32 %v14066_v9, %v14065_v6  ;;  %v14070_v51 = vld [vmem:[#allocation26_spill] sm:$0xff]  ;;  %v14071_v61 = vld [vmem:[#allocation29_spill] sm:$0xff]  ;;  %v8420_v14 = vld [vmem:[%s13870_s2 + $0x30] sm:$0xff] }
 0x1ab   :  { %v1043_v60 = vadd.f32 %v1024_v8, %v832_v36  ;;  %v1109_v58 = vmul.f32 0.01, %v1077_v44  ;;  %vm1093_vm12 = vcmp.ge.f32.partialorder %v1077_v44, 0.0  ;;  %v620_v11 = vadd.f32 %v9109_v17, %v420_v5  ;;  %v8421_v45 = vld [vmem:[%s13870_s2 + $0x38] sm:$0xff]  ;;  %v8418_v36 = vld [vmem:[%s13870_s2 + $0x20] sm:$0xff] }
 0x1ac   :  { %1135 = vrot.lane.b32.xlu0 %v9155_v29, %s8720_s0  ;;  %1149 = vrot.lane.b32.xlu1 %v9158_v19, %s8720_s0  ;;  %v1113_v15 = vmul.f32 0.01, %v1081_v54  ;;  %v1111_v33 = vmul.f32 0.01, %v1079_v23  ;;  %vm1097_vm1 = vcmp.ge.f32.partialorder %v1081_v54, 0.0  ;;  %vm1095_vm2 = vcmp.ge.f32.partialorder %v1079_v23, 0.0 }
 0x1ad   :  { %v1083_v28 = vadd.f32 %v9125_v56, %v1043_v60  ;;  %v9220_v31 = vsel %vm1093_vm12, %v1077_v44, %v1109_v58  ;;  %v1038_v4 = vadd.f32 %v969_v0, %v827_v40  ;;  %v831_v55 = vadd.f32 %v14067_v22, %v620_v11  ;;  %v8419_v60 = vld [vmem:[%s13870_s2 + $0x28] sm:$0xff] }
 0x1ae   :  { %v9226_v3 = vsel %vm1097_vm1, %v1081_v54, %v1113_v15  ;;  %v9228_v26 = vsel %vm1095_vm2, %v1079_v23, %v1111_v33  ;;  %v829_v57 = vadd.f32 %v14069_v2, %v14068_v24  ;;  %v622_v17 = vadd.f32 %v14070_v51, %v473_v30 }
 0x1af   :  { %v1115_v59 = vmul.f32 0.01, %v1083_v28  ;;  %vm1099_vm4 = vcmp.ge.f32.partialorder %v1083_v28, 0.0  ;;  %v1042_v43 = vadd.f32 %v973_v32, %v831_v55  ;;  %v1078_v10 = vadd.f32 %v9138_v41, %v1038_v4 }
 0x1b0   :  { %1151 = vrot.lane.b32.xlu0 %v9169_v27, %s8720_s0  ;;  %1218 = vrot.lane.b32.xlu1 %v9182_v35, %s8718_s19  ;;  %v1040_v16 = vadd.f32 %v1022_v34, %v829_v57  ;;  %v833_v53 = vadd.f32 %v14071_v61, %v622_v17 }
 0x1b1   :  { %v9239_v39 = vsel %vm1099_vm4, %v1083_v28, %v1115_v59  ;;  %v1082_v63 = vadd.f32 %v9125_v56, %v1042_v43  ;;  %v1110_v50 = vmul.f32 0.01, %v1078_v10  ;;  %vm1094_vm5 = vcmp.ge.f32.partialorder %v1078_v10, 0.0 }
 0x1b2   :  { %v1044_v46 = vadd.f32 %v1026_v1, %v833_v53  ;;  %v1080_v25 = vadd.f32 %v9138_v41, %v1040_v16  ;;  %v14074_v53 = vld [vmem:[#allocation12_spill] sm:$0xff] }
 0x1b3   :  { %v1114_v49 = vmul.f32 0.01, %v1082_v63  ;;  %v9264_v37 = vsel %vm1094_vm5, %v1078_v10, %v1110_v50  ;;  %vm1098_vm6 = vcmp.ge.f32.partialorder %v1082_v63, 0.0 }
 0x1b4   :  { %1220 = vrot.lane.b32.xlu0 %v9191_v12, %s8718_s19  ;;  %1234 = vrot.lane.b32.xlu1 %v9195_v38, %s8718_s19  ;;  %v1084_v0 = vadd.f32 %v9125_v56, %v1044_v46  ;;  %v1112_v42 = vmul.f32 0.01, %v1080_v25  ;;  %vm1096_vm7 = vcmp.ge.f32.partialorder %v1080_v25, 0.0 }
 0x1b5   :  { %v9270_v7 = vsel %vm1098_vm6, %v1082_v63, %v1114_v49 }
 0x1b6   :  { %v1116_v41 = vmul.f32 0.01, %v1084_v0  ;;  %v9272_v47 = vsel %vm1096_vm7, %v1080_v25, %v1112_v42  ;;  %vm1100_vm8 = vcmp.ge.f32.partialorder %v1084_v0, 0.0 }
 0x1b8   :  { %1236 = vrot.lane.b32.xlu0 %v9205_v48, %s8718_s19  ;;  %1141 = vrot.lane.b32.xlu1 %v9182_v35, %s8720_s0  ;;  %v9278_v56 = vsel %vm1100_vm8, %v1084_v0, %v1116_v41 }
 0x1bc   :  { %1143 = vrot.lane.b32.xlu0 %v9191_v12, %s8720_s0  ;;  %1157 = vrot.lane.b32.xlu1 %v9195_v38, %s8720_s0 }
 0x1c0   :  { %1159 = vrot.lane.b32.xlu0 %v9205_v48, %s8720_s0  ;;  %1214 = vrot.lane.b32.xlu1 %v9220_v31, %s8718_s19 }
 0x1c4   :  { %1216 = vrot.lane.b32.xlu0 %v9226_v3, %s8718_s19  ;;  %1230 = vrot.lane.b32.xlu1 %v9228_v26, %s8718_s19 }
 0x1c8   :  { %1232 = vrot.lane.b32.xlu0 %v9239_v39, %s8718_s19  ;;  %1137 = vrot.lane.b32.xlu1 %v9220_v31, %s8720_s0 }
 0x1cc   :  { %1139 = vrot.lane.b32.xlu0 %v9226_v3, %s8720_s0  ;;  %1153 = vrot.lane.b32.xlu1 %v9228_v26, %s8720_s0 }
 0x1d0   :  { %1155 = vrot.lane.b32.xlu0 %v9239_v39, %s8720_s0  ;;  %1686 = vrot.lane.b32.xlu1 %v9220_v31, %s8722_s21 }
 0x1d4   :  { %1688 = vrot.lane.b32.xlu0 %v9226_v3, %s8722_s21  ;;  %1222 = vrot.lane.b32.xlu1 %v9264_v37, %s8718_s19 }
 0x1d8   :  { %1224 = vrot.lane.b32.xlu0 %v9270_v7, %s8718_s19  ;;  %1238 = vrot.lane.b32.xlu1 %v9272_v47, %s8718_s19 }
 0x1dc   :  { %1240 = vrot.lane.b32.xlu0 %v9278_v56, %s8718_s19  ;;  %1702 = vrot.lane.b32.xlu1 %v9228_v26, %s8722_s21 }
 0x1e0   :  { %1704 = vrot.lane.b32.xlu0 %v9239_v39, %s8722_s21  ;;  %1145 = vrot.lane.b32.xlu1 %v9264_v37, %s8720_s0 }
 0x1e4   :  { %1684 = vrot.lane.b32.xlu0 %v9155_v29, %s8722_s21  ;;  %1161 = vrot.lane.b32.xlu1 %v9272_v47, %s8720_s0 }
 0x1e8   :  { %1147 = vrot.lane.b32.xlu0 %v9270_v7, %s8720_s0  ;;  %1694 = vrot.lane.b32.xlu1 %v9264_v37, %s8722_s21 }
 0x1ec   :  { %1163 = vrot.lane.b32.xlu0 %v9278_v56, %s8720_s0  ;;  %1710 = vrot.lane.b32.xlu1 %v9272_v47, %s8722_s21 }
 0x1f0   :  { %1692 = vrot.lane.b32.xlu0 %v9191_v12, %s8722_s21  ;;  %1682 = vrot.lane.b32.xlu1 %v9146_v52, %s8722_s21 }
 0x1f4   :  { %1700 = vrot.lane.b32.xlu0 %v9169_v27, %s8722_s21  ;;  %1690 = vrot.lane.b32.xlu1 %v9182_v35, %s8722_s21 }
 0x1f8   :  { %1708 = vrot.lane.b32.xlu0 %v9205_v48, %s8722_s21  ;;  %1698 = vrot.lane.b32.xlu1 %v9158_v19, %s8722_s21 }
 0x1fc   :  { %1903 = vrot.lane.b32.xlu0 %v9226_v3, %s8723_s22  ;;  %1706 = vrot.lane.b32.xlu1 %v9195_v38, %s8722_s21 }
 0x200   :  { %1919 = vrot.lane.b32.xlu0 %v9239_v39, %s8723_s22  ;;  %1901 = vrot.lane.b32.xlu1 %v9220_v31, %s8723_s22 }
 0x204   :  { %1899 = vrot.lane.b32.xlu0 %v9155_v29, %s8723_s22  ;;  %1909 = vrot.lane.b32.xlu1 %v9264_v37, %s8723_s22 }
 0x208   :  { %1696 = vrot.lane.b32.xlu0 %v9270_v7, %s8722_s21  ;;  %1917 = vrot.lane.b32.xlu1 %v9228_v26, %s8723_s22 }
 0x20c   :  { %1712 = vrot.lane.b32.xlu0 %v9278_v56, %s8722_s21  ;;  %1925 = vrot.lane.b32.xlu1 %v9272_v47, %s8723_s22 }
 0x210   :  { %1907 = vrot.lane.b32.xlu0 %v9191_v12, %s8723_s22  ;;  %1897 = vrot.lane.b32.xlu1 %v9146_v52, %s8723_s22 }
 0x212   :  { %v9336_v21 = vpop.permute.xlu1 %1210 }
 0x214   :  { %1915 = vrot.lane.b32.xlu0 %v9169_v27, %s8723_s22  ;;  %1905 = vrot.lane.b32.xlu1 %v9182_v35, %s8723_s22 }
 0x216   :  { %v1213_v34 = vpop.permute.xlu0 %1212  ;;  %v9342_v62 = vpop.permute.xlu1 %1226 }
 0x218   :  { %1911 = vrot.lane.b32.xlu0 %v9270_v7, %s8723_s22  ;;  %1913 = vrot.lane.b32.xlu1 %v9158_v19, %s8723_s22 }
 0x21a   :  { %v1229_v18 = vpop.permute.xlu0 %1228  ;;  %v9348_v20 = vpop.permute.xlu1 %1133 }
 0x21c   :  { %1927 = vrot.lane.b32.xlu0 %v9278_v56, %s8723_s22  ;;  %1921 = vrot.lane.b32.xlu1 %v9195_v38, %s8723_s22 }
 0x21e   :  { %v9354_v13 = vpop.permute.xlu0 %1135  ;;  %v9359_v44 = vpop.permute.xlu1 %1149 }
 0x220   :  { %1923 = vrot.lane.b32.xlu0 %v9205_v48, %s8723_s22  ;;  %2129 = vperm.xlu1 %8617, %v8420_v14  }
 0x222   :  { %v9366_v8 = vpop.permute.xlu0 %1151  ;;  %v1219_v54 = vpop.permute.xlu1 %1218 }
 0x223   :  { %v1250_v43 = vsel %vm167_vm13, %v9336_v21, %v1219_v54 }
 0x224   :  { %2134 = vperm.xlu0 %8616, %v8421_v45   ;;  %2119 = vperm.xlu1 %8617, %v8418_v36  }
 0x226   :  { %v1221_v58 = vpop.permute.xlu0 %1220  ;;  %v1235_v23 = vpop.permute.xlu1 %1234 }
 0x227   :  { %v1251_v10 = vsel %vm167_vm13, %v1213_v34, %v1221_v58  ;;  %v1242_v25 = vsel %vm167_vm13, %v9342_v62, %v1235_v23  ;;  %v1247_v49 = vsel %vm167_vm13, %v1221_v58, %v1229_v18 }
 0x228   :  { %2124 = vperm.xlu0 %8616, %v8419_v60   ;;  %v1263_v41 = vmul.f32 %v1251_v10, %v14074_v53  ;;  %v14077_v10 = vld [vmem:[#allocation11_spill] sm:$0xff] }
 0x22a   :  { %v1237_v15 = vpop.permute.xlu0 %1236  ;;  %v9374_v28 = vpop.permute.xlu1 %1141 }
 0x22b   :  { %v1243_v61 = vsel %vm167_vm13, %v1229_v18, %v1237_v15  ;;  %v1255_v14 = vsel %vm167_vm13, %v1237_v15, %v1213_v34 }
 0x22e   :  { %v9376_v33 = vpop.permute.xlu0 %1143  ;;  %v9378_v59 = vpop.permute.xlu1 %1157 }
 0x232   :  { %v9380_v5 = vpop.permute.xlu0 %1159  ;;  %v1215_v40 = vpop.permute.xlu1 %1214 }
 0x236   :  { %v1217_v11 = vpop.permute.xlu0 %1216  ;;  %v1231_v4 = vpop.permute.xlu1 %1230 }
 0x23a   :  { %v1233_v32 = vpop.permute.xlu0 %1232  ;;  %v9382_v6 = vpop.permute.xlu1 %1137 }
 0x23e   :  { %v9384_v9 = vpop.permute.xlu0 %1139  ;;  %v9386_v30 = vpop.permute.xlu1 %1153 }
 0x242   :  { %v9388_v22 = vpop.permute.xlu0 %1155  ;;  %v9390_v55 = vpop.permute.xlu1 %1686 }
 0x246   :  { %v9392_v24 = vpop.permute.xlu0 %1688  ;;  %v1223_v2 = vpop.permute.xlu1 %1222 }
 0x247   :  { %14072 = vst [vmem:[#allocation23_spill] sm:$0xff] %v9392_v24  ;;  %v1252_v51 = vsel %vm167_vm13, %v1215_v40, %v1223_v2  ;;  %v1248_v45 = vsel %vm167_vm13, %v1223_v2, %v1231_v4  ;;  %v1246_v2 = vsel %vm167_vm13, %v1219_v54, %v9342_v62 }
 0x248   :  { %v1267_v63 = vmul.f32 %v1252_v51, %v14074_v53  ;;  %v14075_v51 = vld [vmem:[#allocation14_spill] sm:$0xff] }
 0x24a   :  { %v1225_v17 = vpop.permute.xlu0 %1224  ;;  %v1239_v16 = vpop.permute.xlu1 %1238 }
 0x24b   :  { %v1253_v1 = vsel %vm167_vm13, %v1217_v11, %v1225_v17  ;;  %v1249_v46 = vsel %vm167_vm13, %v1225_v17, %v1233_v32  ;;  %v1244_v0 = vsel %vm167_vm13, %v1231_v4, %v1239_v16  ;;  %v1256_v42 = vsel %vm167_vm13, %v1239_v16, %v1215_v40 }
 0x24c   :  { %v1271_v50 = vmul.f32 %v1253_v1, %v14074_v53  ;;  %v1265_v17 = vmul.f32 %v1243_v61, %v14075_v51  ;;  %v14076_v1 = vld [vmem:[#allocation13_spill] sm:$0xff]  ;;  %v1266_v16 = vmul.f32 %v1256_v42, %v14077_v10  ;;  %v1269_v34 = vmul.f32 %v1244_v0, %v14075_v51 }
 0x24d   :  { %v1272_v18 = vmul.f32 %v1249_v46, %v14076_v1  ;;  %v1259_v61 = vmul.f32 %v1250_v43, %v14074_v53  ;;  %v1262_v46 = vmul.f32 %v1255_v14, %v14077_v10  ;;  %v1264_v42 = vmul.f32 %v1247_v49, %v14076_v1 }
 0x24e   :  { %v1241_v36 = vpop.permute.xlu0 %1240  ;;  %v1279_v60 = vpack.c.bf16 %v1271_v50, %v1267_v63  ;;  %v9425_v58 = vpop.permute.xlu1 %1702  ;;  %v1261_v63 = vmul.f32 %v1242_v25, %v14075_v51 }
 0x24f   :  { %v1245_v24 = vsel %vm167_vm13, %v1233_v32, %v1241_v36  ;;  %v1257_v40 = vsel %vm167_vm13, %v1241_v36, %v1217_v11  ;;  %v1254_v32 = vsel %vm167_vm13, %v1235_v23, %v9336_v21  ;;  %v1268_v11 = vmul.f32 %v1248_v45, %v14076_v1 }
 0x250   :  { %v1270_v15 = vmul.f32 %v1257_v40, %v14077_v10  ;;  %v1273_v4 = vmul.f32 %v1245_v24, %v14075_v51  ;;  %1315 = vmatprep.subr.bf16.mxu0 %v1279_v60  ;;  %v1275_v54 = vpack.c.bf16 %v1263_v41, %v1259_v61  ;;  %v1258_v43 = vmul.f32 %v1254_v32, %v14077_v10  ;;  %v8628_v40 = vld [vmem:[#allocation2 + $0x60] sm:$0xff]  }
 0x251   :  { %v1280_v36 = vpack.c.bf16 %v1272_v18, %v1268_v11  ;;  %v1277_v21 = vpack.c.bf16 %v1265_v17, %v1261_v63  ;;  %v1260_v23 = vmul.f32 %v1246_v2, %v14076_v1  ;;  %v1174_v17 = vsel %vm95_vm14, %v9354_v13, %v9376_v33 }
 0x252   :  { %v1278_v50 = vpack.c.bf16 %v1270_v15, %v1266_v16  ;;  %v9445_v0 = vpop.permute.xlu0 %1704  ;;  %v1281_v24 = vpack.c.bf16 %v1273_v4, %v1269_v34  ;;  %v1146_v62 = vpop.permute.xlu1 %1145  ;;  %v1274_v25 = vpack.c.bf16 %v1262_v46, %v1258_v43  ;;  %v1173_v34 = vsel %vm95_vm14, %v9348_v20, %v9374_v28  ;;  %v14078_v15 = vld [vmem:[#allocation8_spill] sm:$0xff]  ;;  %v14080_v43 = vld [vmem:[#allocation7_spill] sm:$0xff] }
 0x253   :  { %v1276_v45 = vpack.c.bf16 %v1264_v42, %v1260_v23  ;;  %v1175_v49 = vsel %vm95_vm14, %v9382_v6, %v1146_v62  ;;  %v1165_v32 = vsel %vm95_vm14, %v9359_v44, %v9378_v59  ;;  %v14079_v46 = vmov 0  }
 0x254   :  { %1316 = vmatpush1.bf16.msra.mxu0 %v1278_v50  ;;  %1368 = vmatprep.subr.bf16.mxu1 %v1281_v24  ;;  %v1190_v4 = vmul.f32 %v1175_v49, %v14078_v15  ;;  %v1166_v50 = vsel %vm95_vm14, %v9366_v8, %v9380_v5  ;;  %v1178_v24 = vsel %vm95_vm14, %v9380_v5, %v9354_v13  ;;  %v14081_v13 = vld [vmem:[#allocation10_spill] sm:$0xff] }
 0x255   :  { %1317 = vmatprep.subr.bf16.mxu0 %v1275_v54  ;;  %1369 = vmatpush1.bf16.msra.mxu1 %v1280_v36  ;;  %v1171_v54 = vsel %vm95_vm14, %v1146_v62, %v9386_v30  ;;  %v1182_v62 = vmul.f32 %v1173_v34, %v14078_v15 }
 0x256   :  { %1370 = vmatprep.subr.bf16.mxu1 %v1277_v21  ;;  %v9450_v14 = vpop.permute.xlu0 %1684  ;;  %v1162_v60 = vpop.permute.xlu1 %1161 }
 0x257   :  { %v1179_v2 = vsel %vm95_vm14, %v1162_v60, %v9382_v6  ;;  %v1167_v11 = vsel %vm95_vm14, %v9386_v30, %v1162_v60  ;;  %v1186_v6 = vmul.f32 %v1174_v17, %v14078_v15  ;;  %v8629_v60 = vld [vmem:[#allocation2 + $0x68] sm:$0xff]   ;;  %v1188_v17 = vmul.f32 %v1166_v50, %v14081_v13 }
 0x258   :  { %1318 = vmatpush1.bf16.msra.mxu0 %v1274_v25  ;;  %v1189_v21 = vmul.f32 %v1179_v2, %v14080_v43  ;;  %v1192_v5 = vmul.f32 %v1167_v11, %v14081_v13 }
 0x259   :  { %1371 = vmatpush1.bf16.msra.mxu1 %v1276_v45 }
 0x25a   :  { %v1148_v41 = vpop.permute.xlu0 %1147  ;;  %v9459_v18 = vpop.permute.xlu1 %1694 }
 0x25b   :  { %v1176_v16 = vsel %vm95_vm14, %v9384_v9, %v1148_v41  ;;  %8390 = vmatmul.mubr.msk.bf16.vlgmr.msra.gmra.mxu0 %vm240_vm15, %v8628_v40  ;;  %v1172_v63 = vsel %vm95_vm14, %v1148_v41, %v9388_v22 }
 0x25c   :  { %v1194_v61 = vmul.f32 %v1176_v16, %v14078_v15  ;;  %8392 = vmatmul.mubr.msk.bf16.vlgmr.msra.gmra.mxu1 %vm240_vm15, %v8628_v40  ;;  %1345 = vmatprep.mubr.bf16.mxu0 %v14079_v46  ;;  %v14082_v40 = vld [vmem:[#allocation9_spill] sm:$0xff]  ;;  %v1185_v16 = vmul.f32 %v1178_v24, %v14080_v43 }
 0x25d   :  { %1398 = vmatprep.mubr.bf16.mxu1 %v14079_v46  ;;  %v1195_v49 = vmul.f32 %v1172_v63, %v14082_v40 }
 0x25e   :  { %v1164_v42 = vpop.permute.xlu0 %1163  ;;  %v1202_v36 = vpack.c.bf16 %v1194_v61, %v1190_v4  ;;  %v9500_v23 = vpop.permute.xlu1 %1710  ;;  %v1191_v4 = vmul.f32 %v1171_v54, %v14082_v40 }
 0x25f   :  { %v1168_v25 = vsel %vm95_vm14, %v9388_v22, %v1164_v42  ;;  %v1180_v45 = vsel %vm95_vm14, %v1164_v42, %v9384_v9  ;;  %v1177_v22 = vsel %vm95_vm14, %v9378_v59, %v9348_v20  ;;  %v1170_v9 = vsel %vm95_vm14, %v9376_v33, %v9366_v8 }
 0x260   :  { %v1193_v41 = vmul.f32 %v1180_v45, %v14080_v43  ;;  %v1196_v30 = vmul.f32 %v1168_v25, %v14081_v13  ;;  %1437 = vmatprep.subr.bf16.mxu0 %v1202_v36  ;;  %v1169_v20 = vsel %vm95_vm14, %v9374_v28, %v9359_v44  ;;  %v1184_v59 = vmul.f32 %v1165_v32, %v14081_v13  ;;  %v8630_v36 = vld [vmem:[#allocation2 + $0x50] sm:$0xff]  }
 0x261   :  { %v1198_v8 = vpack.c.bf16 %v1186_v6, %v1182_v62  ;;  %v1181_v33 = vmul.f32 %v1177_v22, %v14080_v43  ;;  %v1187_v63 = vmul.f32 %v1170_v9, %v14082_v40  ;;  %v1203_v50 = vpack.c.bf16 %v1195_v49, %v1191_v4  ;;  %v14085_v4 = vld [vmem:[#allocation23_spill] sm:$0xff] }
 0x262   :  { %v1201_v2 = vpack.c.bf16 %v1193_v41, %v1189_v21  ;;  %v9524_v61 = vpop.permute.xlu0 %1692  ;;  %v1204_v34 = vpack.c.bf16 %v1196_v30, %v1192_v5  ;;  %v9531_v11 = vpop.permute.xlu1 %1682  ;;  %v1200_v24 = vpack.c.bf16 %v1188_v17, %v1184_v59  ;;  %v1183_v44 = vmul.f32 %v1169_v20, %v14082_v40  ;;  %v14083_v5 = vld [vmem:[#allocation15_spill] sm:$0xff]  ;;  %v14084_v41 = vld [vmem:[#allocation16_spill] sm:$0xff]  ;;  %v14086_v20 = vld [vmem:[#allocation17_spill] sm:$0xff] }
 0x263   :  { %8391 = vmatmul.mubr.msk.bf16.gmra.mxu0 %vm240_vm15, %v8629_v60  ;;  %v1197_v28 = vpack.c.bf16 %v1185_v16, %v1181_v33  ;;  %v1536_v42 = vpack.c.bf16 %v9270_v7, %v9264_v37  ;;  %v1538_v21 = vpack.c.bf16 %v9278_v56, %v9272_v47  ;;  %v1535_v45 = vpack.c.bf16 %v9226_v3, %v9220_v31 }
 0x264   :  { %8393 = vmatmul.mubr.msk.bf16.gmra.mxu1 %vm240_vm15, %v8629_v60  ;;  %1438 = vmatpush1.bf16.msra.mxu0 %v1201_v2  ;;  %v1199_v54 = vpack.c.bf16 %v1187_v63, %v1183_v44  ;;  %v1532_v37 = vpack.c.bf16 %v9191_v12, %v9182_v35  ;;  %v1537_v7 = vpack.c.bf16 %v9239_v39, %v9228_v26  ;;  %v8631_v12 = vld [vmem:[#allocation2 + $0x58] sm:$0xff]  }
 0x265   :  { %1490 = vmatprep.subr.bf16.mxu1 %v1204_v34  ;;  %1439 = vmatprep.subr.bf16.mxu0 %v1198_v8  ;;  %v1534_v31 = vpack.c.bf16 %v9205_v48, %v9195_v38  ;;  %v1531_v47 = vpack.c.bf16 %v9155_v29, %v9146_v52  ;;  %v1533_v26 = vpack.c.bf16 %v9169_v27, %v9158_v19  ;;  %v8632_v38 = vld [vmem:[#allocation2 + $0x70] sm:$0xff]  }
 0x266   :  { %1491 = vmatpush1.bf16.msra.mxu1 %v1203_v50  ;;  %v9538_v32 = vpop.permute.xlu0 %1700  ;;  %1457 = vmatprep.mubr.bf16.mxu0 %v14079_v46  ;;  %v1691_v6 = vpop.permute.xlu1 %1690  ;;  %v1720_v29 = vsel %vm633_vm0, %v9459_v18, %v9425_v58  ;;  %v1724_v19 = vsel %vm633_vm0, %v9390_v55, %v9459_v18  ;;  %v1716_v62 = vsel %vm633_vm0, %v9425_v58, %v9500_v23 }
 0x267   :  { %1492 = vmatprep.subr.bf16.mxu1 %v1200_v24  ;;  %1510 = vmatprep.mubr.bf16.mxu1 %v14079_v46  ;;  %v1738_v49 = vmul.f32 %v1724_v19, %v14083_v5  ;;  %v1739_v30 = vmul.f32 %v1720_v29, %v14084_v41  ;;  %v1728_v18 = vsel %vm633_vm0, %v9500_v23, %v9390_v55 }
 0x268   :  { %1440 = vmatpush1.bf16.msra.mxu0 %v1197_v28  ;;  %v1719_v9 = vsel %vm633_vm0, %v9524_v61, %v9538_v32  ;;  %v1722_v55 = vsel %vm633_vm0, %v9531_v11, %v1691_v6  ;;  %v1740_v59 = vmul.f32 %v1716_v62, %v14086_v20  ;;  %v1723_v8 = vsel %vm633_vm0, %v9450_v14, %v9524_v61  ;;  %v14087_v28 = vld [vmem:[#allocation18_spill] sm:$0xff] }
 0x269   :  { %1572 = vmatprep.subr.bf16.mxu0 %v1536_v42  ;;  %v1735_v33 = vmul.f32 %v1719_v9, %v14084_v41  ;;  %v1730_v42 = vmul.f32 %v1722_v55, %v14083_v5  ;;  %v14088_v9 = vld [vmem:[#allocation19_spill] sm:$0xff] }
 0x26a   :  { %1493 = vmatpush1.bf16.msra.mxu1 %v1199_v54  ;;  %v9546_v25 = vpop.permute.xlu0 %1708  ;;  %v9550_v60 = vpop.permute.xlu1 %1698 }
 0x26b   :  { %1625 = vmatprep.subr.bf16.mxu1 %v1538_v21  ;;  %8396 = vmatmul.mubr.msk.bf16.vlgmr.msra.gmra.mxu0 %vm240_vm15, %v8630_v36  ;;  %v1718_v48 = vsel %vm633_vm0, %v1691_v6, %v9550_v60  ;;  %v1741_v6 = vmul.f32 %v1728_v18, %v14087_v28  ;;  %v8633_v21 = vld [vmem:[#allocation2 + $0x78] sm:$0xff]   ;;  %v1715_v19 = vsel %vm633_vm0, %v9538_v32, %v9546_v25 }
 0x26c   :  { %1573 = vmatpush1.bf16.msra.mxu0 %v1535_v45  ;;  %1467 = vmatprep.mubr.bf16.mxu0 %v14079_v46  ;;  %v1731_v23 = vmul.f32 %v1718_v48, %v14084_v41 }
 0x26d   :  { %8398 = vmatmul.mubr.msk.bf16.vlgmr.msra.gmra.mxu1 %vm240_vm15, %v8630_v36  ;;  %1574 = vmatprep.subr.bf16.mxu0 %v1532_v37 }
 0x26e   :  { %1626 = vmatpush1.bf16.msra.mxu1 %v1537_v7  ;;  %v9561_v3 = vpop.permute.xlu0 %1903  ;;  %1520 = vmatprep.mubr.bf16.mxu1 %v14079_v46  ;;  %v1707_v35 = vpop.permute.xlu1 %1706  ;;  %v1747_v7 = vpack.c.bf16 %v1735_v33, %v1731_v23 }
 0x26f   :  { %1627 = vmatprep.subr.bf16.mxu1 %v1534_v31  ;;  %v1726_v63 = vsel %vm633_vm0, %v1707_v35, %v9531_v11  ;;  %v1727_v11 = vsel %vm633_vm0, %v9546_v25, %v9450_v14  ;;  %v1734_v31 = vmul.f32 %v1723_v8, %v14083_v5 }
 0x270   :  { %1575 = vmatpush1.bf16.msra.mxu0 %v1531_v47  ;;  %v1733_v47 = vmul.f32 %v1726_v63, %v14087_v28 }
 0x271   :  { %v1746_v14 = vpack.c.bf16 %v1734_v31, %v1730_v42 }
 0x272   :  { %1628 = vmatpush1.bf16.msra.mxu1 %v1533_v26  ;;  %v9568_v39 = vpop.permute.xlu0 %1919  ;;  %v9570_v56 = vpop.permute.xlu1 %1901 }
 0x273   :  { %8397 = vmatmul.mubr.msk.bf16.gmra.mxu0 %vm240_vm15, %v8631_v12 }
 0x274   :  { %1592 = vmatprep.mubr.bf16.mxu0 %v14079_v46 }
 0x275   :  { %8399 = vmatmul.mubr.msk.bf16.gmra.mxu1 %vm240_vm15, %v8631_v12 }
 0x276   :  { %v9575_v52 = vpop.permute.xlu0 %1899  ;;  %1645 = vmatprep.mubr.bf16.mxu1 %v14079_v46  ;;  %v9586_v27 = vpop.permute.xlu1 %1909 }
 0x277   :  { %v1939_v32 = vsel %vm844_vm3, %v9570_v56, %v9586_v27 }
 0x27a   :  { %v1697_v22 = vpop.permute.xlu0 %1696  ;;  %v1918_v17 = vpop.permute.xlu1 %1917 }
 0x27b   :  { %v1721_v16 = vsel %vm633_vm0, %v1697_v22, %v9445_v0  ;;  %v1725_v58 = vsel %vm633_vm0, %v14085_v4, %v1697_v22  ;;  %8402 = vmatmul.mubr.msk.bf16.vlgmr.msra.gmra.mxu0 %vm240_vm15, %v8632_v38  ;;  %v1935_v25 = vsel %vm844_vm3, %v9586_v27, %v1918_v17  ;;  %v8634_v22 = vld [vmem:[#allocation2 + $0x80] sm:$0xff]  }
 0x27c   :  { %v1742_v2 = vmul.f32 %v1725_v58, %v14083_v5  ;;  %v1743_v34 = vmul.f32 %v1721_v16, %v14084_v41  ;;  %1602 = vmatprep.mubr.bf16.mxu0 %v14079_v46  ;;  %v1953_v16 = vmul.f32 %v1939_v32, %v14088_v9 }
 0x27d   :  { %8404 = vmatmul.mubr.msk.bf16.vlgmr.msra.gmra.mxu1 %vm240_vm15, %v8632_v38  ;;  %v1737_v38 = vmul.f32 %v1727_v11, %v14087_v28 }
 0x27e   :  { %v1750_v50 = vpack.c.bf16 %v1742_v2, %v1738_v49  ;;  %v1713_v24 = vpop.permute.xlu0 %1712  ;;  %v1751_v44 = vpack.c.bf16 %v1743_v34, %v1739_v30  ;;  %1655 = vmatprep.mubr.bf16.mxu1 %v14079_v46  ;;  %v1926_v36 = vpop.permute.xlu1 %1925  ;;  %v1736_v49 = vmul.f32 %v1715_v19, %v14086_v20 }
 0x27f   :  { %v1717_v61 = vsel %vm633_vm0, %v9445_v0, %v1713_v24  ;;  %v1729_v54 = vsel %vm633_vm0, %v1713_v24, %v14085_v4  ;;  %v1714_v0 = vsel %vm633_vm0, %v9550_v60, %v1707_v35  ;;  %v1749_v35 = vpack.c.bf16 %v1737_v38, %v1733_v47  ;;  %v14089_v4 = vld [vmem:[#allocation20_spill] sm:$0xff] }
 0x280   :  { %v1744_v45 = vmul.f32 %v1717_v61, %v14086_v20  ;;  %v1745_v37 = vmul.f32 %v1729_v54, %v14087_v28  ;;  %1787 = vmatprep.subr.bf16.mxu0 %v1751_v44  ;;  %v1732_v60 = vmul.f32 %v1714_v0, %v14086_v20  ;;  %v1954_v58 = vmul.f32 %v1935_v25, %v14089_v4  ;;  %v8635_v0 = vld [vmem:[#allocation2 + $0x88] sm:$0xff]  }
 0x281   :  { %1788 = vmatpush1.bf16.msra.mxu0 %v1750_v50  ;;  %v1931_v55 = vsel %vm844_vm3, %v1918_v17, %v1926_v36  ;;  %v1943_v2 = vsel %vm844_vm3, %v1926_v36, %v9570_v56  ;;  %v14090_v50 = vld [vmem:[#allocation21_spill] sm:$0xff] }
 0x282   :  { %v1752_v12 = vpack.c.bf16 %v1744_v45, %v1740_v59  ;;  %v1908_v26 = vpop.permute.xlu0 %1907  ;;  %1789 = vmatprep.subr.bf16.mxu0 %v1747_v7  ;;  %v1753_v29 = vpack.c.bf16 %v1745_v37, %v1741_v6  ;;  %v1898_v48 = vpop.permute.xlu1 %1897  ;;  %v1748_v18 = vpack.c.bf16 %v1736_v49, %v1732_v60  ;;  %v1955_v24 = vmul.f32 %v1931_v55, %v14090_v50 }
 0x283   :  { %8403 = vmatmul.mubr.msk.bf16.gmra.mxu0 %vm240_vm15, %v8633_v21  ;;  %v1938_v6 = vsel %vm844_vm3, %v9575_v52, %v1908_v26 }
 0x284   :  { %1840 = vmatprep.subr.bf16.mxu1 %v1753_v29  ;;  %1807 = vmatprep.mubr.bf16.mxu0 %v14079_v46 }
 0x285   :  { %8405 = vmatmul.mubr.msk.bf16.gmra.mxu1 %vm240_vm15, %v8633_v21  ;;  %1790 = vmatpush1.bf16.msra.mxu0 %v1746_v14  ;;  %v14091_v21 = vld [vmem:[#allocation22_spill] sm:$0xff]  ;;  %v1949_v14 = vmul.f32 %v1938_v6, %v14088_v9 }
 0x286   :  { %1841 = vmatpush1.bf16.msra.mxu1 %v1752_v12  ;;  %v1916_v30 = vpop.permute.xlu0 %1915  ;;  %1860 = vmatprep.mubr.bf16.mxu1 %v14079_v46  ;;  %v1906_v62 = vpop.permute.xlu1 %1905  ;;  %v1956_v11 = vmul.f32 %v1943_v2, %v14091_v21 }
 0x287   :  { %1842 = vmatprep.subr.bf16.mxu1 %v1749_v35  ;;  %v1934_v27 = vsel %vm844_vm3, %v1908_v26, %v1916_v30  ;;  %v1937_v17 = vsel %vm844_vm3, %v1898_v48, %v1906_v62 }
 0x288   :  { %v1950_v42 = vmul.f32 %v1934_v27, %v14089_v4  ;;  %v1945_v45 = vmul.f32 %v1937_v17, %v14088_v9 }
 0x28a   :  { %1843 = vmatpush1.bf16.msra.mxu1 %v1748_v18  ;;  %v1912_v23 = vpop.permute.xlu0 %1911  ;;  %v1914_v34 = vpop.permute.xlu1 %1913  ;;  %v1961_v60 = vpack.c.bf16 %v1949_v14, %v1945_v45  ;;  %v8637_v18 = vld [vmem:[#allocation2 + $0x98] sm:$0xff]  }
 0x28b   :  { %v1936_v59 = vsel %vm844_vm3, %v1912_v23, %v9568_v39  ;;  %v1940_v8 = vsel %vm844_vm3, %v9561_v3, %v1912_v23  ;;  %8408 = vmatmul.mubr.msk.bf16.vlgmr.msra.gmra.mxu0 %vm240_vm15, %v8634_v22  ;;  %v1933_v56 = vsel %vm844_vm3, %v1906_v62, %v1914_v34 }
 0x28c   :  { %v1957_v33 = vmul.f32 %v1940_v8, %v14088_v9  ;;  %v1958_v63 = vmul.f32 %v1936_v59, %v14089_v4  ;;  %1817 = vmatprep.mubr.bf16.mxu0 %v14079_v46  ;;  %v1946_v44 = vmul.f32 %v1933_v56, %v14089_v4 }
 0x28d   :  { %8410 = vmatmul.mubr.msk.bf16.vlgmr.msra.gmra.mxu1 %vm240_vm15, %v8634_v22 }
 0x28e   :  { %v1965_v36 = vpack.c.bf16 %v1957_v33, %v1953_v16  ;;  %v1928_v61 = vpop.permute.xlu0 %1927  ;;  %v1966_v54 = vpack.c.bf16 %v1958_v63, %v1954_v58  ;;  %1870 = vmatprep.mubr.bf16.mxu1 %v14079_v46  ;;  %v1922_v37 = vpop.permute.xlu1 %1921  ;;  %v1962_v29 = vpack.c.bf16 %v1950_v42, %v1946_v44 }
 0x28f   :  { %v1932_v7 = vsel %vm844_vm3, %v9568_v39, %v1928_v61  ;;  %v1944_v31 = vsel %vm844_vm3, %v1928_v61, %v9561_v3  ;;  %v1929_v47 = vsel %vm844_vm3, %v1914_v34, %v1922_v37  ;;  %v1941_v19 = vsel %vm844_vm3, %v1922_v37, %v1898_v48 }
 0x290   :  { %v1959_v12 = vmul.f32 %v1932_v7, %v14090_v50  ;;  %v1960_v26 = vmul.f32 %v1944_v31, %v14091_v21  ;;  %2002 = vmatprep.subr.bf16.mxu0 %v1966_v54  ;;  %v1947_v35 = vmul.f32 %v1929_v47, %v14090_v50  ;;  %v1948_v25 = vmul.f32 %v1941_v19, %v14091_v21 }
 0x291   :  { %2003 = vmatpush1.bf16.msra.mxu0 %v1965_v36 }
 0x292   :  { %v1967_v39 = vpack.c.bf16 %v1959_v12, %v1955_v24  ;;  %v1924_v38 = vpop.permute.xlu0 %1923  ;;  %2004 = vmatprep.subr.bf16.mxu0 %v1962_v29  ;;  %v1968_v3 = vpack.c.bf16 %v1960_v26, %v1956_v11 }
 0x293   :  { %v1930_v49 = vsel %vm844_vm3, %v1916_v30, %v1924_v38  ;;  %v1942_v32 = vsel %vm844_vm3, %v1924_v38, %v9575_v52  ;;  %8409 = vmatmul.mubr.msk.bf16.gmra.mxu0 %vm240_vm15, %v8635_v0  ;;  %v8636_v52 = vld [vmem:[#allocation2 + $0x90] sm:$0xff]  }
 0x294   :  { %v1951_v48 = vmul.f32 %v1930_v49, %v14090_v50  ;;  %v1952_v62 = vmul.f32 %v1942_v32, %v14091_v21  ;;  %2055 = vmatprep.subr.bf16.mxu1 %v1968_v3  ;;  %2022 = vmatprep.mubr.bf16.mxu0 %v14079_v46 }
 0x295   :  { %8411 = vmatmul.mubr.msk.bf16.gmra.mxu1 %vm240_vm15, %v8635_v0  ;;  %2005 = vmatpush1.bf16.msra.mxu0 %v1961_v60 }
 0x296   :  { %v1963_v22 = vpack.c.bf16 %v1951_v48, %v1947_v35  ;;  %2056 = vmatpush1.bf16.msra.mxu1 %v1967_v39  ;;  %v1964_v30 = vpack.c.bf16 %v1952_v62, %v1948_v25  ;;  %2075 = vmatprep.mubr.bf16.mxu1 %v14079_v46 }
 0x298   :  { %2057 = vmatprep.subr.bf16.mxu1 %v1964_v30 }
 0x29a   :  { %2058 = vmatpush1.bf16.msra.mxu1 %v1963_v22 }
 0x29b   :  { %8414 = vmatmul.mubr.msk.bf16.vlgmr.msra.gmra.mxu0 %vm240_vm15, %v8636_v52  ;;  %v9812_v20 = vpop.permute.xlu1 %2129 }
 0x29c   :  { %2032 = vmatprep.mubr.bf16.mxu0 %v14079_v46 }
 0x29d   :  { %8416 = vmatmul.mubr.msk.bf16.vlgmr.msra.gmra.mxu1 %vm240_vm15, %v8636_v52 }
 0x29e   :  { %2085 = vmatprep.mubr.bf16.mxu1 %v14079_v46 }
 0x2a3   :  { %8415 = vmatmul.mubr.msk.bf16.gmra.mxu0 %vm240_vm15, %v8637_v18 }
 0x2a4   :  { %2403 = vmatprep.mubr.bf16.mxu0 %v14079_v46 }
 0x2a5   :  { %8417 = vmatmul.mubr.msk.bf16.gmra.mxu1 %vm240_vm15, %v8637_v18 }
 0x2a6   :  { %2456 = vmatprep.mubr.bf16.mxu1 %v14079_v46 }
 0x31b   :  { %v9734_v16 = vpop.f32.mrf.mxu0 }
 0x31c   :  { %v9736_v58 = vpop.f32.mrf.mxu1 }
 0x31d   :  { %v9738_v55 = vpop.f32.mrf.mxu0 }
 0x31e   :  { %v9740_v23 = vpop.f32.mrf.mxu1 }
 0x31f   :  { %v9742_v2 = vpop.f32.mrf.mxu0 }
 0x320   :  { %v9744_v27 = vpop.f32.mrf.mxu1 }
 0x321   :  { %v9746_v34 = vpop.f32.mrf.mxu0 }
 0x322   :  { %v9748_v59 = vpop.f32.mrf.mxu1 }
 0x323   :  { %v1347_v8 = vpop.f32.mrf.mxu0 }
 0x324   :  { %v1400_v17 = vpop.f32.mrf.mxu1 }
 0x325   :  { %v1349_v56 = vpop.f32.mrf.mxu0 }
 0x326   :  { %v1402_v33 = vpop.f32.mrf.mxu1 }
 0x327   :  { %v1351_v63 = vpop.f32.mrf.mxu0 }
 0x328   :  { %v1404_v24 = vpop.f32.mrf.mxu1 }
 0x329   :  { %v9750_v44 = vpop.f32.mrf.mxu0 }
 0x32a   :  { %v9752_v6 = vpop.f32.mrf.mxu1 }
 0x32b   :  { %14092 = vst [vmem:[#allocation24_spill] sm:$0xff] %v9752_v6  ;;  %v1459_v42 = vpop.f32.mrf.mxu0 }
 0x32c   :  { %v1460_v41 = vadd.f32 %v1459_v42, %v9734_v16  ;;  %v9827_v16 = vpop.permute.xlu0 %2134 }
 0x32d   :  { %v1512_v36 = vpop.f32.mrf.mxu1  ;;  %v9754_v61 = vpop.f32.mrf.mxu0 }
 0x32e   :  { %v1513_v13 = vadd.f32 %v1512_v36, %v9736_v58 }
 0x32f   :  { %v9756_v54 = vpop.f32.mrf.mxu1  ;;  %v1463_v11 = vpop.f32.mrf.mxu0 }
 0x330   :  { %v1464_v51 = vadd.f32 %v1463_v11, %v9742_v2 }
 0x331   :  { %v9758_v45 = vpop.f32.mrf.mxu1  ;;  %v9760_v37 = vpop.f32.mrf.mxu0 }
 0x332   :  { %v1517_v58 = vadd.f32 %v9758_v45, %v9744_v27 }
 0x333   :  { %v9762_v7 = vpop.f32.mrf.mxu1  ;;  %v1469_v31 = vpop.f32.mrf.mxu0 }
 0x334   :  { %v9764_v0 = vadd.f32 %v1469_v31, %v1347_v8 }
 0x335   :  { %v1522_v47 = vpop.f32.mrf.mxu1  ;;  %v1471_v12 = vpop.f32.mrf.mxu0 }
 0x336   :  { %v9766_v26 = vadd.f32 %v1522_v47, %v1400_v17  ;;  %v1472_v29 = vadd.f32 %v1471_v12, %v1349_v56 }
 0x337   :  { %v1524_v14 = vpop.f32.mrf.mxu1  ;;  %v1473_v19 = vpop.f32.mrf.mxu0 }
 0x338   :  { %v1525_v39 = vadd.f32 %v1524_v14, %v1402_v33  ;;  %v9768_v38 = vadd.f32 %v1473_v19, %v1351_v63 }
 0x339   :  { %v1526_v3 = vpop.f32.mrf.mxu1  ;;  %v9770_v60 = vpop.f32.mrf.mxu0 }
 0x33a   :  { %v9772_v35 = vadd.f32 %v1526_v3, %v1404_v24 }
 0x33b   :  { %v9774_v49 = vpop.f32.mrf.mxu1  ;;  %v1594_v32 = vpop.f32.mrf.mxu0 }
 0x33c   :  { %14093 = vst [vmem:[#allocation28_spill] sm:$0xff] %v9774_v49  ;;  %v1666_v43 = vadd.f32 %v1594_v32, %v1460_v41 }
 0x33d   :  { %v1647_v25 = vpop.f32.mrf.mxu1  ;;  %v9776_v48 = vpop.f32.mrf.mxu0 }
 0x33e   :  { %v1668_v10 = vadd.f32 %v1647_v25, %v1513_v13 }
 0x33f   :  { %v9778_v62 = vpop.f32.mrf.mxu1  ;;  %v1598_v22 = vpop.f32.mrf.mxu0 }
 0x340   :  { %v1670_v41 = vadd.f32 %v1598_v22, %v1464_v51 }
 0x341   :  { %v1651_v30 = vpop.f32.mrf.mxu1  ;;  %v9780_v52 = vpop.f32.mrf.mxu0 }
 0x342   :  { %v1672_v13 = vadd.f32 %v1651_v30, %v1517_v58 }
 0x343   :  { %v9782_v18 = vpop.f32.mrf.mxu1  ;;  %v9784_v8 = vpop.f32.mrf.mxu0 }
 0x345   :  { %v9786_v17 = vpop.f32.mrf.mxu1  ;;  %v1606_v56 = vpop.f32.mrf.mxu0 }
 0x346   :  { %v9788_v33 = vadd.f32 %v1606_v56, %v1472_v29 }
 0x347   :  { %v1659_v63 = vpop.f32.mrf.mxu1  ;;  %v9790_v24 = vpop.f32.mrf.mxu0 }
 0x348   :  { %v9792_v31 = vadd.f32 %v1659_v63, %v1525_v39 }
 0x349   :  { %v9794_v47 = vpop.f32.mrf.mxu1  ;;  %v9796_v12 = vpop.f32.mrf.mxu0 }
 0x34a   :  { %14094 = vst [vmem:[#allocation25_spill] sm:$0xff] %v9792_v31 }
 0x34b   :  { %v9798_v14 = vpop.f32.mrf.mxu1  ;;  %v1809_v19 = vpop.f32.mrf.mxu0 }
 0x34c   :  { %14095 = vst [vmem:[#allocation27_spill] sm:$0xff] %v9798_v14  ;;  %v1881_v1 = vadd.f32 %v1809_v19, %v1666_v43  ;;  %v2120_v14 = vpop.permute.xlu1 %2119 }
 0x34d   :  { %v1862_v3 = vpop.f32.mrf.mxu1  ;;  %v1811_v21 = vpop.f32.mrf.mxu0 }
 0x34e   :  { %v1883_v42 = vadd.f32 %v1862_v3, %v1668_v10  ;;  %v2125_v10 = vpop.permute.xlu0 %2124 }
 0x34f   :  { %v9800_v50 = vpop.f32.mrf.mxu1  ;;  %v1813_v4 = vpop.f32.mrf.mxu0 }
 0x350   :  { %v1885_v43 = vadd.f32 %v1813_v4, %v1670_v41  ;;  %v1674_v41 = vadd.f32 %v9784_v8, %v9764_v0  ;;  %v1676_v0 = vadd.f32 %v9786_v17, %v9766_v26 }
 0x351   :  { %v1866_v9 = vpop.f32.mrf.mxu1  ;;  %v9802_v29 = vpop.f32.mrf.mxu0 }
 0x353   :  { %v9804_v56 = vpop.f32.mrf.mxu1  ;;  %v9806_v28 = vpop.f32.mrf.mxu0 }
 0x355   :  { %v9808_v39 = vpop.f32.mrf.mxu1  ;;  %v9810_v63 = vpop.f32.mrf.mxu0 }
 0x357   :  { %v9815_v5 = vpop.f32.mrf.mxu1  ;;  %v9817_v40 = vpop.f32.mrf.mxu0 }
 0x358   :  { %14096 = vst [vmem:[#allocation26_spill] sm:$0xff] %v9815_v5 }
 0x359   :  { %v9820_v46 = vpop.f32.mrf.mxu1  ;;  %v9822_v15 = vpop.f32.mrf.mxu0 }
 0x35a   :  { %14097 = vst [vmem:[#allocation29_spill] sm:$0xff] %v9822_v15 }
 0x35b   :  { %v9825_v53 = vpop.f32.mrf.mxu1  ;;  %v2024_v57 = vpop.f32.mrf.mxu0 }
 0x35c   :  { %14098 = vst [vmem:[#allocation23_spill] sm:$0xff] %v9825_v53  ;;  %v2096_v49 = vadd.f32 %v2024_v57, %v1881_v1  ;;  %v1887_v53 = vadd.f32 %v1866_v9, %v1672_v13  ;;  %v1462_v57 = vadd.f32 %v9754_v61, %v9738_v55 }
 0x35d   :  { %v2077_v36 = vpop.f32.mrf.mxu1  ;;  %v2026_v32 = vpop.f32.mrf.mxu0 }
 0x35e   :  { %v2137_v6 = vadd.f32 %v2120_v14, %v2096_v49  ;;  %v2098_v15 = vadd.f32 %v2077_v36, %v1883_v42  ;;  %v1667_v27 = vadd.f32 %v9776_v48, %v1462_v57 }
 0x35f   :  { %v2079_v25 = vpop.f32.mrf.mxu1  ;;  %v2028_v2 = vpop.f32.mrf.mxu0 }
 0x360   :  { %v2169_v11 = vmul.f32 0.01, %v2137_v6  ;;  %v2139_v19 = vadd.f32 %v2120_v14, %v2098_v15  ;;  %vm2153_vm9 = vcmp.ge.f32.partialorder %v2137_v6, 0.0  ;;  %v2100_v5 = vadd.f32 %v2028_v2, %v1885_v43 }
 0x361   :  { %v2081_v31 = vpop.f32.mrf.mxu1  ;;  %v1515_v15 = vadd.f32 %v9756_v54, %v9740_v23  ;;  %v1882_v9 = vadd.f32 %v1811_v21, %v1667_v27  ;;  %v2030_v23 = vpop.f32.mrf.mxu0 }
 0x362   :  { %v2141_v1 = vadd.f32 %v2125_v10, %v2100_v5  ;;  %v2102_v51 = vadd.f32 %v2081_v31, %v1887_v53  ;;  %v2171_v45 = vmul.f32 0.01, %v2139_v19  ;;  %v9834_v49 = vsel %vm2153_vm9, %v2137_v6, %v2169_v11 }
 0x363   :  { %vm2155_vm10 = vcmp.ge.f32.partialorder %v2139_v19, 0.0  ;;  %2278 = vrot.lane.b32.xlu1 %v9834_v49, %s8718_s19  ;;  %v1466_v5 = vadd.f32 %v9760_v37, %v9746_v34  ;;  %v1669_v55 = vadd.f32 %v9778_v62, %v1515_v15  ;;  %v2097_v6 = vadd.f32 %v2026_v32, %v1882_v9  ;;  %v2083_v42 = vpop.f32.mrf.mxu1 }
 0x364   :  { %vm2157_vm11 = vcmp.ge.f32.partialorder %v2141_v1, 0.0  ;;  %v2173_v4 = vmul.f32 0.01, %v2141_v1  ;;  %v2143_v22 = vadd.f32 %v2125_v10, %v2102_v51  ;;  %v9845_v61 = vsel %vm2155_vm10, %v2139_v19, %v2171_v45 }
 0x365   :  { %v1671_v48 = vadd.f32 %v9780_v52, %v1466_v5  ;;  %v1884_v21 = vadd.f32 %v9800_v50, %v1669_v55  ;;  %v1519_v34 = vadd.f32 %v9762_v7, %v9748_v59  ;;  %v2138_v37 = vadd.f32 %v2120_v14, %v2097_v6  ;;  %v2087_v43 = vpop.f32.mrf.mxu1 }
 0x366   :  { %v9842_v53 = vsel %vm2157_vm11, %v2141_v1, %v2173_v4  ;;  %v2175_v30 = vmul.f32 0.01, %v2143_v22  ;;  %vm2159_vm12 = vcmp.ge.f32.partialorder %v2143_v22, 0.0  ;;  %v1678_v11 = vadd.f32 %v9790_v24, %v9768_v38 }
 0x367   :  { %2280 = vrot.lane.b32.xlu0 %v9842_v53, %s8718_s19  ;;  %2294 = vrot.lane.b32.xlu1 %v9845_v61, %s8718_s19  ;;  %v1886_v54 = vadd.f32 %v9802_v29, %v1671_v48  ;;  %v2099_v62 = vadd.f32 %v2079_v25, %v1884_v21  ;;  %v1673_v31 = vadd.f32 %v9782_v18, %v1519_v34  ;;  %v2170_v58 = vmul.f32 0.01, %v2138_v37  ;;  %v2034_v18 = vpop.f32.mrf.mxu0  ;;  %v2089_v57 = vpop.f32.mrf.mxu1 }
 0x368   :  { %v9859_v52 = vsel %vm2159_vm12, %v2143_v22, %v2175_v30  ;;  %vm2154_vm1 = vcmp.ge.f32.partialorder %v2138_v37, 0.0  ;;  %v1893_v26 = vadd.f32 %v9817_v40, %v1678_v11  ;;  %v1680_v38 = vadd.f32 %v9794_v47, %v9772_v35 }
 0x369   :  { %v2101_v3 = vadd.f32 %v2030_v23, %v1886_v54  ;;  %v1888_v50 = vadd.f32 %v9804_v56, %v1673_v31  ;;  %v2140_v59 = vadd.f32 %v2120_v14, %v2099_v62  ;;  %v9870_v32 = vsel %vm2154_vm1, %v2138_v37, %v2170_v58  ;;  %v2036_v25 = vpop.f32.mrf.mxu0  ;;  %v14099_v54 = vld [vmem:[#allocation25_spill] sm:$0xff]  ;;  %v14100_v37 = vld [vmem:[#allocation26_spill] sm:$0xff] }
 0x36a   :  { %v1889_v14 = vadd.f32 %v9806_v28, %v1674_v41  ;;  %v1895_v45 = vadd.f32 %v9820_v46, %v1680_v38  ;;  %v1890_v48 = vadd.f32 %v9810_v63, %v9788_v33  ;;  %v1476_v30 = vadd.f32 %v9770_v60, %v9750_v44  ;;  %v14101_v33 = vld [vmem:[#allocation24_spill] sm:$0xff] }
 0x36b   :  { %2201 = vrot.lane.b32.xlu1 %v9834_v49, %s8720_s0  ;;  %2296 = vrot.lane.b32.xlu0 %v9859_v52, %s8718_s19  ;;  %v2142_v7 = vadd.f32 %v2125_v10, %v2101_v3  ;;  %v2103_v29 = vadd.f32 %v2083_v42, %v1888_v50  ;;  %v2172_v36 = vmul.f32 0.01, %v2140_v59  ;;  %vm2156_vm2 = vcmp.ge.f32.partialorder %v2140_v59, 0.0  ;;  %v2038_v1 = vpop.f32.mrf.mxu0  ;;  %v14102_v63 = vld [vmem:[#allocation28_spill] sm:$0xff]  ;;  %v14103_v42 = vld [vmem:[#allocation29_spill] sm:$0xff]  ;;  %v14104_v50 = vld [vmem:[#allocation27_spill] sm:$0xff] }
 0x36c   :  { %v2104_v8 = vadd.f32 %v2034_v18, %v1889_v14  ;;  %v2108_v24 = vadd.f32 %v2038_v1, %v1893_v26  ;;  %v2105_v21 = vadd.f32 %v2036_v25, %v1890_v48  ;;  %v1679_v23 = vadd.f32 %v9796_v12, %v1476_v30 }
 0x36d   :  { %v2174_v56 = vmul.f32 0.01, %v2142_v7  ;;  %v2144_v13 = vadd.f32 %v2125_v10, %v2103_v29  ;;  %vm2158_vm4 = vcmp.ge.f32.partialorder %v2142_v7, 0.0  ;;  %v9879_v2 = vsel %vm2156_vm2, %v2140_v59, %v2172_v36  ;;  %v2040_v31 = vpop.f32.mrf.mxu0  ;;  %v14105_v29 = vld [vmem:[#allocation23_spill] sm:$0xff] }
 0x36e   :  { %v1891_v10 = vadd.f32 %v9808_v39, %v1676_v0  ;;  %v2145_v17 = vadd.f32 %v9812_v20, %v2104_v8  ;;  %v2091_v39 = vpop.f32.mrf.mxu1  ;;  %v2149_v15 = vadd.f32 %v9827_v16, %v2108_v24  ;;  %v1892_v62 = vadd.f32 %v14100_v37, %v14099_v54  ;;  %v8452_v24 = vld [vmem:[%s13870_s2 + $0x40] sm:$0xff] }
 0x36f   :  { %2217 = vrot.lane.b32.xlu1 %v9845_v61, %s8720_s0  ;;  %2203 = vrot.lane.b32.xlu0 %v9842_v53, %s8720_s0  ;;  %v2176_v19 = vmul.f32 0.01, %v2144_v13  ;;  %v9885_v28 = vsel %vm2158_vm4, %v2142_v7, %v2174_v56  ;;  %vm2160_vm5 = vcmp.ge.f32.partialorder %v2144_v13, 0.0  ;;  %v2110_v9 = vadd.f32 %v2091_v39, %v1895_v45  ;;  %v8455_v45 = vld [vmem:[%s13870_s2 + $0x58] sm:$0xff] }
 0x370   :  { %v2106_v51 = vadd.f32 %v2087_v43, %v1891_v10  ;;  %v2177_v4 = vmul.f32 0.01, %v2145_v17  ;;  %vm2161_vm6 = vcmp.ge.f32.partialorder %v2145_v17, 0.0  ;;  %v2181_v22 = vmul.f32 0.01, %v2149_v15  ;;  %v2093_v7 = vpop.f32.mrf.mxu1 }
 0x371   :  { %v9896_v27 = vsel %vm2160_vm5, %v2144_v13, %v2176_v19  ;;  %v2151_v46 = vadd.f32 %v9827_v16, %v2110_v9  ;;  %vm2165_vm8 = vcmp.ge.f32.partialorder %v2149_v15, 0.0  ;;  %v1529_v3 = vadd.f32 %v14102_v63, %v14101_v33 }
 0x372   :  { %v2147_v40 = vadd.f32 %v9812_v20, %v2106_v51  ;;  %v9907_v47 = vsel %vm2161_vm6, %v2145_v17, %v2177_v4  ;;  %v9918_v6 = vsel %vm2165_vm8, %v2149_v15, %v2181_v22  ;;  %v1894_v44 = vadd.f32 %v14103_v42, %v1679_v23  ;;  %v8454_v17 = vld [vmem:[%s13870_s2 + $0x50] sm:$0xff]  ;;  %v8453_v15 = vld [vmem:[%s13870_s2 + $0x48] sm:$0xff] }
 0x373   :  { %2286 = vrot.lane.b32.xlu1 %v9870_v32, %s8718_s19  ;;  %2219 = vrot.lane.b32.xlu0 %v9859_v52, %s8720_s0  ;;  %v2183_v55 = vmul.f32 0.01, %v2151_v46  ;;  %vm2167_vm9 = vcmp.ge.f32.partialorder %v2151_v46, 0.0  ;;  %v2146_v60 = vadd.f32 %v9812_v20, %v2105_v21  ;;  %v2107_v12 = vadd.f32 %v2089_v57, %v1892_v62 }
 0x374   :  { %v2179_v35 = vmul.f32 0.01, %v2147_v40  ;;  %vm2163_vm7 = vcmp.ge.f32.partialorder %v2147_v40, 0.0  ;;  %v1681_v58 = vadd.f32 %v14104_v50, %v1529_v3  ;;  %v2109_v59 = vadd.f32 %v2040_v31, %v1894_v44 }
 0x375   :  { %v9929_v34 = vsel %vm2167_vm9, %v2151_v46, %v2183_v55  ;;  %v2178_v41 = vmul.f32 0.01, %v2146_v60  ;;  %v2148_v36 = vadd.f32 %v9812_v20, %v2107_v12  ;;  %vm2162_vm10 = vcmp.ge.f32.partialorder %v2146_v60, 0.0 }
 0x376   :  { %v9914_v5 = vsel %vm2163_vm7, %v2147_v40, %v2179_v35  ;;  %v1896_v18 = vadd.f32 %v14105_v29, %v1681_v58  ;;  %v2150_v56 = vadd.f32 %v9827_v16, %v2109_v59 }
 0x377   :  { %2302 = vrot.lane.b32.xlu1 %v9879_v2, %s8718_s19  ;;  %2288 = vrot.lane.b32.xlu0 %v9885_v28, %s8718_s19  ;;  %v2180_v14 = vmul.f32 0.01, %v2148_v36  ;;  %v9951_v43 = vsel %vm2162_vm10, %v2146_v60, %v2178_v41  ;;  %vm2164_vm11 = vcmp.ge.f32.partialorder %v2148_v36, 0.0 }
 0x378   :  { %v2111_v13 = vadd.f32 %v2093_v7, %v1896_v18  ;;  %v2182_v25 = vmul.f32 0.01, %v2150_v56  ;;  %vm2166_vm12 = vcmp.ge.f32.partialorder %v2150_v56, 0.0  ;;  %v14109_v18 = vld [vmem:[#allocation12_spill] sm:$0xff] }
 0x379   :  { %v9958_v20 = vsel %vm2164_vm11, %v2148_v36, %v2180_v14 }
 0x37a   :  { %v2152_v0 = vadd.f32 %v9827_v16, %v2111_v13  ;;  %v9962_v11 = vsel %vm2166_vm12, %v2150_v56, %v2182_v25 }
 0x37b   :  { %2209 = vrot.lane.b32.xlu1 %v9870_v32, %s8720_s0  ;;  %2304 = vrot.lane.b32.xlu0 %v9896_v27, %s8718_s19 }
 0x37c   :  { %v2184_v8 = vmul.f32 0.01, %v2152_v0  ;;  %vm2168_vm1 = vcmp.ge.f32.partialorder %v2152_v0, 0.0 }
 0x37e   :  { %v9968_v16 = vsel %vm2168_vm1, %v2152_v0, %v2184_v8 }
 0x37f   :  { %2225 = vrot.lane.b32.xlu1 %v9879_v2, %s8720_s0  ;;  %2211 = vrot.lane.b32.xlu0 %v9885_v28, %s8720_s0 }
 0x383   :  { %2282 = vrot.lane.b32.xlu1 %v9907_v47, %s8718_s19  ;;  %2227 = vrot.lane.b32.xlu0 %v9896_v27, %s8720_s0 }
 0x387   :  { %2298 = vrot.lane.b32.xlu1 %v9914_v5, %s8718_s19  ;;  %2284 = vrot.lane.b32.xlu0 %v9918_v6, %s8718_s19 }
 0x38b   :  { %2205 = vrot.lane.b32.xlu1 %v9907_v47, %s8720_s0  ;;  %2300 = vrot.lane.b32.xlu0 %v9929_v34, %s8718_s19 }
 0x38f   :  { %2221 = vrot.lane.b32.xlu1 %v9914_v5, %s8720_s0  ;;  %2207 = vrot.lane.b32.xlu0 %v9918_v6, %s8720_s0 }
 0x393   :  { %2754 = vrot.lane.b32.xlu1 %v9907_v47, %s8722_s21  ;;  %2223 = vrot.lane.b32.xlu0 %v9929_v34, %s8720_s0 }
 0x397   :  { %2290 = vrot.lane.b32.xlu1 %v9951_v43, %s8718_s19  ;;  %2756 = vrot.lane.b32.xlu0 %v9918_v6, %s8722_s21 }
 0x39b   :  { %2306 = vrot.lane.b32.xlu1 %v9958_v20, %s8718_s19  ;;  %2292 = vrot.lane.b32.xlu0 %v9962_v11, %s8718_s19 }
 0x39f   :  { %2770 = vrot.lane.b32.xlu1 %v9914_v5, %s8722_s21  ;;  %2308 = vrot.lane.b32.xlu0 %v9968_v16, %s8718_s19 }
 0x3a3   :  { %2213 = vrot.lane.b32.xlu1 %v9951_v43, %s8720_s0  ;;  %2772 = vrot.lane.b32.xlu0 %v9929_v34, %s8722_s21 }
 0x3a7   :  { %2229 = vrot.lane.b32.xlu1 %v9958_v20, %s8720_s0  ;;  %2752 = vrot.lane.b32.xlu0 %v9842_v53, %s8722_s21 }
 0x3ab   :  { %2762 = vrot.lane.b32.xlu1 %v9951_v43, %s8722_s21  ;;  %2215 = vrot.lane.b32.xlu0 %v9962_v11, %s8720_s0 }
 0x3af   :  { %2778 = vrot.lane.b32.xlu1 %v9958_v20, %s8722_s21  ;;  %2231 = vrot.lane.b32.xlu0 %v9968_v16, %s8720_s0 }
 0x3b3   :  { %2750 = vrot.lane.b32.xlu1 %v9834_v49, %s8722_s21  ;;  %2760 = vrot.lane.b32.xlu0 %v9885_v28, %s8722_s21 }
 0x3b7   :  { %2758 = vrot.lane.b32.xlu1 %v9870_v32, %s8722_s21  ;;  %2768 = vrot.lane.b32.xlu0 %v9859_v52, %s8722_s21 }
 0x3bb   :  { %2766 = vrot.lane.b32.xlu1 %v9845_v61, %s8722_s21  ;;  %2776 = vrot.lane.b32.xlu0 %v9896_v27, %s8722_s21 }
 0x3bf   :  { %2774 = vrot.lane.b32.xlu1 %v9879_v2, %s8722_s21  ;;  %2971 = vrot.lane.b32.xlu0 %v9918_v6, %s8723_s22 }
 0x3c3   :  { %2969 = vrot.lane.b32.xlu1 %v9907_v47, %s8723_s22  ;;  %2987 = vrot.lane.b32.xlu0 %v9929_v34, %s8723_s22 }
 0x3c7   :  { %2977 = vrot.lane.b32.xlu1 %v9951_v43, %s8723_s22  ;;  %2967 = vrot.lane.b32.xlu0 %v9842_v53, %s8723_s22 }
 0x3cb   :  { %2985 = vrot.lane.b32.xlu1 %v9914_v5, %s8723_s22  ;;  %2764 = vrot.lane.b32.xlu0 %v9962_v11, %s8722_s21 }
 0x3cf   :  { %2993 = vrot.lane.b32.xlu1 %v9958_v20, %s8723_s22  ;;  %2780 = vrot.lane.b32.xlu0 %v9968_v16, %s8722_s21 }
 0x3d3   :  { %2965 = vrot.lane.b32.xlu1 %v9834_v49, %s8723_s22  ;;  %2975 = vrot.lane.b32.xlu0 %v9885_v28, %s8723_s22 }
 0x3d5   :  { %v10024_v19 = vpop.permute.xlu1 %2278 }
 0x3d7   :  { %2973 = vrot.lane.b32.xlu1 %v9870_v32, %s8723_s22  ;;  %2983 = vrot.lane.b32.xlu0 %v9859_v52, %s8723_s22 }
 0x3d9   :  { %v2281_v10 = vpop.permute.xlu0 %2280  ;;  %v10030_v57 = vpop.permute.xlu1 %2294 }
 0x3db   :  { %2981 = vrot.lane.b32.xlu1 %v9845_v61, %s8723_s22  ;;  %2979 = vrot.lane.b32.xlu0 %v9962_v11, %s8723_s22 }
 0x3dd   :  { %v10036_v1 = vpop.permute.xlu1 %2201  ;;  %v2297_v26 = vpop.permute.xlu0 %2296 }
 0x3df   :  { %2989 = vrot.lane.b32.xlu1 %v9879_v2, %s8723_s22  ;;  %2995 = vrot.lane.b32.xlu0 %v9968_v16, %s8723_s22 }
 0x3e1   :  { %v10045_v51 = vpop.permute.xlu1 %2217  ;;  %v10047_v38 = vpop.permute.xlu0 %2203 }
 0x3e3   :  { %3197 = vperm.xlu1 %8617, %v8454_v17   ;;  %2991 = vrot.lane.b32.xlu0 %v9896_v27, %s8723_s22 }
 0x3e5   :  { %v2287_v39 = vpop.permute.xlu1 %2286  ;;  %v10057_v4 = vpop.permute.xlu0 %2219 }
 0x3e6   :  { %v2318_v58 = vsel %vm167_vm13, %v10024_v19, %v2287_v39 }
 0x3e7   :  { %3187 = vperm.xlu1 %8617, %v8452_v24   ;;  %3202 = vperm.xlu0 %8616, %v8455_v45  }
 0x3e9   :  { %v2303_v40 = vpop.permute.xlu1 %2302  ;;  %v2289_v9 = vpop.permute.xlu0 %2288 }
 0x3ea   :  { %v2319_v59 = vsel %vm167_vm13, %v2281_v10, %v2289_v9  ;;  %v2310_v13 = vsel %vm167_vm13, %v10030_v57, %v2303_v40  ;;  %v2315_v14 = vsel %vm167_vm13, %v2289_v9, %v2297_v26  ;;  %v14111_v9 = vld [vmem:[#allocation13_spill] sm:$0xff] }
 0x3eb   :  { %3192 = vperm.xlu0 %8616, %v8453_v15   ;;  %v2331_v17 = vmul.f32 %v2319_v59, %v14109_v18 }
 0x3ed   :  { %v10062_v35 = vpop.permute.xlu1 %2209  ;;  %v2305_v22 = vpop.permute.xlu0 %2304 }
 0x3ee   :  { %v2311_v29 = vsel %vm167_vm13, %v2297_v26, %v2305_v22  ;;  %v2323_v24 = vsel %vm167_vm13, %v2305_v22, %v2281_v10 }
 0x3f1   :  { %v10064_v46 = vpop.permute.xlu1 %2225  ;;  %v10066_v55 = vpop.permute.xlu0 %2211 }
 0x3f5   :  { %v2283_v48 = vpop.permute.xlu1 %2282  ;;  %v10068_v30 = vpop.permute.xlu0 %2227 }
 0x3f9   :  { %v2299_v21 = vpop.permute.xlu1 %2298  ;;  %v2285_v23 = vpop.permute.xlu0 %2284 }
 0x3fd   :  { %v10070_v54 = vpop.permute.xlu1 %2205  ;;  %v2301_v37 = vpop.permute.xlu0 %2300 }
 0x401   :  { %v10072_v62 = vpop.permute.xlu1 %2221  ;;  %v10074_v31 = vpop.permute.xlu0 %2207 }
 0x405   :  { %v10076_v33 = vpop.permute.xlu1 %2754  ;;  %v10078_v63 = vpop.permute.xlu0 %2223 }
 0x406   :  { %14106 = vst [vmem:[#allocation25_spill] sm:$0xff] %v10076_v33 }
 0x409   :  { %v2291_v3 = vpop.permute.xlu1 %2290  ;;  %v10080_v42 = vpop.permute.xlu0 %2756 }
 0x40a   :  { %14107 = vst [vmem:[#allocation26_spill] sm:$0xff] %v10080_v42  ;;  %v2320_v60 = vsel %vm167_vm13, %v2283_v48, %v2291_v3  ;;  %v2316_v45 = vsel %vm167_vm13, %v2291_v3, %v2299_v21  ;;  %v2327_v3 = vmul.f32 %v2318_v58, %v14109_v18 }
 0x40b   :  { %v2335_v41 = vmul.f32 %v2320_v60, %v14109_v18 }
 0x40d   :  { %v2307_v12 = vpop.permute.xlu1 %2306  ;;  %v2293_v50 = vpop.permute.xlu0 %2292 }
 0x40e   :  { %v2321_v7 = vsel %vm167_vm13, %v2285_v23, %v2293_v50  ;;  %v2317_v36 = vsel %vm167_vm13, %v2293_v50, %v2301_v37  ;;  %v2312_v25 = vsel %vm167_vm13, %v2299_v21, %v2307_v12  ;;  %v2324_v0 = vsel %vm167_vm13, %v2307_v12, %v2283_v48  ;;  %v14110_v50 = vld [vmem:[#allocation14_spill] sm:$0xff]  ;;  %v14112_v12 = vld [vmem:[#allocation11_spill] sm:$0xff] }
 0x40f   :  { %v2339_v56 = vmul.f32 %v2321_v7, %v14109_v18  ;;  %v2333_v26 = vmul.f32 %v2311_v29, %v14110_v50  ;;  %v2340_v7 = vmul.f32 %v2317_v36, %v14111_v9  ;;  %v2334_v59 = vmul.f32 %v2324_v0, %v14112_v12 }
 0x410   :  { %v2337_v33 = vmul.f32 %v2312_v25, %v14110_v50  ;;  %v2314_v21 = vsel %vm167_vm13, %v2287_v39, %v10030_v57  ;;  %v2330_v36 = vmul.f32 %v2323_v24, %v14112_v12  ;;  %v2332_v0 = vmul.f32 %v2315_v14, %v14111_v9 }
 0x411   :  { %v10106_v8 = vpop.permute.xlu1 %2770  ;;  %v2309_v15 = vpop.permute.xlu0 %2308  ;;  %v2347_v60 = vpack.c.bf16 %v2339_v56, %v2335_v41  ;;  %v2329_v41 = vmul.f32 %v2310_v13, %v14110_v50  ;;  %v2343_v39 = vpack.c.bf16 %v2331_v17, %v2327_v3  ;;  %v2241_v3 = vsel %vm95_vm14, %v10036_v1, %v10062_v35 }
 0x412   :  { %v2313_v42 = vsel %vm167_vm13, %v2301_v37, %v2309_v15  ;;  %v2325_v48 = vsel %vm167_vm13, %v2309_v15, %v2285_v23  ;;  %v2322_v37 = vsel %vm167_vm13, %v2303_v40, %v10024_v19  ;;  %v2336_v23 = vmul.f32 %v2316_v45, %v14111_v9 }
 0x413   :  { %v2338_v10 = vmul.f32 %v2325_v48, %v14112_v12  ;;  %v2341_v22 = vmul.f32 %v2313_v42, %v14110_v50  ;;  %2383 = vmatprep.subr.bf16.mxu0 %v2347_v60  ;;  %v2326_v58 = vmul.f32 %v2322_v37, %v14112_v12  ;;  %v2345_v19 = vpack.c.bf16 %v2333_v26, %v2329_v41  ;;  %v14113_v48 = vld [vmem:[#allocation8_spill] sm:$0xff] }
 0x414   :  { %v2348_v57 = vpack.c.bf16 %v2340_v7, %v2336_v23  ;;  %v2328_v40 = vmul.f32 %v2314_v21, %v14111_v9  ;;  %v2242_v26 = vsel %vm95_vm14, %v10047_v38, %v10066_v55  ;;  %v14114_v21 = vmov 0  }
 0x415   :  { %v2214_v29 = vpop.permute.xlu1 %2213  ;;  %v2346_v56 = vpack.c.bf16 %v2338_v10, %v2334_v59  ;;  %v10133_v42 = vpop.permute.xlu0 %2772  ;;  %v2349_v25 = vpack.c.bf16 %v2341_v22, %v2337_v33  ;;  %v2342_v45 = vpack.c.bf16 %v2330_v36, %v2326_v58  ;;  %v8638_v33 = vld [vmem:[#allocation2 + $0xb0] sm:$0xff]   ;;  %v2233_v37 = vsel %vm95_vm14, %v10045_v51, %v10064_v46 }
 0x416   :  { %v2344_v15 = vpack.c.bf16 %v2332_v0, %v2328_v40  ;;  %v2243_v14 = vsel %vm95_vm14, %v10070_v54, %v2214_v29  ;;  %v2254_v36 = vmul.f32 %v2242_v26, %v14113_v48  ;;  %v14115_v58 = vld [vmem:[#allocation7_spill] sm:$0xff] }
 0x417   :  { %2384 = vmatpush1.bf16.msra.mxu0 %v2346_v56  ;;  %2436 = vmatprep.subr.bf16.mxu1 %v2349_v25  ;;  %v2258_v59 = vmul.f32 %v2243_v14, %v14113_v48  ;;  %v2234_v56 = vsel %vm95_vm14, %v10057_v4, %v10068_v30  ;;  %v2246_v25 = vsel %vm95_vm14, %v10068_v30, %v10047_v38  ;;  %v14117_v38 = vld [vmem:[#allocation9_spill] sm:$0xff] }
 0x418   :  { %2385 = vmatprep.subr.bf16.mxu0 %v2343_v39  ;;  %2437 = vmatpush1.bf16.msra.mxu1 %v2348_v57  ;;  %v2239_v39 = vsel %vm95_vm14, %v2214_v29, %v10072_v62 }
 0x419   :  { %v2230_v13 = vpop.permute.xlu1 %2229  ;;  %2438 = vmatprep.subr.bf16.mxu1 %v2345_v19  ;;  %v10138_v24 = vpop.permute.xlu0 %2752 }
 0x41a   :  { %v2247_v10 = vsel %vm95_vm14, %v2230_v13, %v10070_v54  ;;  %v2235_v54 = vsel %vm95_vm14, %v10072_v62, %v2230_v13  ;;  %v2250_v62 = vmul.f32 %v2241_v3, %v14113_v48 }
 0x41b   :  { %2386 = vmatpush1.bf16.msra.mxu0 %v2342_v45  ;;  %v2257_v19 = vmul.f32 %v2247_v10, %v14115_v58  ;;  %v8639_v45 = vld [vmem:[#allocation2 + $0xb8] sm:$0xff]  }
 0x41c   :  { %2439 = vmatpush1.bf16.msra.mxu1 %v2344_v15  ;;  %v14116_v15 = vld [vmem:[#allocation10_spill] sm:$0xff] }
 0x41d   :  { %v10143_v17 = vpop.permute.xlu1 %2762  ;;  %v2216_v60 = vpop.permute.xlu0 %2215  ;;  %v2256_v29 = vmul.f32 %v2234_v56, %v14116_v15 }
 0x41e   :  { %v2244_v7 = vsel %vm95_vm14, %v10074_v31, %v2216_v60  ;;  %8424 = vmatmul.mubr.msk.bf16.vlgmr.msra.gmra.mxu0 %vm240_vm15, %v8638_v33  ;;  %v2240_v23 = vsel %vm95_vm14, %v2216_v60, %v10078_v63 }
 0x41f   :  { %v2262_v22 = vmul.f32 %v2244_v7, %v14113_v48  ;;  %8426 = vmatmul.mubr.msk.bf16.vlgmr.msra.gmra.mxu1 %vm240_vm15, %v8638_v33  ;;  %2413 = vmatprep.mubr.bf16.mxu0 %v14114_v21  ;;  %v2260_v33 = vmul.f32 %v2235_v54, %v14116_v15  ;;  %v2263_v30 = vmul.f32 %v2240_v23, %v14117_v38 }
 0x420   :  { %2466 = vmatprep.mubr.bf16.mxu1 %v14114_v21  ;;  %v2253_v7 = vmul.f32 %v2246_v25, %v14115_v58 }
 0x421   :  { %v10174_v41 = vpop.permute.xlu1 %2778  ;;  %v2232_v0 = vpop.permute.xlu0 %2231  ;;  %v2270_v57 = vpack.c.bf16 %v2262_v22, %v2258_v59  ;;  %v2259_v59 = vmul.f32 %v2239_v39, %v14117_v38 }
 0x422   :  { %v2236_v40 = vsel %vm95_vm14, %v10078_v63, %v2232_v0  ;;  %v2248_v13 = vsel %vm95_vm14, %v2232_v0, %v10074_v31  ;;  %v2245_v63 = vsel %vm95_vm14, %v10064_v46, %v10036_v1  ;;  %v2238_v31 = vsel %vm95_vm14, %v10066_v55, %v10057_v4 }
 0x423   :  { %v2261_v14 = vmul.f32 %v2248_v13, %v14115_v58  ;;  %v2264_v60 = vmul.f32 %v2236_v40, %v14116_v15  ;;  %2505 = vmatprep.subr.bf16.mxu0 %v2270_v57  ;;  %v2237_v1 = vsel %vm95_vm14, %v10062_v35, %v10045_v51  ;;  %v2252_v46 = vmul.f32 %v2233_v37, %v14116_v15 }
 0x424   :  { %v2266_v4 = vpack.c.bf16 %v2254_v36, %v2250_v62  ;;  %v2249_v55 = vmul.f32 %v2245_v63, %v14115_v58  ;;  %v2255_v54 = vmul.f32 %v2238_v31, %v14117_v38  ;;  %v2271_v23 = vpack.c.bf16 %v2263_v30, %v2259_v59  ;;  %v8640_v36 = vld [vmem:[#allocation2 + $0xa0] sm:$0xff]   ;;  %v14119_v30 = vld [vmem:[#allocation15_spill] sm:$0xff]  ;;  %v14121_v59 = vld [vmem:[#allocation26_spill] sm:$0xff] }
 0x425   :  { %v10210_v26 = vpop.permute.xlu1 %2750  ;;  %v2269_v10 = vpack.c.bf16 %v2261_v14, %v2257_v19  ;;  %v10214_v22 = vpop.permute.xlu0 %2760  ;;  %v2272_v3 = vpack.c.bf16 %v2264_v60, %v2260_v33  ;;  %v2268_v25 = vpack.c.bf16 %v2256_v29, %v2252_v46  ;;  %v2251_v0 = vmul.f32 %v2237_v1, %v14117_v38  ;;  %v14120_v60 = vld [vmem:[#allocation16_spill] sm:$0xff]  ;;  %v14122_v46 = vld [vmem:[#allocation17_spill] sm:$0xff] }
 0x426   :  { %8425 = vmatmul.mubr.msk.bf16.gmra.mxu0 %vm240_vm15, %v8639_v45  ;;  %v2265_v51 = vpack.c.bf16 %v2253_v7, %v2249_v55  ;;  %v2604_v37 = vpack.c.bf16 %v9962_v11, %v9951_v43  ;;  %v2606_v19 = vpack.c.bf16 %v9968_v16, %v9958_v20  ;;  %v2603_v13 = vpack.c.bf16 %v9918_v6, %v9907_v47 }
 0x427   :  { %8427 = vmatmul.mubr.msk.bf16.gmra.mxu1 %vm240_vm15, %v8639_v45  ;;  %2506 = vmatpush1.bf16.msra.mxu0 %v2269_v10  ;;  %v2267_v57 = vpack.c.bf16 %v2255_v54, %v2251_v0  ;;  %v2600_v43 = vpack.c.bf16 %v9885_v28, %v9870_v32  ;;  %v2605_v11 = vpack.c.bf16 %v9929_v34, %v9914_v5  ;;  %v8641_v32 = vld [vmem:[#allocation2 + $0xa8] sm:$0xff]  }
 0x428   :  { %2558 = vmatprep.subr.bf16.mxu1 %v2272_v3  ;;  %2507 = vmatprep.subr.bf16.mxu0 %v2266_v4  ;;  %v2602_v16 = vpack.c.bf16 %v9896_v27, %v9879_v2  ;;  %v2599_v6 = vpack.c.bf16 %v9842_v53, %v9834_v49  ;;  %v2601_v28 = vpack.c.bf16 %v9859_v52, %v9845_v61  ;;  %v14118_v52 = vld [vmem:[#allocation25_spill] sm:$0xff] }
 0x429   :  { %v2759_v56 = vpop.permute.xlu1 %2758  ;;  %2559 = vmatpush1.bf16.msra.mxu1 %v2271_v23  ;;  %v10226_v35 = vpop.permute.xlu0 %2768  ;;  %2525 = vmatprep.mubr.bf16.mxu0 %v14114_v21  ;;  %v2788_v61 = vsel %vm633_vm0, %v10143_v17, %v10106_v8  ;;  %v2792_v2 = vsel %vm633_vm0, %v14118_v52, %v10143_v17  ;;  %v8642_v27 = vld [vmem:[#allocation2 + $0xc0] sm:$0xff]   ;;  %v2784_v63 = vsel %vm633_vm0, %v10106_v8, %v10174_v41 }
 0x42a   :  { %2560 = vmatprep.subr.bf16.mxu1 %v2268_v25  ;;  %2578 = vmatprep.mubr.bf16.mxu1 %v14114_v21  ;;  %v2806_v14 = vmul.f32 %v2792_v2, %v14119_v30  ;;  %v2807_v62 = vmul.f32 %v2788_v61, %v14120_v60  ;;  %v2796_v17 = vsel %vm633_vm0, %v10174_v41, %v14118_v52 }
 0x42b   :  { %2508 = vmatpush1.bf16.msra.mxu0 %v2265_v51  ;;  %v2787_v29 = vsel %vm633_vm0, %v10214_v22, %v10226_v35  ;;  %v2790_v8 = vsel %vm633_vm0, %v10210_v26, %v2759_v56  ;;  %v2808_v4 = vmul.f32 %v2784_v63, %v14122_v46  ;;  %v2791_v55 = vsel %vm633_vm0, %v10138_v24, %v10214_v22 }
 0x42c   :  { %2640 = vmatprep.subr.bf16.mxu0 %v2604_v37  ;;  %v2803_v23 = vmul.f32 %v2787_v29, %v14120_v60  ;;  %v14123_v37 = vld [vmem:[#allocation18_spill] sm:$0xff] }
 0x42d   :  { %v10232_v39 = vpop.permute.xlu1 %2766  ;;  %2561 = vmatpush1.bf16.msra.mxu1 %v2267_v57  ;;  %v10236_v40 = vpop.permute.xlu0 %2776  ;;  %v2798_v57 = vmul.f32 %v2790_v8, %v14119_v30 }
 0x42e   :  { %2693 = vmatprep.subr.bf16.mxu1 %v2606_v19  ;;  %8430 = vmatmul.mubr.msk.bf16.vlgmr.msra.gmra.mxu0 %vm240_vm15, %v8640_v36  ;;  %v2786_v45 = vsel %vm633_vm0, %v2759_v56, %v10232_v39 }
 0x42f   :  { %2641 = vmatpush1.bf16.msra.mxu0 %v2603_v13  ;;  %2535 = vmatprep.mubr.bf16.mxu0 %v14114_v21  ;;  %v2799_v41 = vmul.f32 %v2786_v45, %v14120_v60  ;;  %v8643_v13 = vld [vmem:[#allocation2 + $0xc8] sm:$0xff]  }
 0x430   :  { %8432 = vmatmul.mubr.msk.bf16.vlgmr.msra.gmra.mxu1 %vm240_vm15, %v8640_v36  ;;  %2642 = vmatprep.subr.bf16.mxu0 %v2600_v43  ;;  %v2809_v36 = vmul.f32 %v2796_v17, %v14123_v37 }
 0x431   :  { %v2775_v20 = vpop.permute.xlu1 %2774  ;;  %2694 = vmatpush1.bf16.msra.mxu1 %v2605_v11  ;;  %v10249_v47 = vpop.permute.xlu0 %2971  ;;  %2588 = vmatprep.mubr.bf16.mxu1 %v14114_v21 }
 0x432   :  { %2695 = vmatprep.subr.bf16.mxu1 %v2602_v16  ;;  %v2794_v56 = vsel %vm633_vm0, %v2775_v20, %v10210_v26  ;;  %v2795_v26 = vsel %vm633_vm0, %v10236_v40, %v10138_v24  ;;  %v2815_v16 = vpack.c.bf16 %v2803_v23, %v2799_v41 }
 0x433   :  { %2643 = vmatpush1.bf16.msra.mxu0 %v2599_v6  ;;  %v2802_v6 = vmul.f32 %v2791_v55, %v14119_v30  ;;  %v2805_v45 = vmul.f32 %v2795_v26, %v14123_v37  ;;  %v14127_v26 = vld [vmem:[#allocation22_spill] sm:$0xff] }
 0x435   :  { %v10256_v5 = vpop.permute.xlu1 %2969  ;;  %2696 = vmatpush1.bf16.msra.mxu1 %v2601_v28  ;;  %v10258_v34 = vpop.permute.xlu0 %2987  ;;  %v2814_v2 = vpack.c.bf16 %v2802_v6, %v2798_v57 }
 0x436   :  { %8431 = vmatmul.mubr.msk.bf16.gmra.mxu0 %vm240_vm15, %v8641_v32 }
 0x437   :  { %2660 = vmatprep.mubr.bf16.mxu0 %v14114_v21 }
 0x438   :  { %8433 = vmatmul.mubr.msk.bf16.gmra.mxu1 %vm240_vm15, %v8641_v32  ;;  %v2801_v32 = vmul.f32 %v2794_v56, %v14123_v37 }
 0x439   :  { %v10263_v49 = vpop.permute.xlu1 %2977  ;;  %v10265_v53 = vpop.permute.xlu0 %2967  ;;  %2713 = vmatprep.mubr.bf16.mxu1 %v14114_v21 }
 0x43d   :  { %v10279_v33 = vpop.permute.xlu1 %2985  ;;  %v2765_v31 = vpop.permute.xlu0 %2764 }
 0x43e   :  { %v2789_v7 = vsel %vm633_vm0, %v2765_v31, %v10133_v42  ;;  %v2793_v10 = vsel %vm633_vm0, %v14121_v59, %v2765_v31  ;;  %8436 = vmatmul.mubr.msk.bf16.vlgmr.msra.gmra.mxu0 %vm240_vm15, %v8642_v27  ;;  %v8644_v31 = vld [vmem:[#allocation2 + $0xd0] sm:$0xff]  }
 0x43f   :  { %v2810_v3 = vmul.f32 %v2793_v10, %v14119_v30  ;;  %v2811_v1 = vmul.f32 %v2789_v7, %v14120_v60  ;;  %2670 = vmatprep.mubr.bf16.mxu0 %v14114_v21  ;;  %v14124_v7 = vld [vmem:[#allocation19_spill] sm:$0xff]  ;;  %v14125_v10 = vld [vmem:[#allocation20_spill] sm:$0xff] }
 0x440   :  { %8438 = vmatmul.mubr.msk.bf16.vlgmr.msra.gmra.mxu1 %vm240_vm15, %v8642_v27  ;;  %v2783_v27 = vsel %vm633_vm0, %v10226_v35, %v10236_v40  ;;  %v3007_v35 = vsel %vm844_vm3, %v10256_v5, %v10263_v49  ;;  %v3003_v40 = vsel %vm844_vm3, %v10263_v49, %v10279_v33 }
 0x441   :  { %v2994_v54 = vpop.permute.xlu1 %2993  ;;  %v2818_v25 = vpack.c.bf16 %v2810_v3, %v2806_v14  ;;  %v2781_v0 = vpop.permute.xlu0 %2780  ;;  %v2819_v51 = vpack.c.bf16 %v2811_v1, %v2807_v62  ;;  %2723 = vmatprep.mubr.bf16.mxu1 %v14114_v21  ;;  %v2817_v14 = vpack.c.bf16 %v2805_v45, %v2801_v32  ;;  %v2804_v62 = vmul.f32 %v2783_v27, %v14122_v46 }
 0x442   :  { %v2785_v22 = vsel %vm633_vm0, %v10133_v42, %v2781_v0  ;;  %v2797_v19 = vsel %vm633_vm0, %v2781_v0, %v14121_v59  ;;  %v2782_v42 = vsel %vm633_vm0, %v10232_v39, %v2775_v20  ;;  %v3021_v59 = vmul.f32 %v3007_v35, %v14124_v7 }
 0x443   :  { %v2812_v43 = vmul.f32 %v2785_v22, %v14122_v46  ;;  %v2813_v11 = vmul.f32 %v2797_v19, %v14123_v37  ;;  %2855 = vmatprep.subr.bf16.mxu0 %v2819_v51  ;;  %v2800_v39 = vmul.f32 %v2782_v42, %v14122_v46  ;;  %v3022_v8 = vmul.f32 %v3003_v40, %v14125_v10  ;;  %v8645_v42 = vld [vmem:[#allocation2 + $0xd8] sm:$0xff]  }
 0x444   :  { %2856 = vmatpush1.bf16.msra.mxu0 %v2818_v25  ;;  %v2999_v41 = vsel %vm844_vm3, %v10279_v33, %v2994_v54  ;;  %v3011_v49 = vsel %vm844_vm3, %v2994_v54, %v10256_v5  ;;  %v14126_v25 = vld [vmem:[#allocation21_spill] sm:$0xff] }
 0x445   :  { %v10339_v28 = vpop.permute.xlu1 %2965  ;;  %v2820_v61 = vpack.c.bf16 %v2812_v43, %v2808_v4  ;;  %v2976_v52 = vpop.permute.xlu0 %2975  ;;  %2857 = vmatprep.subr.bf16.mxu0 %v2815_v16  ;;  %v2821_v24 = vpack.c.bf16 %v2813_v11, %v2809_v36  ;;  %v2816_v17 = vpack.c.bf16 %v2804_v62, %v2800_v39  ;;  %v3023_v0 = vmul.f32 %v2999_v41, %v14126_v25 }
 0x446   :  { %8437 = vmatmul.mubr.msk.bf16.gmra.mxu0 %vm240_vm15, %v8643_v13  ;;  %v3006_v36 = vsel %vm844_vm3, %v10265_v53, %v2976_v52  ;;  %v3024_v43 = vmul.f32 %v3011_v49, %v14127_v26 }
 0x447   :  { %2908 = vmatprep.subr.bf16.mxu1 %v2821_v24  ;;  %2875 = vmatprep.mubr.bf16.mxu0 %v14114_v21 }
 0x448   :  { %8439 = vmatmul.mubr.msk.bf16.gmra.mxu1 %vm240_vm15, %v8643_v13  ;;  %2858 = vmatpush1.bf16.msra.mxu0 %v2814_v2  ;;  %v3017_v2 = vmul.f32 %v3006_v36, %v14124_v7 }
 0x449   :  { %v2974_v20 = vpop.permute.xlu1 %2973  ;;  %2909 = vmatpush1.bf16.msra.mxu1 %v2820_v61  ;;  %v2984_v63 = vpop.permute.xlu0 %2983  ;;  %2928 = vmatprep.mubr.bf16.mxu1 %v14114_v21 }
 0x44a   :  { %2910 = vmatprep.subr.bf16.mxu1 %v2817_v14  ;;  %v3002_v4 = vsel %vm844_vm3, %v2976_v52, %v2984_v63  ;;  %v3005_v23 = vsel %vm844_vm3, %v10339_v28, %v2974_v20 }
 0x44b   :  { %v3018_v57 = vmul.f32 %v3002_v4, %v14125_v10  ;;  %v3013_v11 = vmul.f32 %v3005_v23, %v14124_v7 }
 0x44d   :  { %v2982_v29 = vpop.permute.xlu1 %2981  ;;  %2911 = vmatpush1.bf16.msra.mxu1 %v2816_v17  ;;  %v2980_v1 = vpop.permute.xlu0 %2979  ;;  %v3029_v39 = vpack.c.bf16 %v3017_v2, %v3013_v11  ;;  %v8647_v17 = vld [vmem:[#allocation2 + $0xe8] sm:$0xff]  }
 0x44e   :  { %v3001_v3 = vsel %vm844_vm3, %v2974_v20, %v2982_v29  ;;  %v3004_v55 = vsel %vm844_vm3, %v2980_v1, %v10258_v34  ;;  %v3008_v33 = vsel %vm844_vm3, %v10249_v47, %v2980_v1  ;;  %8442 = vmatmul.mubr.msk.bf16.vlgmr.msra.gmra.mxu0 %vm240_vm15, %v8644_v31 }
 0x44f   :  { %v3014_v56 = vmul.f32 %v3001_v3, %v14125_v10  ;;  %v3025_v5 = vmul.f32 %v3008_v33, %v14124_v7  ;;  %v3026_v54 = vmul.f32 %v3004_v55, %v14125_v10  ;;  %2885 = vmatprep.mubr.bf16.mxu0 %v14114_v21 }
 0x450   :  { %8444 = vmatmul.mubr.msk.bf16.vlgmr.msra.gmra.mxu1 %vm240_vm15, %v8644_v31 }
 0x451   :  { %v2990_v51 = vpop.permute.xlu1 %2989  ;;  %v3033_v22 = vpack.c.bf16 %v3025_v5, %v3021_v59  ;;  %v2996_v19 = vpop.permute.xlu0 %2995  ;;  %v3034_v13 = vpack.c.bf16 %v3026_v54, %v3022_v8  ;;  %2938 = vmatprep.mubr.bf16.mxu1 %v14114_v21  ;;  %v3030_v24 = vpack.c.bf16 %v3018_v57, %v3014_v56 }
 0x452   :  { %v3000_v16 = vsel %vm844_vm3, %v10258_v34, %v2996_v19  ;;  %v3012_v6 = vsel %vm844_vm3, %v2996_v19, %v10249_v47  ;;  %v2997_v32 = vsel %vm844_vm3, %v2982_v29, %v2990_v51  ;;  %v3009_v34 = vsel %vm844_vm3, %v2990_v51, %v10339_v28 }
 0x453   :  { %v3027_v61 = vmul.f32 %v3000_v16, %v14126_v25  ;;  %v3028_v52 = vmul.f32 %v3012_v6, %v14127_v26  ;;  %3070 = vmatprep.subr.bf16.mxu0 %v3034_v13  ;;  %v3015_v20 = vmul.f32 %v2997_v32, %v14126_v25  ;;  %v3016_v35 = vmul.f32 %v3009_v34, %v14127_v26 }
 0x454   :  { %3071 = vmatpush1.bf16.msra.mxu0 %v3033_v22 }
 0x455   :  { %v3035_v27 = vpack.c.bf16 %v3027_v61, %v3023_v0  ;;  %v2992_v45 = vpop.permute.xlu0 %2991  ;;  %3072 = vmatprep.subr.bf16.mxu0 %v3030_v24  ;;  %v3036_v47 = vpack.c.bf16 %v3028_v52, %v3024_v43 }
 0x456   :  { %v2998_v14 = vsel %vm844_vm3, %v2984_v63, %v2992_v45  ;;  %v3010_v62 = vsel %vm844_vm3, %v2992_v45, %v10265_v53  ;;  %8443 = vmatmul.mubr.msk.bf16.gmra.mxu0 %vm240_vm15, %v8645_v42  ;;  %v8646_v53 = vld [vmem:[#allocation2 + $0xe0] sm:$0xff]  }
 0x457   :  { %v3019_v28 = vmul.f32 %v2998_v14, %v14126_v25  ;;  %v3020_v40 = vmul.f32 %v3010_v62, %v14127_v26  ;;  %3123 = vmatprep.subr.bf16.mxu1 %v3036_v47  ;;  %3090 = vmatprep.mubr.bf16.mxu0 %v14114_v21 }
 0x458   :  { %8445 = vmatmul.mubr.msk.bf16.gmra.mxu1 %vm240_vm15, %v8645_v42  ;;  %3073 = vmatpush1.bf16.msra.mxu0 %v3029_v39 }
 0x459   :  { %v3031_v31 = vpack.c.bf16 %v3019_v28, %v3015_v20  ;;  %3124 = vmatpush1.bf16.msra.mxu1 %v3035_v27  ;;  %v3032_v63 = vpack.c.bf16 %v3020_v40, %v3016_v35  ;;  %3143 = vmatprep.mubr.bf16.mxu1 %v14114_v21 }
 0x45b   :  { %3125 = vmatprep.subr.bf16.mxu1 %v3032_v63 }
 0x45d   :  { %3126 = vmatpush1.bf16.msra.mxu1 %v3031_v31 }
 0x45e   :  { %8448 = vmatmul.mubr.msk.bf16.vlgmr.msra.gmra.mxu0 %vm240_vm15, %v8646_v53  ;;  %v10508_v46 = vpop.permute.xlu1 %3197 }
 0x45f   :  { %3100 = vmatprep.mubr.bf16.mxu0 %v14114_v21 }
 0x460   :  { %8450 = vmatmul.mubr.msk.bf16.vlgmr.msra.gmra.mxu1 %vm240_vm15, %v8646_v53 }
 0x461   :  { %3153 = vmatprep.mubr.bf16.mxu1 %v14114_v21 }
 0x466   :  { %8449 = vmatmul.mubr.msk.bf16.gmra.mxu0 %vm240_vm15, %v8647_v17 }
 0x467   :  { %3471 = vmatprep.mubr.bf16.mxu0 %v14114_v21 }
 0x468   :  { %8451 = vmatmul.mubr.msk.bf16.gmra.mxu1 %vm240_vm15, %v8647_v17 }
 0x469   :  { %3524 = vmatprep.mubr.bf16.mxu1 %v14114_v21 }
 0x4de   :  { %v10430_v29 = vpop.f32.mrf.mxu0 }
 0x4df   :  { %v10432_v59 = vpop.f32.mrf.mxu1 }
 0x4e0   :  { %v10434_v8 = vpop.f32.mrf.mxu0 }
 0x4e1   :  { %v10436_v41 = vpop.f32.mrf.mxu1 }
 0x4e2   :  { %v10438_v3 = vpop.f32.mrf.mxu0 }
 0x4e3   :  { %v10440_v1 = vpop.f32.mrf.mxu1 }
 0x4e4   :  { %v10442_v49 = vpop.f32.mrf.mxu0 }
 0x4e5   :  { %v10444_v4 = vpop.f32.mrf.mxu1 }
 0x4e6   :  { %v2415_v55 = vpop.f32.mrf.mxu0 }
 0x4e7   :  { %v2468_v33 = vpop.f32.mrf.mxu1 }
 0x4e8   :  { %v2417_v23 = vpop.f32.mrf.mxu0 }
 0x4e9   :  { %v2470_v56 = vpop.f32.mrf.mxu1 }
 0x4ea   :  { %v2419_v5 = vpop.f32.mrf.mxu0 }
 0x4eb   :  { %v2472_v54 = vpop.f32.mrf.mxu1 }
 0x4ec   :  { %v10446_v0 = vpop.f32.mrf.mxu0 }
 0x4ed   :  { %v10448_v51 = vpop.f32.mrf.mxu1 }
 0x4ee   :  { %14128 = vst [vmem:[#allocation24_spill] sm:$0xff] %v10448_v51  ;;  %v2527_v36 = vpop.f32.mrf.mxu0 }
 0x4ef   :  { %v2528_v60 = vadd.f32 %v2527_v36, %v10430_v29  ;;  %v10523_v29 = vpop.permute.xlu0 %3202 }
 0x4f0   :  { %v2580_v57 = vpop.f32.mrf.mxu1  ;;  %v10450_v22 = vpop.f32.mrf.mxu0 }
 0x4f1   :  { %v2581_v15 = vadd.f32 %v2580_v57, %v10432_v59 }
 0x4f2   :  { %v10452_v19 = vpop.f32.mrf.mxu1  ;;  %v2531_v13 = vpop.f32.mrf.mxu0 }
 0x4f3   :  { %v2532_v50 = vadd.f32 %v2531_v13, %v10438_v3 }
 0x4f4   :  { %v10454_v43 = vpop.f32.mrf.mxu1  ;;  %v10456_v11 = vpop.f32.mrf.mxu0 }
 0x4f5   :  { %v2585_v59 = vadd.f32 %v10454_v43, %v10440_v1 }
 0x4f6   :  { %v10458_v16 = vpop.f32.mrf.mxu1  ;;  %v2537_v6 = vpop.f32.mrf.mxu0 }
 0x4f7   :  { %v10460_v42 = vadd.f32 %v2537_v6, %v2415_v55 }
 0x4f8   :  { %v2590_v32 = vpop.f32.mrf.mxu1  ;;  %v2539_v61 = vpop.f32.mrf.mxu0 }
 0x4f9   :  { %v10462_v52 = vadd.f32 %v2590_v32, %v2468_v33  ;;  %v2540_v24 = vadd.f32 %v2539_v61, %v2417_v23 }
 0x4fa   :  { %v2592_v2 = vpop.f32.mrf.mxu1  ;;  %v2541_v34 = vpop.f32.mrf.mxu0 }
 0x4fb   :  { %v2593_v27 = vadd.f32 %v2592_v2, %v2470_v56  ;;  %v10464_v45 = vadd.f32 %v2541_v34, %v2419_v5 }
 0x4fc   :  { %v2594_v47 = vpop.f32.mrf.mxu1  ;;  %v10466_v39 = vpop.f32.mrf.mxu0 }
 0x4fd   :  { %v10468_v20 = vadd.f32 %v2594_v47, %v2472_v54 }
 0x4fe   :  { %v10470_v14 = vpop.f32.mrf.mxu1  ;;  %v2662_v62 = vpop.f32.mrf.mxu0 }
 0x4ff   :  { %14129 = vst [vmem:[#allocation28_spill] sm:$0xff] %v10470_v14  ;;  %v2734_v58 = vadd.f32 %v2662_v62, %v2528_v60 }
 0x500   :  { %v2715_v35 = vpop.f32.mrf.mxu1  ;;  %v10472_v28 = vpop.f32.mrf.mxu0 }
 0x501   :  { %v2736_v12 = vadd.f32 %v2715_v35, %v2581_v15 }
 0x502   :  { %v10474_v40 = vpop.f32.mrf.mxu1  ;;  %v2666_v31 = vpop.f32.mrf.mxu0 }
 0x503   :  { %v2738_v60 = vadd.f32 %v2666_v31, %v2532_v50 }
 0x504   :  { %v2719_v63 = vpop.f32.mrf.mxu1  ;;  %v10476_v53 = vpop.f32.mrf.mxu0 }
 0x505   :  { %v2740_v15 = vadd.f32 %v2719_v63, %v2585_v59 }
 0x506   :  { %v10478_v17 = vpop.f32.mrf.mxu1  ;;  %v10480_v55 = vpop.f32.mrf.mxu0 }
 0x508   :  { %v10482_v33 = vpop.f32.mrf.mxu1  ;;  %v2674_v23 = vpop.f32.mrf.mxu0 }
 0x509   :  { %v10484_v56 = vadd.f32 %v2674_v23, %v2540_v24 }
 0x50a   :  { %v2727_v5 = vpop.f32.mrf.mxu1  ;;  %v10486_v54 = vpop.f32.mrf.mxu0 }
 0x50b   :  { %v10488_v6 = vadd.f32 %v2727_v5, %v2593_v27 }
 0x50c   :  { %v10490_v32 = vpop.f32.mrf.mxu1  ;;  %v10492_v61 = vpop.f32.mrf.mxu0 }
 0x50d   :  { %14130 = vst [vmem:[#allocation29_spill] sm:$0xff] %v10488_v6 }
 0x50e   :  { %v10494_v2 = vpop.f32.mrf.mxu1  ;;  %v2877_v34 = vpop.f32.mrf.mxu0 }
 0x50f   :  { %14131 = vst [vmem:[#allocation27_spill] sm:$0xff] %v10494_v2  ;;  %v2949_v9 = vadd.f32 %v2877_v34, %v2734_v58  ;;  %v3188_v2 = vpop.permute.xlu1 %3187 }
 0x510   :  { %v2930_v47 = vpop.f32.mrf.mxu1  ;;  %v2879_v26 = vpop.f32.mrf.mxu0 }
 0x511   :  { %v2951_v36 = vadd.f32 %v2930_v47, %v2736_v12  ;;  %v3193_v12 = vpop.permute.xlu0 %3192 }
 0x512   :  { %v10496_v25 = vpop.f32.mrf.mxu1  ;;  %v2881_v10 = vpop.f32.mrf.mxu0 }
 0x513   :  { %v2953_v58 = vadd.f32 %v2881_v10, %v2738_v60  ;;  %v2742_v60 = vadd.f32 %v10480_v55, %v10460_v42  ;;  %v2744_v42 = vadd.f32 %v10482_v33, %v10462_v52 }
 0x514   :  { %v2934_v7 = vpop.f32.mrf.mxu1  ;;  %v10498_v24 = vpop.f32.mrf.mxu0 }
 0x516   :  { %v10500_v23 = vpop.f32.mrf.mxu1  ;;  %v10502_v37 = vpop.f32.mrf.mxu0 }
 0x518   :  { %v10504_v27 = vpop.f32.mrf.mxu1  ;;  %v10506_v5 = vpop.f32.mrf.mxu0 }
 0x51a   :  { %v10511_v30 = vpop.f32.mrf.mxu1  ;;  %v10513_v38 = vpop.f32.mrf.mxu0 }
 0x51b   :  { %14132 = vst [vmem:[#allocation23_spill] sm:$0xff] %v10511_v30 }
 0x51c   :  { %v10516_v21 = vpop.f32.mrf.mxu1  ;;  %v10518_v48 = vpop.f32.mrf.mxu0 }
 0x51d   :  { %14133 = vst [vmem:[#allocation25_spill] sm:$0xff] %v10518_v48 }
 0x51e   :  { %v10521_v18 = vpop.f32.mrf.mxu1  ;;  %v3092_v44 = vpop.f32.mrf.mxu0 }
 0x51f   :  { %14134 = vst [vmem:[#allocation26_spill] sm:$0xff] %v10521_v18  ;;  %v3164_v14 = vadd.f32 %v3092_v44, %v2949_v9  ;;  %v2955_v18 = vadd.f32 %v2934_v7, %v2740_v15  ;;  %v2530_v44 = vadd.f32 %v10450_v22, %v10434_v8 }
 0x520   :  { %v3145_v57 = vpop.f32.mrf.mxu1  ;;  %v3094_v62 = vpop.f32.mrf.mxu0 }
 0x521   :  { %v3205_v51 = vadd.f32 %v3188_v2, %v3164_v14  ;;  %v3166_v48 = vadd.f32 %v3145_v57, %v2951_v36  ;;  %v2735_v1 = vadd.f32 %v10472_v28, %v2530_v44 }
 0x522   :  { %v3147_v35 = vpop.f32.mrf.mxu1  ;;  %v3096_v3 = vpop.f32.mrf.mxu0 }
 0x523   :  { %v3237_v13 = vmul.f32 0.01, %v3205_v51  ;;  %v3207_v34 = vadd.f32 %v3188_v2, %v3166_v48  ;;  %vm3221_vm2 = vcmp.ge.f32.partialorder %v3205_v51, 0.0  ;;  %v3168_v30 = vadd.f32 %v3096_v3, %v2953_v58 }
 0x524   :  { %v3149_v6 = vpop.f32.mrf.mxu1  ;;  %v2583_v48 = vadd.f32 %v10452_v19, %v10436_v41  ;;  %v2950_v7 = vadd.f32 %v2879_v26, %v2735_v1  ;;  %v3098_v41 = vpop.f32.mrf.mxu0 }
 0x525   :  { %v3209_v9 = vadd.f32 %v3193_v12, %v3168_v30  ;;  %v3170_v50 = vadd.f32 %v3149_v6, %v2955_v18  ;;  %v3239_v43 = vmul.f32 0.01, %v3207_v34  ;;  %v10530_v14 = vsel %vm3221_vm2, %v3205_v51, %v3237_v13 }
 0x526   :  { %vm3223_vm4 = vcmp.ge.f32.partialorder %v3207_v34, 0.0  ;;  %3346 = vrot.lane.b32.xlu1 %v10530_v14, %s8718_s19  ;;  %v2534_v30 = vadd.f32 %v10456_v11, %v10442_v49  ;;  %v2737_v8 = vadd.f32 %v10474_v40, %v2583_v48  ;;  %v3165_v51 = vadd.f32 %v3094_v62, %v2950_v7  ;;  %v3151_v36 = vpop.f32.mrf.mxu1 }
 0x527   :  { %vm3225_vm5 = vcmp.ge.f32.partialorder %v3209_v9, 0.0  ;;  %v3241_v10 = vmul.f32 0.01, %v3209_v9  ;;  %v3211_v31 = vadd.f32 %v3193_v12, %v3170_v50  ;;  %v10541_v22 = vsel %vm3223_vm4, %v3207_v34, %v3239_v43 }
 0x528   :  { %v2739_v28 = vadd.f32 %v10476_v53, %v2534_v30  ;;  %v2952_v26 = vadd.f32 %v10496_v25, %v2737_v8  ;;  %v2587_v49 = vadd.f32 %v10458_v16, %v10444_v4  ;;  %v3206_v11 = vadd.f32 %v3188_v2, %v3165_v51  ;;  %v3155_v58 = vpop.f32.mrf.mxu1 }
 0x529   :  { %v10538_v18 = vsel %vm3225_vm5, %v3209_v9, %v3241_v10  ;;  %v3243_v63 = vmul.f32 0.01, %v3211_v31  ;;  %vm3227_vm6 = vcmp.ge.f32.partialorder %v3211_v31, 0.0  ;;  %v2746_v13 = vadd.f32 %v10486_v54, %v10464_v45 }
 0x52a   :  { %3348 = vrot.lane.b32.xlu0 %v10538_v18, %s8718_s19  ;;  %3362 = vrot.lane.b32.xlu1 %v10541_v22, %s8718_s19  ;;  %v2954_v19 = vadd.f32 %v10498_v24, %v2739_v28  ;;  %v3167_v40 = vadd.f32 %v3147_v35, %v2952_v26  ;;  %v2741_v6 = vadd.f32 %v10478_v17, %v2587_v49  ;;  %v3238_v59 = vmul.f32 0.01, %v3206_v11  ;;  %v3102_v17 = vpop.f32.mrf.mxu0  ;;  %v3157_v44 = vpop.f32.mrf.mxu1 }
 0x52b   :  { %v10555_v53 = vsel %vm3227_vm6, %v3211_v31, %v3243_v63  ;;  %vm3222_vm7 = vcmp.ge.f32.partialorder %v3206_v11, 0.0  ;;  %v2961_v52 = vadd.f32 %v10513_v38, %v2746_v13  ;;  %v2748_v45 = vadd.f32 %v10490_v32, %v10468_v20 }
 0x52c   :  { %v3169_v47 = vadd.f32 %v3098_v41, %v2954_v19  ;;  %v2956_v25 = vadd.f32 %v10500_v23, %v2741_v6  ;;  %v3208_v4 = vadd.f32 %v3188_v2, %v3167_v40  ;;  %v10566_v62 = vsel %vm3222_vm7, %v3206_v11, %v3238_v59  ;;  %v3104_v35 = vpop.f32.mrf.mxu0  ;;  %v14135_v19 = vld [vmem:[#allocation29_spill] sm:$0xff]  ;;  %v14136_v11 = vld [vmem:[#allocation23_spill] sm:$0xff] }
 0x52d   :  { %v2957_v2 = vadd.f32 %v10502_v37, %v2742_v60  ;;  %v2963_v43 = vadd.f32 %v10516_v21, %v2748_v45  ;;  %v2958_v28 = vadd.f32 %v10506_v5, %v10484_v56  ;;  %v2544_v63 = vadd.f32 %v10466_v39, %v10446_v0  ;;  %v14137_v56 = vld [vmem:[#allocation24_spill] sm:$0xff] }
 0x52e   :  { %3269 = vrot.lane.b32.xlu1 %v10530_v14, %s8720_s0  ;;  %3364 = vrot.lane.b32.xlu0 %v10555_v53, %s8718_s19  ;;  %v3210_v16 = vadd.f32 %v3193_v12, %v3169_v47  ;;  %v3171_v24 = vadd.f32 %v3151_v36, %v2956_v25  ;;  %v3240_v57 = vmul.f32 0.01, %v3208_v4  ;;  %vm3224_vm8 = vcmp.ge.f32.partialorder %v3208_v4, 0.0  ;;  %v3106_v9 = vpop.f32.mrf.mxu0  ;;  %v14138_v5 = vld [vmem:[#allocation28_spill] sm:$0xff]  ;;  %v14139_v36 = vld [vmem:[#allocation25_spill] sm:$0xff]  ;;  %v14140_v25 = vld [vmem:[#allocation27_spill] sm:$0xff] }
 0x52f   :  { %v3172_v55 = vadd.f32 %v3102_v17, %v2957_v2  ;;  %v3176_v54 = vadd.f32 %v3106_v9, %v2961_v52  ;;  %v3173_v26 = vadd.f32 %v3104_v35, %v2958_v28  ;;  %v2747_v41 = vadd.f32 %v10492_v61, %v2544_v63 }
 0x530   :  { %v3242_v23 = vmul.f32 0.01, %v3210_v16  ;;  %v3212_v15 = vadd.f32 %v3193_v12, %v3171_v24  ;;  %vm3226_vm9 = vcmp.ge.f32.partialorder %v3210_v16, 0.0  ;;  %v10575_v3 = vsel %vm3224_vm8, %v3208_v4, %v3240_v57  ;;  %v3108_v6 = vpop.f32.mrf.mxu0  ;;  %v14141_v24 = vld [vmem:[#allocation26_spill] sm:$0xff] }
 0x531   :  { %v2959_v12 = vadd.f32 %v10504_v27, %v2744_v42  ;;  %v3213_v33 = vadd.f32 %v10508_v46, %v3172_v55  ;;  %v3159_v27 = vpop.f32.mrf.mxu1  ;;  %v3217_v48 = vadd.f32 %v10523_v29, %v3176_v54  ;;  %v2960_v40 = vadd.f32 %v14136_v11, %v14135_v19  ;;  %v8486_v54 = vld [vmem:[%s13870_s2 + $0x60] sm:$0xff] }
 0x532   :  { %3285 = vrot.lane.b32.xlu1 %v10541_v22, %s8720_s0  ;;  %3271 = vrot.lane.b32.xlu0 %v10538_v18, %s8720_s0  ;;  %v3244_v34 = vmul.f32 0.01, %v3212_v15  ;;  %v10581_v37 = vsel %vm3226_vm9, %v3210_v16, %v3242_v23  ;;  %vm3228_vm10 = vcmp.ge.f32.partialorder %v3212_v15, 0.0  ;;  %v3178_v7 = vadd.f32 %v3159_v27, %v2963_v43  ;;  %v8489_v43 = vld [vmem:[%s13870_s2 + $0x78] sm:$0xff] }
 0x533   :  { %v3174_v50 = vadd.f32 %v3155_v58, %v2959_v12  ;;  %v3245_v10 = vmul.f32 0.01, %v3213_v33  ;;  %vm3229_vm11 = vcmp.ge.f32.partialorder %v3213_v33, 0.0  ;;  %v3249_v31 = vmul.f32 0.01, %v3217_v48  ;;  %v3161_v16 = vpop.f32.mrf.mxu1 }
 0x534   :  { %v10592_v1 = vsel %vm3228_vm10, %v3212_v15, %v3244_v34  ;;  %v3219_v21 = vadd.f32 %v10523_v29, %v3178_v7  ;;  %vm3233_vm1 = vcmp.ge.f32.partialorder %v3217_v48, 0.0  ;;  %v2597_v47 = vadd.f32 %v14138_v5, %v14137_v56 }
 0x535   :  { %v3215_v38 = vadd.f32 %v10508_v46, %v3174_v50  ;;  %v10603_v32 = vsel %vm3229_vm11, %v3213_v33, %v3245_v10  ;;  %v10614_v51 = vsel %vm3233_vm1, %v3217_v48, %v3249_v31  ;;  %v2962_v0 = vadd.f32 %v14139_v36, %v2747_v41  ;;  %v8488_v33 = vld [vmem:[%s13870_s2 + $0x70] sm:$0xff]  ;;  %v8487_v48 = vld [vmem:[%s13870_s2 + $0x68] sm:$0xff] }
 0x536   :  { %3354 = vrot.lane.b32.xlu1 %v10566_v62, %s8718_s19  ;;  %3287 = vrot.lane.b32.xlu0 %v10555_v53, %s8720_s0  ;;  %v3251_v8 = vmul.f32 0.01, %v3219_v21  ;;  %vm3235_vm2 = vcmp.ge.f32.partialorder %v3219_v21, 0.0  ;;  %v3214_v39 = vadd.f32 %v10508_v46, %v3173_v26  ;;  %v3175_v61 = vadd.f32 %v3157_v44, %v2960_v40 }
 0x537   :  { %v3247_v20 = vmul.f32 0.01, %v3215_v38  ;;  %vm3231_vm12 = vcmp.ge.f32.partialorder %v3215_v38, 0.0  ;;  %v2749_v59 = vadd.f32 %v14140_v25, %v2597_v47  ;;  %v3177_v4 = vadd.f32 %v3108_v6, %v2962_v0 }
 0x538   :  { %v10625_v49 = vsel %vm3235_vm2, %v3219_v21, %v3251_v8  ;;  %v3246_v60 = vmul.f32 0.01, %v3214_v39  ;;  %v3216_v57 = vadd.f32 %v10508_v46, %v3175_v61  ;;  %vm3230_vm4 = vcmp.ge.f32.partialorder %v3214_v39, 0.0 }
 0x539   :  { %v10610_v30 = vsel %vm3231_vm12, %v3215_v38, %v3247_v20  ;;  %v2964_v17 = vadd.f32 %v14141_v24, %v2749_v59  ;;  %v3218_v23 = vadd.f32 %v10523_v29, %v3177_v4 }
 0x53a   :  { %3370 = vrot.lane.b32.xlu1 %v10575_v3, %s8718_s19  ;;  %3356 = vrot.lane.b32.xlu0 %v10581_v37, %s8718_s19  ;;  %v3248_v2 = vmul.f32 0.01, %v3216_v57  ;;  %v10647_v58 = vsel %vm3230_vm4, %v3214_v39, %v3246_v60  ;;  %vm3232_vm5 = vcmp.ge.f32.partialorder %v3216_v57, 0.0 }
 0x53b   :  { %v3179_v15 = vadd.f32 %v3161_v16, %v2964_v17  ;;  %v3250_v35 = vmul.f32 0.01, %v3218_v23  ;;  %vm3234_vm6 = vcmp.ge.f32.partialorder %v3218_v23, 0.0  ;;  %v14145_v17 = vld [vmem:[#allocation12_spill] sm:$0xff] }
 0x53c   :  { %v10654_v46 = vsel %vm3232_vm5, %v3216_v57, %v3248_v2 }
 0x53d   :  { %v3220_v42 = vadd.f32 %v10523_v29, %v3179_v15  ;;  %v10658_v13 = vsel %vm3234_vm6, %v3218_v23, %v3250_v35 }
 0x53e   :  { %3277 = vrot.lane.b32.xlu1 %v10566_v62, %s8720_s0  ;;  %3372 = vrot.lane.b32.xlu0 %v10592_v1, %s8718_s19 }
 0x53f   :  { %v3252_v55 = vmul.f32 0.01, %v3220_v42  ;;  %vm3236_vm7 = vcmp.ge.f32.partialorder %v3220_v42, 0.0 }
 0x541   :  { %v10664_v29 = vsel %vm3236_vm7, %v3220_v42, %v3252_v55 }
 0x542   :  { %3293 = vrot.lane.b32.xlu1 %v10575_v3, %s8720_s0  ;;  %3279 = vrot.lane.b32.xlu0 %v10581_v37, %s8720_s0 }
 0x546   :  { %3350 = vrot.lane.b32.xlu1 %v10603_v32, %s8718_s19  ;;  %3295 = vrot.lane.b32.xlu0 %v10592_v1, %s8720_s0 }
 0x54a   :  { %3366 = vrot.lane.b32.xlu1 %v10610_v30, %s8718_s19  ;;  %3352 = vrot.lane.b32.xlu0 %v10614_v51, %s8718_s19 }
 0x54e   :  { %3273 = vrot.lane.b32.xlu1 %v10603_v32, %s8720_s0  ;;  %3368 = vrot.lane.b32.xlu0 %v10625_v49, %s8718_s19 }
 0x552   :  { %3289 = vrot.lane.b32.xlu1 %v10610_v30, %s8720_s0  ;;  %3275 = vrot.lane.b32.xlu0 %v10614_v51, %s8720_s0 }
 0x556   :  { %3822 = vrot.lane.b32.xlu1 %v10603_v32, %s8722_s21  ;;  %3291 = vrot.lane.b32.xlu0 %v10625_v49, %s8720_s0 }
 0x55a   :  { %3358 = vrot.lane.b32.xlu1 %v10647_v58, %s8718_s19  ;;  %3824 = vrot.lane.b32.xlu0 %v10614_v51, %s8722_s21 }
 0x55e   :  { %3374 = vrot.lane.b32.xlu1 %v10654_v46, %s8718_s19  ;;  %3360 = vrot.lane.b32.xlu0 %v10658_v13, %s8718_s19 }
 0x562   :  { %3838 = vrot.lane.b32.xlu1 %v10610_v30, %s8722_s21  ;;  %3376 = vrot.lane.b32.xlu0 %v10664_v29, %s8718_s19 }
 0x566   :  { %3281 = vrot.lane.b32.xlu1 %v10647_v58, %s8720_s0  ;;  %3840 = vrot.lane.b32.xlu0 %v10625_v49, %s8722_s21 }
 0x56a   :  { %3297 = vrot.lane.b32.xlu1 %v10654_v46, %s8720_s0  ;;  %3820 = vrot.lane.b32.xlu0 %v10538_v18, %s8722_s21 }
 0x56e   :  { %3830 = vrot.lane.b32.xlu1 %v10647_v58, %s8722_s21  ;;  %3283 = vrot.lane.b32.xlu0 %v10658_v13, %s8720_s0 }
 0x572   :  { %3846 = vrot.lane.b32.xlu1 %v10654_v46, %s8722_s21  ;;  %3299 = vrot.lane.b32.xlu0 %v10664_v29, %s8720_s0 }
 0x576   :  { %3818 = vrot.lane.b32.xlu1 %v10530_v14, %s8722_s21  ;;  %3828 = vrot.lane.b32.xlu0 %v10581_v37, %s8722_s21 }
 0x57a   :  { %3826 = vrot.lane.b32.xlu1 %v10566_v62, %s8722_s21  ;;  %3836 = vrot.lane.b32.xlu0 %v10555_v53, %s8722_s21 }
 0x57e   :  { %3834 = vrot.lane.b32.xlu1 %v10541_v22, %s8722_s21  ;;  %3844 = vrot.lane.b32.xlu0 %v10592_v1, %s8722_s21 }
 0x582   :  { %3842 = vrot.lane.b32.xlu1 %v10575_v3, %s8722_s21  ;;  %4039 = vrot.lane.b32.xlu0 %v10614_v51, %s8723_s22 }
 0x586   :  { %4037 = vrot.lane.b32.xlu1 %v10603_v32, %s8723_s22  ;;  %4055 = vrot.lane.b32.xlu0 %v10625_v49, %s8723_s22 }
 0x58a   :  { %4045 = vrot.lane.b32.xlu1 %v10647_v58, %s8723_s22  ;;  %4035 = vrot.lane.b32.xlu0 %v10538_v18, %s8723_s22 }
 0x58e   :  { %4053 = vrot.lane.b32.xlu1 %v10610_v30, %s8723_s22  ;;  %3832 = vrot.lane.b32.xlu0 %v10658_v13, %s8722_s21 }
 0x592   :  { %4061 = vrot.lane.b32.xlu1 %v10654_v46, %s8723_s22  ;;  %3848 = vrot.lane.b32.xlu0 %v10664_v29, %s8722_s21 }
 0x596   :  { %4033 = vrot.lane.b32.xlu1 %v10530_v14, %s8723_s22  ;;  %4043 = vrot.lane.b32.xlu0 %v10581_v37, %s8723_s22 }
 0x598   :  { %v10720_v34 = vpop.permute.xlu1 %3346 }
 0x59a   :  { %4041 = vrot.lane.b32.xlu1 %v10566_v62, %s8723_s22  ;;  %4051 = vrot.lane.b32.xlu0 %v10555_v53, %s8723_s22 }
 0x59c   :  { %v3349_v12 = vpop.permute.xlu0 %3348  ;;  %v10726_v44 = vpop.permute.xlu1 %3362 }
 0x59e   :  { %4049 = vrot.lane.b32.xlu1 %v10541_v22, %s8723_s22  ;;  %4047 = vrot.lane.b32.xlu0 %v10658_v13, %s8723_s22 }
 0x5a0   :  { %v10732_v9 = vpop.permute.xlu1 %3269  ;;  %v3365_v52 = vpop.permute.xlu0 %3364 }
 0x5a2   :  { %4057 = vrot.lane.b32.xlu1 %v10575_v3, %s8723_s22  ;;  %4063 = vrot.lane.b32.xlu0 %v10664_v29, %s8723_s22 }
 0x5a4   :  { %v10741_v50 = vpop.permute.xlu1 %3285  ;;  %v10743_v45 = vpop.permute.xlu0 %3271 }
 0x5a6   :  { %4265 = vperm.xlu1 %8617, %v8488_v33   ;;  %4059 = vrot.lane.b32.xlu0 %v10592_v1, %s8723_s22 }
 0x5a8   :  { %v3355_v27 = vpop.permute.xlu1 %3354  ;;  %v10753_v10 = vpop.permute.xlu0 %3287 }
 0x5a9   :  { %v3386_v59 = vsel %vm167_vm13, %v10720_v34, %v3355_v27 }
 0x5aa   :  { %4255 = vperm.xlu1 %8617, %v8486_v54   ;;  %4270 = vperm.xlu0 %8616, %v8489_v43  }
 0x5ac   :  { %v3371_v38 = vpop.permute.xlu1 %3370  ;;  %v3357_v7 = vpop.permute.xlu0 %3356 }
 0x5ad   :  { %v3387_v4 = vsel %vm167_vm13, %v3349_v12, %v3357_v7  ;;  %v3378_v15 = vsel %vm167_vm13, %v10726_v44, %v3371_v38  ;;  %v3383_v2 = vsel %vm167_vm13, %v3357_v7, %v3365_v52  ;;  %v14147_v7 = vld [vmem:[#allocation13_spill] sm:$0xff] }
 0x5ae   :  { %4260 = vperm.xlu0 %8616, %v8487_v48   ;;  %v3399_v33 = vmul.f32 %v3387_v4, %v14145_v17 }
 0x5b0   :  { %v10758_v20 = vpop.permute.xlu1 %3277  ;;  %v3373_v31 = vpop.permute.xlu0 %3372 }
 0x5b1   :  { %v3379_v24 = vsel %vm167_vm13, %v3365_v52, %v3373_v31  ;;  %v3391_v54 = vsel %vm167_vm13, %v3373_v31, %v3349_v12 }
 0x5b4   :  { %v10760_v21 = vpop.permute.xlu1 %3293  ;;  %v10762_v8 = vpop.permute.xlu0 %3279 }
 0x5b8   :  { %v3351_v28 = vpop.permute.xlu1 %3350  ;;  %v10764_v63 = vpop.permute.xlu0 %3295 }
 0x5bc   :  { %v3367_v26 = vpop.permute.xlu1 %3366  ;;  %v3353_v41 = vpop.permute.xlu0 %3352 }
 0x5c0   :  { %v10766_v19 = vpop.permute.xlu1 %3273  ;;  %v3369_v11 = vpop.permute.xlu0 %3368 }
 0x5c4   :  { %v10768_v40 = vpop.permute.xlu1 %3289  ;;  %v10770_v6 = vpop.permute.xlu0 %3275 }
 0x5c8   :  { %v10772_v56 = vpop.permute.xlu1 %3822  ;;  %v10774_v5 = vpop.permute.xlu0 %3291 }
 0x5c9   :  { %14142 = vst [vmem:[#allocation29_spill] sm:$0xff] %v10772_v56 }
 0x5cc   :  { %v3359_v47 = vpop.permute.xlu1 %3358  ;;  %v10776_v36 = vpop.permute.xlu0 %3824 }
 0x5cd   :  { %14143 = vst [vmem:[#allocation23_spill] sm:$0xff] %v10776_v36  ;;  %v3388_v39 = vsel %vm167_vm13, %v3351_v28, %v3359_v47  ;;  %v3384_v43 = vsel %vm167_vm13, %v3359_v47, %v3367_v26  ;;  %v3395_v47 = vmul.f32 %v3386_v59, %v14145_v17 }
 0x5ce   :  { %v3403_v60 = vmul.f32 %v3388_v39, %v14145_v17 }
 0x5d0   :  { %v3375_v61 = vpop.permute.xlu1 %3374  ;;  %v3361_v25 = vpop.permute.xlu0 %3360 }
 0x5d1   :  { %v3389_v16 = vsel %vm167_vm13, %v3353_v41, %v3361_v25  ;;  %v3385_v57 = vsel %vm167_vm13, %v3361_v25, %v3369_v11  ;;  %v3380_v35 = vsel %vm167_vm13, %v3367_v26, %v3375_v61  ;;  %v3392_v42 = vsel %vm167_vm13, %v3375_v61, %v3351_v28  ;;  %v14146_v25 = vld [vmem:[#allocation14_spill] sm:$0xff]  ;;  %v14148_v61 = vld [vmem:[#allocation11_spill] sm:$0xff] }
 0x5d2   :  { %v3407_v23 = vmul.f32 %v3389_v16, %v14145_v17  ;;  %v3401_v52 = vmul.f32 %v3379_v24, %v14146_v25  ;;  %v3408_v16 = vmul.f32 %v3385_v57, %v14147_v7  ;;  %v3402_v4 = vmul.f32 %v3392_v42, %v14148_v61 }
 0x5d3   :  { %v3405_v56 = vmul.f32 %v3380_v35, %v14146_v25  ;;  %v3382_v26 = vsel %vm167_vm13, %v3355_v27, %v10726_v44  ;;  %v3398_v57 = vmul.f32 %v3391_v54, %v14148_v61  ;;  %v3400_v42 = vmul.f32 %v3383_v2, %v14147_v7 }
 0x5d4   :  { %v10802_v55 = vpop.permute.xlu1 %3838  ;;  %v3377_v48 = vpop.permute.xlu0 %3376  ;;  %v3415_v39 = vpack.c.bf16 %v3407_v23, %v3403_v60  ;;  %v3397_v60 = vmul.f32 %v3378_v15, %v14146_v25  ;;  %v3411_v27 = vpack.c.bf16 %v3399_v33, %v3395_v47  ;;  %v3309_v47 = vsel %vm95_vm14, %v10732_v9, %v10758_v20 }
 0x5d5   :  { %v3381_v36 = vsel %vm167_vm13, %v3369_v11, %v3377_v48  ;;  %v3393_v28 = vsel %vm167_vm13, %v3377_v48, %v3353_v41  ;;  %v3390_v11 = vsel %vm167_vm13, %v3371_v38, %v10720_v34  ;;  %v3404_v41 = vmul.f32 %v3384_v43, %v14147_v7 }
 0x5d6   :  { %v3406_v12 = vmul.f32 %v3393_v28, %v14148_v61  ;;  %v3409_v31 = vmul.f32 %v3381_v36, %v14146_v25  ;;  %3451 = vmatprep.subr.bf16.mxu0 %v3415_v39  ;;  %v3394_v59 = vmul.f32 %v3390_v11, %v14148_v61  ;;  %v3413_v34 = vpack.c.bf16 %v3401_v52, %v3397_v60  ;;  %v14149_v28 = vld [vmem:[#allocation8_spill] sm:$0xff] }
 0x5d7   :  { %v3416_v44 = vpack.c.bf16 %v3408_v16, %v3404_v41  ;;  %v3396_v38 = vmul.f32 %v3382_v26, %v14147_v7  ;;  %v3310_v52 = vsel %vm95_vm14, %v10743_v45, %v10762_v8  ;;  %v14150_v26 = vmov 0  }
 0x5d8   :  { %v3282_v24 = vpop.permute.xlu1 %3281  ;;  %v3414_v23 = vpack.c.bf16 %v3406_v12, %v3402_v4  ;;  %v10829_v36 = vpop.permute.xlu0 %3840  ;;  %v3417_v35 = vpack.c.bf16 %v3409_v31, %v3405_v56  ;;  %v3410_v43 = vpack.c.bf16 %v3398_v57, %v3394_v59  ;;  %v8648_v56 = vld [vmem:[#allocation2 + $0x100] sm:$0xff]   ;;  %v3301_v11 = vsel %vm95_vm14, %v10741_v50, %v10760_v21  ;;  %v14151_v59 = vld [vmem:[#allocation7_spill] sm:$0xff] }
 0x5d9   :  { %v3412_v48 = vpack.c.bf16 %v3400_v42, %v3396_v38  ;;  %v3311_v2 = vsel %vm95_vm14, %v10766_v19, %v3282_v24  ;;  %v3322_v57 = vmul.f32 %v3310_v52, %v14149_v28 }
 0x5da   :  { %3452 = vmatpush1.bf16.msra.mxu0 %v3414_v23  ;;  %3504 = vmatprep.subr.bf16.mxu1 %v3417_v35  ;;  %v3326_v4 = vmul.f32 %v3311_v2, %v14149_v28  ;;  %v3302_v23 = vsel %vm95_vm14, %v10753_v10, %v10764_v63  ;;  %v3314_v35 = vsel %vm95_vm14, %v10764_v63, %v10743_v45  ;;  %v14153_v45 = vld [vmem:[#allocation9_spill] sm:$0xff] }
 0x5db   :  { %3453 = vmatprep.subr.bf16.mxu0 %v3411_v27  ;;  %3505 = vmatpush1.bf16.msra.mxu1 %v3416_v44  ;;  %v3307_v27 = vsel %vm95_vm14, %v3282_v24, %v10768_v40 }
 0x5dc   :  { %v3298_v15 = vpop.permute.xlu1 %3297  ;;  %3506 = vmatprep.subr.bf16.mxu1 %v3413_v34  ;;  %v10834_v54 = vpop.permute.xlu0 %3820 }
 0x5dd   :  { %v3315_v12 = vsel %vm95_vm14, %v3298_v15, %v10766_v19  ;;  %v3303_v19 = vsel %vm95_vm14, %v10768_v40, %v3298_v15  ;;  %v3318_v40 = vmul.f32 %v3309_v47, %v14149_v28 }
 0x5de   :  { %3454 = vmatpush1.bf16.msra.mxu0 %v3410_v43  ;;  %v3325_v34 = vmul.f32 %v3315_v12, %v14151_v59  ;;  %v8649_v43 = vld [vmem:[#allocation2 + $0x108] sm:$0xff]  }
 0x5df   :  { %3507 = vmatpush1.bf16.msra.mxu1 %v3412_v48  ;;  %v14152_v48 = vld [vmem:[#allocation10_spill] sm:$0xff] }
 0x5e0   :  { %v10839_v33 = vpop.permute.xlu1 %3830  ;;  %v3284_v39 = vpop.permute.xlu0 %3283  ;;  %v3324_v24 = vmul.f32 %v3302_v23, %v14152_v48 }
 0x5e1   :  { %v3312_v16 = vsel %vm95_vm14, %v10770_v6, %v3284_v39  ;;  %8458 = vmatmul.mubr.msk.bf16.vlgmr.msra.gmra.mxu0 %vm240_vm15, %v8648_v56  ;;  %v3308_v41 = vsel %vm95_vm14, %v3284_v39, %v10774_v5 }
 0x5e2   :  { %v3330_v31 = vmul.f32 %v3312_v16, %v14149_v28  ;;  %8460 = vmatmul.mubr.msk.bf16.vlgmr.msra.gmra.mxu1 %vm240_vm15, %v8648_v56  ;;  %3481 = vmatprep.mubr.bf16.mxu0 %v14150_v26  ;;  %v3328_v56 = vmul.f32 %v3303_v19, %v14152_v48  ;;  %v3331_v63 = vmul.f32 %v3308_v41, %v14153_v45 }
 0x5e3   :  { %3534 = vmatprep.mubr.bf16.mxu1 %v14150_v26  ;;  %v3321_v16 = vmul.f32 %v3314_v35, %v14151_v59 }
 0x5e4   :  { %v10870_v60 = vpop.permute.xlu1 %3846  ;;  %v3300_v42 = vpop.permute.xlu0 %3299  ;;  %v3338_v44 = vpack.c.bf16 %v3330_v31, %v3326_v4  ;;  %v3327_v4 = vmul.f32 %v3307_v27, %v14153_v45 }
 0x5e5   :  { %v3304_v38 = vsel %vm95_vm14, %v10774_v5, %v3300_v42  ;;  %v3316_v15 = vsel %vm95_vm14, %v3300_v42, %v10770_v6  ;;  %v3313_v5 = vsel %vm95_vm14, %v10760_v21, %v10732_v9  ;;  %v3306_v6 = vsel %vm95_vm14, %v10762_v8, %v10753_v10 }
 0x5e6   :  { %v3329_v2 = vmul.f32 %v3316_v15, %v14151_v59  ;;  %v3332_v39 = vmul.f32 %v3304_v38, %v14152_v48  ;;  %3573 = vmatprep.subr.bf16.mxu0 %v3338_v44  ;;  %v3305_v9 = vsel %vm95_vm14, %v10758_v20, %v10741_v50  ;;  %v3320_v21 = vmul.f32 %v3301_v11, %v14152_v48 }
 0x5e7   :  { %v3334_v10 = vpack.c.bf16 %v3322_v57, %v3318_v40  ;;  %v3317_v8 = vmul.f32 %v3313_v5, %v14151_v59  ;;  %v3323_v19 = vmul.f32 %v3306_v6, %v14153_v45  ;;  %v3339_v41 = vpack.c.bf16 %v3331_v63, %v3327_v4  ;;  %v8650_v57 = vld [vmem:[#allocation2 + $0xf0] sm:$0xff]  }
 0x5e8   :  { %v10906_v52 = vpop.permute.xlu1 %3818  ;;  %v3337_v12 = vpack.c.bf16 %v3329_v2, %v3325_v34  ;;  %v10910_v31 = vpop.permute.xlu0 %3828  ;;  %v3340_v47 = vpack.c.bf16 %v3332_v39, %v3328_v56  ;;  %v3336_v35 = vpack.c.bf16 %v3324_v24, %v3320_v21  ;;  %v3319_v42 = vmul.f32 %v3305_v9, %v14153_v45  ;;  %v14155_v63 = vld [vmem:[#allocation15_spill] sm:$0xff]  ;;  %v14156_v39 = vld [vmem:[#allocation16_spill] sm:$0xff]  ;;  %v14158_v21 = vld [vmem:[#allocation17_spill] sm:$0xff] }
 0x5e9   :  { %8459 = vmatmul.mubr.msk.bf16.gmra.mxu0 %vm240_vm15, %v8649_v43  ;;  %v3333_v50 = vpack.c.bf16 %v3321_v16, %v3317_v8  ;;  %v3672_v11 = vpack.c.bf16 %v10658_v13, %v10647_v58  ;;  %v3674_v34 = vpack.c.bf16 %v10664_v29, %v10654_v46  ;;  %v3671_v15 = vpack.c.bf16 %v10614_v51, %v10603_v32  ;;  %v14157_v4 = vld [vmem:[#allocation23_spill] sm:$0xff] }
 0x5ea   :  { %8461 = vmatmul.mubr.msk.bf16.gmra.mxu1 %vm240_vm15, %v8649_v43  ;;  %3574 = vmatpush1.bf16.msra.mxu0 %v3337_v12  ;;  %v3335_v44 = vpack.c.bf16 %v3323_v19, %v3319_v42  ;;  %v3668_v58 = vpack.c.bf16 %v10581_v37, %v10566_v62  ;;  %v3673_v13 = vpack.c.bf16 %v10625_v49, %v10610_v30  ;;  %v8651_v62 = vld [vmem:[#allocation2 + $0xf8] sm:$0xff]  }
 0x5eb   :  { %3626 = vmatprep.subr.bf16.mxu1 %v3340_v47  ;;  %3575 = vmatprep.subr.bf16.mxu0 %v3334_v10  ;;  %v3670_v29 = vpack.c.bf16 %v10592_v1, %v10575_v3  ;;  %v3667_v51 = vpack.c.bf16 %v10538_v18, %v10530_v14  ;;  %v3669_v37 = vpack.c.bf16 %v10555_v53, %v10541_v22  ;;  %v14154_v53 = vld [vmem:[#allocation29_spill] sm:$0xff]  ;;  %v8652_v1 = vld [vmem:[#allocation2 + $0x110] sm:$0xff]  }
 0x5ec   :  { %v3827_v23 = vpop.permute.xlu1 %3826  ;;  %3627 = vmatpush1.bf16.msra.mxu1 %v3339_v41  ;;  %v10922_v20 = vpop.permute.xlu0 %3836  ;;  %3593 = vmatprep.mubr.bf16.mxu0 %v14150_v26  ;;  %v3856_v22 = vsel %vm633_vm0, %v10839_v33, %v10802_v55  ;;  %v3860_v3 = vsel %vm633_vm0, %v14154_v53, %v10839_v33  ;;  %v3852_v5 = vsel %vm633_vm0, %v10802_v55, %v10870_v60 }
 0x5ed   :  { %3628 = vmatprep.subr.bf16.mxu1 %v3336_v35  ;;  %3646 = vmatprep.mubr.bf16.mxu1 %v14150_v26  ;;  %v3874_v2 = vmul.f32 %v3860_v3, %v14155_v63  ;;  %v3875_v40 = vmul.f32 %v3856_v22, %v14156_v39  ;;  %v3864_v33 = vsel %vm633_vm0, %v10870_v60, %v14154_v53 }
 0x5ee   :  { %3576 = vmatpush1.bf16.msra.mxu0 %v3333_v50  ;;  %v3855_v24 = vsel %vm633_vm0, %v10910_v31, %v10922_v20  ;;  %v3858_v55 = vsel %vm633_vm0, %v10906_v52, %v3827_v23  ;;  %v3876_v10 = vmul.f32 %v3852_v5, %v14158_v21  ;;  %v3859_v8 = vsel %vm633_vm0, %v10834_v54, %v10910_v31 }
 0x5ef   :  { %3708 = vmatprep.subr.bf16.mxu0 %v3672_v11  ;;  %v3871_v41 = vmul.f32 %v3855_v24, %v14156_v39  ;;  %v14159_v11 = vld [vmem:[#allocation18_spill] sm:$0xff] }
 0x5f0   :  { %v10928_v27 = vpop.permute.xlu1 %3834  ;;  %3629 = vmatpush1.bf16.msra.mxu1 %v3335_v44  ;;  %v10932_v38 = vpop.permute.xlu0 %3844  ;;  %v3866_v44 = vmul.f32 %v3858_v55, %v14155_v63 }
 0x5f1   :  { %3761 = vmatprep.subr.bf16.mxu1 %v3674_v34  ;;  %8464 = vmatmul.mubr.msk.bf16.vlgmr.msra.gmra.mxu0 %vm240_vm15, %v8650_v57  ;;  %v3854_v43 = vsel %vm633_vm0, %v3827_v23, %v10928_v27 }
 0x5f2   :  { %3709 = vmatpush1.bf16.msra.mxu0 %v3671_v15  ;;  %3603 = vmatprep.mubr.bf16.mxu0 %v14150_v26  ;;  %v3867_v60 = vmul.f32 %v3854_v43, %v14156_v39  ;;  %v8653_v15 = vld [vmem:[#allocation2 + $0x118] sm:$0xff]  }
 0x5f3   :  { %8466 = vmatmul.mubr.msk.bf16.vlgmr.msra.gmra.mxu1 %vm240_vm15, %v8650_v57  ;;  %3710 = vmatprep.subr.bf16.mxu0 %v3668_v58  ;;  %v3877_v57 = vmul.f32 %v3864_v33, %v14159_v11 }
 0x5f4   :  { %v3843_v46 = vpop.permute.xlu1 %3842  ;;  %3762 = vmatpush1.bf16.msra.mxu1 %v3673_v13  ;;  %v10945_v32 = vpop.permute.xlu0 %4039  ;;  %3656 = vmatprep.mubr.bf16.mxu1 %v14150_v26 }
 0x5f5   :  { %3763 = vmatprep.subr.bf16.mxu1 %v3670_v29  ;;  %v3862_v23 = vsel %vm633_vm0, %v3843_v46, %v10906_v52  ;;  %v3863_v52 = vsel %vm633_vm0, %v10932_v38, %v10834_v54  ;;  %v3883_v29 = vpack.c.bf16 %v3871_v41, %v3867_v60 }
 0x5f6   :  { %3711 = vmatpush1.bf16.msra.mxu0 %v3667_v51  ;;  %v3870_v51 = vmul.f32 %v3859_v8, %v14155_v63  ;;  %v3873_v43 = vmul.f32 %v3863_v52, %v14159_v11  ;;  %v14163_v52 = vld [vmem:[#allocation22_spill] sm:$0xff] }
 0x5f8   :  { %v10952_v30 = vpop.permute.xlu1 %4037  ;;  %3764 = vmatpush1.bf16.msra.mxu1 %v3669_v37  ;;  %v10954_v49 = vpop.permute.xlu0 %4055  ;;  %v3882_v3 = vpack.c.bf16 %v3870_v51, %v3866_v44 }
 0x5f9   :  { %8465 = vmatmul.mubr.msk.bf16.gmra.mxu0 %vm240_vm15, %v8651_v62 }
 0x5fa   :  { %3728 = vmatprep.mubr.bf16.mxu0 %v14150_v26 }
 0x5fb   :  { %8467 = vmatmul.mubr.msk.bf16.gmra.mxu1 %vm240_vm15, %v8651_v62  ;;  %v3869_v62 = vmul.f32 %v3862_v23, %v14159_v11 }
 0x5fc   :  { %v10959_v14 = vpop.permute.xlu1 %4045  ;;  %v10961_v18 = vpop.permute.xlu0 %4035  ;;  %3781 = vmatprep.mubr.bf16.mxu1 %v14150_v26 }
 0x600   :  { %v10975_v56 = vpop.permute.xlu1 %4053  ;;  %v3833_v6 = vpop.permute.xlu0 %3832 }
 0x601   :  { %v3857_v16 = vsel %vm633_vm0, %v3833_v6, %v10829_v36  ;;  %v3861_v12 = vsel %vm633_vm0, %v14157_v4, %v3833_v6  ;;  %8470 = vmatmul.mubr.msk.bf16.vlgmr.msra.gmra.mxu0 %vm240_vm15, %v8652_v1  ;;  %v8654_v6 = vld [vmem:[#allocation2 + $0x120] sm:$0xff]  }
 0x602   :  { %v3878_v47 = vmul.f32 %v3861_v12, %v14155_v63  ;;  %v3879_v9 = vmul.f32 %v3857_v16, %v14156_v39  ;;  %3738 = vmatprep.mubr.bf16.mxu0 %v14150_v26  ;;  %v14160_v16 = vld [vmem:[#allocation19_spill] sm:$0xff]  ;;  %v14161_v12 = vld [vmem:[#allocation20_spill] sm:$0xff] }
 0x603   :  { %8472 = vmatmul.mubr.msk.bf16.vlgmr.msra.gmra.mxu1 %vm240_vm15, %v8652_v1  ;;  %v3851_v1 = vsel %vm633_vm0, %v10922_v20, %v10932_v38  ;;  %v4075_v20 = vsel %vm844_vm3, %v10952_v30, %v10959_v14  ;;  %v4071_v38 = vsel %vm844_vm3, %v10959_v14, %v10975_v56 }
 0x604   :  { %v4062_v19 = vpop.permute.xlu1 %4061  ;;  %v3886_v35 = vpack.c.bf16 %v3878_v47, %v3874_v2  ;;  %v3849_v42 = vpop.permute.xlu0 %3848  ;;  %v3887_v50 = vpack.c.bf16 %v3879_v9, %v3875_v40  ;;  %3791 = vmatprep.mubr.bf16.mxu1 %v14150_v26  ;;  %v3885_v2 = vpack.c.bf16 %v3873_v43, %v3869_v62  ;;  %v3872_v40 = vmul.f32 %v3851_v1, %v14158_v21 }
 0x605   :  { %v3853_v31 = vsel %vm633_vm0, %v10829_v36, %v3849_v42  ;;  %v3865_v34 = vsel %vm633_vm0, %v3849_v42, %v14157_v4  ;;  %v3850_v36 = vsel %vm633_vm0, %v10928_v27, %v3843_v46  ;;  %v4089_v4 = vmul.f32 %v4075_v20, %v14160_v16 }
 0x606   :  { %v3880_v58 = vmul.f32 %v3853_v31, %v14158_v21  ;;  %v3881_v13 = vmul.f32 %v3865_v34, %v14159_v11  ;;  %3923 = vmatprep.subr.bf16.mxu0 %v3887_v50  ;;  %v3868_v27 = vmul.f32 %v3850_v36, %v14158_v21  ;;  %v4090_v55 = vmul.f32 %v4071_v38, %v14161_v12  ;;  %v8655_v36 = vld [vmem:[#allocation2 + $0x128] sm:$0xff]  }
 0x607   :  { %3924 = vmatpush1.bf16.msra.mxu0 %v3886_v35  ;;  %v4067_v60 = vsel %vm844_vm3, %v10975_v56, %v4062_v19  ;;  %v4079_v14 = vsel %vm844_vm3, %v4062_v19, %v10952_v30  ;;  %v14162_v35 = vld [vmem:[#allocation21_spill] sm:$0xff] }
 0x608   :  { %v11035_v37 = vpop.permute.xlu1 %4033  ;;  %v3888_v22 = vpack.c.bf16 %v3880_v58, %v3876_v10  ;;  %v4044_v53 = vpop.permute.xlu0 %4043  ;;  %3925 = vmatprep.subr.bf16.mxu0 %v3883_v29  ;;  %v3889_v54 = vpack.c.bf16 %v3881_v13, %v3877_v57  ;;  %v3884_v33 = vpack.c.bf16 %v3872_v40, %v3868_v27  ;;  %v4091_v42 = vmul.f32 %v4067_v60, %v14162_v35 }
 0x609   :  { %8471 = vmatmul.mubr.msk.bf16.gmra.mxu0 %vm240_vm15, %v8653_v15  ;;  %v4074_v57 = vsel %vm844_vm3, %v10961_v18, %v4044_v53  ;;  %v4092_v58 = vmul.f32 %v4079_v14, %v14163_v52 }
 0x60a   :  { %3976 = vmatprep.subr.bf16.mxu1 %v3889_v54  ;;  %3943 = vmatprep.mubr.bf16.mxu0 %v14150_v26 }
 0x60b   :  { %8473 = vmatmul.mubr.msk.bf16.gmra.mxu1 %vm240_vm15, %v8653_v15  ;;  %3926 = vmatpush1.bf16.msra.mxu0 %v3882_v3  ;;  %v4085_v3 = vmul.f32 %v4074_v57, %v14160_v16 }
 0x60c   :  { %v4042_v46 = vpop.permute.xlu1 %4041  ;;  %3977 = vmatpush1.bf16.msra.mxu1 %v3888_v22  ;;  %v4052_v5 = vpop.permute.xlu0 %4051  ;;  %3996 = vmatprep.mubr.bf16.mxu1 %v14150_v26 }
 0x60d   :  { %3978 = vmatprep.subr.bf16.mxu1 %v3885_v2  ;;  %v4070_v10 = vsel %vm844_vm3, %v4044_v53, %v4052_v5  ;;  %v4073_v41 = vsel %vm844_vm3, %v11035_v37, %v4042_v46 }
 0x60e   :  { %v4086_v44 = vmul.f32 %v4070_v10, %v14161_v12  ;;  %v4081_v13 = vmul.f32 %v4073_v41, %v14160_v16 }
 0x610   :  { %v4050_v24 = vpop.permute.xlu1 %4049  ;;  %3979 = vmatpush1.bf16.msra.mxu1 %v3884_v33  ;;  %v4048_v9 = vpop.permute.xlu0 %4047  ;;  %v4097_v27 = vpack.c.bf16 %v4085_v3, %v4081_v13  ;;  %v8657_v33 = vld [vmem:[#allocation2 + $0x138] sm:$0xff]  }
 0x611   :  { %v4069_v47 = vsel %vm844_vm3, %v4042_v46, %v4050_v24  ;;  %v4072_v8 = vsel %vm844_vm3, %v4048_v9, %v10954_v49  ;;  %v4076_v56 = vsel %vm844_vm3, %v10945_v32, %v4048_v9  ;;  %8476 = vmatmul.mubr.msk.bf16.vlgmr.msra.gmra.mxu0 %vm240_vm15, %v8654_v6 }
 0x612   :  { %v4082_v23 = vmul.f32 %v4069_v47, %v14161_v12  ;;  %v4093_v30 = vmul.f32 %v4076_v56, %v14160_v16  ;;  %v4094_v19 = vmul.f32 %v4072_v8, %v14161_v12  ;;  %3953 = vmatprep.mubr.bf16.mxu0 %v14150_v26 }
 0x613   :  { %8478 = vmatmul.mubr.msk.bf16.vlgmr.msra.gmra.mxu1 %vm240_vm15, %v8654_v6 }
 0x614   :  { %v4058_v50 = vpop.permute.xlu1 %4057  ;;  %v4101_v31 = vpack.c.bf16 %v4093_v30, %v4089_v4  ;;  %v4064_v34 = vpop.permute.xlu0 %4063  ;;  %v4102_v15 = vpack.c.bf16 %v4094_v19, %v4090_v55  ;;  %4006 = vmatprep.mubr.bf16.mxu1 %v14150_v26  ;;  %v4098_v54 = vpack.c.bf16 %v4086_v44, %v4082_v23 }
 0x615   :  { %v4068_v29 = vsel %vm844_vm3, %v10954_v49, %v4064_v34  ;;  %v4080_v51 = vsel %vm844_vm3, %v4064_v34, %v10945_v32  ;;  %v4065_v62 = vsel %vm844_vm3, %v4050_v24, %v4058_v50  ;;  %v4077_v49 = vsel %vm844_vm3, %v4058_v50, %v11035_v37 }
 0x616   :  { %v4095_v22 = vmul.f32 %v4068_v29, %v14162_v35  ;;  %v4096_v53 = vmul.f32 %v4080_v51, %v14163_v52  ;;  %4138 = vmatprep.subr.bf16.mxu0 %v4102_v15  ;;  %v4083_v46 = vmul.f32 %v4065_v62, %v14162_v35  ;;  %v4084_v20 = vmul.f32 %v4077_v49, %v14163_v52 }
 0x617   :  { %4139 = vmatpush1.bf16.msra.mxu0 %v4101_v31 }
 0x618   :  { %v4103_v1 = vpack.c.bf16 %v4095_v22, %v4091_v42  ;;  %v4060_v43 = vpop.permute.xlu0 %4059  ;;  %4140 = vmatprep.subr.bf16.mxu0 %v4098_v54  ;;  %v4104_v32 = vpack.c.bf16 %v4096_v53, %v4092_v58 }
 0x619   :  { %v4066_v2 = vsel %vm844_vm3, %v4052_v5, %v4060_v43  ;;  %v4078_v40 = vsel %vm844_vm3, %v4060_v43, %v10961_v18  ;;  %8477 = vmatmul.mubr.msk.bf16.gmra.mxu0 %vm240_vm15, %v8655_v36  ;;  %v8656_v18 = vld [vmem:[#allocation2 + $0x130] sm:$0xff]  }
 0x61a   :  { %v4087_v37 = vmul.f32 %v4066_v2, %v14162_v35  ;;  %v4088_v38 = vmul.f32 %v4078_v40, %v14163_v52  ;;  %4191 = vmatprep.subr.bf16.mxu1 %v4104_v32  ;;  %4158 = vmatprep.mubr.bf16.mxu0 %v14150_v26 }
 0x61b   :  { %8479 = vmatmul.mubr.msk.bf16.gmra.mxu1 %vm240_vm15, %v8655_v36  ;;  %4141 = vmatpush1.bf16.msra.mxu0 %v4097_v27 }
 0x61c   :  { %v4099_v6 = vpack.c.bf16 %v4087_v37, %v4083_v46  ;;  %4192 = vmatpush1.bf16.msra.mxu1 %v4103_v1  ;;  %v4100_v5 = vpack.c.bf16 %v4088_v38, %v4084_v20  ;;  %4211 = vmatprep.mubr.bf16.mxu1 %v14150_v26 }
 0x61e   :  { %4193 = vmatprep.subr.bf16.mxu1 %v4100_v5 }
 0x620   :  { %4194 = vmatpush1.bf16.msra.mxu1 %v4099_v6 }
 0x621   :  { %8482 = vmatmul.mubr.msk.bf16.vlgmr.msra.gmra.mxu0 %vm240_vm15, %v8656_v18  ;;  %v11204_v21 = vpop.permute.xlu1 %4265 }
 0x622   :  { %4168 = vmatprep.mubr.bf16.mxu0 %v14150_v26 }
 0x623   :  { %8484 = vmatmul.mubr.msk.bf16.vlgmr.msra.gmra.mxu1 %vm240_vm15, %v8656_v18 }
 0x624   :  { %4221 = vmatprep.mubr.bf16.mxu1 %v14150_v26 }
 0x629   :  { %8483 = vmatmul.mubr.msk.bf16.gmra.mxu0 %vm240_vm15, %v8657_v33 }
 0x62a   :  { %4539 = vmatprep.mubr.bf16.mxu0 %v14150_v26 }
 0x62b   :  { %8485 = vmatmul.mubr.msk.bf16.gmra.mxu1 %vm240_vm15, %v8657_v33 }
 0x62c   :  { %4592 = vmatprep.mubr.bf16.mxu1 %v14150_v26 }
 0x6a1   :  { %v11126_v24 = vpop.f32.mrf.mxu0 }
 0x6a2   :  { %v11128_v4 = vpop.f32.mrf.mxu1 }
 0x6a3   :  { %v11130_v55 = vpop.f32.mrf.mxu0 }
 0x6a4   :  { %v11132_v60 = vpop.f32.mrf.mxu1 }
 0x6a5   :  { %v11134_v47 = vpop.f32.mrf.mxu0 }
 0x6a6   :  { %v11136_v9 = vpop.f32.mrf.mxu1 }
 0x6a7   :  { %v11138_v14 = vpop.f32.mrf.mxu0 }
 0x6a8   :  { %v11140_v10 = vpop.f32.mrf.mxu1 }
 0x6a9   :  { %v3483_v8 = vpop.f32.mrf.mxu0 }
 0x6aa   :  { %v3536_v56 = vpop.f32.mrf.mxu1 }
 0x6ab   :  { %v3485_v41 = vpop.f32.mrf.mxu0 }
 0x6ac   :  { %v3538_v23 = vpop.f32.mrf.mxu1 }
 0x6ad   :  { %v3487_v30 = vpop.f32.mrf.mxu0 }
 0x6ae   :  { %v3540_v19 = vpop.f32.mrf.mxu1 }
 0x6af   :  { %v11142_v42 = vpop.f32.mrf.mxu0 }
 0x6b0   :  { %v11144_v50 = vpop.f32.mrf.mxu1 }
 0x6b1   :  { %14164 = vst [vmem:[#allocation24_spill] sm:$0xff] %v11144_v50  ;;  %v3595_v57 = vpop.f32.mrf.mxu0 }
 0x6b2   :  { %v3596_v39 = vadd.f32 %v3595_v57, %v11126_v24  ;;  %v11219_v24 = vpop.permute.xlu0 %4270 }
 0x6b3   :  { %v3648_v44 = vpop.f32.mrf.mxu1  ;;  %v11146_v31 = vpop.f32.mrf.mxu0 }
 0x6b4   :  { %v3649_v48 = vadd.f32 %v3648_v44, %v11128_v4 }
 0x6b5   :  { %v11148_v34 = vpop.f32.mrf.mxu1  ;;  %v3599_v15 = vpop.f32.mrf.mxu0 }
 0x6b6   :  { %v3600_v25 = vadd.f32 %v3599_v15, %v11134_v47 }
 0x6b7   :  { %v11150_v58 = vpop.f32.mrf.mxu1  ;;  %v11152_v13 = vpop.f32.mrf.mxu0 }
 0x6b8   :  { %v3653_v4 = vadd.f32 %v11150_v58, %v11136_v9 }
 0x6b9   :  { %v11154_v29 = vpop.f32.mrf.mxu1  ;;  %v3605_v51 = vpop.f32.mrf.mxu0 }
 0x6ba   :  { %v11156_v36 = vadd.f32 %v3605_v51, %v3483_v8 }
 0x6bb   :  { %v3658_v62 = vpop.f32.mrf.mxu1  ;;  %v3607_v22 = vpop.f32.mrf.mxu0 }
 0x6bc   :  { %v11158_v53 = vadd.f32 %v3658_v62, %v3536_v56  ;;  %v3608_v54 = vadd.f32 %v3607_v22, %v3485_v41 }
 0x6bd   :  { %v3660_v3 = vpop.f32.mrf.mxu1  ;;  %v3609_v49 = vpop.f32.mrf.mxu0 }
 0x6be   :  { %v3661_v1 = vadd.f32 %v3660_v3, %v3538_v23  ;;  %v11160_v43 = vadd.f32 %v3609_v49, %v3487_v30 }
 0x6bf   :  { %v3662_v32 = vpop.f32.mrf.mxu1  ;;  %v11162_v27 = vpop.f32.mrf.mxu0 }
 0x6c0   :  { %v11164_v46 = vadd.f32 %v3662_v32, %v3540_v19 }
 0x6c1   :  { %v11166_v2 = vpop.f32.mrf.mxu1  ;;  %v3730_v40 = vpop.f32.mrf.mxu0 }
 0x6c2   :  { %14165 = vst [vmem:[#allocation28_spill] sm:$0xff] %v11166_v2  ;;  %v3802_v59 = vadd.f32 %v3730_v40, %v3596_v39 }
 0x6c3   :  { %v3783_v20 = vpop.f32.mrf.mxu1  ;;  %v11168_v37 = vpop.f32.mrf.mxu0 }
 0x6c4   :  { %v3804_v61 = vadd.f32 %v3783_v20, %v3649_v48 }
 0x6c5   :  { %v11170_v38 = vpop.f32.mrf.mxu1  ;;  %v3734_v6 = vpop.f32.mrf.mxu0 }
 0x6c6   :  { %v3806_v39 = vadd.f32 %v3734_v6, %v3600_v25 }
 0x6c7   :  { %v3787_v5 = vpop.f32.mrf.mxu1  ;;  %v11172_v18 = vpop.f32.mrf.mxu0 }
 0x6c8   :  { %v3808_v48 = vadd.f32 %v3787_v5, %v3653_v4 }
 0x6c9   :  { %v11174_v33 = vpop.f32.mrf.mxu1  ;;  %v11176_v8 = vpop.f32.mrf.mxu0 }
 0x6cb   :  { %v11178_v56 = vpop.f32.mrf.mxu1  ;;  %v3742_v41 = vpop.f32.mrf.mxu0 }
 0x6cc   :  { %v11180_v23 = vadd.f32 %v3742_v41, %v3608_v54 }
 0x6cd   :  { %v3795_v30 = vpop.f32.mrf.mxu1  ;;  %v11182_v19 = vpop.f32.mrf.mxu0 }
 0x6ce   :  { %v11184_v51 = vadd.f32 %v3795_v30, %v3661_v1 }
 0x6cf   :  { %v11186_v62 = vpop.f32.mrf.mxu1  ;;  %v11188_v22 = vpop.f32.mrf.mxu0 }
 0x6d0   :  { %14166 = vst [vmem:[#allocation25_spill] sm:$0xff] %v11184_v51 }
 0x6d1   :  { %v11190_v3 = vpop.f32.mrf.mxu1  ;;  %v3945_v49 = vpop.f32.mrf.mxu0 }
 0x6d2   :  { %14167 = vst [vmem:[#allocation27_spill] sm:$0xff] %v11190_v3  ;;  %v4017_v7 = vadd.f32 %v3945_v49, %v3802_v59  ;;  %v4256_v3 = vpop.permute.xlu1 %4255 }
 0x6d3   :  { %v3998_v32 = vpop.f32.mrf.mxu1  ;;  %v3947_v52 = vpop.f32.mrf.mxu0 }
 0x6d4   :  { %v4019_v57 = vadd.f32 %v3998_v32, %v3804_v61  ;;  %v4261_v61 = vpop.permute.xlu0 %4260 }
 0x6d5   :  { %v11192_v35 = vpop.f32.mrf.mxu1  ;;  %v3949_v12 = vpop.f32.mrf.mxu0 }
 0x6d6   :  { %v4021_v59 = vadd.f32 %v3949_v12, %v3806_v39  ;;  %v3810_v39 = vadd.f32 %v11176_v8, %v11156_v36  ;;  %v3812_v36 = vadd.f32 %v11178_v56, %v11158_v53 }
 0x6d7   :  { %v4002_v16 = vpop.f32.mrf.mxu1  ;;  %v11194_v54 = vpop.f32.mrf.mxu0 }
 0x6d9   :  { %v11196_v41 = vpop.f32.mrf.mxu1  ;;  %v11198_v11 = vpop.f32.mrf.mxu0 }
 0x6db   :  { %v11200_v1 = vpop.f32.mrf.mxu1  ;;  %v11202_v30 = vpop.f32.mrf.mxu0 }
 0x6dd   :  { %v11207_v63 = vpop.f32.mrf.mxu1  ;;  %v11209_v45 = vpop.f32.mrf.mxu0 }
 0x6de   :  { %14168 = vst [vmem:[#allocation26_spill] sm:$0xff] %v11207_v63 }
 0x6df   :  { %v11212_v26 = vpop.f32.mrf.mxu1  ;;  %v11214_v28 = vpop.f32.mrf.mxu0 }
 0x6e0   :  { %14169 = vst [vmem:[#allocation29_spill] sm:$0xff] %v11214_v28 }
 0x6e1   :  { %v11217_v17 = vpop.f32.mrf.mxu1  ;;  %v4160_v0 = vpop.f32.mrf.mxu0 }
 0x6e2   :  { %14170 = vst [vmem:[#allocation23_spill] sm:$0xff] %v11217_v17  ;;  %v4232_v2 = vadd.f32 %v4160_v0, %v4017_v7  ;;  %v4023_v17 = vadd.f32 %v4002_v16, %v3808_v48  ;;  %v3598_v0 = vadd.f32 %v11146_v31, %v11130_v55 }
 0x6e3   :  { %v4213_v44 = vpop.f32.mrf.mxu1  ;;  %v4162_v40 = vpop.f32.mrf.mxu0 }
 0x6e4   :  { %v4273_v50 = vadd.f32 %v4256_v3, %v4232_v2  ;;  %v4234_v28 = vadd.f32 %v4213_v44, %v4019_v57  ;;  %v3803_v9 = vadd.f32 %v11168_v37, %v3598_v0 }
 0x6e5   :  { %v4215_v20 = vpop.f32.mrf.mxu1  ;;  %v4164_v47 = vpop.f32.mrf.mxu0 }
 0x6e6   :  { %v4305_v15 = vmul.f32 0.01, %v4273_v50  ;;  %v4275_v49 = vadd.f32 %v4256_v3, %v4234_v28  ;;  %vm4289_vm8 = vcmp.ge.f32.partialorder %v4273_v50, 0.0  ;;  %v4236_v63 = vadd.f32 %v4164_v47, %v4021_v59 }
 0x6e7   :  { %v4217_v51 = vpop.f32.mrf.mxu1  ;;  %v3651_v28 = vadd.f32 %v11148_v34, %v11132_v60  ;;  %v4018_v16 = vadd.f32 %v3947_v52, %v3803_v9  ;;  %v4166_v60 = vpop.f32.mrf.mxu0 }
 0x6e8   :  { %v4277_v7 = vadd.f32 %v4261_v61, %v4236_v63  ;;  %v4238_v25 = vadd.f32 %v4217_v51, %v4023_v17  ;;  %v4307_v58 = vmul.f32 0.01, %v4275_v49  ;;  %v11226_v2 = vsel %vm4289_vm8, %v4273_v50, %v4305_v15 }
 0x6e9   :  { %vm4291_vm9 = vcmp.ge.f32.partialorder %v4275_v49, 0.0  ;;  %4414 = vrot.lane.b32.xlu1 %v11226_v2, %s8718_s19  ;;  %v3602_v63 = vadd.f32 %v11152_v13, %v11138_v14  ;;  %v3805_v55 = vadd.f32 %v11170_v38, %v3651_v28  ;;  %v4233_v50 = vadd.f32 %v4162_v40, %v4018_v16  ;;  %v4219_v57 = vpop.f32.mrf.mxu1 }
 0x6ea   :  { %vm4293_vm10 = vcmp.ge.f32.partialorder %v4277_v7, 0.0  ;;  %v4309_v12 = vmul.f32 0.01, %v4277_v7  ;;  %v4279_v6 = vadd.f32 %v4261_v61, %v4238_v25  ;;  %v11237_v31 = vsel %vm4291_vm9, %v4275_v49, %v4307_v58 }
 0x6eb   :  { %v3807_v37 = vadd.f32 %v11172_v18, %v3602_v63  ;;  %v4020_v52 = vadd.f32 %v11192_v35, %v3805_v55  ;;  %v3655_v14 = vadd.f32 %v11154_v29, %v11140_v10  ;;  %v4274_v13 = vadd.f32 %v4256_v3, %v4233_v50  ;;  %v4223_v59 = vpop.f32.mrf.mxu1 }
 0x6ec   :  { %v11234_v17 = vsel %vm4293_vm10, %v4277_v7, %v4309_v12  ;;  %v4311_v5 = vmul.f32 0.01, %v4279_v6  ;;  %vm4295_vm11 = vcmp.ge.f32.partialorder %v4279_v6, 0.0  ;;  %v3814_v15 = vadd.f32 %v11182_v19, %v11160_v43 }
 0x6ed   :  { %4416 = vrot.lane.b32.xlu0 %v11234_v17, %s8718_s19  ;;  %4430 = vrot.lane.b32.xlu1 %v11237_v31, %s8718_s19  ;;  %v4022_v34 = vadd.f32 %v11194_v54, %v3807_v37  ;;  %v4235_v38 = vadd.f32 %v4215_v20, %v4020_v52  ;;  %v3809_v51 = vadd.f32 %v11174_v33, %v3655_v14  ;;  %v4306_v4 = vmul.f32 0.01, %v4274_v13  ;;  %v4170_v33 = vpop.f32.mrf.mxu0  ;;  %v4225_v0 = vpop.f32.mrf.mxu1 }
 0x6ee   :  { %v11251_v18 = vsel %vm4295_vm11, %v4279_v6, %v4311_v5  ;;  %vm4290_vm12 = vcmp.ge.f32.partialorder %v4274_v13, 0.0  ;;  %v4029_v53 = vadd.f32 %v11209_v45, %v3814_v15  ;;  %v3816_v43 = vadd.f32 %v11186_v62, %v11164_v46 }
 0x6ef   :  { %v4237_v32 = vadd.f32 %v4166_v60, %v4022_v34  ;;  %v4024_v35 = vadd.f32 %v11196_v41, %v3809_v51  ;;  %v4276_v10 = vadd.f32 %v4256_v3, %v4235_v38  ;;  %v11262_v40 = vsel %vm4290_vm12, %v4274_v13, %v4306_v4  ;;  %v4172_v20 = vpop.f32.mrf.mxu0  ;;  %v14171_v34 = vld [vmem:[#allocation25_spill] sm:$0xff]  ;;  %v14172_v13 = vld [vmem:[#allocation26_spill] sm:$0xff] }
 0x6f0   :  { %v4025_v3 = vadd.f32 %v11198_v11, %v3810_v39  ;;  %v4031_v58 = vadd.f32 %v11212_v26, %v3816_v43  ;;  %v4026_v37 = vadd.f32 %v11202_v30, %v11180_v23  ;;  %v3612_v5 = vadd.f32 %v11162_v27, %v11142_v42  ;;  %v14173_v23 = vld [vmem:[#allocation24_spill] sm:$0xff] }
 0x6f1   :  { %4337 = vrot.lane.b32.xlu1 %v11226_v2, %s8720_s0  ;;  %4432 = vrot.lane.b32.xlu0 %v11251_v18, %s8718_s19  ;;  %v4278_v29 = vadd.f32 %v4261_v61, %v4237_v32  ;;  %v4239_v54 = vadd.f32 %v4219_v57, %v4024_v35  ;;  %v4308_v44 = vmul.f32 0.01, %v4276_v10  ;;  %vm4292_vm1 = vcmp.ge.f32.partialorder %v4276_v10, 0.0  ;;  %v4174_v7 = vpop.f32.mrf.mxu0  ;;  %v14174_v30 = vld [vmem:[#allocation28_spill] sm:$0xff]  ;;  %v14175_v57 = vld [vmem:[#allocation29_spill] sm:$0xff]  ;;  %v14176_v35 = vld [vmem:[#allocation27_spill] sm:$0xff] }
 0x6f2   :  { %v4240_v8 = vadd.f32 %v4170_v33, %v4025_v3  ;;  %v4244_v19 = vadd.f32 %v4174_v7, %v4029_v53  ;;  %v4241_v52 = vadd.f32 %v4172_v20, %v4026_v37  ;;  %v3815_v60 = vadd.f32 %v11188_v22, %v3612_v5 }
 0x6f3   :  { %v4310_v41 = vmul.f32 0.01, %v4278_v29  ;;  %v4280_v48 = vadd.f32 %v4261_v61, %v4239_v54  ;;  %vm4294_vm2 = vcmp.ge.f32.partialorder %v4278_v29, 0.0  ;;  %v11271_v47 = vsel %vm4292_vm1, %v4276_v10, %v4308_v44  ;;  %v4176_v51 = vpop.f32.mrf.mxu0  ;;  %v14177_v54 = vld [vmem:[#allocation23_spill] sm:$0xff] }
 0x6f4   :  { %v4027_v61 = vadd.f32 %v11200_v1, %v3812_v36  ;;  %v4281_v56 = vadd.f32 %v11204_v21, %v4240_v8  ;;  %v4227_v1 = vpop.f32.mrf.mxu1  ;;  %v4285_v28 = vadd.f32 %v11219_v24, %v4244_v19  ;;  %v4028_v38 = vadd.f32 %v14172_v13, %v14171_v34  ;;  %v8520_v19 = vld [vmem:[%s13870_s2 + $0x80] sm:$0xff] }
 0x6f5   :  { %4353 = vrot.lane.b32.xlu1 %v11237_v31, %s8720_s0  ;;  %4339 = vrot.lane.b32.xlu0 %v11234_v17, %s8720_s0  ;;  %v4312_v49 = vmul.f32 0.01, %v4280_v48  ;;  %v11277_v11 = vsel %vm4294_vm2, %v4278_v29, %v4310_v41  ;;  %vm4296_vm4 = vcmp.ge.f32.partialorder %v4280_v48, 0.0  ;;  %v4246_v16 = vadd.f32 %v4227_v1, %v4031_v58  ;;  %v8523_v58 = vld [vmem:[%s13870_s2 + $0x98] sm:$0xff] }
 0x6f6   :  { %v4242_v25 = vadd.f32 %v4223_v59, %v4027_v61  ;;  %v4313_v12 = vmul.f32 0.01, %v4281_v56  ;;  %vm4297_vm5 = vcmp.ge.f32.partialorder %v4281_v56, 0.0  ;;  %v4317_v6 = vmul.f32 0.01, %v4285_v28  ;;  %v4229_v29 = vpop.f32.mrf.mxu1 }
 0x6f7   :  { %v11288_v9 = vsel %vm4296_vm4, %v4280_v48, %v4312_v49  ;;  %v4287_v26 = vadd.f32 %v11219_v24, %v4246_v16  ;;  %vm4301_vm7 = vcmp.ge.f32.partialorder %v4285_v28, 0.0  ;;  %v3665_v32 = vadd.f32 %v14174_v30, %v14173_v23 }
 0x6f8   :  { %v4283_v45 = vadd.f32 %v11204_v21, %v4242_v25  ;;  %v11299_v62 = vsel %vm4297_vm5, %v4281_v56, %v4313_v12  ;;  %v11310_v50 = vsel %vm4301_vm7, %v4285_v28, %v4317_v6  ;;  %v4030_v42 = vadd.f32 %v14175_v57, %v3815_v60  ;;  %v8522_v56 = vld [vmem:[%s13870_s2 + $0x90] sm:$0xff]  ;;  %v8521_v28 = vld [vmem:[%s13870_s2 + $0x88] sm:$0xff] }
 0x6f9   :  { %4422 = vrot.lane.b32.xlu1 %v11262_v40, %s8718_s19  ;;  %4355 = vrot.lane.b32.xlu0 %v11251_v18, %s8720_s0  ;;  %v4319_v55 = vmul.f32 0.01, %v4287_v26  ;;  %vm4303_vm8 = vcmp.ge.f32.partialorder %v4287_v26, 0.0  ;;  %v4282_v27 = vadd.f32 %v11204_v21, %v4241_v52  ;;  %v4243_v22 = vadd.f32 %v4225_v0, %v4028_v38 }
 0x6fa   :  { %v4315_v46 = vmul.f32 0.01, %v4283_v45  ;;  %vm4299_vm6 = vcmp.ge.f32.partialorder %v4283_v45, 0.0  ;;  %v3817_v4 = vadd.f32 %v14176_v35, %v3665_v32  ;;  %v4245_v10 = vadd.f32 %v4176_v51, %v4030_v42 }
 0x6fb   :  { %v11321_v14 = vsel %vm4303_vm8, %v4287_v26, %v4319_v55  ;;  %v4314_v39 = vmul.f32 0.01, %v4282_v27  ;;  %v4284_v44 = vadd.f32 %v11204_v21, %v4243_v22  ;;  %vm4298_vm9 = vcmp.ge.f32.partialorder %v4282_v27, 0.0 }
 0x6fc   :  { %v11306_v63 = vsel %vm4299_vm6, %v4283_v45, %v4315_v46  ;;  %v4032_v33 = vadd.f32 %v14177_v54, %v3817_v4  ;;  %v4286_v41 = vadd.f32 %v11219_v24, %v4245_v10 }
 0x6fd   :  { %4438 = vrot.lane.b32.xlu1 %v11271_v47, %s8718_s19  ;;  %4424 = vrot.lane.b32.xlu0 %v11277_v11, %s8718_s19  ;;  %v4316_v3 = vmul.f32 0.01, %v4284_v44  ;;  %v11343_v59 = vsel %vm4298_vm9, %v4282_v27, %v4314_v39  ;;  %vm4300_vm10 = vcmp.ge.f32.partialorder %v4284_v44, 0.0 }
 0x6fe   :  { %v4247_v48 = vadd.f32 %v4229_v29, %v4032_v33  ;;  %v4318_v20 = vmul.f32 0.01, %v4286_v41  ;;  %vm4302_vm11 = vcmp.ge.f32.partialorder %v4286_v41, 0.0  ;;  %v14181_v33 = vld [vmem:[#allocation12_spill] sm:$0xff] }
 0x6ff   :  { %v11350_v21 = vsel %vm4300_vm10, %v4284_v44, %v4316_v3 }
 0x700   :  { %v4288_v36 = vadd.f32 %v11219_v24, %v4247_v48  ;;  %v11354_v15 = vsel %vm4302_vm11, %v4286_v41, %v4318_v20 }
 0x701   :  { %4345 = vrot.lane.b32.xlu1 %v11262_v40, %s8720_s0  ;;  %4440 = vrot.lane.b32.xlu0 %v11288_v9, %s8718_s19 }
 0x702   :  { %v4320_v8 = vmul.f32 0.01, %v4288_v36  ;;  %vm4304_vm12 = vcmp.ge.f32.partialorder %v4288_v36, 0.0 }
 0x704   :  { %v11360_v24 = vsel %vm4304_vm12, %v4288_v36, %v4320_v8 }
 0x705   :  { %4361 = vrot.lane.b32.xlu1 %v11271_v47, %s8720_s0  ;;  %4347 = vrot.lane.b32.xlu0 %v11277_v11, %s8720_s0 }
 0x709   :  { %4418 = vrot.lane.b32.xlu1 %v11299_v62, %s8718_s19  ;;  %4363 = vrot.lane.b32.xlu0 %v11288_v9, %s8720_s0 }
 0x70d   :  { %4434 = vrot.lane.b32.xlu1 %v11306_v63, %s8718_s19  ;;  %4420 = vrot.lane.b32.xlu0 %v11310_v50, %s8718_s19 }
 0x711   :  { %4341 = vrot.lane.b32.xlu1 %v11299_v62, %s8720_s0  ;;  %4436 = vrot.lane.b32.xlu0 %v11321_v14, %s8718_s19 }
 0x715   :  { %4357 = vrot.lane.b32.xlu1 %v11306_v63, %s8720_s0  ;;  %4343 = vrot.lane.b32.xlu0 %v11310_v50, %s8720_s0 }
 0x719   :  { %4890 = vrot.lane.b32.xlu1 %v11299_v62, %s8722_s21  ;;  %4359 = vrot.lane.b32.xlu0 %v11321_v14, %s8720_s0 }
 0x71d   :  { %4426 = vrot.lane.b32.xlu1 %v11343_v59, %s8718_s19  ;;  %4892 = vrot.lane.b32.xlu0 %v11310_v50, %s8722_s21 }
 0x721   :  { %4442 = vrot.lane.b32.xlu1 %v11350_v21, %s8718_s19  ;;  %4428 = vrot.lane.b32.xlu0 %v11354_v15, %s8718_s19 }
 0x725   :  { %4906 = vrot.lane.b32.xlu1 %v11306_v63, %s8722_s21  ;;  %4444 = vrot.lane.b32.xlu0 %v11360_v24, %s8718_s19 }
 0x729   :  { %4349 = vrot.lane.b32.xlu1 %v11343_v59, %s8720_s0  ;;  %4908 = vrot.lane.b32.xlu0 %v11321_v14, %s8722_s21 }
 0x72d   :  { %4365 = vrot.lane.b32.xlu1 %v11350_v21, %s8720_s0  ;;  %4888 = vrot.lane.b32.xlu0 %v11234_v17, %s8722_s21 }
 0x731   :  { %4898 = vrot.lane.b32.xlu1 %v11343_v59, %s8722_s21  ;;  %4351 = vrot.lane.b32.xlu0 %v11354_v15, %s8720_s0 }
 0x735   :  { %4914 = vrot.lane.b32.xlu1 %v11350_v21, %s8722_s21  ;;  %4367 = vrot.lane.b32.xlu0 %v11360_v24, %s8720_s0 }
 0x739   :  { %4886 = vrot.lane.b32.xlu1 %v11226_v2, %s8722_s21  ;;  %4896 = vrot.lane.b32.xlu0 %v11277_v11, %s8722_s21 }
 0x73d   :  { %4894 = vrot.lane.b32.xlu1 %v11262_v40, %s8722_s21  ;;  %4904 = vrot.lane.b32.xlu0 %v11251_v18, %s8722_s21 }
 0x741   :  { %4902 = vrot.lane.b32.xlu1 %v11237_v31, %s8722_s21  ;;  %4912 = vrot.lane.b32.xlu0 %v11288_v9, %s8722_s21 }
 0x745   :  { %4910 = vrot.lane.b32.xlu1 %v11271_v47, %s8722_s21  ;;  %5107 = vrot.lane.b32.xlu0 %v11310_v50, %s8723_s22 }
 0x749   :  { %5105 = vrot.lane.b32.xlu1 %v11299_v62, %s8723_s22  ;;  %5123 = vrot.lane.b32.xlu0 %v11321_v14, %s8723_s22 }
 0x74d   :  { %5113 = vrot.lane.b32.xlu1 %v11343_v59, %s8723_s22  ;;  %5103 = vrot.lane.b32.xlu0 %v11234_v17, %s8723_s22 }
 0x751   :  { %5121 = vrot.lane.b32.xlu1 %v11306_v63, %s8723_s22  ;;  %4900 = vrot.lane.b32.xlu0 %v11354_v15, %s8722_s21 }
 0x755   :  { %5129 = vrot.lane.b32.xlu1 %v11350_v21, %s8723_s22  ;;  %4916 = vrot.lane.b32.xlu0 %v11360_v24, %s8722_s21 }
 0x759   :  { %5101 = vrot.lane.b32.xlu1 %v11226_v2, %s8723_s22  ;;  %5111 = vrot.lane.b32.xlu0 %v11277_v11, %s8723_s22 }
 0x75b   :  { %v11416_v49 = vpop.permute.xlu1 %4414 }
 0x75d   :  { %5109 = vrot.lane.b32.xlu1 %v11262_v40, %s8723_s22  ;;  %5119 = vrot.lane.b32.xlu0 %v11251_v18, %s8723_s22 }
 0x75f   :  { %v4417_v61 = vpop.permute.xlu0 %4416  ;;  %v11422_v0 = vpop.permute.xlu1 %4430 }
 0x761   :  { %5117 = vrot.lane.b32.xlu1 %v11237_v31, %s8723_s22  ;;  %5115 = vrot.lane.b32.xlu0 %v11354_v15, %s8723_s22 }
 0x763   :  { %v11428_v7 = vpop.permute.xlu1 %4337  ;;  %v4433_v53 = vpop.permute.xlu0 %4432 }
 0x765   :  { %5125 = vrot.lane.b32.xlu1 %v11271_v47, %s8723_s22  ;;  %5131 = vrot.lane.b32.xlu0 %v11360_v24, %s8723_s22 }
 0x767   :  { %v11437_v25 = vpop.permute.xlu1 %4353  ;;  %v11439_v43 = vpop.permute.xlu0 %4339 }
 0x769   :  { %5333 = vperm.xlu1 %8617, %v8522_v56   ;;  %5127 = vrot.lane.b32.xlu0 %v11288_v9, %s8723_s22 }
 0x76b   :  { %v4423_v1 = vpop.permute.xlu1 %4422  ;;  %v11449_v12 = vpop.permute.xlu0 %4355 }
 0x76c   :  { %v4454_v4 = vsel %vm167_vm13, %v11416_v49, %v4423_v1 }
 0x76d   :  { %5323 = vperm.xlu1 %8617, %v8520_v19   ;;  %5338 = vperm.xlu0 %8616, %v8523_v58  }
 0x76f   :  { %v4439_v45 = vpop.permute.xlu1 %4438  ;;  %v4425_v16 = vpop.permute.xlu0 %4424 }
 0x770   :  { %v4455_v10 = vsel %vm167_vm13, %v4417_v61, %v4425_v16  ;;  %v4446_v48 = vsel %vm167_vm13, %v11422_v0, %v4439_v45  ;;  %v4451_v3 = vsel %vm167_vm13, %v4425_v16, %v4433_v53  ;;  %v14183_v16 = vld [vmem:[#allocation13_spill] sm:$0xff] }
 0x771   :  { %5328 = vperm.xlu0 %8616, %v8521_v28   ;;  %v4467_v56 = vmul.f32 %v4455_v10, %v14181_v33 }
 0x773   :  { %v11454_v46 = vpop.permute.xlu1 %4345  ;;  %v4441_v6 = vpop.permute.xlu0 %4440 }
 0x774   :  { %v4447_v54 = vsel %vm167_vm13, %v4433_v53, %v4441_v6  ;;  %v4459_v19 = vsel %vm167_vm13, %v4441_v6, %v4417_v61 }
 0x777   :  { %v11456_v26 = vpop.permute.xlu1 %4361  ;;  %v11458_v55 = vpop.permute.xlu0 %4347 }
 0x77b   :  { %v4419_v37 = vpop.permute.xlu1 %4418  ;;  %v11460_v5 = vpop.permute.xlu0 %4363 }
 0x77f   :  { %v4435_v52 = vpop.permute.xlu1 %4434  ;;  %v4421_v60 = vpop.permute.xlu0 %4420 }
 0x783   :  { %v11462_v34 = vpop.permute.xlu1 %4341  ;;  %v4437_v13 = vpop.permute.xlu0 %4436 }
 0x787   :  { %v11464_v38 = vpop.permute.xlu1 %4357  ;;  %v11466_v51 = vpop.permute.xlu0 %4343 }
 0x78b   :  { %v11468_v23 = vpop.permute.xlu1 %4890  ;;  %v11470_v30 = vpop.permute.xlu0 %4359 }
 0x78c   :  { %14178 = vst [vmem:[#allocation25_spill] sm:$0xff] %v11468_v23 }
 0x78f   :  { %v4427_v32 = vpop.permute.xlu1 %4426  ;;  %v11472_v57 = vpop.permute.xlu0 %4892 }
 0x790   :  { %14179 = vst [vmem:[#allocation26_spill] sm:$0xff] %v11472_v57  ;;  %v4456_v27 = vsel %vm167_vm13, %v4419_v37, %v4427_v32  ;;  %v4452_v58 = vsel %vm167_vm13, %v4427_v32, %v4435_v52  ;;  %v4463_v32 = vmul.f32 %v4454_v4, %v14181_v33 }
 0x791   :  { %v4471_v39 = vmul.f32 %v4456_v27, %v14181_v33 }
 0x793   :  { %v4443_v22 = vpop.permute.xlu1 %4442  ;;  %v4429_v35 = vpop.permute.xlu0 %4428 }
 0x794   :  { %v4457_v29 = vsel %vm167_vm13, %v4421_v60, %v4429_v35  ;;  %v4453_v44 = vsel %vm167_vm13, %v4429_v35, %v4437_v13  ;;  %v4448_v20 = vsel %vm167_vm13, %v4435_v52, %v4443_v22  ;;  %v4460_v36 = vsel %vm167_vm13, %v4443_v22, %v4419_v37  ;;  %v14182_v35 = vld [vmem:[#allocation14_spill] sm:$0xff]  ;;  %v14184_v22 = vld [vmem:[#allocation11_spill] sm:$0xff] }
 0x795   :  { %v4475_v41 = vmul.f32 %v4457_v29, %v14181_v33  ;;  %v4469_v53 = vmul.f32 %v4447_v54, %v14182_v35  ;;  %v4476_v29 = vmul.f32 %v4453_v44, %v14183_v16  ;;  %v4470_v10 = vmul.f32 %v4460_v36, %v14184_v22 }
 0x796   :  { %v4473_v23 = vmul.f32 %v4448_v20, %v14182_v35  ;;  %v4450_v52 = vsel %vm167_vm13, %v4423_v1, %v11422_v0  ;;  %v4466_v44 = vmul.f32 %v4459_v19, %v14184_v22  ;;  %v4468_v36 = vmul.f32 %v4451_v3, %v14183_v16 }
 0x797   :  { %v11498_v8 = vpop.permute.xlu1 %4906  ;;  %v4445_v28 = vpop.permute.xlu0 %4444  ;;  %v4483_v27 = vpack.c.bf16 %v4475_v41, %v4471_v39  ;;  %v4465_v39 = vmul.f32 %v4446_v48, %v14182_v35  ;;  %v4479_v1 = vpack.c.bf16 %v4467_v56, %v4463_v32  ;;  %v4377_v32 = vsel %vm95_vm14, %v11428_v7, %v11454_v46 }
 0x798   :  { %v4449_v57 = vsel %vm167_vm13, %v4437_v13, %v4445_v28  ;;  %v4461_v37 = vsel %vm167_vm13, %v4445_v28, %v4421_v60  ;;  %v4458_v13 = vsel %vm167_vm13, %v4439_v45, %v11416_v49  ;;  %v4472_v60 = vmul.f32 %v4452_v58, %v14183_v16 }
 0x799   :  { %v4474_v61 = vmul.f32 %v4461_v37, %v14184_v22  ;;  %v4477_v6 = vmul.f32 %v4449_v57, %v14182_v35  ;;  %4519 = vmatprep.subr.bf16.mxu0 %v4483_v27  ;;  %v4462_v4 = vmul.f32 %v4458_v13, %v14184_v22  ;;  %v4481_v49 = vpack.c.bf16 %v4469_v53, %v4465_v39  ;;  %v14185_v37 = vld [vmem:[#allocation8_spill] sm:$0xff] }
 0x79a   :  { %v4484_v0 = vpack.c.bf16 %v4476_v29, %v4472_v60  ;;  %v4464_v45 = vmul.f32 %v4450_v52, %v14183_v16  ;;  %v4378_v53 = vsel %vm95_vm14, %v11439_v43, %v11458_v55  ;;  %v14186_v52 = vmov 0  }
 0x79b   :  { %v4350_v54 = vpop.permute.xlu1 %4349  ;;  %v4482_v41 = vpack.c.bf16 %v4474_v61, %v4470_v10  ;;  %v11525_v57 = vpop.permute.xlu0 %4908  ;;  %v4485_v20 = vpack.c.bf16 %v4477_v6, %v4473_v23  ;;  %v4478_v58 = vpack.c.bf16 %v4466_v44, %v4462_v4  ;;  %v8658_v23 = vld [vmem:[#allocation2 + $0x150] sm:$0xff]   ;;  %v4369_v13 = vsel %vm95_vm14, %v11437_v25, %v11456_v26 }
 0x79c   :  { %v4480_v28 = vpack.c.bf16 %v4468_v36, %v4464_v45  ;;  %v4379_v3 = vsel %vm95_vm14, %v11462_v34, %v4350_v54  ;;  %v4390_v44 = vmul.f32 %v4378_v53, %v14185_v37  ;;  %v14187_v4 = vld [vmem:[#allocation7_spill] sm:$0xff] }
 0x79d   :  { %4520 = vmatpush1.bf16.msra.mxu0 %v4482_v41  ;;  %4572 = vmatprep.subr.bf16.mxu1 %v4485_v20  ;;  %v4394_v10 = vmul.f32 %v4379_v3, %v14185_v37  ;;  %v4370_v41 = vsel %vm95_vm14, %v11449_v12, %v11460_v5  ;;  %v4382_v20 = vsel %vm95_vm14, %v11460_v5, %v11439_v43  ;;  %v14189_v43 = vld [vmem:[#allocation9_spill] sm:$0xff] }
 0x79e   :  { %4521 = vmatprep.subr.bf16.mxu0 %v4479_v1  ;;  %4573 = vmatpush1.bf16.msra.mxu1 %v4484_v0  ;;  %v4375_v1 = vsel %vm95_vm14, %v4350_v54, %v11464_v38 }
 0x79f   :  { %v4366_v48 = vpop.permute.xlu1 %4365  ;;  %4574 = vmatprep.subr.bf16.mxu1 %v4481_v49  ;;  %v11530_v19 = vpop.permute.xlu0 %4888 }
 0x7a0   :  { %v4383_v61 = vsel %vm95_vm14, %v4366_v48, %v11462_v34  ;;  %v4371_v34 = vsel %vm95_vm14, %v11464_v38, %v4366_v48  ;;  %v4386_v38 = vmul.f32 %v4377_v32, %v14185_v37 }
 0x7a1   :  { %4522 = vmatpush1.bf16.msra.mxu0 %v4478_v58  ;;  %v4393_v49 = vmul.f32 %v4383_v61, %v14187_v4  ;;  %v8659_v58 = vld [vmem:[#allocation2 + $0x158] sm:$0xff]  }
 0x7a2   :  { %4575 = vmatpush1.bf16.msra.mxu1 %v4480_v28  ;;  %v14188_v28 = vld [vmem:[#allocation10_spill] sm:$0xff] }
 0x7a3   :  { %v11535_v56 = vpop.permute.xlu1 %4898  ;;  %v4352_v27 = vpop.permute.xlu0 %4351  ;;  %v4392_v54 = vmul.f32 %v4370_v41, %v14188_v28 }
 0x7a4   :  { %v4380_v29 = vsel %vm95_vm14, %v11466_v51, %v4352_v27  ;;  %8492 = vmatmul.mubr.msk.bf16.vlgmr.msra.gmra.mxu0 %vm240_vm15, %v8658_v23  ;;  %v4376_v60 = vsel %vm95_vm14, %v4352_v27, %v11470_v30 }
 0x7a5   :  { %v4398_v6 = vmul.f32 %v4380_v29, %v14185_v37  ;;  %8494 = vmatmul.mubr.msk.bf16.vlgmr.msra.gmra.mxu1 %vm240_vm15, %v8658_v23  ;;  %4549 = vmatprep.mubr.bf16.mxu0 %v14186_v52  ;;  %v4396_v23 = vmul.f32 %v4371_v34, %v14188_v28  ;;  %v4399_v5 = vmul.f32 %v4376_v60, %v14189_v43 }
 0x7a6   :  { %4602 = vmatprep.mubr.bf16.mxu1 %v14186_v52  ;;  %v4389_v29 = vmul.f32 %v4382_v20, %v14187_v4 }
 0x7a7   :  { %v11566_v39 = vpop.permute.xlu1 %4914  ;;  %v4368_v36 = vpop.permute.xlu0 %4367  ;;  %v4406_v0 = vpack.c.bf16 %v4398_v6, %v4394_v10  ;;  %v4395_v10 = vmul.f32 %v4375_v1, %v14189_v43 }
 0x7a8   :  { %v4372_v45 = vsel %vm95_vm14, %v11470_v30, %v4368_v36  ;;  %v4384_v48 = vsel %vm95_vm14, %v4368_v36, %v11466_v51  ;;  %v4381_v30 = vsel %vm95_vm14, %v11456_v26, %v11428_v7  ;;  %v4374_v51 = vsel %vm95_vm14, %v11458_v55, %v11449_v12 }
 0x7a9   :  { %v4397_v3 = vmul.f32 %v4384_v48, %v14187_v4  ;;  %v4400_v27 = vmul.f32 %v4372_v45, %v14188_v28  ;;  %4641 = vmatprep.subr.bf16.mxu0 %v4406_v0  ;;  %v4373_v7 = vsel %vm95_vm14, %v11454_v46, %v11437_v25  ;;  %v4388_v26 = vmul.f32 %v4369_v13, %v14188_v28 }
 0x7aa   :  { %v4402_v12 = vpack.c.bf16 %v4390_v44, %v4386_v38  ;;  %v4385_v55 = vmul.f32 %v4381_v30, %v14187_v4  ;;  %v4391_v34 = vmul.f32 %v4374_v51, %v14189_v43  ;;  %v4407_v60 = vpack.c.bf16 %v4399_v5, %v4395_v10  ;;  %v8660_v44 = vld [vmem:[#allocation2 + $0x140] sm:$0xff]   ;;  %v14191_v5 = vld [vmem:[#allocation15_spill] sm:$0xff]  ;;  %v14193_v10 = vld [vmem:[#allocation26_spill] sm:$0xff] }
 0x7ab   :  { %v11602_v53 = vpop.permute.xlu1 %4886  ;;  %v4405_v61 = vpack.c.bf16 %v4397_v3, %v4393_v49  ;;  %v11606_v6 = vpop.permute.xlu0 %4896  ;;  %v4408_v32 = vpack.c.bf16 %v4400_v27, %v4396_v23  ;;  %v4404_v20 = vpack.c.bf16 %v4392_v54, %v4388_v26  ;;  %v4387_v36 = vmul.f32 %v4373_v7, %v14189_v43  ;;  %v14192_v27 = vld [vmem:[#allocation16_spill] sm:$0xff]  ;;  %v14194_v26 = vld [vmem:[#allocation17_spill] sm:$0xff] }
 0x7ac   :  { %8493 = vmatmul.mubr.msk.bf16.gmra.mxu0 %vm240_vm15, %v8659_v58  ;;  %v4401_v25 = vpack.c.bf16 %v4389_v29, %v4385_v55  ;;  %v4740_v13 = vpack.c.bf16 %v11354_v15, %v11343_v59  ;;  %v4742_v49 = vpack.c.bf16 %v11360_v24, %v11350_v21  ;;  %v4739_v48 = vpack.c.bf16 %v11310_v50, %v11299_v62 }
 0x7ad   :  { %8495 = vmatmul.mubr.msk.bf16.gmra.mxu1 %vm240_vm15, %v8659_v58  ;;  %4642 = vmatpush1.bf16.msra.mxu0 %v4405_v61  ;;  %v4403_v0 = vpack.c.bf16 %v4391_v34, %v4387_v36  ;;  %v4736_v59 = vpack.c.bf16 %v11277_v11, %v11262_v40  ;;  %v4741_v15 = vpack.c.bf16 %v11321_v14, %v11306_v63  ;;  %v8661_v40 = vld [vmem:[#allocation2 + $0x148] sm:$0xff]  }
 0x7ae   :  { %4694 = vmatprep.subr.bf16.mxu1 %v4408_v32  ;;  %4643 = vmatprep.subr.bf16.mxu0 %v4402_v12  ;;  %v4738_v24 = vpack.c.bf16 %v11288_v9, %v11271_v47  ;;  %v4735_v50 = vpack.c.bf16 %v11234_v17, %v11226_v2  ;;  %v4737_v11 = vpack.c.bf16 %v11251_v18, %v11237_v31  ;;  %v14190_v18 = vld [vmem:[#allocation25_spill] sm:$0xff] }
 0x7af   :  { %v4895_v41 = vpop.permute.xlu1 %4894  ;;  %4695 = vmatpush1.bf16.msra.mxu1 %v4407_v60  ;;  %v11618_v46 = vpop.permute.xlu0 %4904  ;;  %4661 = vmatprep.mubr.bf16.mxu0 %v14186_v52  ;;  %v4924_v31 = vsel %vm633_vm0, %v11535_v56, %v11498_v8  ;;  %v4928_v47 = vsel %vm633_vm0, %v14190_v18, %v11535_v56  ;;  %v8662_v9 = vld [vmem:[#allocation2 + $0x160] sm:$0xff]   ;;  %v4920_v30 = vsel %vm633_vm0, %v11498_v8, %v11566_v39 }
 0x7b0   :  { %4696 = vmatprep.subr.bf16.mxu1 %v4404_v20  ;;  %4714 = vmatprep.mubr.bf16.mxu1 %v14186_v52  ;;  %v4942_v3 = vmul.f32 %v4928_v47, %v14191_v5  ;;  %v4943_v38 = vmul.f32 %v4924_v31, %v14192_v27  ;;  %v4932_v56 = vsel %vm633_vm0, %v11566_v39, %v14190_v18 }
 0x7b1   :  { %4644 = vmatpush1.bf16.msra.mxu0 %v4401_v25  ;;  %v4923_v54 = vsel %vm633_vm0, %v11606_v6, %v11618_v46  ;;  %v4926_v8 = vsel %vm633_vm0, %v11602_v53, %v4895_v41  ;;  %v4944_v12 = vmul.f32 %v4920_v30, %v14194_v26  ;;  %v4927_v55 = vsel %vm633_vm0, %v11530_v19, %v11606_v6 }
 0x7b2   :  { %4776 = vmatprep.subr.bf16.mxu0 %v4740_v13  ;;  %v4939_v60 = vmul.f32 %v4923_v54, %v14192_v27  ;;  %v14195_v13 = vld [vmem:[#allocation18_spill] sm:$0xff] }
 0x7b3   :  { %v11624_v1 = vpop.permute.xlu1 %4902  ;;  %4697 = vmatpush1.bf16.msra.mxu1 %v4403_v0  ;;  %v11628_v45 = vpop.permute.xlu0 %4912  ;;  %v4934_v0 = vmul.f32 %v4926_v8, %v14191_v5 }
 0x7b4   :  { %4829 = vmatprep.subr.bf16.mxu1 %v4742_v49  ;;  %8498 = vmatmul.mubr.msk.bf16.vlgmr.msra.gmra.mxu0 %vm240_vm15, %v8660_v44  ;;  %v4922_v58 = vsel %vm633_vm0, %v4895_v41, %v11624_v1 }
 0x7b5   :  { %4777 = vmatpush1.bf16.msra.mxu0 %v4739_v48  ;;  %4671 = vmatprep.mubr.bf16.mxu0 %v14186_v52  ;;  %v4935_v39 = vmul.f32 %v4922_v58, %v14192_v27  ;;  %v8663_v48 = vld [vmem:[#allocation2 + $0x168] sm:$0xff]  }
 0x7b6   :  { %8500 = vmatmul.mubr.msk.bf16.vlgmr.msra.gmra.mxu1 %vm240_vm15, %v8660_v44  ;;  %4778 = vmatprep.subr.bf16.mxu0 %v4736_v59  ;;  %v4945_v44 = vmul.f32 %v4932_v56, %v14195_v13 }
 0x7b7   :  { %v4911_v21 = vpop.permute.xlu1 %4910  ;;  %4830 = vmatpush1.bf16.msra.mxu1 %v4741_v15  ;;  %v11641_v62 = vpop.permute.xlu0 %5107  ;;  %4724 = vmatprep.mubr.bf16.mxu1 %v14186_v52 }
 0x7b8   :  { %4831 = vmatprep.subr.bf16.mxu1 %v4738_v24  ;;  %v4930_v41 = vsel %vm633_vm0, %v4911_v21, %v11602_v53  ;;  %v4931_v53 = vsel %vm633_vm0, %v11628_v45, %v11530_v19  ;;  %v4951_v24 = vpack.c.bf16 %v4939_v60, %v4935_v39 }
 0x7b9   :  { %4779 = vmatpush1.bf16.msra.mxu0 %v4735_v50  ;;  %v4938_v50 = vmul.f32 %v4927_v55, %v14191_v5  ;;  %v4941_v58 = vmul.f32 %v4931_v53, %v14195_v13  ;;  %v14199_v53 = vld [vmem:[#allocation22_spill] sm:$0xff] }
 0x7bb   :  { %v11648_v63 = vpop.permute.xlu1 %5105  ;;  %4832 = vmatpush1.bf16.msra.mxu1 %v4737_v11  ;;  %v11650_v14 = vpop.permute.xlu0 %5123  ;;  %v4950_v47 = vpack.c.bf16 %v4938_v50, %v4934_v0 }
 0x7bc   :  { %8499 = vmatmul.mubr.msk.bf16.gmra.mxu0 %vm240_vm15, %v8661_v40 }
 0x7bd   :  { %4796 = vmatprep.mubr.bf16.mxu0 %v14186_v52 }
 0x7be   :  { %8501 = vmatmul.mubr.msk.bf16.gmra.mxu1 %vm240_vm15, %v8661_v40  ;;  %v4937_v40 = vmul.f32 %v4930_v41, %v14195_v13 }
 0x7bf   :  { %v11655_v2 = vpop.permute.xlu1 %5113  ;;  %v11657_v17 = vpop.permute.xlu0 %5103  ;;  %4849 = vmatprep.mubr.bf16.mxu1 %v14186_v52 }
 0x7c3   :  { %v11671_v23 = vpop.permute.xlu1 %5121  ;;  %v4901_v51 = vpop.permute.xlu0 %4900 }
 0x7c4   :  { %v4925_v29 = vsel %vm633_vm0, %v4901_v51, %v11525_v57  ;;  %v4929_v61 = vsel %vm633_vm0, %v14193_v10, %v4901_v51  ;;  %8504 = vmatmul.mubr.msk.bf16.vlgmr.msra.gmra.mxu0 %vm240_vm15, %v8662_v9  ;;  %v8664_v51 = vld [vmem:[#allocation2 + $0x170] sm:$0xff]  }
 0x7c5   :  { %v4946_v32 = vmul.f32 %v4929_v61, %v14191_v5  ;;  %v4947_v7 = vmul.f32 %v4925_v29, %v14192_v27  ;;  %4806 = vmatprep.mubr.bf16.mxu0 %v14186_v52  ;;  %v14196_v29 = vld [vmem:[#allocation19_spill] sm:$0xff]  ;;  %v14197_v61 = vld [vmem:[#allocation20_spill] sm:$0xff] }
 0x7c6   :  { %8506 = vmatmul.mubr.msk.bf16.vlgmr.msra.gmra.mxu1 %vm240_vm15, %v8662_v9  ;;  %v4919_v9 = vsel %vm633_vm0, %v11618_v46, %v11628_v45  ;;  %v5143_v46 = vsel %vm844_vm3, %v11648_v63, %v11655_v2  ;;  %v5139_v45 = vsel %vm844_vm3, %v11655_v2, %v11671_v23 }
 0x7c7   :  { %v5130_v34 = vpop.permute.xlu1 %5129  ;;  %v4954_v20 = vpack.c.bf16 %v4946_v32, %v4942_v3  ;;  %v4917_v36 = vpop.permute.xlu0 %4916  ;;  %v4955_v25 = vpack.c.bf16 %v4947_v7, %v4943_v38  ;;  %4859 = vmatprep.mubr.bf16.mxu1 %v14186_v52  ;;  %v4953_v3 = vpack.c.bf16 %v4941_v58, %v4937_v40  ;;  %v4940_v38 = vmul.f32 %v4919_v9, %v14194_v26 }
 0x7c8   :  { %v4921_v6 = vsel %vm633_vm0, %v11525_v57, %v4917_v36  ;;  %v4933_v49 = vsel %vm633_vm0, %v4917_v36, %v14193_v10  ;;  %v4918_v57 = vsel %vm633_vm0, %v11624_v1, %v4911_v21  ;;  %v5157_v10 = vmul.f32 %v5143_v46, %v14196_v29 }
 0x7c9   :  { %v4948_v59 = vmul.f32 %v4921_v6, %v14194_v26  ;;  %v4949_v15 = vmul.f32 %v4933_v49, %v14195_v13  ;;  %4991 = vmatprep.subr.bf16.mxu0 %v4955_v25  ;;  %v4936_v1 = vmul.f32 %v4918_v57, %v14194_v26  ;;  %v5158_v8 = vmul.f32 %v5139_v45, %v14197_v61  ;;  %v8665_v57 = vld [vmem:[#allocation2 + $0x178] sm:$0xff]  }
 0x7ca   :  { %4992 = vmatpush1.bf16.msra.mxu0 %v4954_v20  ;;  %v5135_v39 = vsel %vm844_vm3, %v11671_v23, %v5130_v34  ;;  %v5147_v2 = vsel %vm844_vm3, %v5130_v34, %v11648_v63  ;;  %v14198_v20 = vld [vmem:[#allocation21_spill] sm:$0xff] }
 0x7cb   :  { %v11731_v11 = vpop.permute.xlu1 %5101  ;;  %v4956_v31 = vpack.c.bf16 %v4948_v59, %v4944_v12  ;;  %v5112_v18 = vpop.permute.xlu0 %5111  ;;  %4993 = vmatprep.subr.bf16.mxu0 %v4951_v24  ;;  %v4957_v19 = vpack.c.bf16 %v4949_v15, %v4945_v44  ;;  %v4952_v56 = vpack.c.bf16 %v4940_v38, %v4936_v1  ;;  %v5159_v36 = vmul.f32 %v5135_v39, %v14198_v20 }
 0x7cc   :  { %8505 = vmatmul.mubr.msk.bf16.gmra.mxu0 %vm240_vm15, %v8663_v48  ;;  %v5142_v44 = vsel %vm844_vm3, %v11657_v17, %v5112_v18  ;;  %v5160_v59 = vmul.f32 %v5147_v2, %v14199_v53 }
 0x7cd   :  { %5044 = vmatprep.subr.bf16.mxu1 %v4957_v19  ;;  %5011 = vmatprep.mubr.bf16.mxu0 %v14186_v52 }
 0x7ce   :  { %8507 = vmatmul.mubr.msk.bf16.gmra.mxu1 %vm240_vm15, %v8663_v48  ;;  %4994 = vmatpush1.bf16.msra.mxu0 %v4950_v47  ;;  %v5153_v47 = vmul.f32 %v5142_v44, %v14196_v29 }
 0x7cf   :  { %v5110_v21 = vpop.permute.xlu1 %5109  ;;  %5045 = vmatpush1.bf16.msra.mxu1 %v4956_v31  ;;  %v5120_v30 = vpop.permute.xlu0 %5119  ;;  %5064 = vmatprep.mubr.bf16.mxu1 %v14186_v52 }
 0x7d0   :  { %5046 = vmatprep.subr.bf16.mxu1 %v4953_v3  ;;  %v5138_v12 = vsel %vm844_vm3, %v5112_v18, %v5120_v30  ;;  %v5141_v60 = vsel %vm844_vm3, %v11731_v11, %v5110_v21 }
 0x7d1   :  { %v5154_v0 = vmul.f32 %v5138_v12, %v14197_v61  ;;  %v5149_v15 = vmul.f32 %v5141_v60, %v14196_v29 }
 0x7d3   :  { %v5118_v54 = vpop.permute.xlu1 %5117  ;;  %5047 = vmatpush1.bf16.msra.mxu1 %v4952_v56  ;;  %v5116_v7 = vpop.permute.xlu0 %5115  ;;  %v5165_v1 = vpack.c.bf16 %v5153_v47, %v5149_v15  ;;  %v8667_v56 = vld [vmem:[#allocation2 + $0x188] sm:$0xff]  }
 0x7d4   :  { %v5137_v32 = vsel %vm844_vm3, %v5110_v21, %v5118_v54  ;;  %v5140_v55 = vsel %vm844_vm3, %v5116_v7, %v11650_v14  ;;  %v5144_v23 = vsel %vm844_vm3, %v11641_v62, %v5116_v7  ;;  %8510 = vmatmul.mubr.msk.bf16.vlgmr.msra.gmra.mxu0 %vm240_vm15, %v8664_v51 }
 0x7d5   :  { %v5150_v41 = vmul.f32 %v5137_v32, %v14197_v61  ;;  %v5161_v63 = vmul.f32 %v5144_v23, %v14196_v29  ;;  %v5162_v34 = vmul.f32 %v5140_v55, %v14197_v61  ;;  %5021 = vmatprep.mubr.bf16.mxu0 %v14186_v52 }
 0x7d6   :  { %8512 = vmatmul.mubr.msk.bf16.vlgmr.msra.gmra.mxu1 %vm240_vm15, %v8664_v51 }
 0x7d7   :  { %v5126_v25 = vpop.permute.xlu1 %5125  ;;  %v5169_v6 = vpack.c.bf16 %v5161_v63, %v5157_v10  ;;  %v5132_v49 = vpop.permute.xlu0 %5131  ;;  %v5170_v48 = vpack.c.bf16 %v5162_v34, %v5158_v8  ;;  %5074 = vmatprep.mubr.bf16.mxu1 %v14186_v52  ;;  %v5166_v19 = vpack.c.bf16 %v5154_v0, %v5150_v41 }
 0x7d8   :  { %v5136_v24 = vsel %vm844_vm3, %v11650_v14, %v5132_v49  ;;  %v5148_v50 = vsel %vm844_vm3, %v5132_v49, %v11641_v62  ;;  %v5133_v40 = vsel %vm844_vm3, %v5118_v54, %v5126_v25  ;;  %v5145_v14 = vsel %vm844_vm3, %v5126_v25, %v11731_v11 }
 0x7d9   :  { %v5163_v31 = vmul.f32 %v5136_v24, %v14198_v20  ;;  %v5164_v18 = vmul.f32 %v5148_v50, %v14199_v53  ;;  %5206 = vmatprep.subr.bf16.mxu0 %v5170_v48  ;;  %v5151_v21 = vmul.f32 %v5133_v40, %v14198_v20  ;;  %v5152_v46 = vmul.f32 %v5145_v14, %v14199_v53 }
 0x7da   :  { %5207 = vmatpush1.bf16.msra.mxu0 %v5169_v6 }
 0x7db   :  { %v5171_v9 = vpack.c.bf16 %v5163_v31, %v5159_v36  ;;  %v5128_v58 = vpop.permute.xlu0 %5127  ;;  %5208 = vmatprep.subr.bf16.mxu0 %v5166_v19  ;;  %v5172_v62 = vpack.c.bf16 %v5164_v18, %v5160_v59 }
 0x7dc   :  { %v5134_v3 = vsel %vm844_vm3, %v5120_v30, %v5128_v58  ;;  %v5146_v38 = vsel %vm844_vm3, %v5128_v58, %v11657_v17  ;;  %8511 = vmatmul.mubr.msk.bf16.gmra.mxu0 %vm240_vm15, %v8665_v57  ;;  %v8666_v17 = vld [vmem:[#allocation2 + $0x180] sm:$0xff]  }
 0x7dd   :  { %v5155_v11 = vmul.f32 %v5134_v3, %v14198_v20  ;;  %v5156_v45 = vmul.f32 %v5146_v38, %v14199_v53  ;;  %5259 = vmatprep.subr.bf16.mxu1 %v5172_v62  ;;  %5226 = vmatprep.mubr.bf16.mxu0 %v14186_v52 }
 0x7de   :  { %8513 = vmatmul.mubr.msk.bf16.gmra.mxu1 %vm240_vm15, %v8665_v57  ;;  %5209 = vmatpush1.bf16.msra.mxu0 %v5165_v1 }
 0x7df   :  { %v5167_v51 = vpack.c.bf16 %v5155_v11, %v5151_v21  ;;  %5260 = vmatpush1.bf16.msra.mxu1 %v5171_v9  ;;  %v5168_v30 = vpack.c.bf16 %v5156_v45, %v5152_v46  ;;  %5279 = vmatprep.mubr.bf16.mxu1 %v14186_v52 }
 0x7e1   :  { %5261 = vmatprep.subr.bf16.mxu1 %v5168_v30 }
 0x7e3   :  { %5262 = vmatpush1.bf16.msra.mxu1 %v5167_v51 }
 0x7e4   :  { %8516 = vmatmul.mubr.msk.bf16.vlgmr.msra.gmra.mxu0 %vm240_vm15, %v8666_v17  ;;  %v11900_v26 = vpop.permute.xlu1 %5333 }
 0x7e5   :  { %5236 = vmatprep.mubr.bf16.mxu0 %v14186_v52 }
 0x7e6   :  { %8518 = vmatmul.mubr.msk.bf16.vlgmr.msra.gmra.mxu1 %vm240_vm15, %v8666_v17 }
 0x7e7   :  { %5289 = vmatprep.mubr.bf16.mxu1 %v14186_v52 }
 0x7ec   :  { %8517 = vmatmul.mubr.msk.bf16.gmra.mxu0 %vm240_vm15, %v8667_v56 }
 0x7ed   :  { %5607 = vmatprep.mubr.bf16.mxu0 %v14186_v52 }
 0x7ee   :  { %8519 = vmatmul.mubr.msk.bf16.gmra.mxu1 %vm240_vm15, %v8667_v56 }
 0x7ef   :  { %5660 = vmatprep.mubr.bf16.mxu1 %v14186_v52 }
 0x864   :  { %v11822_v54 = vpop.f32.mrf.mxu0 }
 0x865   :  { %v11824_v10 = vpop.f32.mrf.mxu1 }
 0x866   :  { %v11826_v8 = vpop.f32.mrf.mxu0 }
 0x867   :  { %v11828_v39 = vpop.f32.mrf.mxu1 }
 0x868   :  { %v11830_v32 = vpop.f32.mrf.mxu0 }
 0x869   :  { %v11832_v7 = vpop.f32.mrf.mxu1 }
 0x86a   :  { %v11834_v2 = vpop.f32.mrf.mxu0 }
 0x86b   :  { %v11836_v12 = vpop.f32.mrf.mxu1 }
 0x86c   :  { %v4551_v55 = vpop.f32.mrf.mxu0 }
 0x86d   :  { %v4604_v23 = vpop.f32.mrf.mxu1 }
 0x86e   :  { %v4553_v60 = vpop.f32.mrf.mxu0 }
 0x86f   :  { %v4606_v41 = vpop.f32.mrf.mxu1 }
 0x870   :  { %v4555_v63 = vpop.f32.mrf.mxu0 }
 0x871   :  { %v4608_v34 = vpop.f32.mrf.mxu1 }
 0x872   :  { %v11838_v36 = vpop.f32.mrf.mxu0 }
 0x873   :  { %v11840_v25 = vpop.f32.mrf.mxu1 }
 0x874   :  { %14200 = vst [vmem:[#allocation24_spill] sm:$0xff] %v11840_v25  ;;  %v4663_v44 = vpop.f32.mrf.mxu0 }
 0x875   :  { %v4664_v27 = vadd.f32 %v4663_v44, %v11822_v54  ;;  %v11915_v54 = vpop.permute.xlu0 %5338 }
 0x876   :  { %v4716_v0 = vpop.f32.mrf.mxu1  ;;  %v11842_v6 = vpop.f32.mrf.mxu0 }
 0x877   :  { %v4717_v28 = vadd.f32 %v4716_v0, %v11824_v10 }
 0x878   :  { %v11844_v49 = vpop.f32.mrf.mxu1  ;;  %v4667_v48 = vpop.f32.mrf.mxu0 }
 0x879   :  { %v4668_v35 = vadd.f32 %v4667_v48, %v11830_v32 }
 0x87a   :  { %v11846_v59 = vpop.f32.mrf.mxu1  ;;  %v11848_v15 = vpop.f32.mrf.mxu0 }
 0x87b   :  { %v4721_v10 = vadd.f32 %v11846_v59, %v11832_v7 }
 0x87c   :  { %v11850_v24 = vpop.f32.mrf.mxu1  ;;  %v4673_v50 = vpop.f32.mrf.mxu0 }
 0x87d   :  { %v11852_v57 = vadd.f32 %v4673_v50, %v4551_v55 }
 0x87e   :  { %v4726_v40 = vpop.f32.mrf.mxu1  ;;  %v4675_v31 = vpop.f32.mrf.mxu0 }
 0x87f   :  { %v11854_v18 = vadd.f32 %v4726_v40, %v4604_v23  ;;  %v4676_v19 = vadd.f32 %v4675_v31, %v4553_v60 }
 0x880   :  { %v4728_v47 = vpop.f32.mrf.mxu1  ;;  %v4677_v14 = vpop.f32.mrf.mxu0 }
 0x881   :  { %v4729_v9 = vadd.f32 %v4728_v47, %v4606_v41  ;;  %v11856_v58 = vadd.f32 %v4677_v14, %v4555_v63 }
 0x882   :  { %v4730_v62 = vpop.f32.mrf.mxu1  ;;  %v11858_v1 = vpop.f32.mrf.mxu0 }
 0x883   :  { %v11860_v21 = vadd.f32 %v4730_v62, %v4608_v34 }
 0x884   :  { %v11862_v3 = vpop.f32.mrf.mxu1  ;;  %v4798_v38 = vpop.f32.mrf.mxu0 }
 0x885   :  { %14201 = vst [vmem:[#allocation28_spill] sm:$0xff] %v11862_v3  ;;  %v4870_v4 = vadd.f32 %v4798_v38, %v4664_v27 }
 0x886   :  { %v4851_v46 = vpop.f32.mrf.mxu1  ;;  %v11864_v11 = vpop.f32.mrf.mxu0 }
 0x887   :  { %v4872_v22 = vadd.f32 %v4851_v46, %v4717_v28 }
 0x888   :  { %v11866_v45 = vpop.f32.mrf.mxu1  ;;  %v4802_v51 = vpop.f32.mrf.mxu0 }
 0x889   :  { %v4874_v27 = vadd.f32 %v4802_v51, %v4668_v35 }
 0x88a   :  { %v4855_v30 = vpop.f32.mrf.mxu1  ;;  %v11868_v17 = vpop.f32.mrf.mxu0 }
 0x88b   :  { %v4876_v28 = vadd.f32 %v4855_v30, %v4721_v10 }
 0x88c   :  { %v11870_v56 = vpop.f32.mrf.mxu1  ;;  %v11872_v55 = vpop.f32.mrf.mxu0 }
 0x88e   :  { %v11874_v23 = vpop.f32.mrf.mxu1  ;;  %v4810_v60 = vpop.f32.mrf.mxu0 }
 0x88f   :  { %v11876_v41 = vadd.f32 %v4810_v60, %v4676_v19 }
 0x890   :  { %v4863_v63 = vpop.f32.mrf.mxu1  ;;  %v11878_v34 = vpop.f32.mrf.mxu0 }
 0x891   :  { %v11880_v50 = vadd.f32 %v4863_v63, %v4729_v9 }
 0x892   :  { %v11882_v40 = vpop.f32.mrf.mxu1  ;;  %v11884_v31 = vpop.f32.mrf.mxu0 }
 0x893   :  { %14202 = vst [vmem:[#allocation29_spill] sm:$0xff] %v11880_v50 }
 0x894   :  { %v11886_v47 = vpop.f32.mrf.mxu1  ;;  %v5013_v14 = vpop.f32.mrf.mxu0 }
 0x895   :  { %14203 = vst [vmem:[#allocation27_spill] sm:$0xff] %v11886_v47  ;;  %v5085_v16 = vadd.f32 %v5013_v14, %v4870_v4  ;;  %v5324_v47 = vpop.permute.xlu1 %5323 }
 0x896   :  { %v5066_v62 = vpop.f32.mrf.mxu1  ;;  %v5015_v53 = vpop.f32.mrf.mxu0 }
 0x897   :  { %v5087_v44 = vadd.f32 %v5066_v62, %v4872_v22  ;;  %v5329_v22 = vpop.permute.xlu0 %5328 }
 0x898   :  { %v11888_v20 = vpop.f32.mrf.mxu1  ;;  %v5017_v61 = vpop.f32.mrf.mxu0 }
 0x899   :  { %v5089_v4 = vadd.f32 %v5017_v61, %v4874_v27 }
 0x89a   :  { %v5070_v29 = vpop.f32.mrf.mxu1  ;;  %v11890_v19 = vpop.f32.mrf.mxu0 }
 0x89c   :  { %v11892_v60 = vpop.f32.mrf.mxu1  ;;  %v11894_v13 = vpop.f32.mrf.mxu0 }
 0x89e   :  { %v11896_v9 = vpop.f32.mrf.mxu1  ;;  %v11898_v63 = vpop.f32.mrf.mxu0 }
 0x8a0   :  { %v11903_v5 = vpop.f32.mrf.mxu1  ;;  %v11905_v43 = vpop.f32.mrf.mxu0 }
 0x8a1   :  { %14204 = vst [vmem:[#allocation23_spill] sm:$0xff] %v11903_v5 }
 0x8a2   :  { %v11908_v52 = vpop.f32.mrf.mxu1  ;;  %v11910_v37 = vpop.f32.mrf.mxu0 }
 0x8a3   :  { %14205 = vst [vmem:[#allocation25_spill] sm:$0xff] %v11910_v37 }
 0x8a4   :  { %v11913_v33 = vpop.f32.mrf.mxu1  ;;  %v5228_v42 = vpop.f32.mrf.mxu0 }
 0x8a5   :  { %14206 = vst [vmem:[#allocation26_spill] sm:$0xff] %v11913_v33  ;;  %v5300_v5 = vadd.f32 %v5228_v42, %v5085_v16  ;;  %v5091_v33 = vadd.f32 %v5070_v29, %v4876_v28  ;;  %v4666_v42 = vadd.f32 %v11842_v6, %v11826_v8 }
 0x8a6   :  { %v5281_v0 = vpop.f32.mrf.mxu1  ;;  %v5230_v38 = vpop.f32.mrf.mxu0 }
 0x8a7   :  { %v5341_v50 = vadd.f32 %v5324_v47, %v5300_v5  ;;  %v5302_v37 = vadd.f32 %v5281_v0, %v5087_v44  ;;  %v4719_v5 = vadd.f32 %v11844_v49, %v11828_v39  ;;  %v4871_v7 = vadd.f32 %v11864_v11, %v4666_v42 }
 0x8a8   :  { %v5283_v46 = vpop.f32.mrf.mxu1  ;;  %v5232_v32 = vpop.f32.mrf.mxu0 }
 0x8a9   :  { %v5373_v48 = vmul.f32 0.01, %v5341_v50  ;;  %v5343_v14 = vadd.f32 %v5324_v47, %v5302_v37  ;;  %vm5357_vm1 = vcmp.ge.f32.partialorder %v5341_v50, 0.0  ;;  %v5304_v3 = vadd.f32 %v5232_v32, %v5089_v4 }
 0x8aa   :  { %v5285_v25 = vpop.f32.mrf.mxu1  ;;  %v4670_v37 = vadd.f32 %v11848_v15, %v11834_v2  ;;  %v5086_v8 = vadd.f32 %v5015_v53, %v4871_v7  ;;  %v5234_v11 = vpop.f32.mrf.mxu0  ;;  %v4723_v2 = vadd.f32 %v11850_v24, %v11836_v12  ;;  %v4882_v32 = vadd.f32 %v11878_v34, %v11856_v58 }
 0x8ab   :  { %v5345_v16 = vadd.f32 %v5329_v22, %v5304_v3  ;;  %v5306_v35 = vadd.f32 %v5285_v25, %v5091_v33  ;;  %v5375_v61 = vmul.f32 0.01, %v5343_v14  ;;  %v11924_v59 = vsel %vm5357_vm1, %v5341_v50, %v5373_v48 }
 0x8ac   :  { %vm5359_vm2 = vcmp.ge.f32.partialorder %v5343_v14, 0.0  ;;  %5482 = vrot.lane.b32.xlu1 %v11924_v59, %s8718_s19  ;;  %v4873_v33 = vadd.f32 %v11866_v45, %v4719_v5  ;;  %v4875_v39 = vadd.f32 %v11868_v17, %v4670_v37  ;;  %v5301_v49 = vadd.f32 %v5230_v38, %v5086_v8  ;;  %v5287_v44 = vpop.f32.mrf.mxu1  ;;  %v5238_v27 = vpop.f32.mrf.mxu0 }
 0x8ad   :  { %vm5361_vm4 = vcmp.ge.f32.partialorder %v5345_v16, 0.0  ;;  %v5377_v29 = vmul.f32 0.01, %v5345_v16  ;;  %v5347_v6 = vadd.f32 %v5329_v22, %v5306_v35  ;;  %v11934_v51 = vsel %vm5359_vm2, %v5343_v14, %v5375_v61 }
 0x8ae   :  { %v5090_v53 = vadd.f32 %v11890_v19, %v4875_v39  ;;  %v5088_v15 = vadd.f32 %v11888_v20, %v4873_v33  ;;  %v4877_v45 = vadd.f32 %v11870_v56, %v4723_v2  ;;  %v5342_v50 = vadd.f32 %v5324_v47, %v5301_v49  ;;  %v5291_v28 = vpop.f32.mrf.mxu1  ;;  %v5240_v4 = vpop.f32.mrf.mxu0 }
 0x8af   :  { %v11932_v25 = vsel %vm5361_vm4, %v5345_v16, %v5377_v29  ;;  %vm5363_vm5 = vcmp.ge.f32.partialorder %v5347_v6, 0.0  ;;  %v5379_v3 = vmul.f32 0.01, %v5347_v6  ;;  %v4884_v34 = vadd.f32 %v11882_v40, %v11860_v21 }
 0x8b0   :  { %5484 = vrot.lane.b32.xlu0 %v11932_v25, %s8718_s19  ;;  %5498 = vrot.lane.b32.xlu1 %v11934_v51, %s8718_s19  ;;  %v5305_v30 = vadd.f32 %v5234_v11, %v5090_v53  ;;  %v5303_v62 = vadd.f32 %v5283_v46, %v5088_v15  ;;  %v5092_v12 = vadd.f32 %v11892_v60, %v4877_v45  ;;  %v5374_v10 = vmul.f32 0.01, %v5342_v50  ;;  %v5242_v42 = vpop.f32.mrf.mxu0  ;;  %v14207_v45 = vld [vmem:[#allocation24_spill] sm:$0xff] }
 0x8b1   :  { %v11945_v17 = vsel %vm5363_vm5, %v5347_v6, %v5379_v3  ;;  %vm5358_vm6 = vcmp.ge.f32.partialorder %v5342_v50, 0.0  ;;  %v4878_v60 = vadd.f32 %v11872_v55, %v11852_v57  ;;  %v4880_v55 = vadd.f32 %v11874_v23, %v11854_v18 }
 0x8b2   :  { %v5346_v24 = vadd.f32 %v5329_v22, %v5305_v30  ;;  %v5307_v19 = vadd.f32 %v5287_v44, %v5092_v12  ;;  %v5344_v20 = vadd.f32 %v5324_v47, %v5303_v62  ;;  %v11958_v46 = vsel %vm5358_vm6, %v5342_v50, %v5374_v10  ;;  %v5244_v15 = vpop.f32.mrf.mxu0  ;;  %v14208_v30 = vld [vmem:[#allocation28_spill] sm:$0xff]  ;;  %v14209_v62 = vld [vmem:[#allocation25_spill] sm:$0xff]  ;;  %v14211_v44 = vld [vmem:[#allocation23_spill] sm:$0xff] }
 0x8b3   :  { %v5093_v47 = vadd.f32 %v11894_v13, %v4878_v60  ;;  %v5097_v13 = vadd.f32 %v11905_v43, %v4882_v32  ;;  %v5095_v58 = vadd.f32 %v11896_v9, %v4880_v55  ;;  %v5099_v43 = vadd.f32 %v11908_v52, %v4884_v34 }
 0x8b4   :  { %5500 = vrot.lane.b32.xlu0 %v11945_v17, %s8718_s19  ;;  %5405 = vrot.lane.b32.xlu1 %v11924_v59, %s8720_s0  ;;  %v5378_v56 = vmul.f32 0.01, %v5346_v24  ;;  %v5348_v0 = vadd.f32 %v5329_v22, %v5307_v19  ;;  %v5376_v38 = vmul.f32 0.01, %v5344_v20  ;;  %vm5362_vm7 = vcmp.ge.f32.partialorder %v5346_v24, 0.0  ;;  %v5293_v22 = vpop.f32.mrf.mxu1 }
 0x8b5   :  { %vm5360_vm8 = vcmp.ge.f32.partialorder %v5344_v20, 0.0  ;;  %v5308_v14 = vadd.f32 %v5238_v27, %v5093_v47  ;;  %v5312_v18 = vadd.f32 %v5242_v42, %v5097_v13  ;;  %v5310_v5 = vadd.f32 %v5291_v28, %v5095_v58 }
 0x8b6   :  { %v5380_v48 = vmul.f32 0.01, %v5348_v0  ;;  %v11967_v57 = vsel %vm5362_vm7, %v5346_v24, %v5378_v56  ;;  %vm5364_vm9 = vcmp.ge.f32.partialorder %v5348_v0, 0.0  ;;  %v11971_v16 = vsel %vm5360_vm8, %v5344_v20, %v5376_v38  ;;  %v5295_v7 = vpop.f32.mrf.mxu1  ;;  %v14213_v20 = vld [vmem:[#allocation26_spill] sm:$0xff] }
 0x8b7   :  { %v5349_v35 = vadd.f32 %v11900_v26, %v5308_v14  ;;  %v5353_v9 = vadd.f32 %v11915_v54, %v5312_v18  ;;  %v5314_v61 = vadd.f32 %v5295_v7, %v5099_v43  ;;  %v5351_v21 = vadd.f32 %v11900_v26, %v5310_v5  ;;  %v8556_v18 = vld [vmem:[%s13870_s2 + $0xb0] sm:$0xff]  ;;  %v8557_v5 = vld [vmem:[%s13870_s2 + $0xb8] sm:$0xff]  ;;  %v8554_v43 = vld [vmem:[%s13870_s2 + $0xa0] sm:$0xff] }
 0x8b8   :  { %5407 = vrot.lane.b32.xlu0 %v11932_v25, %s8720_s0  ;;  %5421 = vrot.lane.b32.xlu1 %v11934_v51, %s8720_s0  ;;  %v11981_v23 = vsel %vm5364_vm9, %v5348_v0, %v5380_v48  ;;  %v4680_v49 = vadd.f32 %v11858_v1, %v11838_v36  ;;  %v5094_v3 = vadd.f32 %v11898_v63, %v11876_v41  ;;  %v14210_v1 = vld [vmem:[#allocation29_spill] sm:$0xff]  ;;  %v14212_v63 = vld [vmem:[#allocation27_spill] sm:$0xff]  ;;  %v5297_v10 = vpop.f32.mrf.mxu1 }
 0x8b9   :  { %v5381_v37 = vmul.f32 0.01, %v5349_v35  ;;  %vm5365_vm10 = vcmp.ge.f32.partialorder %v5349_v35, 0.0  ;;  %v5385_v40 = vmul.f32 0.01, %v5353_v9  ;;  %v5355_v29 = vadd.f32 %v11915_v54, %v5314_v61  ;;  %v8555_v61 = vld [vmem:[%s13870_s2 + $0xa8] sm:$0xff] }
 0x8ba   :  { %v5383_v52 = vmul.f32 0.01, %v5351_v21  ;;  %vm5369_vm11 = vcmp.ge.f32.partialorder %v5353_v9, 0.0  ;;  %vm5367_vm12 = vcmp.ge.f32.partialorder %v5351_v21, 0.0  ;;  %v4883_v11 = vadd.f32 %v11884_v31, %v4680_v49 }
 0x8bb   :  { %v11998_v8 = vsel %vm5365_vm10, %v5349_v35, %v5381_v37  ;;  %v5387_v6 = vmul.f32 0.01, %v5355_v29  ;;  %v12002_v33 = vsel %vm5369_vm11, %v5353_v9, %v5385_v40  ;;  %vm5371_vm1 = vcmp.ge.f32.partialorder %v5355_v29, 0.0 }
 0x8bc   :  { %5423 = vrot.lane.b32.xlu0 %v11945_v17, %s8720_s0  ;;  %5490 = vrot.lane.b32.xlu1 %v11958_v46, %s8718_s19  ;;  %v12004_v39 = vsel %vm5367_vm12, %v5351_v21, %v5383_v52  ;;  %v5309_v53 = vadd.f32 %v5240_v4, %v5094_v3  ;;  %v4733_v50 = vadd.f32 %v14208_v30, %v14207_v45 }
 0x8bd   :  { %v12015_v2 = vsel %vm5371_vm1, %v5355_v29, %v5387_v6  ;;  %v5098_v36 = vadd.f32 %v14209_v62, %v4883_v11  ;;  %v5096_v41 = vadd.f32 %v14211_v44, %v14210_v1 }
 0x8be   :  { %v4885_v31 = vadd.f32 %v14212_v63, %v4733_v50  ;;  %v5350_v24 = vadd.f32 %v11900_v26, %v5309_v53 }
 0x8bf   :  { %v5313_v12 = vadd.f32 %v5244_v15, %v5098_v36  ;;  %v5311_v19 = vadd.f32 %v5293_v22, %v5096_v41 }
 0x8c0   :  { %5492 = vrot.lane.b32.xlu0 %v11967_v57, %s8718_s19  ;;  %5506 = vrot.lane.b32.xlu1 %v11971_v16, %s8718_s19  ;;  %v5100_v27 = vadd.f32 %v14213_v20, %v4885_v31  ;;  %v5382_v60 = vmul.f32 0.01, %v5350_v24  ;;  %vm5366_vm2 = vcmp.ge.f32.partialorder %v5350_v24, 0.0 }
 0x8c1   :  { %v5354_v56 = vadd.f32 %v11915_v54, %v5313_v12  ;;  %v5352_v38 = vadd.f32 %v11900_v26, %v5311_v19 }
 0x8c2   :  { %v5315_v0 = vadd.f32 %v5297_v10, %v5100_v27  ;;  %v12040_v32 = vsel %vm5366_vm2, %v5350_v24, %v5382_v60  ;;  %v14216_v27 = vld [vmem:[#allocation12_spill] sm:$0xff] }
 0x8c3   :  { %v5386_v28 = vmul.f32 0.01, %v5354_v56  ;;  %v5384_v47 = vmul.f32 0.01, %v5352_v38  ;;  %vm5370_vm4 = vcmp.ge.f32.partialorder %v5354_v56, 0.0  ;;  %vm5368_vm5 = vcmp.ge.f32.partialorder %v5352_v38, 0.0 }
 0x8c4   :  { %5508 = vrot.lane.b32.xlu0 %v11981_v23, %s8718_s19  ;;  %5413 = vrot.lane.b32.xlu1 %v11958_v46, %s8720_s0  ;;  %v5356_v4 = vadd.f32 %v11915_v54, %v5315_v0 }
 0x8c5   :  { %v12046_v48 = vsel %vm5370_vm4, %v5354_v56, %v5386_v28  ;;  %v12048_v55 = vsel %vm5368_vm5, %v5352_v38, %v5384_v47 }
 0x8c6   :  { %v5388_v26 = vmul.f32 0.01, %v5356_v4  ;;  %vm5372_vm6 = vcmp.ge.f32.partialorder %v5356_v4, 0.0 }
 0x8c8   :  { %5415 = vrot.lane.b32.xlu0 %v11967_v57, %s8720_s0  ;;  %5429 = vrot.lane.b32.xlu1 %v11971_v16, %s8720_s0  ;;  %v12054_v54 = vsel %vm5372_vm6, %v5356_v4, %v5388_v26 }
 0x8cc   :  { %5431 = vrot.lane.b32.xlu0 %v11981_v23, %s8720_s0  ;;  %5486 = vrot.lane.b32.xlu1 %v11998_v8, %s8718_s19 }
 0x8d0   :  { %5488 = vrot.lane.b32.xlu0 %v12002_v33, %s8718_s19  ;;  %5502 = vrot.lane.b32.xlu1 %v12004_v39, %s8718_s19 }
 0x8d4   :  { %5504 = vrot.lane.b32.xlu0 %v12015_v2, %s8718_s19  ;;  %5409 = vrot.lane.b32.xlu1 %v11998_v8, %s8720_s0 }
 0x8d8   :  { %5411 = vrot.lane.b32.xlu0 %v12002_v33, %s8720_s0  ;;  %5425 = vrot.lane.b32.xlu1 %v12004_v39, %s8720_s0 }
 0x8dc   :  { %5427 = vrot.lane.b32.xlu0 %v12015_v2, %s8720_s0  ;;  %5958 = vrot.lane.b32.xlu1 %v11998_v8, %s8722_s21 }
 0x8e0   :  { %5960 = vrot.lane.b32.xlu0 %v12002_v33, %s8722_s21  ;;  %5494 = vrot.lane.b32.xlu1 %v12040_v32, %s8718_s19 }
 0x8e4   :  { %5496 = vrot.lane.b32.xlu0 %v12046_v48, %s8718_s19  ;;  %5510 = vrot.lane.b32.xlu1 %v12048_v55, %s8718_s19 }
 0x8e8   :  { %5512 = vrot.lane.b32.xlu0 %v12054_v54, %s8718_s19  ;;  %5974 = vrot.lane.b32.xlu1 %v12004_v39, %s8722_s21 }
 0x8ec   :  { %5976 = vrot.lane.b32.xlu0 %v12015_v2, %s8722_s21  ;;  %5417 = vrot.lane.b32.xlu1 %v12040_v32, %s8720_s0 }
 0x8f0   :  { %5956 = vrot.lane.b32.xlu0 %v11932_v25, %s8722_s21  ;;  %5433 = vrot.lane.b32.xlu1 %v12048_v55, %s8720_s0 }
 0x8f4   :  { %5419 = vrot.lane.b32.xlu0 %v12046_v48, %s8720_s0  ;;  %5966 = vrot.lane.b32.xlu1 %v12040_v32, %s8722_s21 }
 0x8f8   :  { %5435 = vrot.lane.b32.xlu0 %v12054_v54, %s8720_s0  ;;  %5982 = vrot.lane.b32.xlu1 %v12048_v55, %s8722_s21 }
 0x8fc   :  { %5964 = vrot.lane.b32.xlu0 %v11967_v57, %s8722_s21  ;;  %5954 = vrot.lane.b32.xlu1 %v11924_v59, %s8722_s21 }
 0x900   :  { %5972 = vrot.lane.b32.xlu0 %v11945_v17, %s8722_s21  ;;  %5962 = vrot.lane.b32.xlu1 %v11958_v46, %s8722_s21 }
 0x904   :  { %5980 = vrot.lane.b32.xlu0 %v11981_v23, %s8722_s21  ;;  %5970 = vrot.lane.b32.xlu1 %v11934_v51, %s8722_s21 }
 0x908   :  { %6175 = vrot.lane.b32.xlu0 %v12002_v33, %s8723_s22  ;;  %5978 = vrot.lane.b32.xlu1 %v11971_v16, %s8722_s21 }
 0x90c   :  { %6191 = vrot.lane.b32.xlu0 %v12015_v2, %s8723_s22  ;;  %6173 = vrot.lane.b32.xlu1 %v11998_v8, %s8723_s22 }
 0x910   :  { %6171 = vrot.lane.b32.xlu0 %v11932_v25, %s8723_s22  ;;  %6181 = vrot.lane.b32.xlu1 %v12040_v32, %s8723_s22 }
 0x914   :  { %5968 = vrot.lane.b32.xlu0 %v12046_v48, %s8722_s21  ;;  %6189 = vrot.lane.b32.xlu1 %v12004_v39, %s8723_s22 }
 0x918   :  { %5984 = vrot.lane.b32.xlu0 %v12054_v54, %s8722_s21  ;;  %6197 = vrot.lane.b32.xlu1 %v12048_v55, %s8723_s22 }
 0x91c   :  { %6179 = vrot.lane.b32.xlu0 %v11967_v57, %s8723_s22  ;;  %6169 = vrot.lane.b32.xlu1 %v11924_v59, %s8723_s22 }
 0x91e   :  { %v12112_v14 = vpop.permute.xlu1 %5482 }
 0x920   :  { %6187 = vrot.lane.b32.xlu0 %v11945_v17, %s8723_s22  ;;  %6177 = vrot.lane.b32.xlu1 %v11958_v46, %s8723_s22 }
 0x922   :  { %v5485_v22 = vpop.permute.xlu0 %5484  ;;  %v12118_v42 = vpop.permute.xlu1 %5498 }
 0x924   :  { %6183 = vrot.lane.b32.xlu0 %v12046_v48, %s8723_s22  ;;  %6185 = vrot.lane.b32.xlu1 %v11934_v51, %s8723_s22 }
 0x926   :  { %v5501_v13 = vpop.permute.xlu0 %5500  ;;  %v12124_v58 = vpop.permute.xlu1 %5405 }
 0x928   :  { %6199 = vrot.lane.b32.xlu0 %v12054_v54, %s8723_s22  ;;  %6193 = vrot.lane.b32.xlu1 %v11971_v16, %s8723_s22 }
 0x92a   :  { %v12130_v34 = vpop.permute.xlu0 %5407  ;;  %v12135_v35 = vpop.permute.xlu1 %5421 }
 0x92c   :  { %6195 = vrot.lane.b32.xlu0 %v11981_v23, %s8723_s22  ;;  %6401 = vperm.xlu1 %8617, %v8556_v18  }
 0x92e   :  { %v12142_v7 = vpop.permute.xlu0 %5423  ;;  %v5491_v9 = vpop.permute.xlu1 %5490 }
 0x92f   :  { %v5522_v12 = vsel %vm167_vm13, %v12112_v14, %v5491_v9 }
 0x930   :  { %6406 = vperm.xlu0 %8616, %v8557_v5   ;;  %6391 = vperm.xlu1 %8617, %v8554_v43  }
 0x932   :  { %v5493_v37 = vpop.permute.xlu0 %5492  ;;  %v5507_v21 = vpop.permute.xlu1 %5506 }
 0x933   :  { %v5523_v24 = vsel %vm167_vm13, %v5485_v22, %v5493_v37  ;;  %v5514_v38 = vsel %vm167_vm13, %v12118_v42, %v5507_v21  ;;  %v5519_v28 = vsel %vm167_vm13, %v5493_v37, %v5501_v13 }
 0x934   :  { %6396 = vperm.xlu0 %8616, %v8555_v61   ;;  %v5535_v26 = vmul.f32 %v5523_v24, %v14216_v27  ;;  %v14219_v24 = vld [vmem:[#allocation11_spill] sm:$0xff] }
 0x936   :  { %v5509_v40 = vpop.permute.xlu0 %5508  ;;  %v12150_v29 = vpop.permute.xlu1 %5413 }
 0x937   :  { %v5515_v20 = vsel %vm167_vm13, %v5501_v13, %v5509_v40  ;;  %v5527_v18 = vsel %vm167_vm13, %v5509_v40, %v5485_v22 }
 0x93a   :  { %v12152_v52 = vpop.permute.xlu0 %5415  ;;  %v12154_v6 = vpop.permute.xlu1 %5429 }
 0x93e   :  { %v12156_v49 = vpop.permute.xlu0 %5431  ;;  %v5487_v3 = vpop.permute.xlu1 %5486 }
 0x942   :  { %v5489_v11 = vpop.permute.xlu0 %5488  ;;  %v5503_v53 = vpop.permute.xlu1 %5502 }
 0x946   :  { %v5505_v15 = vpop.permute.xlu0 %5504  ;;  %v12158_v45 = vpop.permute.xlu1 %5409 }
 0x94a   :  { %v12160_v30 = vpop.permute.xlu0 %5411  ;;  %v12162_v50 = vpop.permute.xlu1 %5425 }
 0x94e   :  { %v12164_v62 = vpop.permute.xlu0 %5427  ;;  %v12166_v36 = vpop.permute.xlu1 %5958 }
 0x952   :  { %v12168_v1 = vpop.permute.xlu0 %5960  ;;  %v5495_v44 = vpop.permute.xlu1 %5494 }
 0x953   :  { %14214 = vst [vmem:[#allocation24_spill] sm:$0xff] %v12168_v1  ;;  %v5524_v63 = vsel %vm167_vm13, %v5487_v3, %v5495_v44  ;;  %v5520_v5 = vsel %vm167_vm13, %v5495_v44, %v5503_v53  ;;  %v5518_v44 = vsel %vm167_vm13, %v5491_v9, %v12118_v42 }
 0x954   :  { %v5539_v56 = vmul.f32 %v5524_v63, %v14216_v27  ;;  %v14217_v63 = vld [vmem:[#allocation14_spill] sm:$0xff] }
 0x956   :  { %v5497_v31 = vpop.permute.xlu0 %5496  ;;  %v5511_v19 = vpop.permute.xlu1 %5510 }
 0x957   :  { %v5525_v10 = vsel %vm167_vm13, %v5489_v11, %v5497_v31  ;;  %v5521_v0 = vsel %vm167_vm13, %v5497_v31, %v5505_v15  ;;  %v5516_v4 = vsel %vm167_vm13, %v5503_v53, %v5511_v19  ;;  %v5528_v47 = vsel %vm167_vm13, %v5511_v19, %v5487_v3 }
 0x958   :  { %v5543_v60 = vmul.f32 %v5525_v10, %v14216_v27  ;;  %v5537_v31 = vmul.f32 %v5515_v20, %v14217_v63  ;;  %v14218_v10 = vld [vmem:[#allocation13_spill] sm:$0xff]  ;;  %v5538_v19 = vmul.f32 %v5528_v47, %v14219_v24  ;;  %v5541_v22 = vmul.f32 %v5516_v4, %v14217_v63 }
 0x959   :  { %v5544_v13 = vmul.f32 %v5521_v0, %v14218_v10  ;;  %v5531_v20 = vmul.f32 %v5522_v12, %v14216_v27  ;;  %v5534_v0 = vmul.f32 %v5527_v18, %v14219_v24  ;;  %v5536_v47 = vmul.f32 %v5519_v28, %v14218_v10 }
 0x95a   :  { %v5513_v43 = vpop.permute.xlu0 %5512  ;;  %v5551_v61 = vpack.c.bf16 %v5543_v60, %v5539_v56  ;;  %v12201_v37 = vpop.permute.xlu1 %5974  ;;  %v5533_v56 = vmul.f32 %v5514_v38, %v14217_v63 }
 0x95b   :  { %v5517_v1 = vsel %vm167_vm13, %v5505_v15, %v5513_v43  ;;  %v5529_v3 = vsel %vm167_vm13, %v5513_v43, %v5489_v11  ;;  %v5526_v15 = vsel %vm167_vm13, %v5507_v21, %v12112_v14  ;;  %v5540_v11 = vmul.f32 %v5520_v5, %v14218_v10 }
 0x95c   :  { %v5542_v40 = vmul.f32 %v5529_v3, %v14219_v24  ;;  %v5545_v53 = vmul.f32 %v5517_v1, %v14217_v63  ;;  %5587 = vmatprep.subr.bf16.mxu0 %v5551_v61  ;;  %v5547_v9 = vpack.c.bf16 %v5535_v26, %v5531_v20  ;;  %v5530_v12 = vmul.f32 %v5526_v15, %v14219_v24  ;;  %v8668_v3 = vld [vmem:[#allocation2 + $0x1a0] sm:$0xff]  }
 0x95d   :  { %v5552_v43 = vpack.c.bf16 %v5544_v13, %v5540_v11  ;;  %v5549_v14 = vpack.c.bf16 %v5537_v31, %v5533_v56  ;;  %v5532_v21 = vmul.f32 %v5518_v44, %v14218_v10  ;;  %v5446_v31 = vsel %vm95_vm14, %v12130_v34, %v12152_v52 }
 0x95e   :  { %v5550_v60 = vpack.c.bf16 %v5542_v40, %v5538_v19  ;;  %v12221_v4 = vpop.permute.xlu0 %5976  ;;  %v5553_v1 = vpack.c.bf16 %v5545_v53, %v5541_v22  ;;  %v5418_v42 = vpop.permute.xlu1 %5417  ;;  %v5546_v38 = vpack.c.bf16 %v5534_v0, %v5530_v12  ;;  %v5445_v22 = vsel %vm95_vm14, %v12124_v58, %v12150_v29  ;;  %v14220_v40 = vld [vmem:[#allocation8_spill] sm:$0xff]  ;;  %v14222_v12 = vld [vmem:[#allocation7_spill] sm:$0xff] }
 0x95f   :  { %v5548_v5 = vpack.c.bf16 %v5536_v47, %v5532_v21  ;;  %v5447_v28 = vsel %vm95_vm14, %v12158_v45, %v5418_v42  ;;  %v5437_v15 = vsel %vm95_vm14, %v12135_v35, %v12154_v6  ;;  %v14221_v0 = vmov 0  }
 0x960   :  { %5588 = vmatpush1.bf16.msra.mxu0 %v5550_v60  ;;  %5640 = vmatprep.subr.bf16.mxu1 %v5553_v1  ;;  %v5462_v53 = vmul.f32 %v5447_v28, %v14220_v40  ;;  %v5438_v60 = vsel %vm95_vm14, %v12142_v7, %v12156_v49  ;;  %v5450_v1 = vsel %vm95_vm14, %v12156_v49, %v12130_v34  ;;  %v14223_v34 = vld [vmem:[#allocation10_spill] sm:$0xff] }
 0x961   :  { %5589 = vmatprep.subr.bf16.mxu0 %v5547_v9  ;;  %5641 = vmatpush1.bf16.msra.mxu1 %v5552_v43  ;;  %v5443_v9 = vsel %vm95_vm14, %v5418_v42, %v12162_v50  ;;  %v5454_v42 = vmul.f32 %v5445_v22, %v14220_v40 }
 0x962   :  { %5642 = vmatprep.subr.bf16.mxu1 %v5549_v14  ;;  %v12226_v18 = vpop.permute.xlu0 %5956  ;;  %v5434_v61 = vpop.permute.xlu1 %5433 }
 0x963   :  { %v5451_v44 = vsel %vm95_vm14, %v5434_v61, %v12158_v45  ;;  %v5439_v11 = vsel %vm95_vm14, %v12162_v50, %v5434_v61  ;;  %v5458_v45 = vmul.f32 %v5446_v31, %v14220_v40  ;;  %v8669_v61 = vld [vmem:[#allocation2 + $0x1a8] sm:$0xff]   ;;  %v5460_v31 = vmul.f32 %v5438_v60, %v14223_v34 }
 0x964   :  { %5590 = vmatpush1.bf16.msra.mxu0 %v5546_v38  ;;  %v5461_v14 = vmul.f32 %v5451_v44, %v14222_v12  ;;  %v5464_v49 = vmul.f32 %v5439_v11, %v14223_v34 }
 0x965   :  { %5643 = vmatpush1.bf16.msra.mxu1 %v5548_v5 }
 0x966   :  { %v5420_v26 = vpop.permute.xlu0 %5419  ;;  %v12235_v13 = vpop.permute.xlu1 %5966 }
 0x967   :  { %v5448_v19 = vsel %vm95_vm14, %v12160_v30, %v5420_v26  ;;  %8526 = vmatmul.mubr.msk.bf16.vlgmr.msra.gmra.mxu0 %vm240_vm15, %v8668_v3  ;;  %v5444_v56 = vsel %vm95_vm14, %v5420_v26, %v12164_v62 }
 0x968   :  { %v5466_v20 = vmul.f32 %v5448_v19, %v14220_v40  ;;  %8528 = vmatmul.mubr.msk.bf16.vlgmr.msra.gmra.mxu1 %vm240_vm15, %v8668_v3  ;;  %5617 = vmatprep.mubr.bf16.mxu0 %v14221_v0  ;;  %v14224_v3 = vld [vmem:[#allocation9_spill] sm:$0xff]  ;;  %v5457_v19 = vmul.f32 %v5450_v1, %v14222_v12 }
 0x969   :  { %5670 = vmatprep.mubr.bf16.mxu1 %v14221_v0  ;;  %v5467_v28 = vmul.f32 %v5444_v56, %v14224_v3 }
 0x96a   :  { %v5436_v47 = vpop.permute.xlu0 %5435  ;;  %v5474_v43 = vpack.c.bf16 %v5466_v20, %v5462_v53  ;;  %v12276_v21 = vpop.permute.xlu1 %5982  ;;  %v5463_v53 = vmul.f32 %v5443_v9, %v14224_v3 }
 0x96b   :  { %v5440_v38 = vsel %vm95_vm14, %v12164_v62, %v5436_v47  ;;  %v5452_v5 = vsel %vm95_vm14, %v5436_v47, %v12160_v30  ;;  %v5449_v62 = vsel %vm95_vm14, %v12154_v6, %v12124_v58  ;;  %v5442_v30 = vsel %vm95_vm14, %v12152_v52, %v12142_v7 }
 0x96c   :  { %v5465_v26 = vmul.f32 %v5452_v5, %v14222_v12  ;;  %v5468_v50 = vmul.f32 %v5440_v38, %v14223_v34  ;;  %5709 = vmatprep.subr.bf16.mxu0 %v5474_v43  ;;  %v5441_v58 = vsel %vm95_vm14, %v12150_v29, %v12135_v35  ;;  %v5456_v6 = vmul.f32 %v5437_v15, %v14223_v34  ;;  %v8670_v43 = vld [vmem:[#allocation2 + $0x190] sm:$0xff]  }
 0x96d   :  { %v5470_v7 = vpack.c.bf16 %v5458_v45, %v5454_v42  ;;  %v5453_v52 = vmul.f32 %v5449_v62, %v14222_v12  ;;  %v5459_v56 = vmul.f32 %v5442_v30, %v14224_v3  ;;  %v5475_v60 = vpack.c.bf16 %v5467_v28, %v5463_v53  ;;  %v14227_v53 = vld [vmem:[#allocation24_spill] sm:$0xff] }
 0x96e   :  { %v5473_v44 = vpack.c.bf16 %v5465_v26, %v5461_v14  ;;  %v12300_v20 = vpop.permute.xlu0 %5964  ;;  %v5476_v22 = vpack.c.bf16 %v5468_v50, %v5464_v49  ;;  %v12307_v11 = vpop.permute.xlu1 %5954  ;;  %v5472_v1 = vpack.c.bf16 %v5460_v31, %v5456_v6  ;;  %v5455_v35 = vmul.f32 %v5441_v58, %v14224_v3  ;;  %v14225_v49 = vld [vmem:[#allocation15_spill] sm:$0xff]  ;;  %v14226_v26 = vld [vmem:[#allocation16_spill] sm:$0xff]  ;;  %v14228_v58 = vld [vmem:[#allocation17_spill] sm:$0xff] }
 0x96f   :  { %8527 = vmatmul.mubr.msk.bf16.gmra.mxu0 %vm240_vm15, %v8669_v61  ;;  %v5469_v29 = vpack.c.bf16 %v5457_v19, %v5453_v52  ;;  %v5808_v47 = vpack.c.bf16 %v12046_v48, %v12040_v32  ;;  %v5810_v14 = vpack.c.bf16 %v12054_v54, %v12048_v55  ;;  %v5807_v5 = vpack.c.bf16 %v12002_v33, %v11998_v8 }
 0x970   :  { %8529 = vmatmul.mubr.msk.bf16.gmra.mxu1 %vm240_vm15, %v8669_v61  ;;  %5710 = vmatpush1.bf16.msra.mxu0 %v5473_v44  ;;  %v5471_v9 = vpack.c.bf16 %v5459_v56, %v5455_v35  ;;  %v5804_v32 = vpack.c.bf16 %v11967_v57, %v11958_v46  ;;  %v5809_v48 = vpack.c.bf16 %v12015_v2, %v12004_v39  ;;  %v8671_v57 = vld [vmem:[#allocation2 + $0x198] sm:$0xff]  }
 0x971   :  { %5762 = vmatprep.subr.bf16.mxu1 %v5476_v22  ;;  %5711 = vmatprep.subr.bf16.mxu0 %v5470_v7  ;;  %v5806_v8 = vpack.c.bf16 %v11981_v23, %v11971_v16  ;;  %v5803_v55 = vpack.c.bf16 %v11932_v25, %v11924_v59  ;;  %v5805_v39 = vpack.c.bf16 %v11945_v17, %v11934_v51  ;;  %v8672_v16 = vld [vmem:[#allocation2 + $0x1b0] sm:$0xff]  }
 0x972   :  { %5763 = vmatpush1.bf16.msra.mxu1 %v5475_v60  ;;  %v12314_v15 = vpop.permute.xlu0 %5972  ;;  %5729 = vmatprep.mubr.bf16.mxu0 %v14221_v0  ;;  %v5963_v45 = vpop.permute.xlu1 %5962  ;;  %v5992_v25 = vsel %vm633_vm0, %v12235_v13, %v12201_v37  ;;  %v5996_v51 = vsel %vm633_vm0, %v12166_v36, %v12235_v13  ;;  %v5988_v42 = vsel %vm633_vm0, %v12201_v37, %v12276_v21 }
 0x973   :  { %5764 = vmatprep.subr.bf16.mxu1 %v5472_v1  ;;  %5782 = vmatprep.mubr.bf16.mxu1 %v14221_v0  ;;  %v6010_v28 = vmul.f32 %v5996_v51, %v14225_v49  ;;  %v6011_v50 = vmul.f32 %v5992_v25, %v14226_v26  ;;  %v6000_v13 = vsel %vm633_vm0, %v12276_v21, %v12166_v36 }
 0x974   :  { %5712 = vmatpush1.bf16.msra.mxu0 %v5469_v29  ;;  %v5991_v30 = vsel %vm633_vm0, %v12300_v20, %v12314_v15  ;;  %v5994_v36 = vsel %vm633_vm0, %v12307_v11, %v5963_v45  ;;  %v6012_v6 = vmul.f32 %v5988_v42, %v14228_v58  ;;  %v5995_v7 = vsel %vm633_vm0, %v12226_v18, %v12300_v20  ;;  %v14229_v29 = vld [vmem:[#allocation18_spill] sm:$0xff] }
 0x975   :  { %5844 = vmatprep.subr.bf16.mxu0 %v5808_v47  ;;  %v6007_v52 = vmul.f32 %v5991_v30, %v14226_v26  ;;  %v6002_v47 = vmul.f32 %v5994_v36, %v14225_v49  ;;  %v14230_v30 = vld [vmem:[#allocation19_spill] sm:$0xff] }
 0x976   :  { %5765 = vmatpush1.bf16.msra.mxu1 %v5471_v9  ;;  %v12322_v38 = vpop.permute.xlu0 %5980  ;;  %v12326_v61 = vpop.permute.xlu1 %5970 }
 0x977   :  { %5897 = vmatprep.subr.bf16.mxu1 %v5810_v14  ;;  %8532 = vmatmul.mubr.msk.bf16.vlgmr.msra.gmra.mxu0 %vm240_vm15, %v8670_v43  ;;  %v5990_v23 = vsel %vm633_vm0, %v5963_v45, %v12326_v61  ;;  %v6013_v45 = vmul.f32 %v6000_v13, %v14229_v29  ;;  %v8673_v14 = vld [vmem:[#allocation2 + $0x1b8] sm:$0xff]   ;;  %v5987_v51 = vsel %vm633_vm0, %v12314_v15, %v12322_v38 }
 0x978   :  { %5845 = vmatpush1.bf16.msra.mxu0 %v5807_v5  ;;  %5739 = vmatprep.mubr.bf16.mxu0 %v14221_v0  ;;  %v6003_v21 = vmul.f32 %v5990_v23, %v14226_v26 }
 0x979   :  { %8534 = vmatmul.mubr.msk.bf16.vlgmr.msra.gmra.mxu1 %vm240_vm15, %v8670_v43  ;;  %5846 = vmatprep.subr.bf16.mxu0 %v5804_v32 }
 0x97a   :  { %5898 = vmatpush1.bf16.msra.mxu1 %v5809_v48  ;;  %v12337_v33 = vpop.permute.xlu0 %6175  ;;  %5792 = vmatprep.mubr.bf16.mxu1 %v14221_v0  ;;  %v5979_v46 = vpop.permute.xlu1 %5978  ;;  %v6019_v48 = vpack.c.bf16 %v6007_v52, %v6003_v21 }
 0x97b   :  { %5899 = vmatprep.subr.bf16.mxu1 %v5806_v8  ;;  %v5998_v56 = vsel %vm633_vm0, %v5979_v46, %v12307_v11  ;;  %v5999_v11 = vsel %vm633_vm0, %v12322_v38, %v12226_v18  ;;  %v6006_v8 = vmul.f32 %v5995_v7, %v14225_v49 }
 0x97c   :  { %5847 = vmatpush1.bf16.msra.mxu0 %v5803_v55  ;;  %v6005_v55 = vmul.f32 %v5998_v56, %v14229_v29 }
 0x97d   :  { %v6018_v18 = vpack.c.bf16 %v6006_v8, %v6002_v47 }
 0x97e   :  { %5900 = vmatpush1.bf16.msra.mxu1 %v5805_v39  ;;  %v12344_v2 = vpop.permute.xlu0 %6191  ;;  %v12346_v54 = vpop.permute.xlu1 %6173 }
 0x97f   :  { %8533 = vmatmul.mubr.msk.bf16.gmra.mxu0 %vm240_vm15, %v8671_v57 }
 0x980   :  { %5864 = vmatprep.mubr.bf16.mxu0 %v14221_v0 }
 0x981   :  { %8535 = vmatmul.mubr.msk.bf16.gmra.mxu1 %vm240_vm15, %v8671_v57 }
 0x982   :  { %v12351_v59 = vpop.permute.xlu0 %6171  ;;  %5917 = vmatprep.mubr.bf16.mxu1 %v14221_v0  ;;  %v12362_v17 = vpop.permute.xlu1 %6181 }
 0x983   :  { %v6211_v15 = vsel %vm844_vm3, %v12346_v54, %v12362_v17 }
 0x986   :  { %v5969_v62 = vpop.permute.xlu0 %5968  ;;  %v6190_v31 = vpop.permute.xlu1 %6189 }
 0x987   :  { %v5993_v19 = vsel %vm633_vm0, %v5969_v62, %v12221_v4  ;;  %v5997_v37 = vsel %vm633_vm0, %v14227_v53, %v5969_v62  ;;  %8538 = vmatmul.mubr.msk.bf16.vlgmr.msra.gmra.mxu0 %vm240_vm15, %v8672_v16  ;;  %v6207_v38 = vsel %vm844_vm3, %v12362_v17, %v6190_v31  ;;  %v8674_v62 = vld [vmem:[#allocation2 + $0x1c0] sm:$0xff]  }
 0x988   :  { %v6014_v44 = vmul.f32 %v5997_v37, %v14225_v49  ;;  %v6015_v22 = vmul.f32 %v5993_v19, %v14226_v26  ;;  %5874 = vmatprep.mubr.bf16.mxu0 %v14221_v0  ;;  %v6225_v19 = vmul.f32 %v6211_v15, %v14230_v30 }
 0x989   :  { %8540 = vmatmul.mubr.msk.bf16.vlgmr.msra.gmra.mxu1 %vm240_vm15, %v8672_v16  ;;  %v6009_v16 = vmul.f32 %v5999_v11, %v14229_v29 }
 0x98a   :  { %v6022_v60 = vpack.c.bf16 %v6014_v44, %v6010_v28  ;;  %v5985_v1 = vpop.permute.xlu0 %5984  ;;  %v6023_v35 = vpack.c.bf16 %v6015_v22, %v6011_v50  ;;  %5927 = vmatprep.mubr.bf16.mxu1 %v14221_v0  ;;  %v6198_v43 = vpop.permute.xlu1 %6197  ;;  %v6008_v28 = vmul.f32 %v5987_v51, %v14228_v58 }
 0x98b   :  { %v5989_v20 = vsel %vm633_vm0, %v12221_v4, %v5985_v1  ;;  %v6001_v9 = vsel %vm633_vm0, %v5985_v1, %v14227_v53  ;;  %v5986_v4 = vsel %vm633_vm0, %v12326_v61, %v5979_v46  ;;  %v6021_v46 = vpack.c.bf16 %v6009_v16, %v6005_v55  ;;  %v14231_v53 = vld [vmem:[#allocation20_spill] sm:$0xff] }
 0x98c   :  { %v6016_v5 = vmul.f32 %v5989_v20, %v14228_v58  ;;  %v6017_v32 = vmul.f32 %v6001_v9, %v14229_v29  ;;  %6059 = vmatprep.subr.bf16.mxu0 %v6023_v35  ;;  %v6004_v61 = vmul.f32 %v5986_v4, %v14228_v58  ;;  %v6226_v37 = vmul.f32 %v6207_v38, %v14231_v53  ;;  %v8675_v4 = vld [vmem:[#allocation2 + $0x1c8] sm:$0xff]  }
 0x98d   :  { %6060 = vmatpush1.bf16.msra.mxu0 %v6022_v60  ;;  %v6203_v36 = vsel %vm844_vm3, %v6190_v31, %v6198_v43  ;;  %v6215_v44 = vsel %vm844_vm3, %v6198_v43, %v12346_v54  ;;  %v14232_v60 = vld [vmem:[#allocation21_spill] sm:$0xff] }
 0x98e   :  { %v6024_v57 = vpack.c.bf16 %v6016_v5, %v6012_v6  ;;  %v6180_v39 = vpop.permute.xlu0 %6179  ;;  %6061 = vmatprep.subr.bf16.mxu0 %v6019_v48  ;;  %v6025_v25 = vpack.c.bf16 %v6017_v32, %v6013_v45  ;;  %v6170_v23 = vpop.permute.xlu1 %6169  ;;  %v6020_v13 = vpack.c.bf16 %v6008_v28, %v6004_v61  ;;  %v6227_v1 = vmul.f32 %v6203_v36, %v14232_v60 }
 0x98f   :  { %8539 = vmatmul.mubr.msk.bf16.gmra.mxu0 %vm240_vm15, %v8673_v14  ;;  %v6210_v45 = vsel %vm844_vm3, %v12351_v59, %v6180_v39 }
 0x990   :  { %6112 = vmatprep.subr.bf16.mxu1 %v6025_v25  ;;  %6079 = vmatprep.mubr.bf16.mxu0 %v14221_v0 }
 0x991   :  { %8541 = vmatmul.mubr.msk.bf16.gmra.mxu1 %vm240_vm15, %v8673_v14  ;;  %6062 = vmatpush1.bf16.msra.mxu0 %v6018_v18  ;;  %v14233_v14 = vld [vmem:[#allocation22_spill] sm:$0xff]  ;;  %v6221_v18 = vmul.f32 %v6210_v45, %v14230_v30 }
 0x992   :  { %6113 = vmatpush1.bf16.msra.mxu1 %v6024_v57  ;;  %v6188_v50 = vpop.permute.xlu0 %6187  ;;  %6132 = vmatprep.mubr.bf16.mxu1 %v14221_v0  ;;  %v6178_v42 = vpop.permute.xlu1 %6177  ;;  %v6228_v11 = vmul.f32 %v6215_v44, %v14233_v14 }
 0x993   :  { %6114 = vmatprep.subr.bf16.mxu1 %v6021_v46  ;;  %v6206_v17 = vsel %vm844_vm3, %v6180_v39, %v6188_v50  ;;  %v6209_v31 = vsel %vm844_vm3, %v6170_v23, %v6178_v42 }
 0x994   :  { %v6222_v47 = vmul.f32 %v6206_v17, %v14231_v53  ;;  %v6217_v5 = vmul.f32 %v6209_v31, %v14230_v30 }
 0x996   :  { %6115 = vmatpush1.bf16.msra.mxu1 %v6020_v13  ;;  %v6184_v21 = vpop.permute.xlu0 %6183  ;;  %v6186_v22 = vpop.permute.xlu1 %6185  ;;  %v6233_v61 = vpack.c.bf16 %v6221_v18, %v6217_v5  ;;  %v8677_v13 = vld [vmem:[#allocation2 + $0x1d8] sm:$0xff]  }
 0x997   :  { %v6208_v6 = vsel %vm844_vm3, %v6184_v21, %v12344_v2  ;;  %v6212_v7 = vsel %vm844_vm3, %v12337_v33, %v6184_v21  ;;  %8544 = vmatmul.mubr.msk.bf16.vlgmr.msra.gmra.mxu0 %vm240_vm15, %v8674_v62  ;;  %v6205_v54 = vsel %vm844_vm3, %v6178_v42, %v6186_v22 }
 0x998   :  { %v6229_v52 = vmul.f32 %v6212_v7, %v14230_v30  ;;  %v6230_v56 = vmul.f32 %v6208_v6, %v14231_v53  ;;  %6089 = vmatprep.mubr.bf16.mxu0 %v14221_v0  ;;  %v6218_v35 = vmul.f32 %v6205_v54, %v14231_v53 }
 0x999   :  { %8546 = vmatmul.mubr.msk.bf16.vlgmr.msra.gmra.mxu1 %vm240_vm15, %v8674_v62 }
 0x99a   :  { %v6237_v43 = vpack.c.bf16 %v6229_v52, %v6225_v19  ;;  %v6200_v20 = vpop.permute.xlu0 %6199  ;;  %v6238_v9 = vpack.c.bf16 %v6230_v56, %v6226_v37  ;;  %6142 = vmatprep.mubr.bf16.mxu1 %v14221_v0  ;;  %v6194_v32 = vpop.permute.xlu1 %6193  ;;  %v6234_v25 = vpack.c.bf16 %v6222_v47, %v6218_v35 }
 0x99b   :  { %v6204_v48 = vsel %vm844_vm3, %v12344_v2, %v6200_v20  ;;  %v6216_v8 = vsel %vm844_vm3, %v6200_v20, %v12337_v33  ;;  %v6201_v55 = vsel %vm844_vm3, %v6186_v22, %v6194_v32  ;;  %v6213_v51 = vsel %vm844_vm3, %v6194_v32, %v6170_v23 }
 0x99c   :  { %v6231_v57 = vmul.f32 %v6204_v48, %v14232_v60  ;;  %v6232_v39 = vmul.f32 %v6216_v8, %v14233_v14  ;;  %6274 = vmatprep.subr.bf16.mxu0 %v6238_v9  ;;  %v6219_v46 = vmul.f32 %v6201_v55, %v14232_v60  ;;  %v6220_v38 = vmul.f32 %v6213_v51, %v14233_v14 }
 0x99d   :  { %6275 = vmatpush1.bf16.msra.mxu0 %v6237_v43 }
 0x99e   :  { %v6239_v2 = vpack.c.bf16 %v6231_v57, %v6227_v1  ;;  %v6196_v16 = vpop.permute.xlu0 %6195  ;;  %6276 = vmatprep.subr.bf16.mxu0 %v6234_v25  ;;  %v6240_v33 = vpack.c.bf16 %v6232_v39, %v6228_v11 }
 0x99f   :  { %v6202_v28 = vsel %vm844_vm3, %v6188_v50, %v6196_v16  ;;  %v6214_v15 = vsel %vm844_vm3, %v6196_v16, %v12351_v59  ;;  %8545 = vmatmul.mubr.msk.bf16.gmra.mxu0 %vm240_vm15, %v8675_v4  ;;  %v8676_v59 = vld [vmem:[#allocation2 + $0x1d0] sm:$0xff]  }
 0x9a0   :  { %v6223_v23 = vmul.f32 %v6202_v28, %v14232_v60  ;;  %v6224_v42 = vmul.f32 %v6214_v15, %v14233_v14  ;;  %6327 = vmatprep.subr.bf16.mxu1 %v6240_v33  ;;  %6294 = vmatprep.mubr.bf16.mxu0 %v14221_v0 }
 0x9a1   :  { %8547 = vmatmul.mubr.msk.bf16.gmra.mxu1 %vm240_vm15, %v8675_v4  ;;  %6277 = vmatpush1.bf16.msra.mxu0 %v6233_v61 }
 0x9a2   :  { %v6235_v62 = vpack.c.bf16 %v6223_v23, %v6219_v46  ;;  %6328 = vmatpush1.bf16.msra.mxu1 %v6239_v2  ;;  %v6236_v50 = vpack.c.bf16 %v6224_v42, %v6220_v38  ;;  %6347 = vmatprep.mubr.bf16.mxu1 %v14221_v0 }
 0x9a4   :  { %6329 = vmatprep.subr.bf16.mxu1 %v6236_v50 }
 0x9a6   :  { %6330 = vmatpush1.bf16.msra.mxu1 %v6235_v62 }
 0x9a7   :  { %8550 = vmatmul.mubr.msk.bf16.vlgmr.msra.gmra.mxu0 %vm240_vm15, %v8676_v59 }
 0x9a8   :  { %6304 = vmatprep.mubr.bf16.mxu0 %v14221_v0 }
 0x9a9   :  { %8552 = vmatmul.mubr.msk.bf16.vlgmr.msra.gmra.mxu1 %vm240_vm15, %v8676_v59 }
 0x9aa   :  { %6357 = vmatprep.mubr.bf16.mxu1 %v14221_v0 }
 0x9af   :  { %8551 = vmatmul.mubr.msk.bf16.gmra.mxu0 %vm240_vm15, %v8677_v13 }
 0x9b0   :  { %6675 = vmatprep.mubr.bf16.mxu0 %v14221_v0 }
 0x9b1   :  { %8553 = vmatmul.mubr.msk.bf16.gmra.mxu1 %vm240_vm15, %v8677_v13 }
 0x9b2   :  { %6728 = vmatprep.mubr.bf16.mxu1 %v14221_v0 }
 0xa27   :  { %v12510_v19 = vpop.f32.mrf.mxu0 }
 0xa28   :  { %v12512_v37 = vpop.f32.mrf.mxu1 }
 0xa29   :  { %v12514_v36 = vpop.f32.mrf.mxu0 }
 0xa2a   :  { %v12516_v21 = vpop.f32.mrf.mxu1 }
 0xa2b   :  { %v12518_v44 = vpop.f32.mrf.mxu0 }
 0xa2c   :  { %v12520_v17 = vpop.f32.mrf.mxu1 }
 0xa2d   :  { %v12522_v22 = vpop.f32.mrf.mxu0 }
 0xa2e   :  { %v12524_v6 = vpop.f32.mrf.mxu1 }
 0xa2f   :  { %v5619_v7 = vpop.f32.mrf.mxu0 }
 0xa30   :  { %v5672_v31 = vpop.f32.mrf.mxu1 }
 0xa31   :  { %v5621_v54 = vpop.f32.mrf.mxu0 }
 0xa32   :  { %v5674_v52 = vpop.f32.mrf.mxu1 }
 0xa33   :  { %v5623_v56 = vpop.f32.mrf.mxu0 }
 0xa34   :  { %v5676_v1 = vpop.f32.mrf.mxu1 }
 0xa35   :  { %v5625_v35 = vpop.f32.mrf.mxu0 }
 0xa36   :  { %v5678_v45 = vpop.f32.mrf.mxu1 }
 0xa37   :  { %v5731_v47 = vpop.f32.mrf.mxu0 }
 0xa39   :  { %v5784_v43 = vpop.f32.mrf.mxu1  ;;  %v12526_v20 = vpop.f32.mrf.mxu0 }
 0xa3a   :  { %v5785_v58 = vadd.f32 %v5784_v43, %v12512_v37 }
 0xa3b   :  { %v12528_v9 = vpop.f32.mrf.mxu1  ;;  %v5735_v11 = vpop.f32.mrf.mxu0 }
 0xa3c   :  { %v5736_v0 = vadd.f32 %v5735_v11, %v12518_v44 }
 0xa3d   :  { %v12530_v5 = vpop.f32.mrf.mxu1  ;;  %v12532_v32 = vpop.f32.mrf.mxu0 }
 0xa3e   :  { %v5789_v37 = vadd.f32 %v12530_v5, %v12520_v17 }
 0xa3f   :  { %v12534_v48 = vpop.f32.mrf.mxu1  ;;  %v5741_v8 = vpop.f32.mrf.mxu0 }
 0xa40   :  { %v12536_v4 = vadd.f32 %v5741_v8, %v5619_v7 }
 0xa41   :  { %v5794_v55 = vpop.f32.mrf.mxu1  ;;  %v5743_v57 = vpop.f32.mrf.mxu0 }
 0xa42   :  { %v12538_v39 = vadd.f32 %v5794_v55, %v5672_v31  ;;  %v5744_v25 = vadd.f32 %v5743_v57, %v5621_v54 }
 0xa43   :  { %v5796_v18 = vpop.f32.mrf.mxu1  ;;  %v5745_v51 = vpop.f32.mrf.mxu0 }
 0xa44   :  { %v5797_v2 = vadd.f32 %v5796_v18, %v5674_v52  ;;  %v12540_v16 = vadd.f32 %v5745_v51, %v5623_v56 }
 0xa45   :  { %v5798_v33 = vpop.f32.mrf.mxu1  ;;  %v5747_v61 = vpop.f32.mrf.mxu0 }
 0xa46   :  { %v12542_v46 = vadd.f32 %v5798_v33, %v5676_v1  ;;  %v5748_v28 = vadd.f32 %v5747_v61, %v5625_v35 }
 0xa47   :  { %v5800_v15 = vpop.f32.mrf.mxu1  ;;  %v5866_v38 = vpop.f32.mrf.mxu0 }
 0xa48   :  { %v5801_v23 = vadd.f32 %v5800_v15, %v5678_v45 }
 0xa49   :  { %v5919_v42 = vpop.f32.mrf.mxu1  ;;  %v12544_v62 = vpop.f32.mrf.mxu0 }
 0xa4a   :  { %v5940_v34 = vadd.f32 %v5919_v42, %v5785_v58 }
 0xa4b   :  { %v12546_v50 = vpop.f32.mrf.mxu1  ;;  %v5870_v59 = vpop.f32.mrf.mxu0 }
 0xa4c   :  { %v5942_v43 = vadd.f32 %v5870_v59, %v5736_v0 }
 0xa4d   :  { %v5923_v13 = vpop.f32.mrf.mxu1  ;;  %v12548_v7 = vpop.f32.mrf.mxu0 }
 0xa4e   :  { %v5944_v58 = vadd.f32 %v5923_v13, %v5789_v37 }
 0xa4f   :  { %v12550_v31 = vpop.f32.mrf.mxu1  ;;  %v12552_v54 = vpop.f32.mrf.mxu0 }
 0xa51   :  { %v12554_v52 = vpop.f32.mrf.mxu1  ;;  %v5878_v56 = vpop.f32.mrf.mxu0 }
 0xa52   :  { %v12556_v1 = vadd.f32 %v5878_v56, %v5744_v25 }
 0xa53   :  { %v5931_v35 = vpop.f32.mrf.mxu1  ;;  %v12558_v45 = vpop.f32.mrf.mxu0 }
 0xa54   :  { %v12560_v8 = vadd.f32 %v5931_v35, %v5797_v2 }
 0xa55   :  { %v12562_v55 = vpop.f32.mrf.mxu1  ;;  %v5882_v57 = vpop.f32.mrf.mxu0 }
 0xa56   :  { %v12564_v18 = vadd.f32 %v5882_v57, %v5748_v28  ;;  %v12580_v57 = vpop.permute.xlu1 %6401 }
 0xa57   :  { %v5935_v51 = vpop.f32.mrf.mxu1  ;;  %v6081_v33 = vpop.f32.mrf.mxu0 }
 0xa58   :  { %v12566_v61 = vadd.f32 %v5935_v51, %v5801_v23  ;;  %v5732_v23 = vadd.f32 %v5731_v47, %v12510_v19  ;;  %v12595_v19 = vpop.permute.xlu0 %6406 }
 0xa59   :  { %v6134_v15 = vpop.f32.mrf.mxu1  ;;  %v6083_v14 = vpop.f32.mrf.mxu0 }
 0xa5a   :  { %14234 = vst [vmem:[#allocation28_spill] sm:$0xff] %v12566_v61  ;;  %v5938_v26 = vadd.f32 %v5866_v38, %v5732_v23  ;;  %v6392_v10 = vpop.permute.xlu1 %6391  ;;  %v6155_v47 = vadd.f32 %v6134_v15, %v5940_v34 }
 0xa5b   :  { %v12568_v60 = vpop.f32.mrf.mxu1  ;;  %v6085_v25 = vpop.f32.mrf.mxu0 }
 0xa5c   :  { %v6153_v12 = vadd.f32 %v6081_v33, %v5938_v26  ;;  %v6157_v26 = vadd.f32 %v6085_v25, %v5942_v43  ;;  %v6397_v34 = vpop.permute.xlu0 %6396 }
 0xa5d   :  { %v6138_v56 = vpop.f32.mrf.mxu1  ;;  %v12570_v53 = vpop.f32.mrf.mxu0 }
 0xa5f   :  { %v12572_v30 = vpop.f32.mrf.mxu1  ;;  %v12574_v2 = vpop.f32.mrf.mxu0 }
 0xa61   :  { %v12576_v35 = vpop.f32.mrf.mxu1  ;;  %v12578_v28 = vpop.f32.mrf.mxu0 }
 0xa63   :  { %v12583_v51 = vpop.f32.mrf.mxu1  ;;  %v12585_v29 = vpop.f32.mrf.mxu0 }
 0xa64   :  { %14235 = vst [vmem:[#allocation25_spill] sm:$0xff] %v12583_v51 }
 0xa65   :  { %v12588_v49 = vpop.f32.mrf.mxu1  ;;  %v12590_v3 = vpop.f32.mrf.mxu0 }
 0xa67   :  { %v12593_v40 = vpop.f32.mrf.mxu1  ;;  %v6296_v24 = vpop.f32.mrf.mxu0 }
 0xa68   :  { %14236 = vst [vmem:[#allocation29_spill] sm:$0xff] %v12593_v40  ;;  %v6368_v63 = vadd.f32 %v6296_v24, %v6153_v12  ;;  %v6159_v40 = vadd.f32 %v6138_v56, %v5944_v58  ;;  %v5734_v24 = vadd.f32 %v12526_v20, %v12514_v36 }
 0xa69   :  { %v6349_v38 = vpop.f32.mrf.mxu1  ;;  %v6298_v23 = vpop.f32.mrf.mxu0 }
 0xa6a   :  { %v6409_v27 = vadd.f32 %v6392_v10, %v6368_v63  ;;  %v6370_v41 = vadd.f32 %v6349_v38, %v6155_v47  ;;  %v5787_v63 = vadd.f32 %v12528_v9, %v12516_v21  ;;  %v5939_v17 = vadd.f32 %v12544_v62, %v5734_v24 }
 0xa6b   :  { %v6351_v42 = vpop.f32.mrf.mxu1  ;;  %v6300_v44 = vpop.f32.mrf.mxu0 }
 0xa6c   :  { %v6441_v11 = vmul.f32 0.01, %v6409_v27  ;;  %v6411_v33 = vadd.f32 %v6392_v10, %v6370_v41  ;;  %vm6425_vm7 = vcmp.ge.f32.partialorder %v6409_v27, 0.0  ;;  %v6372_v61 = vadd.f32 %v6300_v44, %v6157_v26 }
 0xa6d   :  { %v6353_v51 = vpop.f32.mrf.mxu1  ;;  %v5738_v41 = vadd.f32 %v12532_v32, %v12522_v22  ;;  %v6154_v36 = vadd.f32 %v6083_v14, %v5939_v17  ;;  %v5791_v22 = vadd.f32 %v12534_v48, %v12524_v6  ;;  %v5950_v44 = vadd.f32 %v12558_v45, %v12540_v16 }
 0xa6e   :  { %v6413_v12 = vadd.f32 %v6397_v34, %v6372_v61  ;;  %v6374_v0 = vadd.f32 %v6353_v51, %v6159_v40  ;;  %v6443_v5 = vmul.f32 0.01, %v6411_v33  ;;  %v12604_v59 = vsel %vm6425_vm7, %v6409_v27, %v6441_v11  ;;  %v6302_v61 = vpop.f32.mrf.mxu0 }
 0xa6f   :  { %vm6427_vm8 = vcmp.ge.f32.partialorder %v6411_v33, 0.0  ;;  %6550 = vrot.lane.b32.xlu1 %v12604_v59, %s8718_s19  ;;  %v5941_v40 = vadd.f32 %v12546_v50, %v5787_v63  ;;  %v5943_v21 = vadd.f32 %v12548_v7, %v5738_v41  ;;  %v6369_v62 = vadd.f32 %v6298_v23, %v6154_v36  ;;  %v6355_v47 = vpop.f32.mrf.mxu1 }
 0xa70   :  { %vm6429_vm9 = vcmp.ge.f32.partialorder %v6413_v12, 0.0  ;;  %v6445_v13 = vmul.f32 0.01, %v6413_v12  ;;  %v6415_v20 = vadd.f32 %v6397_v34, %v6374_v0  ;;  %v12614_v15 = vsel %vm6427_vm8, %v6411_v33, %v6443_v5  ;;  %v6306_v43 = vpop.f32.mrf.mxu0 }
 0xa71   :  { %v6158_v14 = vadd.f32 %v12570_v53, %v5943_v21  ;;  %v6156_v32 = vadd.f32 %v12568_v60, %v5941_v40  ;;  %v5945_v50 = vadd.f32 %v12550_v31, %v5791_v22  ;;  %v6410_v56 = vadd.f32 %v6392_v10, %v6369_v62  ;;  %v6359_v58 = vpop.f32.mrf.mxu1 }
 0xa72   :  { %v12612_v9 = vsel %vm6429_vm9, %v6413_v12, %v6445_v13  ;;  %vm6431_vm10 = vcmp.ge.f32.partialorder %v6415_v20, 0.0  ;;  %v6447_v27 = vmul.f32 0.01, %v6415_v20  ;;  %v6308_v26 = vpop.f32.mrf.mxu0  ;;  %v5952_v45 = vadd.f32 %v12562_v55, %v12542_v46 }
 0xa73   :  { %6552 = vrot.lane.b32.xlu0 %v12612_v9, %s8718_s19  ;;  %6566 = vrot.lane.b32.xlu1 %v12614_v15, %s8718_s19  ;;  %v6373_v7 = vadd.f32 %v6302_v61, %v6158_v14  ;;  %v6371_v51 = vadd.f32 %v6351_v42, %v6156_v32  ;;  %v6160_v6 = vadd.f32 %v12572_v30, %v5945_v50  ;;  %v6442_v37 = vmul.f32 0.01, %v6410_v56  ;;  %v14237_v32 = vld [vmem:[#allocation25_spill] sm:$0xff] }
 0xa74   :  { %v12625_v25 = vsel %vm6431_vm10, %v6415_v20, %v6447_v27  ;;  %vm6426_vm11 = vcmp.ge.f32.partialorder %v6410_v56, 0.0  ;;  %v5946_v30 = vadd.f32 %v12552_v54, %v12536_v4  ;;  %v5948_v54 = vadd.f32 %v12554_v52, %v12538_v39  ;;  %v6310_v24 = vpop.f32.mrf.mxu0 }
 0xa75   :  { %v6414_v53 = vadd.f32 %v6397_v34, %v6373_v7  ;;  %v6375_v48 = vadd.f32 %v6355_v47, %v6160_v6  ;;  %v6412_v60 = vadd.f32 %v6392_v10, %v6371_v51  ;;  %v12638_v42 = vsel %vm6426_vm11, %v6410_v56, %v6442_v37  ;;  %v14238_v51 = vld [vmem:[#allocation28_spill] sm:$0xff]  ;;  %v14239_v47 = vld [vmem:[#allocation29_spill] sm:$0xff] }
 0xa76   :  { %v6161_v10 = vadd.f32 %v12574_v2, %v5946_v30  ;;  %v6165_v2 = vadd.f32 %v12585_v29, %v5950_v44  ;;  %v6163_v16 = vadd.f32 %v12576_v35, %v5948_v54  ;;  %v6167_v29 = vadd.f32 %v12588_v49, %v5952_v45  ;;  %v6312_v22 = vpop.f32.mrf.mxu0 }
 0xa77   :  { %6568 = vrot.lane.b32.xlu0 %v12625_v25, %s8718_s19  ;;  %6473 = vrot.lane.b32.xlu1 %v12604_v59, %s8720_s0  ;;  %v6446_v31 = vmul.f32 0.01, %v6414_v53  ;;  %v6416_v38 = vadd.f32 %v6397_v34, %v6375_v48  ;;  %v6444_v23 = vmul.f32 0.01, %v6412_v60  ;;  %vm6430_vm12 = vcmp.ge.f32.partialorder %v6414_v53, 0.0  ;;  %v6361_v34 = vpop.f32.mrf.mxu1 }
 0xa78   :  { %vm6428_vm1 = vcmp.ge.f32.partialorder %v6412_v60, 0.0  ;;  %v6376_v33 = vadd.f32 %v6306_v43, %v6161_v10  ;;  %v6380_v39 = vadd.f32 %v6310_v24, %v6165_v2  ;;  %v6378_v63 = vadd.f32 %v6359_v58, %v6163_v16  ;;  %v8588_v24 = vld [vmem:[%s13870_s2 + $0xc0] sm:$0xff]  ;;  %v8589_v16 = vld [vmem:[%s13870_s2 + $0xc8] sm:$0xff] }
 0xa79   :  { %v6448_v11 = vmul.f32 0.01, %v6416_v38  ;;  %v12647_v4 = vsel %vm6430_vm12, %v6414_v53, %v6446_v31  ;;  %vm6432_vm2 = vcmp.ge.f32.partialorder %v6416_v38, 0.0  ;;  %v12651_v12 = vsel %vm6428_vm1, %v6412_v60, %v6444_v23  ;;  %v6363_v17 = vpop.f32.mrf.mxu1 }
 0xa7a   :  { %v6417_v0 = vadd.f32 %v12580_v57, %v6376_v33  ;;  %v6421_v35 = vadd.f32 %v12595_v19, %v6380_v39  ;;  %v6382_v5 = vadd.f32 %v6363_v17, %v6167_v29  ;;  %v6419_v46 = vadd.f32 %v12580_v57, %v6378_v63  ;;  %v8591_v33 = vld [vmem:[%s13870_s2 + $0xd8] sm:$0xff] }
 0xa7b   :  { %6475 = vrot.lane.b32.xlu0 %v12612_v9, %s8720_s0  ;;  %6489 = vrot.lane.b32.xlu1 %v12614_v15, %s8720_s0  ;;  %v12661_v52 = vsel %vm6432_vm2, %v6416_v38, %v6448_v11  ;;  %v6162_v62 = vadd.f32 %v12578_v28, %v12556_v1  ;;  %v6166_v14 = vadd.f32 %v12590_v3, %v12564_v18  ;;  %v6365_v28 = vpop.f32.mrf.mxu1  ;;  %v8590_v11 = vld [vmem:[%s13870_s2 + $0xd0] sm:$0xff] }
 0xa7c   :  { %v6449_v41 = vmul.f32 0.01, %v6417_v0  ;;  %vm6433_vm4 = vcmp.ge.f32.partialorder %v6417_v0, 0.0  ;;  %v6453_v55 = vmul.f32 0.01, %v6421_v35  ;;  %v6423_v13 = vadd.f32 %v12595_v19, %v6382_v5 }
 0xa7d   :  { %v6451_v49 = vmul.f32 0.01, %v6419_v46  ;;  %vm6437_vm5 = vcmp.ge.f32.partialorder %v6421_v35, 0.0  ;;  %vm6435_vm6 = vcmp.ge.f32.partialorder %v6419_v46, 0.0  ;;  %v6377_v61 = vadd.f32 %v6308_v26, %v6162_v62 }
 0xa7e   :  { %v12678_v36 = vsel %vm6433_vm4, %v6417_v0, %v6449_v41  ;;  %v6455_v20 = vmul.f32 0.01, %v6423_v13  ;;  %v12682_v40 = vsel %vm6437_vm5, %v6421_v35, %v6453_v55  ;;  %vm6439_vm7 = vcmp.ge.f32.partialorder %v6423_v13, 0.0 }
 0xa7f   :  { %6491 = vrot.lane.b32.xlu0 %v12625_v25, %s8720_s0  ;;  %6558 = vrot.lane.b32.xlu1 %v12638_v42, %s8718_s19  ;;  %v12684_v21 = vsel %vm6435_vm6, %v6419_v46, %v6451_v49  ;;  %v6164_v50 = vadd.f32 %v14237_v32, %v12560_v8  ;;  %v6381_v7 = vadd.f32 %v6312_v22, %v6166_v14  ;;  %v8194_v32 = vld [vmem:[#allocation2 + $0x270] sm:$0xf] }
 0xa80   :  { %v12692_v27 = vsel %vm6439_vm7, %v6423_v13, %v6455_v20  ;;  %v6418_v56 = vadd.f32 %v12580_v57, %v6377_v61  ;;  %v6168_v6 = vadd.f32 %v14239_v47, %v14238_v51 }
 0xa81   :  { %v6379_v1 = vadd.f32 %v6361_v34, %v6164_v50  ;;  %v6422_v3 = vadd.f32 %v12595_v19, %v6381_v7 }
 0xa82   :  { %v6383_v18 = vadd.f32 %v6365_v28, %v6168_v6  ;;  %v6450_v53 = vmul.f32 0.01, %v6418_v56  ;;  %vm6434_vm8 = vcmp.ge.f32.partialorder %v6418_v56, 0.0  ;;  %v14242_v6 = vld [vmem:[#allocation12_spill] sm:$0xff] }
 0xa83   :  { %6560 = vrot.lane.b32.xlu0 %v12647_v4, %s8718_s19  ;;  %6574 = vrot.lane.b32.xlu1 %v12651_v12, %s8718_s19  ;;  %v6420_v8 = vadd.f32 %v12580_v57, %v6379_v1  ;;  %v6454_v48 = vmul.f32 0.01, %v6422_v3  ;;  %vm6438_vm9 = vcmp.ge.f32.partialorder %v6422_v3, 0.0 }
 0xa84   :  { %v6424_v37 = vadd.f32 %v12595_v19, %v6383_v18  ;;  %v12716_v43 = vsel %vm6434_vm8, %v6418_v56, %v6450_v53 }
 0xa85   :  { %v6452_v60 = vmul.f32 0.01, %v6420_v8  ;;  %vm6436_vm10 = vcmp.ge.f32.partialorder %v6420_v8, 0.0  ;;  %v12722_v31 = vsel %vm6438_vm9, %v6422_v3, %v6454_v48 }
 0xa86   :  { %v6456_v57 = vmul.f32 0.01, %v6424_v37  ;;  %vm6440_vm11 = vcmp.ge.f32.partialorder %v6424_v37, 0.0 }
 0xa87   :  { %6576 = vrot.lane.b32.xlu0 %v12661_v52, %s8718_s19  ;;  %6481 = vrot.lane.b32.xlu1 %v12638_v42, %s8720_s0  ;;  %v12724_v38 = vsel %vm6436_vm10, %v6420_v8, %v6452_v60 }
 0xa88   :  { %v12730_v19 = vsel %vm6440_vm11, %v6424_v37, %v6456_v57 }
 0xa8b   :  { %6483 = vrot.lane.b32.xlu0 %v12647_v4, %s8720_s0  ;;  %6497 = vrot.lane.b32.xlu1 %v12651_v12, %s8720_s0 }
 0xa8f   :  { %6499 = vrot.lane.b32.xlu0 %v12661_v52, %s8720_s0  ;;  %6554 = vrot.lane.b32.xlu1 %v12678_v36, %s8718_s19 }
 0xa93   :  { %6556 = vrot.lane.b32.xlu0 %v12682_v40, %s8718_s19  ;;  %6570 = vrot.lane.b32.xlu1 %v12684_v21, %s8718_s19 }
 0xa97   :  { %6572 = vrot.lane.b32.xlu0 %v12692_v27, %s8718_s19  ;;  %6477 = vrot.lane.b32.xlu1 %v12678_v36, %s8720_s0 }
 0xa9b   :  { %6479 = vrot.lane.b32.xlu0 %v12682_v40, %s8720_s0  ;;  %6493 = vrot.lane.b32.xlu1 %v12684_v21, %s8720_s0 }
 0xa9f   :  { %6495 = vrot.lane.b32.xlu0 %v12692_v27, %s8720_s0  ;;  %7026 = vrot.lane.b32.xlu1 %v12678_v36, %s8722_s21 }
 0xaa3   :  { %7028 = vrot.lane.b32.xlu0 %v12682_v40, %s8722_s21  ;;  %6562 = vrot.lane.b32.xlu1 %v12716_v43, %s8718_s19 }
 0xaa7   :  { %6564 = vrot.lane.b32.xlu0 %v12722_v31, %s8718_s19  ;;  %6578 = vrot.lane.b32.xlu1 %v12724_v38, %s8718_s19 }
 0xaab   :  { %6580 = vrot.lane.b32.xlu0 %v12730_v19, %s8718_s19  ;;  %7042 = vrot.lane.b32.xlu1 %v12684_v21, %s8722_s21 }
 0xaaf   :  { %7044 = vrot.lane.b32.xlu0 %v12692_v27, %s8722_s21  ;;  %6485 = vrot.lane.b32.xlu1 %v12716_v43, %s8720_s0 }
 0xab3   :  { %7024 = vrot.lane.b32.xlu0 %v12612_v9, %s8722_s21  ;;  %6501 = vrot.lane.b32.xlu1 %v12724_v38, %s8720_s0 }
 0xab7   :  { %6487 = vrot.lane.b32.xlu0 %v12722_v31, %s8720_s0  ;;  %7034 = vrot.lane.b32.xlu1 %v12716_v43, %s8722_s21 }
 0xabb   :  { %6503 = vrot.lane.b32.xlu0 %v12730_v19, %s8720_s0  ;;  %7050 = vrot.lane.b32.xlu1 %v12724_v38, %s8722_s21 }
 0xabf   :  { %7032 = vrot.lane.b32.xlu0 %v12647_v4, %s8722_s21  ;;  %7022 = vrot.lane.b32.xlu1 %v12604_v59, %s8722_s21 }
 0xac3   :  { %7040 = vrot.lane.b32.xlu0 %v12625_v25, %s8722_s21  ;;  %7030 = vrot.lane.b32.xlu1 %v12638_v42, %s8722_s21 }
 0xac7   :  { %7048 = vrot.lane.b32.xlu0 %v12661_v52, %s8722_s21  ;;  %7038 = vrot.lane.b32.xlu1 %v12614_v15, %s8722_s21 }
 0xacb   :  { %7243 = vrot.lane.b32.xlu0 %v12682_v40, %s8723_s22  ;;  %7046 = vrot.lane.b32.xlu1 %v12651_v12, %s8722_s21 }
 0xacf   :  { %7259 = vrot.lane.b32.xlu0 %v12692_v27, %s8723_s22  ;;  %7241 = vrot.lane.b32.xlu1 %v12678_v36, %s8723_s22 }
 0xad3   :  { %7239 = vrot.lane.b32.xlu0 %v12612_v9, %s8723_s22  ;;  %7249 = vrot.lane.b32.xlu1 %v12716_v43, %s8723_s22 }
 0xad7   :  { %7036 = vrot.lane.b32.xlu0 %v12722_v31, %s8722_s21  ;;  %7257 = vrot.lane.b32.xlu1 %v12684_v21, %s8723_s22 }
 0xadb   :  { %7052 = vrot.lane.b32.xlu0 %v12730_v19, %s8722_s21  ;;  %7265 = vrot.lane.b32.xlu1 %v12724_v38, %s8723_s22 }
 0xadf   :  { %7247 = vrot.lane.b32.xlu0 %v12647_v4, %s8723_s22  ;;  %7237 = vrot.lane.b32.xlu1 %v12604_v59, %s8723_s22 }
 0xae1   :  { %v12788_v30 = vpop.permute.xlu1 %6550 }
 0xae3   :  { %7255 = vrot.lane.b32.xlu0 %v12625_v25, %s8723_s22  ;;  %7245 = vrot.lane.b32.xlu1 %v12638_v42, %s8723_s22 }
 0xae5   :  { %v6553_v23 = vpop.permute.xlu0 %6552  ;;  %v12794_v58 = vpop.permute.xlu1 %6566 }
 0xae7   :  { %7251 = vrot.lane.b32.xlu0 %v12722_v31, %s8723_s22  ;;  %7253 = vrot.lane.b32.xlu1 %v12614_v15, %s8723_s22 }
 0xae9   :  { %v6569_v26 = vpop.permute.xlu0 %6568  ;;  %v12800_v10 = vpop.permute.xlu1 %6473 }
 0xaeb   :  { %7267 = vrot.lane.b32.xlu0 %v12730_v19, %s8723_s22  ;;  %7261 = vrot.lane.b32.xlu1 %v12651_v12, %s8723_s22 }
 0xaed   :  { %v12806_v44 = vpop.permute.xlu0 %6475  ;;  %v12811_v54 = vpop.permute.xlu1 %6489 }
 0xaef   :  { %7263 = vrot.lane.b32.xlu0 %v12661_v52, %s8723_s22  ;;  %7469 = vperm.xlu1 %8617, %v8590_v11  }
 0xaf1   :  { %v12818_v34 = vpop.permute.xlu0 %6491  ;;  %v6559_v2 = vpop.permute.xlu1 %6558 }
 0xaf2   :  { %v6590_v56 = vsel %vm167_vm13, %v12788_v30, %v6559_v2 }
 0xaf3   :  { %7474 = vperm.xlu0 %8616, %v8591_v33   ;;  %7459 = vperm.xlu1 %8617, %v8588_v24  }
 0xaf5   :  { %v6561_v45 = vpop.permute.xlu0 %6560  ;;  %v6575_v39 = vpop.permute.xlu1 %6574 }
 0xaf6   :  { %v6591_v1 = vsel %vm167_vm13, %v6553_v23, %v6561_v45  ;;  %v6582_v8 = vsel %vm167_vm13, %v12794_v58, %v6575_v39  ;;  %v6587_v48 = vsel %vm167_vm13, %v6561_v45, %v6569_v26 }
 0xaf7   :  { %7464 = vperm.xlu0 %8616, %v8589_v16   ;;  %v6603_v57 = vmul.f32 %v6591_v1, %v14242_v6  ;;  %v14245_v1 = vld [vmem:[#allocation11_spill] sm:$0xff] }
 0xaf9   :  { %v6577_v0 = vpop.permute.xlu0 %6576  ;;  %v12826_v63 = vpop.permute.xlu1 %6481 }
 0xafa   :  { %v6583_v47 = vsel %vm167_vm13, %v6569_v26, %v6577_v0  ;;  %v6595_v11 = vsel %vm167_vm13, %v6577_v0, %v6553_v23 }
 0xafd   :  { %v12828_v17 = vpop.permute.xlu0 %6483  ;;  %v12830_v29 = vpop.permute.xlu1 %6497 }
 0xb01   :  { %v12832_v35 = vpop.permute.xlu0 %6499  ;;  %v6555_v5 = vpop.permute.xlu1 %6554 }
 0xb05   :  { %v6557_v41 = vpop.permute.xlu0 %6556  ;;  %v6571_v46 = vpop.permute.xlu1 %6570 }
 0xb09   :  { %v6573_v55 = vpop.permute.xlu0 %6572  ;;  %v12834_v13 = vpop.permute.xlu1 %6477 }
 0xb0d   :  { %v12836_v49 = vpop.permute.xlu0 %6479  ;;  %v12838_v20 = vpop.permute.xlu1 %6493 }
 0xb11   :  { %v12840_v62 = vpop.permute.xlu0 %6495  ;;  %v12842_v61 = vpop.permute.xlu1 %7026 }
 0xb15   :  { %v12844_v22 = vpop.permute.xlu0 %7028  ;;  %v6563_v14 = vpop.permute.xlu1 %6562 }
 0xb16   :  { %14240 = vst [vmem:[#allocation23_spill] sm:$0xff] %v12844_v22  ;;  %v6592_v50 = vsel %vm167_vm13, %v6555_v5, %v6563_v14  ;;  %v6588_v33 = vsel %vm167_vm13, %v6563_v14, %v6571_v46  ;;  %v6586_v14 = vsel %vm167_vm13, %v6559_v2, %v12794_v58 }
 0xb17   :  { %v6607_v3 = vmul.f32 %v6592_v50, %v14242_v6  ;;  %v14243_v50 = vld [vmem:[#allocation14_spill] sm:$0xff] }
 0xb19   :  { %v6565_v7 = vpop.permute.xlu0 %6564  ;;  %v6579_v28 = vpop.permute.xlu1 %6578 }
 0xb1a   :  { %v6593_v51 = vsel %vm167_vm13, %v6557_v41, %v6565_v7  ;;  %v6589_v18 = vsel %vm167_vm13, %v6565_v7, %v6573_v55  ;;  %v6584_v37 = vsel %vm167_vm13, %v6571_v46, %v6579_v28  ;;  %v6596_v60 = vsel %vm167_vm13, %v6579_v28, %v6555_v5 }
 0xb1b   :  { %v6611_v53 = vmul.f32 %v6593_v51, %v14242_v6  ;;  %v6605_v7 = vmul.f32 %v6583_v47, %v14243_v50  ;;  %v14244_v51 = vld [vmem:[#allocation13_spill] sm:$0xff]  ;;  %v6606_v28 = vmul.f32 %v6596_v60, %v14245_v1  ;;  %v6609_v23 = vmul.f32 %v6584_v37, %v14243_v50 }
 0xb1c   :  { %v6612_v26 = vmul.f32 %v6589_v18, %v14244_v51  ;;  %v6599_v47 = vmul.f32 %v6590_v56, %v14242_v6  ;;  %v6602_v18 = vmul.f32 %v6595_v11, %v14245_v1  ;;  %v6604_v60 = vmul.f32 %v6587_v48, %v14244_v51 }
 0xb1d   :  { %v6581_v24 = vpop.permute.xlu0 %6580  ;;  %v6619_v16 = vpack.c.bf16 %v6611_v53, %v6607_v3  ;;  %v12877_v45 = vpop.permute.xlu1 %7042  ;;  %v6601_v3 = vmul.f32 %v6582_v8, %v14243_v50 }
 0xb1e   :  { %v6585_v22 = vsel %vm167_vm13, %v6573_v55, %v6581_v24  ;;  %v6597_v5 = vsel %vm167_vm13, %v6581_v24, %v6557_v41  ;;  %v6594_v55 = vsel %vm167_vm13, %v6575_v39, %v12788_v30  ;;  %v6608_v41 = vmul.f32 %v6588_v33, %v14244_v51 }
 0xb1f   :  { %v6610_v0 = vmul.f32 %v6597_v5, %v14245_v1  ;;  %v6613_v46 = vmul.f32 %v6585_v22, %v14243_v50  ;;  %6655 = vmatprep.subr.bf16.mxu0 %v6619_v16  ;;  %v6615_v2 = vpack.c.bf16 %v6603_v57, %v6599_v47  ;;  %v6598_v56 = vmul.f32 %v6594_v55, %v14245_v1  ;;  %v8678_v5 = vld [vmem:[#allocation2 + $0x1f0] sm:$0xff]  }
 0xb20   :  { %v6620_v24 = vpack.c.bf16 %v6612_v26, %v6608_v41  ;;  %v6617_v30 = vpack.c.bf16 %v6605_v7, %v6601_v3  ;;  %v6600_v39 = vmul.f32 %v6586_v14, %v14244_v51  ;;  %v6514_v7 = vsel %vm95_vm14, %v12806_v44, %v12828_v17 }
 0xb21   :  { %v6618_v53 = vpack.c.bf16 %v6610_v0, %v6606_v28  ;;  %v12897_v37 = vpop.permute.xlu0 %7044  ;;  %v6621_v22 = vpack.c.bf16 %v6613_v46, %v6609_v23  ;;  %v6486_v58 = vpop.permute.xlu1 %6485  ;;  %v6614_v8 = vpack.c.bf16 %v6602_v18, %v6598_v56  ;;  %v6513_v23 = vsel %vm95_vm14, %v12800_v10, %v12826_v63  ;;  %v14246_v0 = vld [vmem:[#allocation8_spill] sm:$0xff]  ;;  %v14248_v56 = vld [vmem:[#allocation7_spill] sm:$0xff] }
 0xb22   :  { %v6616_v33 = vpack.c.bf16 %v6604_v60, %v6600_v39  ;;  %v6515_v48 = vsel %vm95_vm14, %v12834_v13, %v6486_v58  ;;  %v6505_v55 = vsel %vm95_vm14, %v12811_v54, %v12830_v29  ;;  %v14247_v18 = vmov 0  }
 0xb23   :  { %6656 = vmatpush1.bf16.msra.mxu0 %v6618_v53  ;;  %6708 = vmatprep.subr.bf16.mxu1 %v6621_v22  ;;  %v6530_v46 = vmul.f32 %v6515_v48, %v14246_v0  ;;  %v6506_v53 = vsel %vm95_vm14, %v12818_v34, %v12832_v35  ;;  %v6518_v22 = vsel %vm95_vm14, %v12832_v35, %v12806_v44  ;;  %v14249_v44 = vld [vmem:[#allocation10_spill] sm:$0xff] }
 0xb24   :  { %6657 = vmatprep.subr.bf16.mxu0 %v6615_v2  ;;  %6709 = vmatpush1.bf16.msra.mxu1 %v6620_v24  ;;  %v6511_v2 = vsel %vm95_vm14, %v6486_v58, %v12838_v20  ;;  %v6522_v58 = vmul.f32 %v6513_v23, %v14246_v0 }
 0xb25   :  { %6710 = vmatprep.subr.bf16.mxu1 %v6617_v30  ;;  %v12902_v11 = vpop.permute.xlu0 %7024  ;;  %v6502_v16 = vpop.permute.xlu1 %6501 }
 0xb26   :  { %v6519_v14 = vsel %vm95_vm14, %v6502_v16, %v12834_v13  ;;  %v6507_v41 = vsel %vm95_vm14, %v12838_v20, %v6502_v16  ;;  %v6526_v13 = vmul.f32 %v6514_v7, %v14246_v0  ;;  %v8679_v16 = vld [vmem:[#allocation2 + $0x1f8] sm:$0xff]   ;;  %v6528_v7 = vmul.f32 %v6506_v53, %v14249_v44 }
 0xb27   :  { %6658 = vmatpush1.bf16.msra.mxu0 %v6614_v8  ;;  %v6529_v30 = vmul.f32 %v6519_v14, %v14248_v56  ;;  %v6532_v35 = vmul.f32 %v6507_v41, %v14249_v44 }
 0xb28   :  { %6711 = vmatpush1.bf16.msra.mxu1 %v6616_v33 }
 0xb29   :  { %v6488_v57 = vpop.permute.xlu0 %6487  ;;  %v12911_v26 = vpop.permute.xlu1 %7034 }
 0xb2a   :  { %v6516_v28 = vsel %vm95_vm14, %v12836_v49, %v6488_v57  ;;  %8560 = vmatmul.mubr.msk.bf16.vlgmr.msra.gmra.mxu0 %vm240_vm15, %v8678_v5  ;;  %v6512_v3 = vsel %vm95_vm14, %v6488_v57, %v12840_v62 }
 0xb2b   :  { %v6534_v47 = vmul.f32 %v6516_v28, %v14246_v0  ;;  %8562 = vmatmul.mubr.msk.bf16.vlgmr.msra.gmra.mxu1 %vm240_vm15, %v8678_v5  ;;  %6685 = vmatprep.mubr.bf16.mxu0 %v14247_v18  ;;  %v14250_v5 = vld [vmem:[#allocation9_spill] sm:$0xff]  ;;  %v6525_v28 = vmul.f32 %v6518_v22, %v14248_v56 }
 0xb2c   :  { %6738 = vmatprep.mubr.bf16.mxu1 %v14247_v18  ;;  %v6535_v48 = vmul.f32 %v6512_v3, %v14250_v5 }
 0xb2d   :  { %v6504_v60 = vpop.permute.xlu0 %6503  ;;  %v6542_v24 = vpack.c.bf16 %v6534_v47, %v6530_v46  ;;  %v12952_v39 = vpop.permute.xlu1 %7050  ;;  %v6531_v46 = vmul.f32 %v6511_v2, %v14250_v5 }
 0xb2e   :  { %v6508_v8 = vsel %vm95_vm14, %v12840_v62, %v6504_v60  ;;  %v6520_v33 = vsel %vm95_vm14, %v6504_v60, %v12836_v49  ;;  %v6517_v62 = vsel %vm95_vm14, %v12830_v29, %v12800_v10  ;;  %v6510_v49 = vsel %vm95_vm14, %v12828_v17, %v12818_v34 }
 0xb2f   :  { %v6533_v57 = vmul.f32 %v6520_v33, %v14248_v56  ;;  %v6536_v20 = vmul.f32 %v6508_v8, %v14249_v44  ;;  %6777 = vmatprep.subr.bf16.mxu0 %v6542_v24  ;;  %v6509_v10 = vsel %vm95_vm14, %v12826_v63, %v12811_v54  ;;  %v6524_v29 = vmul.f32 %v6505_v55, %v14249_v44  ;;  %v8680_v24 = vld [vmem:[#allocation2 + $0x1e0] sm:$0xff]  }
 0xb30   :  { %v6538_v34 = vpack.c.bf16 %v6526_v13, %v6522_v58  ;;  %v6521_v17 = vmul.f32 %v6517_v62, %v14248_v56  ;;  %v6527_v3 = vmul.f32 %v6510_v49, %v14250_v5  ;;  %v6543_v53 = vpack.c.bf16 %v6535_v48, %v6531_v46  ;;  %v14253_v46 = vld [vmem:[#allocation23_spill] sm:$0xff] }
 0xb31   :  { %v6541_v14 = vpack.c.bf16 %v6533_v57, %v6529_v30  ;;  %v12976_v47 = vpop.permute.xlu0 %7032  ;;  %v6544_v23 = vpack.c.bf16 %v6536_v20, %v6532_v35  ;;  %v12983_v41 = vpop.permute.xlu1 %7022  ;;  %v6540_v22 = vpack.c.bf16 %v6528_v7, %v6524_v29  ;;  %v6523_v54 = vmul.f32 %v6509_v10, %v14250_v5  ;;  %v14251_v35 = vld [vmem:[#allocation15_spill] sm:$0xff]  ;;  %v14252_v57 = vld [vmem:[#allocation16_spill] sm:$0xff]  ;;  %v14254_v10 = vld [vmem:[#allocation17_spill] sm:$0xff] }
 0xb32   :  { %8561 = vmatmul.mubr.msk.bf16.gmra.mxu0 %vm240_vm15, %v8679_v16  ;;  %v6537_v63 = vpack.c.bf16 %v6525_v28, %v6521_v17  ;;  %v6876_v60 = vpack.c.bf16 %v12722_v31, %v12716_v43  ;;  %v6878_v30 = vpack.c.bf16 %v12730_v19, %v12724_v38  ;;  %v6875_v33 = vpack.c.bf16 %v12682_v40, %v12678_v36 }
 0xb33   :  { %8563 = vmatmul.mubr.msk.bf16.gmra.mxu1 %vm240_vm15, %v8679_v16  ;;  %6778 = vmatpush1.bf16.msra.mxu0 %v6541_v14  ;;  %v6539_v2 = vpack.c.bf16 %v6527_v3, %v6523_v54  ;;  %v6872_v43 = vpack.c.bf16 %v12647_v4, %v12638_v42  ;;  %v6877_v31 = vpack.c.bf16 %v12692_v27, %v12684_v21  ;;  %v8681_v4 = vld [vmem:[#allocation2 + $0x1e8] sm:$0xff]  }
 0xb34   :  { %6830 = vmatprep.subr.bf16.mxu1 %v6544_v23  ;;  %6779 = vmatprep.subr.bf16.mxu0 %v6538_v34  ;;  %v6874_v36 = vpack.c.bf16 %v12661_v52, %v12651_v12  ;;  %v6871_v38 = vpack.c.bf16 %v12612_v9, %v12604_v59  ;;  %v6873_v21 = vpack.c.bf16 %v12625_v25, %v12614_v15  ;;  %v8682_v12 = vld [vmem:[#allocation2 + $0x200] sm:$0xff]  }
 0xb35   :  { %6831 = vmatpush1.bf16.msra.mxu1 %v6543_v53  ;;  %v12990_v55 = vpop.permute.xlu0 %7040  ;;  %6797 = vmatprep.mubr.bf16.mxu0 %v14247_v18  ;;  %v7031_v13 = vpop.permute.xlu1 %7030  ;;  %v7060_v9 = vsel %vm633_vm0, %v12911_v26, %v12877_v45  ;;  %v7064_v15 = vsel %vm633_vm0, %v12842_v61, %v12911_v26  ;;  %v7056_v58 = vsel %vm633_vm0, %v12877_v45, %v12952_v39 }
 0xb36   :  { %6832 = vmatprep.subr.bf16.mxu1 %v6540_v22  ;;  %6850 = vmatprep.mubr.bf16.mxu1 %v14247_v18  ;;  %v7078_v48 = vmul.f32 %v7064_v15, %v14251_v35  ;;  %v7079_v20 = vmul.f32 %v7060_v9, %v14252_v57  ;;  %v7068_v26 = vsel %vm633_vm0, %v12952_v39, %v12842_v61 }
 0xb37   :  { %6780 = vmatpush1.bf16.msra.mxu0 %v6537_v63  ;;  %v7059_v49 = vsel %vm633_vm0, %v12976_v47, %v12990_v55  ;;  %v7062_v61 = vsel %vm633_vm0, %v12983_v41, %v7031_v13  ;;  %v7080_v29 = vmul.f32 %v7056_v58, %v14254_v10  ;;  %v7063_v34 = vsel %vm633_vm0, %v12902_v11, %v12976_v47  ;;  %v14255_v63 = vld [vmem:[#allocation18_spill] sm:$0xff] }
 0xb38   :  { %6912 = vmatprep.subr.bf16.mxu0 %v6876_v60  ;;  %v7075_v17 = vmul.f32 %v7059_v49, %v14252_v57  ;;  %v7070_v60 = vmul.f32 %v7062_v61, %v14251_v35  ;;  %v14256_v49 = vld [vmem:[#allocation19_spill] sm:$0xff] }
 0xb39   :  { %6833 = vmatpush1.bf16.msra.mxu1 %v6539_v2  ;;  %v12998_v8 = vpop.permute.xlu0 %7048  ;;  %v13002_v16 = vpop.permute.xlu1 %7038 }
 0xb3a   :  { %6965 = vmatprep.subr.bf16.mxu1 %v6878_v30  ;;  %8566 = vmatmul.mubr.msk.bf16.vlgmr.msra.gmra.mxu0 %vm240_vm15, %v8680_v24  ;;  %v7058_v52 = vsel %vm633_vm0, %v7031_v13, %v13002_v16  ;;  %v7081_v13 = vmul.f32 %v7068_v26, %v14255_v63  ;;  %v8683_v30 = vld [vmem:[#allocation2 + $0x208] sm:$0xff]   ;;  %v7055_v15 = vsel %vm633_vm0, %v12990_v55, %v12998_v8 }
 0xb3b   :  { %6913 = vmatpush1.bf16.msra.mxu0 %v6875_v33  ;;  %6807 = vmatprep.mubr.bf16.mxu0 %v14247_v18  ;;  %v7071_v39 = vmul.f32 %v7058_v52, %v14252_v57 }
 0xb3c   :  { %8568 = vmatmul.mubr.msk.bf16.vlgmr.msra.gmra.mxu1 %vm240_vm15, %v8680_v24  ;;  %6914 = vmatprep.subr.bf16.mxu0 %v6872_v43 }
 0xb3d   :  { %6966 = vmatpush1.bf16.msra.mxu1 %v6877_v31  ;;  %v13013_v40 = vpop.permute.xlu0 %7243  ;;  %6860 = vmatprep.mubr.bf16.mxu1 %v14247_v18  ;;  %v7047_v42 = vpop.permute.xlu1 %7046  ;;  %v7087_v31 = vpack.c.bf16 %v7075_v17, %v7071_v39 }
 0xb3e   :  { %6967 = vmatprep.subr.bf16.mxu1 %v6874_v36  ;;  %v7066_v3 = vsel %vm633_vm0, %v7047_v42, %v12983_v41  ;;  %v7067_v41 = vsel %vm633_vm0, %v12998_v8, %v12902_v11  ;;  %v7074_v36 = vmul.f32 %v7063_v34, %v14251_v35 }
 0xb3f   :  { %6915 = vmatpush1.bf16.msra.mxu0 %v6871_v38  ;;  %v7073_v38 = vmul.f32 %v7066_v3, %v14255_v63 }
 0xb40   :  { %v7086_v11 = vpack.c.bf16 %v7074_v36, %v7070_v60 }
 0xb41   :  { %6968 = vmatpush1.bf16.msra.mxu1 %v6873_v21  ;;  %v13020_v27 = vpop.permute.xlu0 %7259  ;;  %v13022_v19 = vpop.permute.xlu1 %7241 }
 0xb42   :  { %8567 = vmatmul.mubr.msk.bf16.gmra.mxu0 %vm240_vm15, %v8681_v4 }
 0xb43   :  { %6932 = vmatprep.mubr.bf16.mxu0 %v14247_v18 }
 0xb44   :  { %8569 = vmatmul.mubr.msk.bf16.gmra.mxu1 %vm240_vm15, %v8681_v4 }
 0xb45   :  { %v13027_v59 = vpop.permute.xlu0 %7239  ;;  %6985 = vmatprep.mubr.bf16.mxu1 %v14247_v18  ;;  %v13038_v25 = vpop.permute.xlu1 %7249 }
 0xb46   :  { %v7279_v55 = vsel %vm844_vm3, %v13022_v19, %v13038_v25 }
 0xb49   :  { %v7037_v62 = vpop.permute.xlu0 %7036  ;;  %v7258_v7 = vpop.permute.xlu1 %7257 }
 0xb4a   :  { %v7061_v28 = vsel %vm633_vm0, %v7037_v62, %v12897_v37  ;;  %v7065_v45 = vsel %vm633_vm0, %v14253_v46, %v7037_v62  ;;  %8572 = vmatmul.mubr.msk.bf16.vlgmr.msra.gmra.mxu0 %vm240_vm15, %v8682_v12  ;;  %v7275_v8 = vsel %vm844_vm3, %v13038_v25, %v7258_v7  ;;  %v8684_v62 = vld [vmem:[#allocation2 + $0x210] sm:$0xff]  }
 0xb4b   :  { %v7082_v14 = vmul.f32 %v7065_v45, %v14251_v35  ;;  %v7083_v23 = vmul.f32 %v7061_v28, %v14252_v57  ;;  %6942 = vmatprep.mubr.bf16.mxu0 %v14247_v18  ;;  %v7293_v28 = vmul.f32 %v7279_v55, %v14256_v49 }
 0xb4c   :  { %8574 = vmatmul.mubr.msk.bf16.vlgmr.msra.gmra.mxu1 %vm240_vm15, %v8682_v12  ;;  %v7077_v12 = vmul.f32 %v7067_v41, %v14255_v63 }
 0xb4d   :  { %v7090_v53 = vpack.c.bf16 %v7082_v14, %v7078_v48  ;;  %v7053_v22 = vpop.permute.xlu0 %7052  ;;  %v7091_v54 = vpack.c.bf16 %v7083_v23, %v7079_v20  ;;  %6995 = vmatprep.mubr.bf16.mxu1 %v14247_v18  ;;  %v7266_v24 = vpop.permute.xlu1 %7265  ;;  %v7076_v48 = vmul.f32 %v7055_v15, %v14254_v10 }
 0xb4e   :  { %v7057_v47 = vsel %vm633_vm0, %v12897_v37, %v7053_v22  ;;  %v7069_v2 = vsel %vm633_vm0, %v7053_v22, %v14253_v46  ;;  %v7054_v37 = vsel %vm633_vm0, %v13002_v16, %v7047_v42  ;;  %v7089_v42 = vpack.c.bf16 %v7077_v12, %v7073_v38  ;;  %v14257_v46 = vld [vmem:[#allocation20_spill] sm:$0xff] }
 0xb4f   :  { %v7084_v33 = vmul.f32 %v7057_v47, %v14254_v10  ;;  %v7085_v43 = vmul.f32 %v7069_v2, %v14255_v63  ;;  %7127 = vmatprep.subr.bf16.mxu0 %v7091_v54  ;;  %v7072_v16 = vmul.f32 %v7054_v37, %v14254_v10  ;;  %v7294_v45 = vmul.f32 %v7275_v8, %v14257_v46  ;;  %v8685_v37 = vld [vmem:[#allocation2 + $0x218] sm:$0xff]  }
 0xb50   :  { %7128 = vmatpush1.bf16.msra.mxu0 %v7090_v53  ;;  %v7271_v61 = vsel %vm844_vm3, %v7258_v7, %v7266_v24  ;;  %v7283_v14 = vsel %vm844_vm3, %v7266_v24, %v13022_v19  ;;  %v14258_v53 = vld [vmem:[#allocation21_spill] sm:$0xff] }
 0xb51   :  { %v7092_v4 = vpack.c.bf16 %v7084_v33, %v7080_v29  ;;  %v7248_v21 = vpop.permute.xlu0 %7247  ;;  %7129 = vmatprep.subr.bf16.mxu0 %v7087_v31  ;;  %v7093_v9 = vpack.c.bf16 %v7085_v43, %v7081_v13  ;;  %v7238_v52 = vpop.permute.xlu1 %7237  ;;  %v7088_v26 = vpack.c.bf16 %v7076_v48, %v7072_v16  ;;  %v7295_v22 = vmul.f32 %v7271_v61, %v14258_v53 }
 0xb52   :  { %8573 = vmatmul.mubr.msk.bf16.gmra.mxu0 %vm240_vm15, %v8683_v30  ;;  %v7278_v13 = vsel %vm844_vm3, %v13027_v59, %v7248_v21 }
 0xb53   :  { %7180 = vmatprep.subr.bf16.mxu1 %v7093_v9  ;;  %7147 = vmatprep.mubr.bf16.mxu0 %v14247_v18 }
 0xb54   :  { %8575 = vmatmul.mubr.msk.bf16.gmra.mxu1 %vm240_vm15, %v8683_v30  ;;  %7130 = vmatpush1.bf16.msra.mxu0 %v7086_v11  ;;  %v14259_v30 = vld [vmem:[#allocation22_spill] sm:$0xff]  ;;  %v7289_v11 = vmul.f32 %v7278_v13, %v14256_v49 }
 0xb55   :  { %7181 = vmatpush1.bf16.msra.mxu1 %v7092_v4  ;;  %v7256_v20 = vpop.permute.xlu0 %7255  ;;  %7200 = vmatprep.mubr.bf16.mxu1 %v14247_v18  ;;  %v7246_v58 = vpop.permute.xlu1 %7245  ;;  %v7296_v41 = vmul.f32 %v7283_v14, %v14259_v30 }
 0xb56   :  { %7182 = vmatprep.subr.bf16.mxu1 %v7089_v42  ;;  %v7274_v25 = vsel %vm844_vm3, %v7248_v21, %v7256_v20  ;;  %v7277_v7 = vsel %vm844_vm3, %v7238_v52, %v7246_v58 }
 0xb57   :  { %v7290_v60 = vmul.f32 %v7274_v25, %v14257_v46  ;;  %v7285_v33 = vmul.f32 %v7277_v7, %v14256_v49 }
 0xb59   :  { %7183 = vmatpush1.bf16.msra.mxu1 %v7088_v26  ;;  %v7252_v39 = vpop.permute.xlu0 %7251  ;;  %v7254_v23 = vpop.permute.xlu1 %7253  ;;  %v7301_v16 = vpack.c.bf16 %v7289_v11, %v7285_v33  ;;  %v8687_v26 = vld [vmem:[#allocation2 + $0x228] sm:$0xff]  }
 0xb5a   :  { %v7276_v29 = vsel %vm844_vm3, %v7252_v39, %v13020_v27  ;;  %v7280_v34 = vsel %vm844_vm3, %v13013_v40, %v7252_v39  ;;  %8578 = vmatmul.mubr.msk.bf16.vlgmr.msra.gmra.mxu0 %vm240_vm15, %v8684_v62  ;;  %v7273_v19 = vsel %vm844_vm3, %v7246_v58, %v7254_v23 }
 0xb5b   :  { %v7297_v17 = vmul.f32 %v7280_v34, %v14256_v49  ;;  %v7298_v3 = vmul.f32 %v7276_v29, %v14257_v46  ;;  %7157 = vmatprep.mubr.bf16.mxu0 %v14247_v18  ;;  %v7286_v54 = vmul.f32 %v7273_v19, %v14257_v46 }
 0xb5c   :  { %8580 = vmatmul.mubr.msk.bf16.vlgmr.msra.gmra.mxu1 %vm240_vm15, %v8684_v62 }
 0xb5d   :  { %v7305_v24 = vpack.c.bf16 %v7297_v17, %v7293_v28  ;;  %v7268_v47 = vpop.permute.xlu0 %7267  ;;  %v7306_v2 = vpack.c.bf16 %v7298_v3, %v7294_v45  ;;  %7210 = vmatprep.mubr.bf16.mxu1 %v14247_v18  ;;  %v7262_v43 = vpop.permute.xlu1 %7261  ;;  %v7302_v9 = vpack.c.bf16 %v7290_v60, %v7286_v54 }
 0xb5e   :  { %v7272_v31 = vsel %vm844_vm3, %v13020_v27, %v7268_v47  ;;  %v7284_v36 = vsel %vm844_vm3, %v7268_v47, %v13013_v40  ;;  %v7269_v38 = vsel %vm844_vm3, %v7254_v23, %v7262_v43  ;;  %v7281_v15 = vsel %vm844_vm3, %v7262_v43, %v7238_v52 }
 0xb5f   :  { %v7299_v4 = vmul.f32 %v7272_v31, %v14258_v53  ;;  %v7300_v21 = vmul.f32 %v7284_v36, %v14259_v30  ;;  %7342 = vmatprep.subr.bf16.mxu0 %v7306_v2  ;;  %v7287_v42 = vmul.f32 %v7269_v38, %v14258_v53  ;;  %v7288_v8 = vmul.f32 %v7281_v15, %v14259_v30 }
 0xb60   :  { %7343 = vmatpush1.bf16.msra.mxu0 %v7305_v24 }
 0xb61   :  { %v7307_v27 = vpack.c.bf16 %v7299_v4, %v7295_v22  ;;  %v7264_v12 = vpop.permute.xlu0 %7263  ;;  %7344 = vmatprep.subr.bf16.mxu0 %v7302_v9  ;;  %v7308_v40 = vpack.c.bf16 %v7300_v21, %v7296_v41 }
 0xb62   :  { %v7270_v48 = vsel %vm844_vm3, %v7256_v20, %v7264_v12  ;;  %v7282_v55 = vsel %vm844_vm3, %v7264_v12, %v13027_v59  ;;  %8579 = vmatmul.mubr.msk.bf16.gmra.mxu0 %vm240_vm15, %v8685_v37  ;;  %v8686_v59 = vld [vmem:[#allocation2 + $0x220] sm:$0xff]  }
 0xb63   :  { %v7291_v52 = vmul.f32 %v7270_v48, %v14258_v53  ;;  %v7292_v58 = vmul.f32 %v7282_v55, %v14259_v30  ;;  %7395 = vmatprep.subr.bf16.mxu1 %v7308_v40  ;;  %7362 = vmatprep.mubr.bf16.mxu0 %v14247_v18 }
 0xb64   :  { %8581 = vmatmul.mubr.msk.bf16.gmra.mxu1 %vm240_vm15, %v8685_v37  ;;  %7345 = vmatpush1.bf16.msra.mxu0 %v7301_v16 }
 0xb65   :  { %v7303_v62 = vpack.c.bf16 %v7291_v52, %v7287_v42  ;;  %7396 = vmatpush1.bf16.msra.mxu1 %v7307_v27  ;;  %v7304_v20 = vpack.c.bf16 %v7292_v58, %v7288_v8  ;;  %7415 = vmatprep.mubr.bf16.mxu1 %v14247_v18 }
 0xb67   :  { %7397 = vmatprep.subr.bf16.mxu1 %v7304_v20 }
 0xb69   :  { %7398 = vmatpush1.bf16.msra.mxu1 %v7303_v62 }
 0xb6a   :  { %8584 = vmatmul.mubr.msk.bf16.vlgmr.msra.gmra.mxu0 %vm240_vm15, %v8686_v59 }
 0xb6b   :  { %7372 = vmatprep.mubr.bf16.mxu0 %v14247_v18 }
 0xb6c   :  { %8586 = vmatmul.mubr.msk.bf16.vlgmr.msra.gmra.mxu1 %vm240_vm15, %v8686_v59 }
 0xb6d   :  { %7425 = vmatprep.mubr.bf16.mxu1 %v14247_v18 }
 0xb6e   :  { %v13258_v10 = vpop.permute.xlu0 %7474 }
 0xb72   :  { %8585 = vmatmul.mubr.msk.bf16.gmra.mxu0 %vm240_vm15, %v8687_v26 }
 0xb73   :  { %7724 = vmatprep.mubr.bf16.mxu0 %v14247_v18 }
 0xb74   :  { %8587 = vmatmul.mubr.msk.bf16.gmra.mxu1 %vm240_vm15, %v8687_v26 }
 0xb75   :  { %7765 = vmatprep.mubr.bf16.mxu1 %v14247_v18 }
 0xbea   :  { %v13186_v28 = vpop.f32.mrf.mxu0 }
 0xbeb   :  { %v13188_v45 = vpop.f32.mrf.mxu1 }
 0xbec   :  { %v6679_v61 = vpop.f32.mrf.mxu0 }
 0xbed   :  { %v6732_v39 = vpop.f32.mrf.mxu1 }
 0xbee   :  { %v13190_v14 = vpop.f32.mrf.mxu0 }
 0xbef   :  { %v13192_v25 = vpop.f32.mrf.mxu1 }
 0xbf0   :  { %v6683_v23 = vpop.f32.mrf.mxu0 }
 0xbf1   :  { %v6736_v29 = vpop.f32.mrf.mxu1 }
 0xbf2   :  { %v6687_v34 = vpop.f32.mrf.mxu0 }
 0xbf3   :  { %v6740_v7 = vpop.f32.mrf.mxu1 }
 0xbf4   :  { %v6689_v19 = vpop.f32.mrf.mxu0 }
 0xbf5   :  { %v6742_v17 = vpop.f32.mrf.mxu1 }
 0xbf6   :  { %v6691_v3 = vpop.f32.mrf.mxu0 }
 0xbf7   :  { %v6744_v22 = vpop.f32.mrf.mxu1 }
 0xbf8   :  { %v6693_v54 = vpop.f32.mrf.mxu0 }
 0xbf9   :  { %v6746_v13 = vpop.f32.mrf.mxu1 }
 0xbfa   :  { %v13194_v60 = vpop.f32.mrf.mxu0 }
 0xbfc   :  { %v13196_v24 = vpop.f32.mrf.mxu1  ;;  %v6801_v47 = vpop.f32.mrf.mxu0 }
 0xbfd   :  { %v13198_v2 = vadd.f32 %v6801_v47, %v6679_v61 }
 0xbfe   :  { %v6854_v41 = vpop.f32.mrf.mxu1  ;;  %v13200_v33 = vpop.f32.mrf.mxu0 }
 0xbff   :  { %v13202_v43 = vadd.f32 %v6854_v41, %v6732_v39 }
 0xc00   :  { %v13204_v31 = vpop.f32.mrf.mxu1  ;;  %v6805_v36 = vpop.f32.mrf.mxu0 }
 0xc01   :  { %v13206_v37 = vadd.f32 %v6805_v36, %v6683_v23 }
 0xc02   :  { %v6858_v38 = vpop.f32.mrf.mxu1  ;;  %v6809_v4 = vpop.f32.mrf.mxu0 }
 0xc03   :  { %v13208_v21 = vadd.f32 %v6858_v38, %v6736_v29  ;;  %v6810_v9 = vadd.f32 %v6809_v4, %v6687_v34 }
 0xc04   :  { %v6862_v11 = vpop.f32.mrf.mxu1  ;;  %v6811_v15 = vpop.f32.mrf.mxu0 }
 0xc05   :  { %v6863_v27 = vadd.f32 %v6862_v11, %v6740_v7  ;;  %v6812_v12 = vadd.f32 %v6811_v15, %v6689_v19 }
 0xc06   :  { %v6864_v40 = vpop.f32.mrf.mxu1  ;;  %v6813_v16 = vpop.f32.mrf.mxu0 }
 0xc07   :  { %v6865_v42 = vadd.f32 %v6864_v40, %v6742_v17  ;;  %v6814_v48 = vadd.f32 %v6813_v16, %v6691_v3 }
 0xc08   :  { %v6866_v55 = vpop.f32.mrf.mxu1  ;;  %v6815_v8 = vpop.f32.mrf.mxu0 }
 0xc09   :  { %v6867_v52 = vadd.f32 %v6866_v55, %v6744_v22  ;;  %v6816_v58 = vadd.f32 %v6815_v8, %v6693_v54 }
 0xc0a   :  { %v6868_v62 = vpop.f32.mrf.mxu1  ;;  %v6934_v20 = vpop.f32.mrf.mxu0 }
 0xc0b   :  { %v6869_v59 = vadd.f32 %v6868_v62, %v6746_v13 }
 0xc0c   :  { %v6987_v26 = vpop.f32.mrf.mxu1  ;;  %v13210_v61 = vpop.f32.mrf.mxu0 }
 0xc0e   :  { %v13212_v39 = vpop.f32.mrf.mxu1  ;;  %v6938_v23 = vpop.f32.mrf.mxu0 }
 0xc10   :  { %v6991_v29 = vpop.f32.mrf.mxu1  ;;  %v13214_v34 = vpop.f32.mrf.mxu0 }
 0xc12   :  { %v13216_v7 = vpop.f32.mrf.mxu1  ;;  %v6944_v19 = vpop.f32.mrf.mxu0 }
 0xc13   :  { %v13218_v17 = vadd.f32 %v6944_v19, %v6810_v9 }
 0xc14   :  { %v6997_v3 = vpop.f32.mrf.mxu1  ;;  %v6946_v22 = vpop.f32.mrf.mxu0 }
 0xc15   :  { %v13220_v54 = vadd.f32 %v6997_v3, %v6863_v27  ;;  %v7015_v47 = vadd.f32 %v6946_v22, %v6812_v12 }
 0xc16   :  { %v6999_v13 = vpop.f32.mrf.mxu1  ;;  %v6948_v41 = vpop.f32.mrf.mxu0 }
 0xc17   :  { %v7017_v36 = vadd.f32 %v6999_v13, %v6865_v42  ;;  %v13222_v38 = vadd.f32 %v6948_v41, %v6814_v48 }
 0xc18   :  { %v7001_v4 = vpop.f32.mrf.mxu1  ;;  %v6950_v11 = vpop.f32.mrf.mxu0 }
 0xc19   :  { %v13224_v15 = vadd.f32 %v7001_v4, %v6867_v52  ;;  %v7019_v40 = vadd.f32 %v6950_v11, %v6816_v58  ;;  %v13238_v58 = vpop.permute.xlu1 %7469  ;;  %v6853_v11 = vadd.f32 %v13196_v24, %v13188_v45 }
 0xc1a   :  { %v7003_v16 = vpop.f32.mrf.mxu1  ;;  %v7149_v55 = vpop.f32.mrf.mxu0 }
 0xc1b   :  { %v7021_v8 = vadd.f32 %v7003_v16, %v6869_v59  ;;  %v6800_v59 = vadd.f32 %v13194_v60, %v13186_v28  ;;  %v7008_v46 = vadd.f32 %v6987_v26, %v6853_v11  ;;  %v6804_v28 = vadd.f32 %v13200_v33, %v13190_v14 }
 0xc1c   :  { %v7202_v9 = vpop.f32.mrf.mxu1  ;;  %v13226_v62 = vpop.f32.mrf.mxu0 }
 0xc1d   :  { %v7006_v16 = vadd.f32 %v6934_v20, %v6800_v59  ;;  %v7223_v45 = vadd.f32 %v7202_v9, %v7008_v46  ;;  %v7010_v26 = vadd.f32 %v6938_v23, %v6804_v28  ;;  %v7465_v9 = vpop.permute.xlu0 %7464 }
 0xc1e   :  { %v13228_v19 = vpop.f32.mrf.mxu1  ;;  %v7153_v27 = vpop.f32.mrf.mxu0 }
 0xc1f   :  { %v7221_v18 = vadd.f32 %v7149_v55, %v7006_v16  ;;  %v7225_v33 = vadd.f32 %v7153_v27, %v7010_v26  ;;  %v7009_v26 = vadd.f32 %v13212_v39, %v13202_v43 }
 0xc20   :  { %v7206_v12 = vpop.f32.mrf.mxu1  ;;  %v13230_v3 = vpop.f32.mrf.mxu0 }
 0xc22   :  { %v13232_v42 = vpop.f32.mrf.mxu1  ;;  %v13234_v48 = vpop.f32.mrf.mxu0 }
 0xc24   :  { %v13236_v22 = vpop.f32.mrf.mxu1  ;;  %v7161_v52 = vpop.f32.mrf.mxu0 }
 0xc25   :  { %v13242_v13 = vadd.f32 %v7161_v52, %v7015_v47  ;;  %v13256_v52 = vpop.permute.xlu1 %7459 }
 0xc26   :  { %v7214_v41 = vpop.f32.mrf.mxu1  ;;  %v13244_v4 = vpop.f32.mrf.mxu0 }
 0xc27   :  { %v13248_v30 = vadd.f32 %v7214_v41, %v7017_v36  ;;  %v6857_v36 = vadd.f32 %v13204_v31, %v13192_v25 }
 0xc28   :  { %v13250_v53 = vpop.f32.mrf.mxu1  ;;  %v7165_v49 = vpop.f32.mrf.mxu0 }
 0xc29   :  { %v13252_v63 = vadd.f32 %v7165_v49, %v7019_v40  ;;  %v7012_v14 = vadd.f32 %v6991_v29, %v6857_v36  ;;  %v7011_v36 = vadd.f32 %v13214_v34, %v13206_v37  ;;  %v7013_v37 = vadd.f32 %v13216_v7, %v13208_v21 }
 0xc2a   :  { %v7218_v60 = vpop.f32.mrf.mxu1  ;;  %v7364_v47 = vpop.f32.mrf.mxu0 }
 0xc2b   :  { %v13260_v24 = vadd.f32 %v7218_v60, %v7021_v8  ;;  %v7436_v20 = vadd.f32 %v7364_v47, %v7221_v18  ;;  %v7227_v46 = vadd.f32 %v7206_v12, %v7012_v14 }
 0xc2c   :  { %v7417_v55 = vpop.f32.mrf.mxu1  ;;  %v7366_v49 = vpop.f32.mrf.mxu0 }
 0xc2d   :  { %v7477_v40 = vadd.f32 %v13256_v52, %v7436_v20  ;;  %v7438_v59 = vadd.f32 %v7417_v55, %v7223_v45  ;;  %v7007_v20 = vadd.f32 %v13210_v61, %v13198_v2  ;;  %v7226_v61 = vadd.f32 %v13230_v3, %v7011_v36  ;;  %v14268_v2 = vld [vmem:[#allocation16_spill] sm:$0xff] }
 0xc2e   :  { %v7419_v41 = vpop.f32.mrf.mxu1  ;;  %v7368_v11 = vpop.f32.mrf.mxu0 }
 0xc2f   :  { %v7509_v16 = vmul.f32 0.01, %v7477_v40  ;;  %v7479_v57 = vadd.f32 %v13256_v52, %v7438_v59  ;;  %vm7493_vm12 = vcmp.ge.f32.partialorder %v7477_v40, 0.0  ;;  %v7440_v8 = vadd.f32 %v7368_v11, %v7225_v33 }
 0xc30   :  { %v7421_v18 = vpop.f32.mrf.mxu1  ;;  %v7228_v59 = vadd.f32 %v13232_v42, %v7013_v37 }
 0xc31   :  { %v7481_v60 = vadd.f32 %v7465_v9, %v7440_v8  ;;  %v7442_v25 = vadd.f32 %v7421_v18, %v7227_v46  ;;  %v7511_v31 = vmul.f32 0.01, %v7479_v57  ;;  %v13266_v23 = vsel %vm7493_vm12, %v7477_v40, %v7509_v16  ;;  %v7370_v40 = vpop.f32.mrf.mxu0 }
 0xc32   :  { %14260 = vst [vmem:[#allocation27_spill] sm:$0xff] %v13266_v23  ;;  %vm7495_vm1 = vcmp.ge.f32.partialorder %v7479_v57, 0.0  ;;  %7615 = vrot.lane.b32.xlu1 %v13266_v23, %s8718_s19  ;;  %v7441_v34 = vadd.f32 %v7370_v40, %v7226_v61 }
 0xc33   :  { %vm7497_vm2 = vcmp.ge.f32.partialorder %v7481_v60, 0.0  ;;  %v7513_v28 = vmul.f32 0.01, %v7481_v60  ;;  %v7483_v29 = vadd.f32 %v7465_v9, %v7442_v25  ;;  %v13272_v47 = vsel %vm7495_vm1, %v7479_v57, %v7511_v31  ;;  %v7374_v16 = vpop.f32.mrf.mxu0 }
 0xc34   :  { %14262 = vst [vmem:[#allocation24_spill] sm:$0xff] %v13272_v47  ;;  %v7222_v57 = vadd.f32 %v13226_v62, %v7007_v20  ;;  %v7224_v62 = vadd.f32 %v13228_v19, %v7009_v26  ;;  %v7482_v3 = vadd.f32 %v7465_v9, %v7441_v34 }
 0xc35   :  { %v13270_v27 = vsel %vm7497_vm2, %v7481_v60, %v7513_v28  ;;  %vm7499_vm4 = vcmp.ge.f32.partialorder %v7483_v29, 0.0  ;;  %v7515_v12 = vmul.f32 0.01, %v7483_v29  ;;  %v7229_v60 = vadd.f32 %v13234_v48, %v13218_v17 }
 0xc36   :  { %14261 = vst [vmem:[#allocation26_spill] sm:$0xff] %v13270_v27  ;;  %7617 = vrot.lane.b32.xlu0 %v13270_v27, %s8718_s19  ;;  %7631 = vrot.lane.b32.xlu1 %v13272_v47, %s8718_s19  ;;  %v7437_v55 = vadd.f32 %v7366_v49, %v7222_v57  ;;  %v7439_v39 = vadd.f32 %v7419_v41, %v7224_v62  ;;  %v7423_v49 = vpop.f32.mrf.mxu1  ;;  %v7514_v21 = vmul.f32 0.01, %v7482_v3  ;;  %vm7498_vm6 = vcmp.ge.f32.partialorder %v7482_v3, 0.0 }
 0xc37   :  { %v13278_v45 = vsel %vm7499_vm4, %v7483_v29, %v7515_v12  ;;  %v7443_v14 = vadd.f32 %v7423_v49, %v7228_v59  ;;  %v7444_v25 = vadd.f32 %v7374_v16, %v7229_v60  ;;  %v7233_v29 = vadd.f32 %v13244_v4, %v13222_v38 }
 0xc38   :  { %14263 = vst [vmem:[#allocation25_spill] sm:$0xff] %v13278_v45  ;;  %v7478_v43 = vadd.f32 %v13256_v52, %v7437_v55  ;;  %v7480_v19 = vadd.f32 %v13256_v52, %v7439_v39  ;;  %v13322_v11 = vsel %vm7498_vm6, %v7482_v3, %v7514_v21  ;;  %v7427_v18 = vpop.f32.mrf.mxu1  ;;  %v7231_v12 = vadd.f32 %v13236_v22, %v13220_v54 }
 0xc39   :  { %v7484_v7 = vadd.f32 %v7465_v9, %v7443_v14  ;;  %v7376_v9 = vpop.f32.mrf.mxu0  ;;  %v7485_v57 = vadd.f32 %v13238_v58, %v7444_v25  ;;  %v7235_v48 = vadd.f32 %v13250_v53, %v13224_v15 }
 0xc3a   :  { %7633 = vrot.lane.b32.xlu0 %v13278_v45, %s8718_s19  ;;  %7541 = vrot.lane.b32.xlu1 %v13266_v23, %s8720_s0  ;;  %v7510_v33 = vmul.f32 0.01, %v7478_v43  ;;  %vm7494_vm5 = vcmp.ge.f32.partialorder %v7478_v43, 0.0  ;;  %v7512_v41 = vmul.f32 0.01, %v7480_v19  ;;  %vm7496_vm7 = vcmp.ge.f32.partialorder %v7480_v19, 0.0  ;;  %v7429_v31 = vpop.f32.mrf.mxu1 }
 0xc3b   :  { %v7516_v52 = vmul.f32 0.01, %v7484_v7  ;;  %vm7500_vm8 = vcmp.ge.f32.partialorder %v7484_v7, 0.0  ;;  %v7378_v28 = vpop.f32.mrf.mxu0  ;;  %v7446_v36 = vadd.f32 %v7427_v18, %v7231_v12  ;;  %v7517_v26 = vmul.f32 0.01, %v7485_v57 }
 0xc3c   :  { %v13316_v42 = vsel %vm7494_vm5, %v7478_v43, %v7510_v33  ;;  %v13324_v46 = vsel %vm7496_vm7, %v7480_v19, %v7512_v41  ;;  %v7448_v20 = vadd.f32 %v7378_v28, %v7233_v29  ;;  %v7431_v17 = vpop.f32.mrf.mxu1  ;;  %vm7501_vm9 = vcmp.ge.f32.partialorder %v7485_v57, 0.0 }
 0xc3d   :  { %v13330_v8 = vsel %vm7500_vm8, %v7484_v7, %v7516_v52  ;;  %v7450_v4 = vadd.f32 %v7431_v17, %v7235_v48  ;;  %v7487_v54 = vadd.f32 %v13238_v58, %v7446_v36  ;;  %v13362_v15 = vsel %vm7501_vm9, %v7485_v57, %v7517_v26  ;;  %v7380_v43 = vpop.f32.mrf.mxu0 }
 0xc3e   :  { %7543 = vrot.lane.b32.xlu0 %v13270_v27, %s8720_s0  ;;  %7557 = vrot.lane.b32.xlu1 %v13272_v47, %s8720_s0  ;;  %14264 = vst [vmem:[#allocation28_spill] sm:$0xff] %v13330_v8  ;;  %v7489_v38 = vadd.f32 %v13258_v10, %v7448_v20  ;;  %v7445_v34 = vadd.f32 %v7376_v9, %v13242_v13  ;;  %v7433_v3 = vpop.f32.mrf.mxu1 }
 0xc3f   :  { %v7491_v55 = vadd.f32 %v13258_v10, %v7450_v4  ;;  %v7519_v53 = vmul.f32 0.01, %v7487_v54  ;;  %vm7503_vm11 = vcmp.ge.f32.partialorder %v7487_v54, 0.0  ;;  %v7449_v39 = vadd.f32 %v7380_v43, %v13252_v63 }
 0xc40   :  { %v7521_v22 = vmul.f32 0.01, %v7489_v38  ;;  %vm7505_vm10 = vcmp.ge.f32.partialorder %v7489_v38, 0.0  ;;  %v7486_v49 = vadd.f32 %v13238_v58, %v7445_v34  ;;  %v7447_v59 = vadd.f32 %v7429_v31, %v13248_v30  ;;  %v8602_v31 = vld [vmem:[%s13870_s2 + $0xe0] sm:$0xff] }
 0xc41   :  { %v7523_v40 = vmul.f32 0.01, %v7491_v55  ;;  %vm7507_vm12 = vcmp.ge.f32.partialorder %v7491_v55, 0.0  ;;  %v13368_v62 = vsel %vm7503_vm11, %v7487_v54, %v7519_v53  ;;  %v7490_v13 = vadd.f32 %v13258_v10, %v7449_v39 }
 0xc42   :  { %7559 = vrot.lane.b32.xlu0 %v13278_v45, %s8720_s0  ;;  %7958 = vrot.lane.b32.xlu1 %v13266_v23, %s8722_s21  ;;  %v13366_v61 = vsel %vm7505_vm10, %v7489_v38, %v7521_v22  ;;  %v7451_v14 = vadd.f32 %v7433_v3, %v13260_v24  ;;  %v7518_v33 = vmul.f32 0.01, %v7486_v49  ;;  %v7488_v19 = vadd.f32 %v13238_v58, %v7447_v59 }
 0xc43   :  { %v13374_v37 = vsel %vm7507_vm12, %v7491_v55, %v7523_v40  ;;  %vm7502_vm1 = vcmp.ge.f32.partialorder %v7486_v49, 0.0  ;;  %v7522_v63 = vmul.f32 0.01, %v7490_v13  ;;  %vm7506_vm2 = vcmp.ge.f32.partialorder %v7490_v13, 0.0 }
 0xc44   :  { %v7492_v30 = vadd.f32 %v13258_v10, %v7451_v14  ;;  %v7520_v21 = vmul.f32 0.01, %v7488_v19  ;;  %v13408_v7 = vsel %vm7502_vm1, %v7486_v49, %v7518_v33  ;;  %vm7504_vm4 = vcmp.ge.f32.partialorder %v7488_v19, 0.0 }
 0xc45   :  { %v13414_v24 = vsel %vm7506_vm2, %v7490_v13, %v7522_v63 }
 0xc46   :  { %7960 = vrot.lane.b32.xlu0 %v13270_v27, %s8722_s21  ;;  %7974 = vrot.lane.b32.xlu1 %v13272_v47, %s8722_s21  ;;  %v7524_v58 = vmul.f32 0.01, %v7492_v30  ;;  %vm7508_vm5 = vcmp.ge.f32.partialorder %v7492_v30, 0.0  ;;  %v13416_v41 = vsel %vm7504_vm4, %v7488_v19, %v7520_v21 }
 0xc48   :  { %v13422_v10 = vsel %vm7508_vm5, %v7492_v30, %v7524_v58 }
 0xc4a   :  { %7976 = vrot.lane.b32.xlu0 %v13278_v45, %s8722_s21  ;;  %8121 = vrot.lane.b32.xlu1 %v13266_v23, %s8723_s22 }
 0xc4e   :  { %8123 = vrot.lane.b32.xlu0 %v13270_v27, %s8723_s22  ;;  %7623 = vrot.lane.b32.xlu1 %v13316_v42, %s8718_s19 }
 0xc52   :  { %7625 = vrot.lane.b32.xlu0 %v13322_v11, %s8718_s19  ;;  %7639 = vrot.lane.b32.xlu1 %v13324_v46, %s8718_s19 }
 0xc56   :  { %7641 = vrot.lane.b32.xlu0 %v13330_v8, %s8718_s19  ;;  %7549 = vrot.lane.b32.xlu1 %v13316_v42, %s8720_s0 }
 0xc5a   :  { %7551 = vrot.lane.b32.xlu0 %v13322_v11, %s8720_s0  ;;  %7565 = vrot.lane.b32.xlu1 %v13324_v46, %s8720_s0 }
 0xc5e   :  { %7567 = vrot.lane.b32.xlu0 %v13330_v8, %s8720_s0  ;;  %7966 = vrot.lane.b32.xlu1 %v13316_v42, %s8722_s21 }
 0xc62   :  { %7968 = vrot.lane.b32.xlu0 %v13322_v11, %s8722_s21  ;;  %7982 = vrot.lane.b32.xlu1 %v13324_v46, %s8722_s21 }
 0xc66   :  { %7984 = vrot.lane.b32.xlu0 %v13330_v8, %s8722_s21  ;;  %7619 = vrot.lane.b32.xlu1 %v13362_v15, %s8718_s19 }
 0xc6a   :  { %7621 = vrot.lane.b32.xlu0 %v13366_v61, %s8718_s19  ;;  %7635 = vrot.lane.b32.xlu1 %v13368_v62, %s8718_s19 }
 0xc6e   :  { %7637 = vrot.lane.b32.xlu0 %v13374_v37, %s8718_s19  ;;  %7545 = vrot.lane.b32.xlu1 %v13362_v15, %s8720_s0 }
 0xc72   :  { %7547 = vrot.lane.b32.xlu0 %v13366_v61, %s8720_s0  ;;  %7561 = vrot.lane.b32.xlu1 %v13368_v62, %s8720_s0 }
 0xc76   :  { %7563 = vrot.lane.b32.xlu0 %v13374_v37, %s8720_s0  ;;  %7962 = vrot.lane.b32.xlu1 %v13362_v15, %s8722_s21 }
 0xc7a   :  { %7964 = vrot.lane.b32.xlu0 %v13366_v61, %s8722_s21  ;;  %7978 = vrot.lane.b32.xlu1 %v13368_v62, %s8722_s21 }
 0xc7e   :  { %7980 = vrot.lane.b32.xlu0 %v13374_v37, %s8722_s21  ;;  %8125 = vrot.lane.b32.xlu1 %v13362_v15, %s8723_s22 }
 0xc82   :  { %8127 = vrot.lane.b32.xlu0 %v13366_v61, %s8723_s22  ;;  %8141 = vrot.lane.b32.xlu1 %v13368_v62, %s8723_s22 }
 0xc86   :  { %8143 = vrot.lane.b32.xlu0 %v13374_v37, %s8723_s22  ;;  %7627 = vrot.lane.b32.xlu1 %v13408_v7, %s8718_s19 }
 0xc8a   :  { %7629 = vrot.lane.b32.xlu0 %v13414_v24, %s8718_s19  ;;  %7643 = vrot.lane.b32.xlu1 %v13416_v41, %s8718_s19 }
 0xc8e   :  { %7645 = vrot.lane.b32.xlu0 %v13422_v10, %s8718_s19  ;;  %7553 = vrot.lane.b32.xlu1 %v13408_v7, %s8720_s0 }
 0xc92   :  { %7555 = vrot.lane.b32.xlu0 %v13414_v24, %s8720_s0  ;;  %7569 = vrot.lane.b32.xlu1 %v13416_v41, %s8720_s0 }
 0xc96   :  { %7571 = vrot.lane.b32.xlu0 %v13422_v10, %s8720_s0  ;;  %8129 = vrot.lane.b32.xlu1 %v13316_v42, %s8723_s22 }
 0xc9a   :  { %8131 = vrot.lane.b32.xlu0 %v13322_v11, %s8723_s22  ;;  %7970 = vrot.lane.b32.xlu1 %v13408_v7, %s8722_s21 }
 0xc9e   :  { %8139 = vrot.lane.b32.xlu0 %v13278_v45, %s8723_s22  ;;  %7986 = vrot.lane.b32.xlu1 %v13416_v41, %s8722_s21 }
 0xca2   :  { %7972 = vrot.lane.b32.xlu0 %v13414_v24, %s8722_s21  ;;  %8133 = vrot.lane.b32.xlu1 %v13408_v7, %s8723_s22 }
 0xca4   :  { %v7616_v52 = vpop.permute.xlu1 %7615 }
 0xca6   :  { %7988 = vrot.lane.b32.xlu0 %v13422_v10, %s8722_s21  ;;  %8149 = vrot.lane.b32.xlu1 %v13416_v41, %s8723_s22 }
 0xca8   :  { %v7618_v16 = vpop.permute.xlu0 %7617  ;;  %v7632_v18 = vpop.permute.xlu1 %7631 }
 0xcaa   :  { %8135 = vrot.lane.b32.xlu0 %v13414_v24, %s8723_s22  ;;  %8137 = vrot.lane.b32.xlu1 %v13272_v47, %s8723_s22 }
 0xcac   :  { %v7634_v9 = vpop.permute.xlu0 %7633  ;;  %v7542_v60 = vpop.permute.xlu1 %7541 }
 0xcae   :  { %8151 = vrot.lane.b32.xlu0 %v13422_v10, %s8723_s22  ;;  %8145 = vrot.lane.b32.xlu1 %v13324_v46, %s8723_s22 }
 0xcb0   :  { %v7544_v25 = vpop.permute.xlu0 %7543  ;;  %v7558_v28 = vpop.permute.xlu1 %7557 }
 0xcb2   :  { %8147 = vrot.lane.b32.xlu0 %v13330_v8, %s8723_s22  ;;  %8288 = vperm.xlu1 %8617, %v8602_v31  }
 0xcb4   :  { %v7560_v29 = vpop.permute.xlu0 %7559  ;;  %v13465_v12 = vpop.permute.xlu1 %7958 }
 0xcb8   :  { %v13467_v20 = vpop.permute.xlu0 %7960  ;;  %v7975_v57 = vpop.permute.xlu1 %7974 }
 0xcbc   :  { %v13469_v36 = vpop.permute.xlu0 %7976  ;;  %v13471_v17 = vpop.permute.xlu1 %8121 }
 0xcbd   :  { %14265 = vst [vmem:[#allocation29_spill] sm:$0xff] %v13471_v17 }
 0xcc0   :  { %v13473_v48 = vpop.permute.xlu0 %8123  ;;  %v7624_v38 = vpop.permute.xlu1 %7623 }
 0xcc1   :  { %14266 = vst [vmem:[#allocation6_spill] sm:$0xff] %v13473_v48  ;;  %v7651_v4 = vsel %vm167_vm13, %v7624_v38, %v7632_v18  ;;  %v7655_v26 = vsel %vm167_vm13, %v7616_v52, %v7624_v38 }
 0xcc2   :  { %v13480_v22 = vmul.f32 %v7655_v26, %v14242_v6  ;;  %v13483_v55 = vmul.f32 %v7651_v4, %v14244_v51 }
 0xcc4   :  { %v7626_v54 = vpop.permute.xlu0 %7625  ;;  %v7640_v53 = vpop.permute.xlu1 %7639 }
 0xcc5   :  { %v7652_v40 = vsel %vm167_vm13, %v7626_v54, %v7634_v9  ;;  %v7656_v34 = vsel %vm167_vm13, %v7618_v16, %v7626_v54  ;;  %v7647_v43 = vsel %vm167_vm13, %v7632_v18, %v7640_v53  ;;  %v7659_v39 = vsel %vm167_vm13, %v7640_v53, %v7616_v52 }
 0xcc6   :  { %v13494_v49 = vmul.f32 %v7656_v34, %v14242_v6  ;;  %v13497_v59 = vmul.f32 %v7652_v40, %v14244_v51  ;;  %v13504_v33 = vmul.f32 %v7659_v39, %v14245_v1  ;;  %v13507_v19 = vmul.f32 %v7647_v43, %v14243_v50 }
 0xcc8   :  { %v7642_v13 = vpop.permute.xlu0 %7641  ;;  %v7550_v63 = vpop.permute.xlu1 %7549 }
 0xcc9   :  { %v7648_v30 = vsel %vm167_vm13, %v7634_v9, %v7642_v13  ;;  %v7660_v21 = vsel %vm167_vm13, %v7642_v13, %v7618_v16  ;;  %v7577_v58 = vsel %vm95_vm14, %v7550_v63, %v7558_v28  ;;  %v7581_v52 = vsel %vm95_vm14, %v7542_v60, %v7550_v63 }
 0xcca   :  { %v13518_v18 = vmul.f32 %v7660_v21, %v14245_v1  ;;  %v13521_v31 = vmul.f32 %v7648_v30, %v14243_v50  ;;  %v13528_v16 = vmul.f32 %v7581_v52, %v14246_v0  ;;  %v13531_v26 = vmul.f32 %v7577_v58, %v14250_v5 }
 0xccc   :  { %v7552_v4 = vpop.permute.xlu0 %7551  ;;  %v7566_v54 = vpop.permute.xlu1 %7565 }
 0xccd   :  { %v7578_v53 = vsel %vm95_vm14, %v7552_v4, %v7560_v29  ;;  %v7582_v40 = vsel %vm95_vm14, %v7544_v25, %v7552_v4  ;;  %v7573_v34 = vsel %vm95_vm14, %v7558_v28, %v7566_v54  ;;  %v7585_v43 = vsel %vm95_vm14, %v7566_v54, %v7542_v60 }
 0xcce   :  { %v13542_v39 = vmul.f32 %v7582_v40, %v14246_v0  ;;  %v13545_v13 = vmul.f32 %v7578_v53, %v14250_v5  ;;  %v13552_v58 = vmul.f32 %v7585_v43, %v14248_v56  ;;  %v13555_v28 = vmul.f32 %v7573_v34, %v14249_v44 }
 0xcd0   :  { %v7568_v30 = vpop.permute.xlu0 %7567  ;;  %v7967_v60 = vpop.permute.xlu1 %7966 }
 0xcd1   :  { %v7574_v52 = vsel %vm95_vm14, %v7560_v29, %v7568_v30  ;;  %v7586_v4 = vsel %vm95_vm14, %v7568_v30, %v7544_v25  ;;  %v7994_v54 = vsel %vm633_vm0, %v7967_v60, %v7975_v57  ;;  %v7998_v53 = vsel %vm633_vm0, %v13465_v12, %v7967_v60 }
 0xcd2   :  { %v13567_v40 = vmul.f32 %v7586_v4, %v14248_v56  ;;  %v13570_v34 = vmul.f32 %v7574_v52, %v14249_v44  ;;  %v13577_v30 = vmul.f32 %v7998_v53, %v14251_v35  ;;  %v13580_v63 = vmul.f32 %v7994_v54, %v14268_v2 }
 0xcd4   :  { %v7969_v29 = vpop.permute.xlu0 %7968  ;;  %14267 = vst [vmem:[#allocation12_spill] sm:$0xff] %v13577_v30  ;;  %14269 = vst [vmem:[#allocation14_spill] sm:$0xff] %v13580_v63  ;;  %v7983_v60 = vpop.permute.xlu1 %7982 }
 0xcd5   :  { %v7995_v4 = vsel %vm633_vm0, %v7969_v29, %v13469_v36  ;;  %v7999_v52 = vsel %vm633_vm0, %v13467_v20, %v7969_v29  ;;  %v7990_v43 = vsel %vm633_vm0, %v7975_v57, %v7983_v60  ;;  %v8002_v53 = vsel %vm633_vm0, %v7983_v60, %v13465_v12 }
 0xcd6   :  { %v13594_v25 = vmul.f32 %v7999_v52, %v14251_v35  ;;  %v13597_v54 = vmul.f32 %v7995_v4, %v14268_v2  ;;  %v14272_v52 = vld [vmem:[#allocation17_spill] sm:$0xff]  ;;  %v14274_v4 = vld [vmem:[#allocation18_spill] sm:$0xff] }
 0xcd7   :  { %v13610_v38 = vmul.f32 %v7990_v43, %v14272_v52  ;;  %v13613_v9 = vmul.f32 %v8002_v53, %v14274_v4 }
 0xcd8   :  { %14270 = vst [vmem:[#allocation13_spill] sm:$0xff] %v13594_v25  ;;  %14271 = vst [vmem:[#allocation11_spill] sm:$0xff] %v13597_v54  ;;  %v7985_v3 = vpop.permute.xlu0 %7984  ;;  %v7620_v60 = vpop.permute.xlu1 %7619 }
 0xcd9   :  { %v7991_v57 = vsel %vm633_vm0, %v13469_v36, %v7985_v3  ;;  %v8003_v12 = vsel %vm633_vm0, %v7985_v3, %v13467_v20  ;;  %14273 = vst [vmem:[#allocation8_spill] sm:$0xff] %v13610_v38  ;;  %14275 = vst [vmem:[#allocation7_spill] sm:$0xff] %v13613_v9 }
 0xcda   :  { %v13616_v21 = vmul.f32 %v7991_v57, %v14272_v52  ;;  %v13619_v29 = vmul.f32 %v8003_v12, %v14274_v4 }
 0xcdc   :  { %14276 = vst [vmem:[#allocation10_spill] sm:$0xff] %v13616_v21  ;;  %14277 = vst [vmem:[#allocation9_spill] sm:$0xff] %v13619_v29  ;;  %v7622_v14 = vpop.permute.xlu0 %7621  ;;  %v7636_v3 = vpop.permute.xlu1 %7635 }
 0xce0   :  { %v7638_v30 = vpop.permute.xlu0 %7637  ;;  %v7546_v43 = vpop.permute.xlu1 %7545 }
 0xce4   :  { %v7548_v25 = vpop.permute.xlu0 %7547  ;;  %v7562_v63 = vpop.permute.xlu1 %7561 }
 0xce8   :  { %v7564_v53 = vpop.permute.xlu0 %7563  ;;  %v13625_v54 = vpop.permute.xlu1 %7962 }
 0xcec   :  { %v13627_v57 = vpop.permute.xlu0 %7964  ;;  %v13629_v48 = vpop.permute.xlu1 %7978 }
 0xcf0   :  { %v13631_v12 = vpop.permute.xlu0 %7980  ;;  %v13633_v17 = vpop.permute.xlu1 %8125 }
 0xcf1   :  { %14278 = vst [vmem:[#allocation23_spill] sm:$0xff] %v13633_v17 }
 0xcf4   :  { %v13635_v36 = vpop.permute.xlu0 %8127  ;;  %v13637_v38 = vpop.permute.xlu1 %8141 }
 0xcf5   :  { %14279 = vst [vmem:[#allocation16_spill] sm:$0xff] %v13635_v36  ;;  %14280 = vst [vmem:[#allocation30_spill] sm:$0xff] %v13637_v38 }
 0xcf8   :  { %v13639_v20 = vpop.permute.xlu0 %8143  ;;  %v7628_v21 = vpop.permute.xlu1 %7627 }
 0xcf9   :  { %14281 = vst [vmem:[#allocation31_spill] sm:$0xff] %v13639_v20  ;;  %v7657_v9 = vsel %vm167_vm13, %v7620_v60, %v7628_v21  ;;  %v7653_v47 = vsel %vm167_vm13, %v7628_v21, %v7636_v3 }
 0xcfa   :  { %v7672_v4 = vmul.f32 %v7657_v9, %v14242_v6 }
 0xcfc   :  { %v7630_v29 = vpop.permute.xlu0 %7629  ;;  %v7644_v23 = vpop.permute.xlu1 %7643 }
 0xcfd   :  { %v7658_v27 = vsel %vm167_vm13, %v7622_v14, %v7630_v29  ;;  %v7654_v17 = vsel %vm167_vm13, %v7630_v29, %v7638_v30  ;;  %v7649_v38 = vsel %vm167_vm13, %v7636_v3, %v7644_v23  ;;  %v7661_v20 = vsel %vm167_vm13, %v7644_v23, %v7620_v60 }
 0xcfe   :  { %v7676_v36 = vmul.f32 %v7658_v27, %v14242_v6  ;;  %v7677_v35 = vmul.f32 %v7654_v17, %v14244_v51  ;;  %v7671_v27 = vmul.f32 %v7661_v20, %v14245_v1  ;;  %v7674_v29 = vmul.f32 %v7649_v38, %v14243_v50 }
 0xcff   :  { %v7673_v17 = vmul.f32 %v7653_v47, %v14244_v51  ;;  %v14282_v47 = vpack.c.bf16 %v13494_v49, %v13480_v22 }
 0xd00   :  { %v7646_v52 = vpop.permute.xlu0 %7645  ;;  %v7684_v45 = vpack.c.bf16 %v7676_v36, %v7672_v4  ;;  %v7554_v8 = vpop.permute.xlu1 %7553 }
 0xd01   :  { %v7650_v9 = vsel %vm167_vm13, %v7638_v30, %v7646_v52  ;;  %v7662_v6 = vsel %vm167_vm13, %v7646_v52, %v7622_v14  ;;  %v7583_v21 = vsel %vm95_vm14, %v7546_v43, %v7554_v8  ;;  %v7685_v52 = vpack.c.bf16 %v7677_v35, %v7673_v17 }
 0xd02   :  { %v7675_v23 = vmul.f32 %v7662_v6, %v14245_v1  ;;  %v7678_v60 = vmul.f32 %v7650_v9, %v14243_v50  ;;  %7704 = vmatprep.subr.bf16.mxu0 %v7684_v45  ;;  %v7598_v38 = vmul.f32 %v7583_v21, %v14246_v0  ;;  %v7579_v9 = vsel %vm95_vm14, %v7554_v8, %v7562_v63 }
 0xd03   :  { %vm8324_vm13 = vcmask 1043456  }
 0xd04   :  { %v7683_v4 = vpack.c.bf16 %v7675_v23, %v7671_v27  ;;  %v7556_v36 = vpop.permute.xlu0 %7555  ;;  %v7686_v30 = vpack.c.bf16 %v7678_v60, %v7674_v29  ;;  %v7570_v3 = vpop.permute.xlu1 %7569  ;;  %v14283_v27 = vpack.c.bf16 %v13521_v31, %v13507_v19  ;;  %v14284_v23 = vpack.c.bf16 %v13518_v18, %v13504_v33  ;;  %v7688_v19 = vld [vmem:[#allocation2 + $0x240] sm:$0xf] }
 0xd05   :  { %v7584_v14 = vsel %vm95_vm14, %v7548_v25, %v7556_v36  ;;  %v7580_v1 = vsel %vm95_vm14, %v7556_v36, %v7564_v53  ;;  %v7575_v45 = vsel %vm95_vm14, %v7562_v63, %v7570_v3  ;;  %v7587_v51 = vsel %vm95_vm14, %v7570_v3, %v7546_v43  ;;  %v14292_v3 = vld [vmem:[#allocation15_spill] sm:$0xff] }
 0xd06   :  { %v7602_v50 = vmul.f32 %v7584_v14, %v14246_v0  ;;  %7705 = vmatpush1.bf16.msra.mxu0 %v7683_v4  ;;  %7745 = vmatprep.subr.bf16.mxu1 %v7686_v30  ;;  %v7603_v0 = vmul.f32 %v7580_v1, %v14250_v5  ;;  %v7597_v49 = vmul.f32 %v7587_v51, %v14248_v56  ;;  %v14296_v51 = vld [vmem:[#allocation18_spill] sm:$0xff] }
 0xd07   :  { %7706 = vmatprep.subr.bf16.mxu0 %v14282_v47  ;;  %7746 = vmatpush1.bf16.msra.mxu1 %v7685_v52  ;;  %v7600_v29 = vmul.f32 %v7575_v45, %v14249_v44  ;;  %v7599_v31 = vmul.f32 %v7579_v9, %v14250_v5  ;;  %v14288_v33 = vpack.c.bf16 %v13570_v34, %v13555_v28  ;;  %v14293_v52 = vld [vmem:[#allocation24_spill] sm:$0xff]  ;;  %v14297_v9 = vld [vmem:[#allocation26_spill] sm:$0xff] }
 0xd08   :  { %v7572_v35 = vpop.permute.xlu0 %7571  ;;  %v7610_v20 = vpack.c.bf16 %v7602_v50, %v7598_v38  ;;  %v13683_v6 = vpop.permute.xlu1 %8129  ;;  %7747 = vmatprep.subr.bf16.mxu1 %v14283_v27  ;;  %v7864_v18 = vpack.c.bf16 %v13414_v24, %v13408_v7  ;;  %v14289_v4 = vpack.c.bf16 %v13567_v40, %v13552_v58  ;;  %v7866_v36 = vpack.c.bf16 %v13422_v10, %v13416_v41  ;;  %v14295_v50 = vld [vmem:[#allocation17_spill] sm:$0xff] }
 0xd09   :  { %v7576_v43 = vsel %vm95_vm14, %v7564_v53, %v7572_v35  ;;  %v7588_v22 = vsel %vm95_vm14, %v7572_v35, %v7548_v25  ;;  %v14285_v25 = vpack.c.bf16 %v13497_v59, %v13483_v55  ;;  %v14287_v55 = vmov 0  }
 0xd0a   :  { %v7601_v8 = vmul.f32 %v7588_v22, %v14248_v56  ;;  %v7604_v63 = vmul.f32 %v7576_v43, %v14249_v44  ;;  %7707 = vmatpush1.bf16.msra.mxu0 %v14284_v23  ;;  %v7611_v56 = vpack.c.bf16 %v7603_v0, %v7599_v31  ;;  %v14286_v44 = vpack.c.bf16 %v13542_v39, %v13528_v16  ;;  %v7614_v16 = vld [vmem:[#allocation2 + $0x230] sm:$0xf]  ;;  %v14301_v22 = vld [vmem:[#allocation30_spill] sm:$0xff] }
 0xd0b   :  { %7789 = vmatprep.subr.bf16.mxu0 %v7610_v20  ;;  %7748 = vmatpush1.bf16.msra.mxu1 %v14285_v25  ;;  %v14290_v28 = vpack.c.bf16 %v13545_v13, %v13531_v26  ;;  %v7863_v24 = vpack.c.bf16 %v13366_v61, %v13362_v15  ;;  %v7860_v41 = vpack.c.bf16 %v13322_v11, %v13316_v42  ;;  %v14291_v11 = vld [vmem:[#allocation28_spill] sm:$0xff]  ;;  %v14298_v0 = vld [vmem:[#allocation27_spill] sm:$0xff]  ;;  %vm8335_vm14 = vcmask 3072  }
 0xd0c   :  { %v7609_v53 = vpack.c.bf16 %v7601_v8, %v7597_v49  ;;  %v13703_v60 = vpop.permute.xlu0 %8131  ;;  %v7612_v21 = vpack.c.bf16 %v7604_v63, %v7600_v29  ;;  %v7971_v17 = vpop.permute.xlu1 %7970  ;;  %v7865_v26 = vpack.c.bf16 %v13374_v37, %v13368_v62  ;;  %v7862_v30 = vpack.c.bf16 %v14291_v11, %v13324_v46  ;;  %v14294_v62 = vld [vmem:[#allocation25_spill] sm:$0xff]  ;;  %v7868_v43 = vld [vmem:[#allocation2 + $0x250] sm:$0xf] }
 0xd0d   :  { %8592 = vmatmul.mubr.msk.bf16.vlgmr.msra.gmra.mxu0 %vm240_vm15, %v7688_v19  ;;  %v7996_v39 = vsel %vm633_vm0, %v7971_v17, %v13629_v48  ;;  %v8000_v10 = vsel %vm633_vm0, %v13625_v54, %v7971_v17  ;;  %v7861_v37 = vpack.c.bf16 %v14294_v62, %v14293_v52  ;;  %v14299_v27 = vpack.c.bf16 %v14297_v9, %v14298_v0  ;;  %v14302_v29 = vld [vmem:[#allocation23_spill] sm:$0xff]  ;;  %v14320_v9 = vld [vmem:[#allocation8_spill] sm:$0xff] }
 0xd0e   :  { %7790 = vmatpush1.bf16.msra.mxu0 %v7609_v53  ;;  %7830 = vmatprep.subr.bf16.mxu1 %v7612_v21  ;;  %v8015_v15 = vmul.f32 %v7996_v39, %v14268_v2  ;;  %v14303_v53 = vld [vmem:[#allocation6_spill] sm:$0xff] }
 0xd0f   :  { %8593 = vmatmul.mubr.msk.bf16.vlgmr.msra.gmra.mxu1 %vm240_vm15, %v7688_v19  ;;  %7791 = vmatprep.subr.bf16.mxu0 %v14286_v44  ;;  %v8162_v25 = vsel %vm844_vm3, %v14303_v53, %v13703_v60 }
 0xd10   :  { %7831 = vmatpush1.bf16.msra.mxu1 %v7611_v56  ;;  %v13710_v5 = vpop.permute.xlu0 %8139  ;;  %7809 = vmatprep.mubr.bf16.mxu0 %v14287_v55  ;;  %v7987_v59 = vpop.permute.xlu1 %7986  ;;  %v14304_v56 = vld [vmem:[#allocation31_spill] sm:$0xff] }
 0xd11   :  { %7832 = vmatprep.subr.bf16.mxu1 %v14288_v33  ;;  %7850 = vmatprep.mubr.bf16.mxu1 %v14287_v55  ;;  %v7992_v13 = vsel %vm633_vm0, %v13629_v48, %v7987_v59  ;;  %v8004_v42 = vsel %vm633_vm0, %v7987_v59, %v13625_v54  ;;  %v8014_v48 = vmul.f32 %v8000_v10, %v14292_v3  ;;  %v14305_v59 = vld [vmem:[#allocation16_spill] sm:$0xff] }
 0xd12   :  { %7792 = vmatpush1.bf16.msra.mxu0 %v14289_v4  ;;  %v8016_v45 = vmul.f32 %v7992_v13, %v14295_v50  ;;  %v8017_v47 = vmul.f32 %v8004_v42, %v14296_v51  ;;  %v14312_v13 = vld [vmem:[#allocation9_spill] sm:$0xff]  ;;  %v14313_v42 = vld [vmem:[#allocation7_spill] sm:$0xff] }
 0xd13   :  { %7884 = vmatprep.subr.bf16.mxu0 %v7864_v18  ;;  %v14306_v18 = vld [vmem:[#allocation20_spill] sm:$0xff]  ;;  %v14314_v11 = vpack.c.bf16 %v14312_v13, %v14313_v42 }
 0xd14   :  { %7833 = vmatpush1.bf16.msra.mxu1 %v14290_v28  ;;  %v7973_v7 = vpop.permute.xlu0 %7972  ;;  %v8134_v34 = vpop.permute.xlu1 %8133  ;;  %v14307_v28 = vld [vmem:[#allocation19_spill] sm:$0xff] }
 0xd15   :  { %7925 = vmatprep.subr.bf16.mxu1 %v7866_v36  ;;  %v7997_v58 = vsel %vm633_vm0, %v7973_v7, %v13631_v12  ;;  %v8001_v40 = vsel %vm633_vm0, %v13627_v57, %v7973_v7  ;;  %8594 = vmatmul.mubr.msk.bf16.vlgmr.msra.gmra.mxu0 %vm240_vm15, %v7614_v16  ;;  %v8159_v49 = vsel %vm844_vm3, %v8134_v34, %v14301_v22 }
 0xd16   :  { %v8019_v61 = vmul.f32 %v7997_v58, %v14268_v2  ;;  %7885 = vmatpush1.bf16.msra.mxu0 %v7863_v24  ;;  %v8018_v2 = vmul.f32 %v8001_v40, %v14292_v3  ;;  %7904 = vmatprep.mubr.bf16.mxu0 %v14287_v55  ;;  %v8163_v8 = vsel %vm844_vm3, %v14302_v29, %v8134_v34  ;;  %v14308_v34 = vld [vmem:[#allocation11_spill] sm:$0xff]  ;;  %v14309_v58 = vld [vmem:[#allocation14_spill] sm:$0xff]  ;;  %v14311_v40 = vld [vmem:[#allocation21_spill] sm:$0xff] }
 0xd17   :  { %8595 = vmatmul.mubr.msk.bf16.vlgmr.msra.gmra.mxu1 %vm240_vm15, %v7614_v16  ;;  %7886 = vmatprep.subr.bf16.mxu0 %v7860_v41  ;;  %v8178_v4 = vmul.f32 %v8159_v49, %v14306_v18  ;;  %v8158_v36 = vsel %vm844_vm3, %v13703_v60, %v13710_v5  ;;  %v8177_v7 = vmul.f32 %v8163_v8, %v14307_v28 }
 0xd18   :  { %7926 = vmatpush1.bf16.msra.mxu1 %v7865_v26  ;;  %v7989_v14 = vpop.permute.xlu0 %7988  ;;  %v8027_v38 = vpack.c.bf16 %v8019_v61, %v8015_v15  ;;  %v8150_v1 = vpop.permute.xlu1 %8149  ;;  %7945 = vmatprep.mubr.bf16.mxu1 %v14287_v55  ;;  %v8026_v63 = vpack.c.bf16 %v8018_v2, %v8014_v48  ;;  %v14315_v2 = vld [vmem:[#allocation22_spill] sm:$0xff]  ;;  %v14317_v48 = vld [vmem:[#allocation12_spill] sm:$0xff] }
 0xd19   :  { %7927 = vmatprep.subr.bf16.mxu1 %v7862_v30  ;;  %v7993_v54 = vsel %vm633_vm0, %v13631_v12, %v7989_v14  ;;  %v8005_v46 = vsel %vm633_vm0, %v7989_v14, %v13627_v57  ;;  %v14300_v12 = vld [vmem:[#allocation29_spill] sm:$0xff]  ;;  %v8155_v21 = vsel %vm844_vm3, %v14301_v22, %v8150_v1  ;;  %v8167_v24 = vsel %vm844_vm3, %v8150_v1, %v14302_v29 }
 0xd1a   :  { %v8020_v35 = vmul.f32 %v7993_v54, %v14295_v50  ;;  %v8021_v20 = vmul.f32 %v8005_v46, %v14296_v51  ;;  %7887 = vmatpush1.bf16.msra.mxu0 %v14299_v27  ;;  %v8161_v57 = vsel %vm844_vm3, %v14300_v12, %v13683_v6  ;;  %v8179_v41 = vmul.f32 %v8155_v21, %v14311_v40  ;;  %v8031_v54 = vld [vmem:[#allocation2 + $0x260] sm:$0xf] }
 0xd1b   :  { %8047 = vmatprep.subr.bf16.mxu0 %v8027_v38  ;;  %v8180_v14 = vmul.f32 %v8167_v24, %v14315_v2  ;;  %v14316_v38 = vld [vmem:[#allocation13_spill] sm:$0xff]  ;;  %v8169_v46 = vmul.f32 %v8161_v57, %v14307_v28  ;;  %v8174_v50 = vmul.f32 %v8158_v36, %v14306_v18  ;;  %v8173_v51 = vmul.f32 %v8162_v25, %v14307_v28 }
 0xd1c   :  { %v8028_v23 = vpack.c.bf16 %v8020_v35, %v8016_v45  ;;  %7928 = vmatpush1.bf16.msra.mxu1 %v7861_v37  ;;  %v8136_v19 = vpop.permute.xlu0 %8135  ;;  %v8029_v31 = vpack.c.bf16 %v8021_v20, %v8017_v47  ;;  %v8138_v17 = vpop.permute.xlu1 %8137  ;;  %v14318_v1 = vpack.c.bf16 %v14316_v38, %v14317_v48  ;;  %v14319_v20 = vld [vmem:[#allocation10_spill] sm:$0xff] }
 0xd1d   :  { %v8160_v44 = vsel %vm844_vm3, %v8136_v19, %v14304_v56  ;;  %v8164_v33 = vsel %vm844_vm3, %v14305_v59, %v8136_v19  ;;  %8596 = vmatmul.mubr.msk.bf16.vlgmr.msra.gmra.mxu0 %vm240_vm15, %v7868_v43  ;;  %v8157_v16 = vsel %vm844_vm3, %v13683_v6, %v8138_v17  ;;  %v14310_v6 = vpack.c.bf16 %v14308_v34, %v14309_v58 }
 0xd1e   :  { %v8182_v39 = vmul.f32 %v8160_v44, %v14306_v18  ;;  %8048 = vmatpush1.bf16.msra.mxu0 %v8026_v63  ;;  %8088 = vmatprep.subr.bf16.mxu1 %v8029_v31  ;;  %v8181_v10 = vmul.f32 %v8164_v33, %v14307_v28  ;;  %v8170_v60 = vmul.f32 %v8157_v16, %v14306_v18 }
 0xd1f   :  { %8597 = vmatmul.mubr.msk.bf16.vlgmr.msra.gmra.mxu1 %vm240_vm15, %v7868_v43  ;;  %8049 = vmatprep.subr.bf16.mxu0 %v14310_v6  ;;  %v14321_v0 = vpack.c.bf16 %v14319_v20, %v14320_v9 }
 0xd20   :  { %8089 = vmatpush1.bf16.msra.mxu1 %v8028_v23  ;;  %v8152_v15 = vpop.permute.xlu0 %8151  ;;  %v8190_v61 = vpack.c.bf16 %v8182_v39, %v8178_v4  ;;  %8067 = vmatprep.mubr.bf16.mxu0 %v14287_v55  ;;  %v8146_v26 = vpop.permute.xlu1 %8145  ;;  %v8189_v47 = vpack.c.bf16 %v8181_v10, %v8177_v7  ;;  %v8186_v49 = vpack.c.bf16 %v8174_v50, %v8170_v60 }
 0xd21   :  { %8090 = vmatprep.subr.bf16.mxu1 %v14314_v11  ;;  %v8156_v30 = vsel %vm844_vm3, %v14304_v56, %v8152_v15  ;;  %v8168_v3 = vsel %vm844_vm3, %v8152_v15, %v14305_v59  ;;  %8108 = vmatprep.mubr.bf16.mxu1 %v14287_v55  ;;  %v8153_v52 = vsel %vm844_vm3, %v8138_v17, %v8146_v26  ;;  %v8725_v11 = vmov 1966171168  }
 0xd22   :  { %v8183_v62 = vmul.f32 %v8156_v30, %v14311_v40  ;;  %v8184_v37 = vmul.f32 %v8168_v3, %v14315_v2  ;;  %8050 = vmatpush1.bf16.msra.mxu0 %v14318_v1  ;;  %v8165_v45 = vsel %vm844_vm3, %v8146_v26, %v14300_v12  ;;  %v8171_v22 = vmul.f32 %v8153_v52, %v14311_v40 }
 0xd23   :  { %8210 = vmatprep.subr.bf16.mxu0 %v8190_v61  ;;  %v8172_v29 = vmul.f32 %v8165_v45, %v14315_v2  ;;  %v8185_v23 = vpack.c.bf16 %v8173_v51, %v8169_v46  ;;  %v8302_v30 = vunpack.c.l.s4 %v8725_v11 }
 0xd24   :  { %v8191_v35 = vpack.c.bf16 %v8183_v62, %v8179_v41  ;;  %8091 = vmatpush1.bf16.msra.mxu1 %v14321_v0  ;;  %v8148_v27 = vpop.permute.xlu0 %8147  ;;  %v8192_v43 = vpack.c.bf16 %v8184_v37, %v8180_v14 }
 0xd25   :  { %v8154_v57 = vsel %vm844_vm3, %v13710_v5, %v8148_v27  ;;  %v8166_v12 = vsel %vm844_vm3, %v8148_v27, %v14303_v53  ;;  %8598 = vmatmul.mubr.msk.bf16.vlgmr.msra.gmra.mxu0 %vm240_vm15, %v8031_v54  ;;  %v8303_v50 = vunpack.c.0.s8 %v8302_v30 }
 0xd26   :  { %v8175_v8 = vmul.f32 %v8154_v57, %v14311_v40  ;;  %v8176_v63 = vmul.f32 %v8166_v12, %v14315_v2  ;;  %8211 = vmatpush1.bf16.msra.mxu0 %v8189_v47  ;;  %8251 = vmatprep.subr.bf16.mxu1 %v8192_v43 }
 0xd27   :  { %8599 = vmatmul.mubr.msk.bf16.vlgmr.msra.gmra.mxu1 %vm240_vm15, %v8031_v54  ;;  %8212 = vmatprep.subr.bf16.mxu0 %v8186_v49 }
 0xd28   :  { %v8187_v5 = vpack.c.bf16 %v8175_v8, %v8171_v22  ;;  %8252 = vmatpush1.bf16.msra.mxu1 %v8191_v35  ;;  %v8188_v19 = vpack.c.bf16 %v8176_v63, %v8172_v29  ;;  %8230 = vmatprep.mubr.bf16.mxu0 %v14287_v55  ;;  %v14322_v8 = vld [vmem:[#allocation5_spill] sm:$0xff] }
 0xd29   :  { %8271 = vmatprep.mubr.bf16.mxu1 %v14287_v55  ;;  %v8306_v63 = vsub.s32 %v8303_v50, %v14322_v8 }
 0xd2a   :  { %8213 = vmatpush1.bf16.msra.mxu0 %v8185_v23  ;;  %8253 = vmatprep.subr.bf16.mxu1 %v8188_v19 }
 0xd2c   :  { %8254 = vmatpush1.bf16.msra.mxu1 %v8187_v5 }
 0xd2d   :  { %8600 = vmatmul.mubr.msk.bf16.vlgmr.msra.gmra.mxu0 %vm240_vm15, %v8194_v32  ;;  %v8289_v0 = vpop.permute.xlu1 %8288 }
 0xd2f   :  { %8601 = vmatmul.mubr.msk.bf16.vlgmr.msra.gmra.mxu1 %vm240_vm15, %v8194_v32 }
 0xdcd   :  { %v7726_v31 = vpop.f32.mrf.mxu0 }
 0xdcf   :  { %v7767_v53 = vpop.f32.mrf.mxu1  ;;  %v7728_v25 = vpop.f32.mrf.mxu0 }
 0xdd1   :  { %v7769_v21 = vpop.f32.mrf.mxu1  ;;  %v7730_v17 = vpop.f32.mrf.mxu0 }
 0xdd3   :  { %v7771_v56 = vpop.f32.mrf.mxu1  ;;  %v7731_v44 = vpop.f32.mrf.mxu0 }
 0xdd5   :  { %v7772_v59 = vpop.f32.mrf.mxu1  ;;  %v7811_v33 = vpop.f32.mrf.mxu0 }
 0xdd6   :  { %v7812_v26 = vadd.f32 %v7811_v33, %v7726_v31 }
 0xdd7   :  { %v7852_v18 = vpop.f32.mrf.mxu1  ;;  %v7813_v4 = vpop.f32.mrf.mxu0 }
 0xdd8   :  { %v7853_v3 = vadd.f32 %v7852_v18, %v7767_v53  ;;  %v7814_v2 = vadd.f32 %v7813_v4, %v7728_v25 }
 0xdd9   :  { %v7854_v55 = vpop.f32.mrf.mxu1  ;;  %v7815_v16 = vpop.f32.mrf.mxu0 }
 0xdda   :  { %v7855_v37 = vadd.f32 %v7854_v55, %v7769_v21 }
 0xddb   :  { %v7856_v39 = vpop.f32.mrf.mxu1  ;;  %v7816_v36 = vpop.f32.mrf.mxu0 }
 0xddd   :  { %v7857_v28 = vpop.f32.mrf.mxu1  ;;  %v7906_v7 = vpop.f32.mrf.mxu0 }
 0xdde   :  { %v7954_v14 = vadd.f32 %v7906_v7, %v7812_v26 }
 0xddf   :  { %v7947_v24 = vpop.f32.mrf.mxu1  ;;  %v7908_v34 = vpop.f32.mrf.mxu0 }
 0xde0   :  { %v7956_v38 = vadd.f32 %v7947_v24, %v7853_v3  ;;  %v7955_v48 = vadd.f32 %v7908_v34, %v7814_v2 }
 0xde1   :  { %v7949_v58 = vpop.f32.mrf.mxu1  ;;  %v7910_v6 = vpop.f32.mrf.mxu0 }
 0xde2   :  { %v7957_v45 = vadd.f32 %v7949_v58, %v7855_v37 }
 0xde3   :  { %v7951_v40 = vpop.f32.mrf.mxu1  ;;  %v7911_v41 = vpop.f32.mrf.mxu0 }
 0xde5   :  { %v7952_v10 = vpop.f32.mrf.mxu1  ;;  %v8069_v15 = vpop.f32.mrf.mxu0 }
 0xde6   :  { %v8117_v1 = vadd.f32 %v8069_v15, %v7954_v14 }
 0xde7   :  { %v8110_v61 = vpop.f32.mrf.mxu1  ;;  %v8071_v60 = vpop.f32.mrf.mxu0 }
 0xde8   :  { %v8119_v51 = vadd.f32 %v8110_v61, %v7956_v38  ;;  %v8118_v47 = vadd.f32 %v8071_v60, %v7955_v48 }
 0xde9   :  { %v8112_v13 = vpop.f32.mrf.mxu1  ;;  %v8073_v42 = vpop.f32.mrf.mxu0 }
 0xdea   :  { %v8120_v27 = vadd.f32 %v8112_v13, %v7957_v45 }
 0xdeb   :  { %v8114_v52 = vpop.f32.mrf.mxu1  ;;  %v8074_v62 = vpop.f32.mrf.mxu0 }
 0xded   :  { %v8115_v54 = vpop.f32.mrf.mxu1  ;;  %v8232_v46 = vpop.f32.mrf.mxu0 }
 0xdee   :  { %v8280_v35 = vadd.f32 %v8232_v46, %v8117_v1 }
 0xdef   :  { %v8273_v20 = vpop.f32.mrf.mxu1  ;;  %v8234_v9 = vpop.f32.mrf.mxu0 }
 0xdf0   :  { %v8282_v43 = vadd.f32 %v8273_v20, %v8119_v51  ;;  %v8281_v22 = vadd.f32 %v8234_v9, %v8118_v47  ;;  %v8291_v49 = vadd.f32 %v8289_v0, %v8280_v35 }
 0xdf1   :  { %v8275_v57 = vpop.f32.mrf.mxu1  ;;  %v8236_v12 = vpop.f32.mrf.mxu0 }
 0xdf2   :  { %v8292_v29 = vadd.f32 %v8289_v0, %v8281_v22  ;;  %v8283_v23 = vadd.f32 %v8275_v57, %v8120_v27  ;;  %v8293_v32 = vadd.f32 %v8289_v0, %v8282_v43 }
 0xdf3   :  { %v8277_v5 = vpop.f32.mrf.mxu1  ;;  %v8237_v19 = vpop.f32.mrf.mxu0 }
 0xdf4   :  { %v8299_v31 = vcombine.low %v8291_v49, %v8292_v29  ;;  %v8294_v53 = vadd.f32 %v8289_v0, %v8283_v23 }
 0xdf5   :  { %v8278_v25 = vpop.f32.mrf.mxu1 }
 0xdf6   :  { %v8307_v21 = vrot.slane %v8299_v31, %v8306_v63  ;;  %v8300_v17 = vcombine.low %v8293_v32, %v8294_v53 }
 0xdf8   :  { %v8314_v56 = vrot.slane %v8300_v17, %v8306_v63 }
 0xdfa   :  { %v8315_v44 = vcombine.low %v8307_v21, %v8314_v56 }
 0xdfc   :  { %v8322_v59 = vrot.slane %v8315_v44, %v8306_v63 }
 0xdfe   :  { %v8325_v33 = vsel %vm8324_vm13, %v8322_v59, 0.0 }
 0xdff   :  { %8326 = vadd.xlane.f32.xlu0 %v8325_v33 }
 0xe88   :  { %v8327_v18 = vpop.xlane.xlu0 %8326 }
 0xe89   :  { %v8603_v4 = vmul.f32 -0.0078125, %v8327_v18 }
 0xe8b   :  { %v8330_v55 = vmul.f32 1.442695, %v8603_v4 }
 0xe8d   :  { %8688 = vpow2.f32 %v8330_v55 }
 0xe9a   :  { %v8689_v16 = vpop.eup %8688 }
 0xe9b   :  { %v8332_v39 = vadd.f32 1.0, %v8689_v16 }
 0xe9d   :  { %8690 = vrcp.f32 %v8332_v39 }
 0xeaa   :  { %v8691_v36 = vpop.eup %8690 }
 0xeab   :  { %8336 = vst.msk [vmem:[%s13871_s3] sm:$0xf] %vm8335_vm14, %v8691_v36 }
 0xeac   :  { %8341 = vsyncpa [#allocation3], 1 }

</bundles_post_ra>
